<compile_context>
chip_gen: v7x
topology: tpu7x:2x2x1
jax: 0.10.0
libtpu: 0.0.40
codegen_flags: <defaults>
</compile_context>

<pallas_src>
import functools

import jax
import jax.numpy as jnp
from jax.experimental import pallas as pl
from jax.experimental.pallas import tpu as pltpu


LANE = 128                      # conv Cout / carried channel padding (lane width)
CIN1_PAD = 8                    # conv1 input channels padded 1 -> 8  => K = 4*4*8 = 128
VMEM_LIMIT = 48 * 1024 * 1024   # explicit scoped-VMEM limit (actual use is far below)


# ---------------------------------------------------------------------------
# Pallas kernels
# ---------------------------------------------------------------------------
def _gemm_bias_lrelu_kernel(x_ref, w_ref, b_ref, o_ref, *, alpha):
    # x_ref: (TM, K) bf16, w_ref: (K, N) bf16, b_ref: (1, N) f32, o_ref: (TM, N)
    acc = jnp.dot(x_ref[...], w_ref[...], preferred_element_type=jnp.float32)
    acc = acc + b_ref[...]                       # broadcast (1, N) over rows
    acc = jnp.where(acc > 0, acc, alpha * acc)   # LeakyReLU in f32 epilogue
    o_ref[...] = acc.astype(o_ref.dtype)


def _mlp_head_kernel(x_ref, w1_ref, b1_ref, w2_ref, b2_ref, o_ref, *, alpha):
    # Fused fc1 + LeakyReLU + fc2 + Sigmoid.
    # x_ref: (TM, K) bf16, w1_ref: (K, 512) bf16, b1_ref: (1, 512) f32,
    # w2_ref: (1, 512) f32, b2_ref: (1, 1) f32, o_ref: (TM, 1) f32
    h = jnp.dot(x_ref[...], w1_ref[...], preferred_element_type=jnp.float32)
    h = h + b1_ref[...]
    h = jnp.where(h > 0, h, alpha * h)
    # fc2 has N=1 -> avoid the MXU: VPU multiply + lane reduction (XLU), f32.
    z = jnp.sum(h * w2_ref[...], axis=-1, keepdims=True) + b2_ref[...]
    # numerically stable sigmoid via tanh (EUP), no exp overflow
    o_ref[...] = (0.5 * (jnp.tanh(0.5 * z) + 1.0)).astype(o_ref.dtype)


# ---------------------------------------------------------------------------
# Row-tile selection: multiple of 16, capped, and >=2 grid steps when M allows
# so ("parallel",) grid axes can shard across v7x's two TensorCores.
# ---------------------------------------------------------------------------
def _pick_tm(M, cap):
    if M <= 16:
        return M                          # single tiny block (full-dim block is legal)
    half = (M + 1) // 2                   # ceil(M/2) -> at least 2 grid steps
    tm = ((half + 15) // 16) * 16         # round up to a sublane-friendly multiple
    return max(16, min(tm, cap))


# ---------------------------------------------------------------------------
# Pallas wrappers (M-tiled, weights stay VMEM-resident across the grid)
# ---------------------------------------------------------------------------
def gemm_bias_lrelu(x, w, b, *, alpha=0.2, out_dtype=jnp.bfloat16, tile_m_cap=1024):
    """x: (M, K), w: (K, N) bf16, b: (N,) f32  ->  LeakyReLU(x @ w + b), (M, N)."""
    M, K = x.shape
    K2, N = w.shape
    assert K == K2 and b.shape == (N,)
    if x.dtype != jnp.bfloat16:
        x = x.astype(jnp.bfloat16)
    tm = _pick_tm(M, tile_m_cap)
    grid = (pl.cdiv(M, tm),)
    cost = pl.CostEstimate(
        flops=2 * M * K * N,
        transcendentals=0,
        bytes_accessed=M * K * 2 + K * N * 2 + N * 4
        + M * N * jnp.dtype(out_dtype).itemsize)
    return pl.pallas_call(
        functools.partial(_gemm_bias_lrelu_kernel, alpha=alpha),
        out_shape=jax.ShapeDtypeStruct((M, N), out_dtype),
        grid=grid,
        in_specs=[
            pl.BlockSpec((tm, K), lambda i: (i, 0)),   # activation tile streams
            pl.BlockSpec((K, N), lambda i: (0, 0)),    # weight resident
            pl.BlockSpec((1, N), lambda i: (0, 0)),    # bias resident
        ],
        out_specs=pl.BlockSpec((tm, N), lambda i: (i, 0)),
        compiler_params=pltpu.CompilerParams(
            dimension_semantics=("parallel",), vmem_limit_bytes=VMEM_LIMIT),
        cost_estimate=cost,
    )(x, w, b.reshape(1, N))


def mlp_head(x, w1, b1, w2_row, b2, *, alpha=0.2, tile_m_cap=512):
    """Fused fc1 + LeakyReLU + fc2 + Sigmoid.  x: (M, K) -> (M, 1) f32."""
    M, K = x.shape
    K1, N1 = w1.shape
    assert K == K1 and b1.shape == (N1,) and w2_row.shape == (1, N1) and b2.shape == (1,)
    if x.dtype != jnp.bfloat16:
        x = x.astype(jnp.bfloat16)
    tm = _pick_tm(M, tile_m_cap)
    grid = (pl.cdiv(M, tm),)
    cost = pl.CostEstimate(
        flops=2 * M * K * N1 + 2 * M * N1,
        transcendentals=M,
        bytes_accessed=M * K * 2 + K * N1 * 2 + N1 * 4 + N1 * 4 + M * 4)
    return pl.pallas_call(
        functools.partial(_mlp_head_kernel, alpha=alpha),
        out_shape=jax.ShapeDtypeStruct((M, 1), jnp.float32),
        grid=grid,
        in_specs=[
            pl.BlockSpec((tm, K), lambda i: (i, 0)),   # activation tile streams
            pl.BlockSpec((K, N1), lambda i: (0, 0)),   # fc1 weight resident
            pl.BlockSpec((1, N1), lambda i: (0, 0)),   # fc1 bias resident
            pl.BlockSpec((1, N1), lambda i: (0, 0)),   # fc2 weight row (f32) resident
            pl.BlockSpec((1, 1), lambda i: (0, 0)),    # fc2 bias resident
        ],
        out_specs=pl.BlockSpec((tm, 1), lambda i: (i, 0)),
        compiler_params=pltpu.CompilerParams(
            dimension_semantics=("parallel",), vmem_limit_bytes=VMEM_LIMIT),
        cost_estimate=cost,
    )(x, w1, b1.reshape(1, N1), w2_row, b2.reshape(1, 1))


# ---------------------------------------------------------------------------
# Plain-JAX glue: NHWC im2col (strided slices only, no big transposes)
# ---------------------------------------------------------------------------
def im2col_nhwc(x, k=4, stride=2, pad=1):
    """x: (B, H, W, C) -> patches (B*Ho*Wo, k*k*C), feature order (kh, kw, c)."""
    B, H, W, C = x.shape
    xp = jnp.pad(x, ((0, 0), (pad, pad), (pad, pad), (0, 0)))
    Ho = (H + 2 * pad - k) // stride + 1
    Wo = (W + 2 * pad - k) // stride + 1
    slabs = []
    for i in range(k):
        for j in range(k):
            slabs.append(xp[:, i:i + stride * Ho:stride, j:j + stride * Wo:stride, :])
    p = jnp.stack(slabs, axis=3)            # (B, Ho, Wo, k*k, C)
    return p.reshape(B * Ho * Wo, k * k * C), Ho, Wo


# ---------------------------------------------------------------------------
# Parameters (torch layout) + one-time kernel-ready preparation
# ---------------------------------------------------------------------------
def init_params(key, depth=1):
    ks = jax.random.split(key, 8)
    scale = 0.05
    return {
        "conv1_w": scale * jax.random.normal(ks[0], (32, depth, 4, 4), jnp.float32),
        "conv1_b": scale * jax.random.normal(ks[1], (32,), jnp.float32),
        "conv2_w": scale * jax.random.normal(ks[2], (64, 32, 4, 4), jnp.float32),
        "conv2_b": scale * jax.random.normal(ks[3], (64,), jnp.float32),
        "fc1_w": scale * jax.random.normal(ks[4], (512, 3136), jnp.float32),  # torch (out,in)
        "fc1_b": scale * jax.random.normal(ks[5], (512,), jnp.float32),
        "fc2_w": scale * jax.random.normal(ks[6], (1, 512), jnp.float32),
        "fc2_b": scale * jax.random.normal(ks[7], (1,), jnp.float32),
    }


def prepare_params(params, k=4):
    """One-time layout prep: im2col weight layout with zero-padded K rows for the
    padded carried channels, lane-padded Cout, fc1 permuted to the NHWC flatten,
    bf16 casts.  Every value in the returned dict is a jnp array (jit-safe)."""
    def conv_w(w, cin_pad, cout_pad):
        cout, cin = w.shape[0], w.shape[1]
        w2 = jnp.transpose(w, (2, 3, 1, 0))                               # (kh, kw, cin, cout)
        w2 = jnp.pad(w2, ((0, 0), (0, 0), (0, cin_pad - cin), (0, cout_pad - cout)))
        return w2.reshape(k * k * cin_pad, cout_pad).astype(jnp.bfloat16)

    def conv_b(b, cout_pad):
        return jnp.pad(b, (0, cout_pad - b.shape[0])).astype(jnp.float32)

    # fc1: torch weight (512, 3136) over input flattened as (C=64, H=7, W=7).
    # Activations here flatten as (H, W, Cpad=128) -> permute + channel-pad once.
    f1 = params["fc1_w"].reshape(512, 64, 7, 7).transpose(0, 2, 3, 1)     # (512,7,7,64)
    f1 = jnp.pad(f1, ((0, 0), (0, 0), (0, 0), (0, LANE - 64)))            # (512,7,7,128)
    f1 = f1.reshape(512, 7 * 7 * LANE)

    return {
        "c1_w": conv_w(params["conv1_w"], CIN1_PAD, LANE),    # (128, 128) bf16
        "c1_b": conv_b(params["conv1_b"], LANE),              # (128,) f32
        "c2_w": conv_w(params["conv2_w"], LANE, LANE),        # (2048, 128) bf16
        "c2_b": conv_b(params["conv2_b"], LANE),              # (128,) f32
        "fc1_w": f1.T.astype(jnp.bfloat16),                   # (6272, 512) bf16
        "fc1_b": params["fc1_b"].astype(jnp.float32),         # (512,) f32
        "fc2_w": params["fc2_w"].astype(jnp.float32),         # (1, 512) f32 row (VPU reduce)
        "fc2_b": params["fc2_b"].astype(jnp.float32),         # (1,) f32
    }


# ---------------------------------------------------------------------------
# Discriminator forward
# ---------------------------------------------------------------------------
def discriminator_forward(prep, x, alpha=0.2):
    # x: (B, depth, 28, 28) NCHW (torch layout); fc1 in_features=3136 = 64*7*7.
    B, depth = x.shape[0], x.shape[1]
    assert depth <= CIN1_PAD
    x = jnp.transpose(x, (0, 2, 3, 1)).astype(jnp.bfloat16)          # NHWC, bf16 once
    # pad input channels so conv1's im2col K = 4*4*8 = 128 (lane-dense operand)
    x = jnp.pad(x, ((0, 0), (0, 0), (0, 0), (0, CIN1_PAD - depth)))

    # conv1 + LeakyReLU  (Cout carried zero-padded to 128; no slice afterwards)
    p, Ho, Wo = im2col_nhwc(x)                                        # (B*196, 128)
    y = gemm_bias_lrelu(p, prep["c1_w"], prep["c1_b"], alpha=alpha)   # (B*196, 128)
    y = y.reshape(B, Ho, Wo, LANE)                                    # (B, 14, 14, 128)

    # conv2 + LeakyReLU  (weight rows for the padded input channels are zero)
    p, Ho, Wo = im2col_nhwc(y)                                        # (B*49, 2048)
    y = gemm_bias_lrelu(p, prep["c2_w"], prep["c2_b"], alpha=alpha)   # (B*49, 128)

    # NHWC flatten with padded channels; fc1 weight was permuted/padded to match.
    flat = y.reshape(B, Ho * Wo * LANE)                               # (B, 6272)

    # fused fc1 + LeakyReLU + fc2 (VPU reduce) + Sigmoid
    return mlp_head(flat, prep["fc1_w"], prep["fc1_b"],
                    prep["fc2_w"], prep["fc2_b"], alpha=alpha)        # (B, 1) f32


# ---------------------------------------------------------------------------
# Pure-JAX reference (torch semantics, f32) for a correctness sanity check
# ---------------------------------------------------------------------------
def reference_forward(params, x, alpha=0.2):
    dn = ("NCHW", "OIHW", "NCHW")
    y = jax.lax.conv_general_dilated(x, params["conv1_w"], (2, 2),
                                     [(1, 1), (1, 1)], dimension_numbers=dn)
    y = y + params["conv1_b"][None, :, None, None]
    y = jnp.where(y > 0, y, alpha * y)
    y = jax.lax.conv_general_dilated(y, params["conv2_w"], (2, 2),
                                     [(1, 1), (1, 1)], dimension_numbers=dn)
    y = y + params["conv2_b"][None, :, None, None]
    y = jnp.where(y > 0, y, alpha * y)
    y = y.reshape(y.shape[0], -1)                                     # (B, 3136) (C,H,W) order
    y = y @ params["fc1_w"].T + params["fc1_b"]
    y = jnp.where(y > 0, y, alpha * y)
    y = y @ params["fc2_w"].T + params["fc2_b"]
    return jax.nn.sigmoid(y)


if __name__ == "__main__":
    key = jax.random.PRNGKey(0)
    pkey, xkey = jax.random.split(key)
    params = init_params(pkey, depth=1)
    prep = prepare_params(params)
    # 28x28 input is required by fc1 (3136 = 64*7*7); small batch.
    x = jax.random.normal(xkey, (2, 1, 28, 28), jnp.float32)

    fwd = jax.jit(discriminator_forward)
    out = jax.block_until_ready(fwd(prep, x))

    ref = reference_forward(params, x)
    assert out.shape == (2, 1)
    assert bool(jnp.all(jnp.isfinite(out)))
    assert bool(jnp.all((out >= 0.0) & (out <= 1.0)))
    assert float(jnp.max(jnp.abs(out - ref))) < 5e-2
    print("KERNEL_OK")
</pallas_src>

<mosaic_0001>
module attributes {stable_mosaic.version = 11 : i64} {
  func.func @_gemm_bias_lrelu_kernel(%arg0: i32, %arg1: memref<208x128xbf16, #tpu.memory_space<vmem>>, %arg2: memref<128x128xbf16, #tpu.memory_space<vmem>>, %arg3: memref<1x128xf32, #tpu.memory_space<vmem>>, %arg4: memref<208x128xbf16, #tpu.memory_space<vmem>>) attributes {dimension_semantics = [#tpu.dimension_semantics<parallel>], iteration_bounds = array<i64: 2>, scalar_prefetch = 0 : i64, scratch_operands = 0 : i64, tpu.core_type = #tpu.core_type<tc>, window_params = [{transform_indices = @transform_0, window_bounds = array<i64: 208, 128>}, {pipeline_mode = #tpu.pipeline_mode<synchronous>, transform_indices = @transform_1, window_bounds = array<i64: 128, 128>}, {pipeline_mode = #tpu.pipeline_mode<synchronous>, transform_indices = @transform_2, window_bounds = array<i64: 1, 128>}, {transform_indices = @transform_3, window_bounds = array<i64: 208, 128>}]} {
    %c0 = arith.constant 0 : index
    %c0_0 = arith.constant 0 : index
    %0 = vector.load %arg1[%c0, %c0_0] : memref<208x128xbf16, #tpu.memory_space<vmem>>, vector<208x128xbf16>
    %c0_1 = arith.constant 0 : index
    %c0_2 = arith.constant 0 : index
    %1 = vector.load %arg2[%c0_1, %c0_2] : memref<128x128xbf16, #tpu.memory_space<vmem>>, vector<128x128xbf16>
    %cst = arith.constant dense<0.000000e+00> : vector<208x128xf32>
    %2 = tpu.matmul %0, %1, %cst {dimension_numbers = #tpu.dot_dimension_numbers<[1], [0], [0], [1], [0, 0, 1, 1], [], []>} : vector<208x128xbf16>, vector<128x128xbf16>, vector<208x128xf32> -> vector<208x128xf32>
    %c0_3 = arith.constant 0 : index
    %c0_4 = arith.constant 0 : index
    %3 = vector.load %arg3[%c0_3, %c0_4] : memref<1x128xf32, #tpu.memory_space<vmem>>, vector<1x128xf32>
    %4 = vector.broadcast %3 : vector<1x128xf32> to vector<208x128xf32>
    %5 = arith.addf %2, %4 : vector<208x128xf32>
    %cst_5 = arith.constant 0.000000e+00 : f32
    %6 = vector.broadcast %cst_5 : f32 to vector<208x128xf32>
    %7 = arith.cmpf ogt, %5, %6 : vector<208x128xf32>
    %cst_6 = arith.constant 2.000000e-01 : f32
    %8 = vector.broadcast %cst_6 : f32 to vector<208x128xf32>
    %9 = arith.mulf %8, %5 : vector<208x128xf32>
    %10 = arith.select %7, %5, %9 : vector<208x128xi1>, vector<208x128xf32>
    %11 = arith.truncf %10 : vector<208x128xf32> to vector<208x128xbf16>
    %c0_7 = arith.constant 0 : index
    %c0_8 = arith.constant 0 : index
    %12 = vector.load %arg4[%c0_7, %c0_8] : memref<208x128xbf16, #tpu.memory_space<vmem>>, vector<208x128xbf16>
    tpu.vector_store %arg4[%c0_7, %c0_8], %11 {strides = array<i32>} : memref<208x128xbf16, #tpu.memory_space<vmem>>, vector<208x128xbf16>,
    return
  }
  func.func @transform_0(%arg0: i32) -> (i32, i32) {
    %c0_i32 = arith.constant 0 : i32
    %c0_i32_0 = arith.constant 0 : i32
    return %arg0, %c0_i32 : i32, i32
  }
  func.func @transform_1(%arg0: i32) -> (i32, i32) {
    %c0_i32 = arith.constant 0 : i32
    %c0_i32_0 = arith.constant 0 : i32
    %c0_i32_1 = arith.constant 0 : i32
    return %c0_i32, %c0_i32_0 : i32, i32
  }
  func.func @transform_2(%arg0: i32) -> (i32, i32) {
    %c0_i32 = arith.constant 0 : i32
    %c0_i32_0 = arith.constant 0 : i32
    %c0_i32_1 = arith.constant 0 : i32
    return %c0_i32, %c0_i32_0 : i32, i32
  }
  func.func @transform_3(%arg0: i32) -> (i32, i32) {
    %c0_i32 = arith.constant 0 : i32
    %c0_i32_0 = arith.constant 0 : i32
    return %arg0, %c0_i32 : i32, i32
  }
}

module attributes {stable_mosaic.version = 11 : i64} {
  func.func @_gemm_bias_lrelu_kernel(%arg0: i32, %arg1: memref<64x2048xbf16, #tpu.memory_space<vmem>>, %arg2: memref<2048x128xbf16, #tpu.memory_space<vmem>>, %arg3: memref<1x128xf32, #tpu.memory_space<vmem>>, %arg4: memref<64x128xbf16, #tpu.memory_space<vmem>>) attributes {dimension_semantics = [#tpu.dimension_semantics<parallel>], iteration_bounds = array<i64: 2>, scalar_prefetch = 0 : i64, scratch_operands = 0 : i64, tpu.core_type = #tpu.core_type<tc>, window_params = [{transform_indices = @transform_0, window_bounds = array<i64: 64, 2048>}, {pipeline_mode = #tpu.pipeline_mode<synchronous>, transform_indices = @transform_1, window_bounds = array<i64: 2048, 128>}, {pipeline_mode = #tpu.pipeline_mode<synchronous>, transform_indices = @transform_2, window_bounds = array<i64: 1, 128>}, {transform_indices = @transform_3, window_bounds = array<i64: 64, 128>}]} {
    %c0 = arith.constant 0 : index
    %c0_0 = arith.constant 0 : index
    %0 = vector.load %arg1[%c0, %c0_0] : memref<64x2048xbf16, #tpu.memory_space<vmem>>, vector<64x2048xbf16>
    %c0_1 = arith.constant 0 : index
    %c0_2 = arith.constant 0 : index
    %1 = vector.load %arg2[%c0_1, %c0_2] : memref<2048x128xbf16, #tpu.memory_space<vmem>>, vector<2048x128xbf16>
    %cst = arith.constant dense<0.000000e+00> : vector<64x128xf32>
    %2 = tpu.matmul %0, %1, %cst {dimension_numbers = #tpu.dot_dimension_numbers<[1], [0], [0], [1], [0, 0, 1, 1], [], []>} : vector<64x2048xbf16>, vector<2048x128xbf16>, vector<64x128xf32> -> vector<64x128xf32>
    %c0_3 = arith.constant 0 : index
    %c0_4 = arith.constant 0 : index
    %3 = vector.load %arg3[%c0_3, %c0_4] : memref<1x128xf32, #tpu.memory_space<vmem>>, vector<1x128xf32>
    %4 = vector.broadcast %3 : vector<1x128xf32> to vector<64x128xf32>
    %5 = arith.addf %2, %4 : vector<64x128xf32>
    %cst_5 = arith.constant 0.000000e+00 : f32
    %6 = vector.broadcast %cst_5 : f32 to vector<64x128xf32>
    %7 = arith.cmpf ogt, %5, %6 : vector<64x128xf32>
    %cst_6 = arith.constant 2.000000e-01 : f32
    %8 = vector.broadcast %cst_6 : f32 to vector<64x128xf32>
    %9 = arith.mulf %8, %5 : vector<64x128xf32>
    %10 = arith.select %7, %5, %9 : vector<64x128xi1>, vector<64x128xf32>
    %11 = arith.truncf %10 : vector<64x128xf32> to vector<64x128xbf16>
    %c0_7 = arith.constant 0 : index
    %c0_8 = arith.constant 0 : index
    %12 = vector.load %arg4[%c0_7, %c0_8] : memref<64x128xbf16, #tpu.memory_space<vmem>>, vector<64x128xbf16>
    tpu.vector_store %arg4[%c0_7, %c0_8], %11 {strides = array<i32>} : memref<64x128xbf16, #tpu.memory_space<vmem>>, vector<64x128xbf16>,
    return
  }
  func.func @transform_0(%arg0: i32) -> (i32, i32) {
    %c0_i32 = arith.constant 0 : i32
    %c0_i32_0 = arith.constant 0 : i32
    return %arg0, %c0_i32 : i32, i32
  }
  func.func @transform_1(%arg0: i32) -> (i32, i32) {
    %c0_i32 = arith.constant 0 : i32
    %c0_i32_0 = arith.constant 0 : i32
    %c0_i32_1 = arith.constant 0 : i32
    return %c0_i32, %c0_i32_0 : i32, i32
  }
  func.func @transform_2(%arg0: i32) -> (i32, i32) {
    %c0_i32 = arith.constant 0 : i32
    %c0_i32_0 = arith.constant 0 : i32
    %c0_i32_1 = arith.constant 0 : i32
    return %c0_i32, %c0_i32_0 : i32, i32
  }
  func.func @transform_3(%arg0: i32) -> (i32, i32) {
    %c0_i32 = arith.constant 0 : i32
    %c0_i32_0 = arith.constant 0 : i32
    return %arg0, %c0_i32 : i32, i32
  }
}

module attributes {stable_mosaic.version = 11 : i64} {
  func.func @_mlp_head_kernel(%arg0: i32, %arg1: memref<2x6272xbf16, #tpu.memory_space<vmem>>, %arg2: memref<6272x512xbf16, #tpu.memory_space<vmem>>, %arg3: memref<1x512xf32, #tpu.memory_space<vmem>>, %arg4: memref<1x512xf32, #tpu.memory_space<vmem>>, %arg5: memref<1x1xf32, #tpu.memory_space<vmem>>, %arg6: memref<2x1xf32, #tpu.memory_space<vmem>>) attributes {dimension_semantics = [#tpu.dimension_semantics<parallel>], iteration_bounds = array<i64: 1>, scalar_prefetch = 0 : i64, scratch_operands = 0 : i64, tpu.core_type = #tpu.core_type<tc>, window_params = [{transform_indices = @transform_0, window_bounds = array<i64: 2, 6272>}, {pipeline_mode = #tpu.pipeline_mode<synchronous>, transform_indices = @transform_1, window_bounds = array<i64: 6272, 512>}, {pipeline_mode = #tpu.pipeline_mode<synchronous>, transform_indices = @transform_2, window_bounds = array<i64: 1, 512>}, {pipeline_mode = #tpu.pipeline_mode<synchronous>, transform_indices = @transform_3, window_bounds = array<i64: 1, 512>}, {pipeline_mode = #tpu.pipeline_mode<synchronous>, transform_indices = @transform_4, window_bounds = array<i64: 1, 1>}, {transform_indices = @transform_5, window_bounds = array<i64: 2, 1>}]} {
    %c0 = arith.constant 0 : index
    %c0_0 = arith.constant 0 : index
    %0 = vector.load %arg1[%c0, %c0_0] : memref<2x6272xbf16, #tpu.memory_space<vmem>>, vector<2x6272xbf16>
    %c0_1 = arith.constant 0 : index
    %c0_2 = arith.constant 0 : index
    %1 = vector.load %arg2[%c0_1, %c0_2] : memref<6272x512xbf16, #tpu.memory_space<vmem>>, vector<6272x512xbf16>
    %cst = arith.constant dense<0.000000e+00> : vector<2x512xf32>
    %2 = tpu.matmul %0, %1, %cst {dimension_numbers = #tpu.dot_dimension_numbers<[1], [0], [0], [1], [0, 0, 1, 1], [], []>} : vector<2x6272xbf16>, vector<6272x512xbf16>, vector<2x512xf32> -> vector<2x512xf32>
    %c0_3 = arith.constant 0 : index
    %c0_4 = arith.constant 0 : index
    %3 = vector.load %arg3[%c0_3, %c0_4] : memref<1x512xf32, #tpu.memory_space<vmem>>, vector<1x512xf32>
    %4 = vector.broadcast %3 : vector<1x512xf32> to vector<2x512xf32>
    %5 = arith.addf %2, %4 : vector<2x512xf32>
    %cst_5 = arith.constant 0.000000e+00 : f32
    %6 = vector.broadcast %cst_5 : f32 to vector<2x512xf32>
    %7 = arith.cmpf ogt, %5, %6 : vector<2x512xf32>
    %cst_6 = arith.constant 2.000000e-01 : f32
    %8 = vector.broadcast %cst_6 : f32 to vector<2x512xf32>
    %9 = arith.mulf %8, %5 : vector<2x512xf32>
    %10 = arith.select %7, %5, %9 : vector<2x512xi1>, vector<2x512xf32>
    %c0_7 = arith.constant 0 : index
    %c0_8 = arith.constant 0 : index
    %11 = vector.load %arg4[%c0_7, %c0_8] : memref<1x512xf32, #tpu.memory_space<vmem>>, vector<1x512xf32>
    %12 = vector.broadcast %11 : vector<1x512xf32> to vector<2x512xf32>
    %13 = arith.mulf %10, %12 : vector<2x512xf32>
    %cst_9 = arith.constant dense<0.000000e+00> : vector<2xf32>
    %14 = vector.multi_reduction <add>, %13, %cst_9 [1] : vector<2x512xf32> to vector<2xf32>
    %15 = vector.shape_cast %14 : vector<2xf32> to vector<2x1xf32>
    %c0_10 = arith.constant 0 : index
    %c0_11 = arith.constant 0 : index
    %16 = vector.load %arg5[%c0_10, %c0_11] : memref<1x1xf32, #tpu.memory_space<vmem>>, vector<1x1xf32>
    %17 = vector.broadcast %16 : vector<1x1xf32> to vector<2x1xf32>
    %18 = arith.addf %15, %17 : vector<2x1xf32>
    %cst_12 = arith.constant 5.000000e-01 : f32
    %19 = vector.broadcast %cst_12 : f32 to vector<2x1xf32>
    %20 = arith.mulf %19, %18 : vector<2x1xf32>
    %21 = math.tanh %20 : vector<2x1xf32>
    %cst_13 = arith.constant 1.000000e+00 : f32
    %22 = vector.broadcast %cst_13 : f32 to vector<2x1xf32>
    %23 = arith.addf %21, %22 : vector<2x1xf32>
    %cst_14 = arith.constant 5.000000e-01 : f32
    %24 = vector.broadcast %cst_14 : f32 to vector<2x1xf32>
    %25 = arith.mulf %24, %23 : vector<2x1xf32>
    %c0_15 = arith.constant 0 : index
    %c0_16 = arith.constant 0 : index
    %26 = vector.load %arg6[%c0_15, %c0_16] : memref<2x1xf32, #tpu.memory_space<vmem>>, vector<2x1xf32>
    tpu.vector_store %arg6[%c0_15, %c0_16], %25 {strides = array<i32>} : memref<2x1xf32, #tpu.memory_space<vmem>>, vector<2x1xf32>,
    return
  }
  func.func @transform_0(%arg0: i32) -> (i32, i32) {
    %c0_i32 = arith.constant 0 : i32
    %c0_i32_0 = arith.constant 0 : i32
    return %arg0, %c0_i32 : i32, i32
  }
  func.func @transform_1(%arg0: i32) -> (i32, i32) {
    %c0_i32 = arith.constant 0 : i32
    %c0_i32_0 = arith.constant 0 : i32
    %c0_i32_1 = arith.constant 0 : i32
    return %c0_i32, %c0_i32_0 : i32, i32
  }
  func.func @transform_2(%arg0: i32) -> (i32, i32) {
    %c0_i32 = arith.constant 0 : i32
    %c0_i32_0 = arith.constant 0 : i32
    %c0_i32_1 = arith.constant 0 : i32
    return %c0_i32, %c0_i32_0 : i32, i32
  }
  func.func @transform_3(%arg0: i32) -> (i32, i32) {
    %c0_i32 = arith.constant 0 : i32
    %c0_i32_0 = arith.constant 0 : i32
    %c0_i32_1 = arith.constant 0 : i32
    return %c0_i32, %c0_i32_0 : i32, i32
  }
  func.func @transform_4(%arg0: i32) -> (i32, i32) {
    %c0_i32 = arith.constant 0 : i32
    %c0_i32_0 = arith.constant 0 : i32
    %c0_i32_1 = arith.constant 0 : i32
    return %c0_i32, %c0_i32_0 : i32, i32
  }
  func.func @transform_5(%arg0: i32) -> (i32, i32) {
    %c0_i32 = arith.constant 0 : i32
    %c0_i32_0 = arith.constant 0 : i32
    return %arg0, %c0_i32 : i32, i32
  }
}

</mosaic_0001>

<bundles_post_ra>
// kernel: discriminator_forward.3
= control target key start
LH: loop header
LB: loop body
LE: loop exit
PB: predicated region body
PF: predicated region fallthrough
CT: control target
= control target key end

     0   :  { %s1530_s12 = smov 0   ;;  %s1532_s13 = smov 0   ;;  %s1813_s0 = inlined_call_operand.vmem [shape: bf16[392,128], index: 0, kind: input, shape index: {}]   ;;  %s1814_s1 = inlined_call_operand.vmem [shape: bf16[128,128], index: 1, kind: input, shape index: {}]   ;;  %s1815_s2 = inlined_call_operand.vmem [shape: f32[1,128], index: 2, kind: input, shape index: {}]   ;;  %s1816_s3 = inlined_call_operand.vmem [shape: bf16[392,128], index: 3, kind: output, shape index: {}]  }
   0x1   :  { %s1534_s14 = smov 0  }
   0x2 LB: > { %s1543_s15 = sadd.s32 4294967295, %s1474_s14   ;;  %s1545_s16 = sadd.s32 1, %s1474_s14   ;;  %s1474_s14 = sphi %s1534_s14, %s1823_s14   ;;  %s1470_s13 = sphi %s1532_s13, %s1822_s13   ;;  %s1466_s12 = sphi %s1530_s12, %s1821_s12  }
   0x3   : > { %s85_s17 = ssub.s32 %s1474_s14, %s1545_s16  ;;  %s88_s18 = sadd.s32 1, %s1470_s13 }
   0x4   : > { %p86_p0 = scmp.eq.s32.totalorder %s85_s17, 0  ;;  %p98_p1 = scmp.ne.s32.totalorder %s1470_s13, %s1466_s12 }
   0x5   : > { %p99_p2 = scmp.eq.s32.totalorder %s1543_s15, 1  ;;  %p1032_p3 = scmp.ge.s32.totalorder %s1474_s14, 1 }
   0x6   : > { %s1553_s19 = scalar_select %p86_p0, %s1470_s13, %s88_s18  }
   0x7   : > { %p1555_p4 = por %p99_p2, %p98_p1  ;;  %p146_p5 = scmp.lt.s32.totalorder %s1474_s14, 3 }
   0x9   : > { %p147_p6 = pnand %p1032_p3, %p146_p5 }
   0xa   : > { %v1395_v0 = vld [vmem:[%s1814_s1] sm:$0xff] (!%p147_p6)   ;;  %v1508_v1 = vmov (!%p147_p6), 0.0   ;;  %v1396_v2 = vld [vmem:[%s1814_s1 + $0x8] sm:$0xff] (!%p147_p6)   ;;  %s1568_s25 = smul.u32 (!%p147_p6), 26, %s1543_s15  ;;  %vm1509_vm0 = vmmov (!%p147_p6), 0   ;;  %v1397_v3 = vld [vmem:[%s1814_s1 + $0x10] sm:$0xff] (!%p147_p6)  }
   0xb   : > { %150 = sbr.rel (%p147_p6) target bundleno = 392 (0x188), region = 32  ;;  %1219 = vmatprep.subr.bf16.mxu0 (!%p147_p6), %v1508_v1  ;;  %1287 = vmatprep.subr.bf16.mxu1 (!%p147_p6), %v1508_v1  ;;  %v1398_v4 = vld [vmem:[%s1814_s1 + $0x18] sm:$0xff] (!%p147_p6)   ;;  %v1399_v5 = vld [vmem:[%s1814_s1 + $0x20] sm:$0xff] (!%p147_p6)   ;;  %v1400_v6 = vld [vmem:[%s1814_s1 + $0x28] sm:$0xff] (!%p147_p6)   ;;  %s170_s24 = sand.u32 (!%p147_p6), 1, %s1466_s12  }
   0xc   : > { %1220 = vmatpush3.bf16.msra.mxu0 (!%p147_p6), %v1395_v0  ;;  %1295 = vmatpush3.bf16.msra.mxu1 (!%p147_p6), %v1395_v0  ;;  %p178_p7 = scmp.lt.s32.totalorder (!%p147_p6), %s1568_s25, 48  ;;  %v1401_v7 = vld [vmem:[%s1814_s1 + $0x30] sm:$0xff] (!%p147_p6)   ;;  %v1402_v8 = vld [vmem:[%s1814_s1 + $0x38] sm:$0xff] (!%p147_p6)   ;;  %v1651_v22 = vld [vmem:[%s1815_s2] ss:$0 sm:$0xff] (!%p147_p6)  ;;  %s1303_s26 = smul.u32 (!%p147_p6), 104, %s170_s24 }
   0xd   : > { %1221 = vmatprep.subr.bf16.mxu0 (!%p147_p6), %v1508_v1  ;;  %1288 = vmatprep.subr.bf16.mxu1 (!%p147_p6), %v1508_v1 }
   0xe   : > { %1235 = vmatprep.mubr.msk.bf16.mxu0 (!%p147_p6), %vm1509_vm0, %v1508_v1  ;;  %1263 = vmatprep.mubr.msk.bf16.mxu1 (!%p147_p6), %vm1509_vm0, %v1508_v1  ;;  %s1660_s12 = scalar_lea.vmem (!%p147_p6), [#allocation2], %s1303_s26  }
  0x10   : > { %1222 = vmatpush3.bf16.msra.mxu0 (!%p147_p6), %v1396_v2  ;;  %1296 = vmatpush3.bf16.msra.mxu1 (!%p147_p6), %v1396_v2 }
  0x11   : > { %1223 = vmatprep.subr.bf16.mxu0 (!%p147_p6), %v1508_v1  ;;  %1289 = vmatprep.subr.bf16.mxu1 (!%p147_p6), %v1508_v1 }
  0x12   : > { %s179_s28 = scalar_select %p178_p7, %s1568_s25, 48 }
  0x13   : > { %s721_s27 = ssub.s32 (%p1555_p4), 49, %s1568_s25 }
  0x14   : > { %s1033_s29 = sshll.u32 %s179_s28, 2  ;;  %1224 = vmatpush3.bf16.msra.mxu0 %v1397_v3  ;;  %1297 = vmatpush3.bf16.msra.mxu1 %v1397_v3  ;;  %s1120_s28 = smul.u32 (%p1555_p4), 104, %s1543_s15 }
  0x15   : > { %s1586_s5 = scalar_lea.vmem %s1813_s0, %s1033_s29  ;;  %1225 = vmatprep.subr.bf16.mxu0 %v1508_v1  ;;  %1290 = vmatprep.subr.bf16.mxu1 %v1508_v1  ;;  %p722_p8 = scmp.lt.s32.totalorder (%p1555_p4), %s721_s27, 26 }
  0x16   : > { %v1403_v9 = vld [vmem:[%s1586_s5] sm:$0xff]   ;;  %v1404_v10 = vld [vmem:[%s1586_s5 + $0x38] sm:$0xff]   ;;  %v1405_v11 = vld [vmem:[%s1586_s5 + $0x8] sm:$0xff]   ;;  %s1702_s4 = scalar_lea.vmem (%p1555_p4), %s1816_s3, %s1120_s28  }
  0x17   : > { %v1406_v12 = vld [vmem:[%s1586_s5 + $0x40] sm:$0xff]   ;;  %v1407_v13 = vld [vmem:[%s1586_s5 + $0x10] sm:$0xff]   ;;  %v1408_v14 = vld [vmem:[%s1586_s5 + $0x48] sm:$0xff]  }
  0x18   : > { %1226 = vmatpush3.bf16.msra.mxu0 %v1398_v4  ;;  %1298 = vmatpush3.bf16.msra.mxu1 %v1398_v4  ;;  %v1409_v15 = vld [vmem:[%s1586_s5 + $0x18] sm:$0xff]   ;;  %v1410_v16 = vld [vmem:[%s1586_s5 + $0x50] sm:$0xff]   ;;  %v1411_v17 = vld [vmem:[%s1586_s5 + $0x20] sm:$0xff]  }
  0x19   : > { %1227 = vmatprep.subr.bf16.mxu0 %v1508_v1  ;;  %1291 = vmatprep.subr.bf16.mxu1 %v1508_v1  ;;  %v1412_v18 = vld [vmem:[%s1586_s5 + $0x58] sm:$0xff]   ;;  %v1413_v19 = vld [vmem:[%s1586_s5 + $0x28] sm:$0xff]   ;;  %v1414_v20 = vld [vmem:[%s1586_s5 + $0x60] sm:$0xff]  }
  0x1a   : > { %v1415_v21 = vld [vmem:[%s1586_s5 + $0x30] sm:$0xff]  }
  0x1c   : > { %1228 = vmatpush3.bf16.msra.mxu0 %v1399_v5  ;;  %1299 = vmatpush3.bf16.msra.mxu1 %v1399_v5 }
  0x1d   : > { %1229 = vmatprep.subr.bf16.mxu0 %v1508_v1  ;;  %1292 = vmatprep.subr.bf16.mxu1 %v1508_v1 }
  0x20   : > { %1230 = vmatpush3.bf16.msra.mxu0 %v1400_v6  ;;  %1300 = vmatpush3.bf16.msra.mxu1 %v1400_v6 }
  0x21   : > { %1231 = vmatprep.subr.bf16.mxu0 %v1508_v1  ;;  %1293 = vmatprep.subr.bf16.mxu1 %v1508_v1 }
  0x24   : > { %1232 = vmatpush3.bf16.msra.mxu0 %v1401_v7  ;;  %1301 = vmatpush3.bf16.msra.mxu1 %v1401_v7 }
  0x25   : > { %1233 = vmatprep.subr.bf16.mxu0 %v1508_v1  ;;  %1294 = vmatprep.subr.bf16.mxu1 %v1508_v1 }
  0x28   : > { %1234 = vmatpush3.bf16.msra.mxu0 %v1402_v8  ;;  %1302 = vmatpush3.bf16.msra.mxu1 %v1402_v8 }
  0x2b   : > { %1236 = vmatmul.mubr.bf16.vlgmr.msra.gmra.mrb[0].mxu0 %v1403_v9  ;;  %1264 = vmatmul.mubr.bf16.vlgmr.msra.gmra.mrb[0].mxu1 %v1404_v10 }
  0x2c   : > { %1239 = vmatprep.mubr.msk.bf16.mxu0 %vm1509_vm0, %v1508_v1  ;;  %1267 = vmatprep.mubr.msk.bf16.mxu1 %vm1509_vm0, %v1508_v1 }
  0x33   : > { %1240 = vmatmul.mubr.bf16.gmra.mrb[4].mxu0 %v1405_v11  ;;  %1268 = vmatmul.mubr.bf16.gmra.mrb[4].mxu1 %v1406_v12 }
  0x34   : > { %1243 = vmatprep.mubr.msk.bf16.mxu0 %vm1509_vm0, %v1508_v1  ;;  %1271 = vmatprep.mubr.msk.bf16.mxu1 %vm1509_vm0, %v1508_v1 }
  0x3b   : > { %1244 = vmatmul.mubr.bf16.gmra.mrb[8].mxu0 %v1407_v13  ;;  %1272 = vmatmul.mubr.bf16.gmra.mrb[8].mxu1 %v1408_v14 }
  0x3c   : > { %1247 = vmatprep.mubr.msk.bf16.mxu0 %vm1509_vm0, %v1508_v1  ;;  %1275 = vmatprep.mubr.msk.bf16.mxu1 %vm1509_vm0, %v1508_v1 }
  0x43   : > { %1248 = vmatmul.mubr.bf16.gmra.mrb[12].mxu0 %v1409_v15  ;;  %1276 = vmatmul.mubr.bf16.gmra.mrb[12].mxu1 %v1410_v16 }
  0x44   : > { %1251 = vmatprep.mubr.msk.bf16.mxu0 %vm1509_vm0, %v1508_v1  ;;  %1279 = vmatprep.mubr.msk.bf16.mxu1 %vm1509_vm0, %v1508_v1 }
  0x4b   : > { %1252 = vmatmul.mubr.bf16.gmra.mrb[16].mxu0 %v1411_v17  ;;  %1280 = vmatmul.mubr.bf16.gmra.mrb[16].mxu1 %v1412_v18 }
  0x4c   : > { %1255 = vmatprep.mubr.msk.bf16.mxu0 %vm1509_vm0, %v1508_v1  ;;  %1283 = vmatprep.mubr.msk.bf16.mxu1 %vm1509_vm0, %v1508_v1 }
  0x53   : > { %1256 = vmatmul.mubr.bf16.gmra.mrb[20].mxu0 %v1413_v19  ;;  %1284 = vmatmul.mubr.bf16.gmra.mrb[20].mxu1 %v1414_v20 }
  0x54   : > { %1259 = vmatprep.mubr.msk.bf16.mxu0 %vm1509_vm0, %v1508_v1 }
  0x5b   : > { %1260 = vmatmul.mubr.bf16.gmra.mrb[24].mxu0 %v1415_v21 }
  0xfe   : > { %v402_v23 = vpop.f32.mrb[0].mxu0  ;;  %v458_v24 = vpop.f32.mrb[0].mxu1 }
  0xff   : > { %v403_v25 = vadd.f32 %v1651_v22, %v402_v23  ;;  %v1237_v26 = vpop.f32.mrb[1].mxu0  ;;  %v459_v27 = vadd.f32 %v1651_v22, %v458_v24  ;;  %v1265_v28 = vpop.f32.mrb[1].mxu1 }
 0x100   : > { %v405_v29 = vpop.f32.mrb[2].mxu0  ;;  %v461_v30 = vpop.f32.mrb[2].mxu1 }
 0x101   : > { %v531_v31 = vmul.f32 0.2, %v403_v25  ;;  %v406_v32 = vadd.f32 %v1651_v22, %v405_v29  ;;  %v1238_v33 = vpop.f32.mrb[3].mxu0  ;;  %vm519_vm1 = vcmp.gt.f32.partialorder %v459_v27, 0.0  ;;  %v1266_v34 = vpop.f32.mrb[3].mxu1  ;;  %vm505_vm2 = vcmp.gt.f32.partialorder %v403_v25, 0.0 }
 0x102   : > { %v545_v35 = vmul.f32 0.2, %v459_v27  ;;  %v462_v36 = vadd.f32 %v1651_v22, %v461_v30 }
 0x103   : > { %vm506_vm3 = vcmp.gt.f32.partialorder %v406_v32, 0.0  ;;  %v532_v37 = vmul.f32 0.2, %v406_v32  ;;  %v557_v40 = vsel %vm505_vm2, %v403_v25, %v531_v31 }
 0x104   : > { %v571_v38 = vsel %vm519_vm1, %v459_v27, %v545_v35  ;;  %vm520_vm4 = vcmp.gt.f32.partialorder %v462_v36, 0.0  ;;  %v546_v39 = vmul.f32 0.2, %v462_v36 }
 0x105   : > { %v558_v41 = vsel %vm506_vm3, %v406_v32, %v532_v37 }
 0x106   : > { %v1124_v42 = vpack.c.bf16 %v558_v41, %v557_v40  ;;  %v572_v43 = vsel %vm520_vm4, %v462_v36, %v546_v39  ;;  %v410_v44 = vpop.f32.mrb[4].mxu0  ;;  %v466_v45 = vpop.f32.mrb[4].mxu1 }
 0x107   : > { %v1159_v46 = vpack.c.bf16 %v572_v43, %v571_v38  ;;  %v411_v47 = vadd.f32 %v1651_v22, %v410_v44  ;;  %v1241_v48 = vpop.f32.mrb[5].mxu0  ;;  %v467_v49 = vadd.f32 %v1651_v22, %v466_v45  ;;  %v1269_v50 = vpop.f32.mrb[5].mxu1 }
 0x108   : > { %1125 = vst [vmem:[%s1660_s12] sm:$0xff] %v1124_v42   ;;  %v413_v51 = vpop.f32.mrb[6].mxu0  ;;  %v469_v52 = vpop.f32.mrb[6].mxu1 }
 0x109   : > { %1192 = vst [vmem:[%s1660_s12 + $0x38] sm:$0xff] %v1159_v46   ;;  %v533_v53 = vmul.f32 0.2, %v411_v47  ;;  %v414_v54 = vadd.f32 %v1651_v22, %v413_v51  ;;  %v1242_v55 = vpop.f32.mrb[7].mxu0  ;;  %vm521_vm5 = vcmp.gt.f32.partialorder %v467_v49, 0.0  ;;  %v1270_v56 = vpop.f32.mrb[7].mxu1  ;;  %v470_v58 = vadd.f32 %v1651_v22, %v469_v52 }
 0x10a   : > { %vm507_vm6 = vcmp.gt.f32.partialorder %v411_v47, 0.0  ;;  %v547_v57 = vmul.f32 0.2, %v467_v49 }
 0x10b   : > { %vm508_vm7 = vcmp.gt.f32.partialorder %v414_v54, 0.0  ;;  %v534_v59 = vmul.f32 0.2, %v414_v54  ;;  %vm522_vm8 = vcmp.gt.f32.partialorder %v470_v58, 0.0  ;;  %v548_v61 = vmul.f32 0.2, %v470_v58 }
 0x10c   : > { %v573_v60 = vsel %vm521_vm5, %v467_v49, %v547_v57  ;;  %v559_v62 = vsel %vm507_vm6, %v411_v47, %v533_v53 }
 0x10d   : > { %v560_v63 = vsel %vm508_vm7, %v414_v54, %v534_v59  ;;  %v574_v1 = vsel %vm522_vm8, %v470_v58, %v548_v61 }
 0x10e   : > { %v1129_v0 = vpack.c.bf16 %v560_v63, %v559_v62  ;;  %v418_v2 = vpop.f32.mrb[8].mxu0  ;;  %v474_v3 = vpop.f32.mrb[8].mxu1  ;;  %v1164_v4 = vpack.c.bf16 %v574_v1, %v573_v60 }
 0x10f   : > { %v419_v5 = vadd.f32 %v1651_v22, %v418_v2  ;;  %v1245_v6 = vpop.f32.mrb[9].mxu0  ;;  %v475_v7 = vadd.f32 %v1651_v22, %v474_v3  ;;  %v1273_v8 = vpop.f32.mrb[9].mxu1 }
 0x110   : > { %1186 = vst [vmem:[%s1660_s12 + $0x8] sm:$0xff] %v1129_v0   ;;  %v421_v9 = vpop.f32.mrb[10].mxu0  ;;  %v477_v10 = vpop.f32.mrb[10].mxu1  ;;  %1193 = vst [vmem:[%s1660_s12 + $0x40] sm:$0xff] %v1164_v4  }
 0x111   : > { %v535_v11 = vmul.f32 0.2, %v419_v5  ;;  %v422_v12 = vadd.f32 %v1651_v22, %v421_v9  ;;  %v1246_v13 = vpop.f32.mrb[11].mxu0  ;;  %vm523_vm9 = vcmp.gt.f32.partialorder %v475_v7, 0.0  ;;  %v1274_v14 = vpop.f32.mrb[11].mxu1  ;;  %vm509_vm10 = vcmp.gt.f32.partialorder %v419_v5, 0.0 }
 0x112   : > { %v549_v15 = vmul.f32 0.2, %v475_v7  ;;  %v478_v16 = vadd.f32 %v1651_v22, %v477_v10 }
 0x113   : > { %vm510_vm11 = vcmp.gt.f32.partialorder %v422_v12, 0.0  ;;  %v536_v17 = vmul.f32 0.2, %v422_v12  ;;  %v561_v20 = vsel %vm509_vm10, %v419_v5, %v535_v11 }
 0x114   : > { %v575_v18 = vsel %vm523_vm9, %v475_v7, %v549_v15  ;;  %vm524_vm12 = vcmp.gt.f32.partialorder %v478_v16, 0.0  ;;  %v550_v19 = vmul.f32 0.2, %v478_v16 }
 0x115   : > { %v562_v21 = vsel %vm510_vm11, %v422_v12, %v536_v17 }
 0x116   : > { %v1134_v23 = vpack.c.bf16 %v562_v21, %v561_v20  ;;  %v576_v24 = vsel %vm524_vm12, %v478_v16, %v550_v19  ;;  %v426_v25 = vpop.f32.mrb[12].mxu0  ;;  %v482_v26 = vpop.f32.mrb[12].mxu1 }
 0x117   : > { %v1169_v27 = vpack.c.bf16 %v576_v24, %v575_v18  ;;  %v427_v28 = vadd.f32 %v1651_v22, %v426_v25  ;;  %v1249_v29 = vpop.f32.mrb[13].mxu0  ;;  %v483_v30 = vadd.f32 %v1651_v22, %v482_v26  ;;  %v1277_v31 = vpop.f32.mrb[13].mxu1 }
 0x118   : > { %1187 = vst [vmem:[%s1660_s12 + $0x10] sm:$0xff] %v1134_v23   ;;  %v429_v32 = vpop.f32.mrb[14].mxu0  ;;  %v485_v33 = vpop.f32.mrb[14].mxu1 }
 0x119   : > { %1194 = vst [vmem:[%s1660_s12 + $0x48] sm:$0xff] %v1169_v27   ;;  %v537_v34 = vmul.f32 0.2, %v427_v28  ;;  %v430_v35 = vadd.f32 %v1651_v22, %v429_v32  ;;  %v1250_v36 = vpop.f32.mrb[15].mxu0  ;;  %vm525_vm13 = vcmp.gt.f32.partialorder %v483_v30, 0.0  ;;  %v1278_v37 = vpop.f32.mrb[15].mxu1  ;;  %v486_v39 = vadd.f32 %v1651_v22, %v485_v33 }
 0x11a   : > { %vm511_vm14 = vcmp.gt.f32.partialorder %v427_v28, 0.0  ;;  %v551_v38 = vmul.f32 0.2, %v483_v30 }
 0x11b   : > { %vm512_vm15 = vcmp.gt.f32.partialorder %v430_v35, 0.0  ;;  %v538_v40 = vmul.f32 0.2, %v430_v35  ;;  %vm526_vm0 = vcmp.gt.f32.partialorder %v486_v39, 0.0  ;;  %v552_v42 = vmul.f32 0.2, %v486_v39 }
 0x11c   : > { %v577_v41 = vsel %vm525_vm13, %v483_v30, %v551_v38  ;;  %v563_v43 = vsel %vm511_vm14, %v427_v28, %v537_v34 }
 0x11d   : > { %v564_v44 = vsel %vm512_vm15, %v430_v35, %v538_v40  ;;  %v578_v46 = vsel %vm526_vm0, %v486_v39, %v552_v42 }
 0x11e   : > { %v1139_v45 = vpack.c.bf16 %v564_v44, %v563_v43  ;;  %v434_v47 = vpop.f32.mrb[16].mxu0  ;;  %v490_v48 = vpop.f32.mrb[16].mxu1  ;;  %v1174_v49 = vpack.c.bf16 %v578_v46, %v577_v41 }
 0x11f   : > { %v435_v50 = vadd.f32 %v1651_v22, %v434_v47  ;;  %v1253_v51 = vpop.f32.mrb[17].mxu0  ;;  %v491_v52 = vadd.f32 %v1651_v22, %v490_v48  ;;  %v1281_v53 = vpop.f32.mrb[17].mxu1 }
 0x120   : > { %1188 = vst [vmem:[%s1660_s12 + $0x18] sm:$0xff] %v1139_v45   ;;  %v437_v54 = vpop.f32.mrb[18].mxu0  ;;  %v493_v55 = vpop.f32.mrb[18].mxu1  ;;  %1195 = vst [vmem:[%s1660_s12 + $0x50] sm:$0xff] %v1174_v49  }
 0x121   : > { %v539_v56 = vmul.f32 0.2, %v435_v50  ;;  %v438_v57 = vadd.f32 %v1651_v22, %v437_v54  ;;  %v1254_v58 = vpop.f32.mrb[19].mxu0  ;;  %vm527_vm1 = vcmp.gt.f32.partialorder %v491_v52, 0.0  ;;  %v1282_v59 = vpop.f32.mrb[19].mxu1  ;;  %vm513_vm2 = vcmp.gt.f32.partialorder %v435_v50, 0.0 }
 0x122   : > { %v553_v60 = vmul.f32 0.2, %v491_v52  ;;  %v494_v61 = vadd.f32 %v1651_v22, %v493_v55 }
 0x123   : > { %vm514_vm3 = vcmp.gt.f32.partialorder %v438_v57, 0.0  ;;  %v540_v62 = vmul.f32 0.2, %v438_v57  ;;  %v565_v1 = vsel %vm513_vm2, %v435_v50, %v539_v56 }
 0x124   : > { %v579_v63 = vsel %vm527_vm1, %v491_v52, %v553_v60  ;;  %vm528_vm4 = vcmp.gt.f32.partialorder %v494_v61, 0.0  ;;  %v554_v0 = vmul.f32 0.2, %v494_v61 }
 0x125   : > { %v566_v2 = vsel %vm514_vm3, %v438_v57, %v540_v62 }
 0x126   : > { %v1144_v3 = vpack.c.bf16 %v566_v2, %v565_v1  ;;  %v580_v4 = vsel %vm528_vm4, %v494_v61, %v554_v0  ;;  %v442_v5 = vpop.f32.mrb[20].mxu0  ;;  %v498_v6 = vpop.f32.mrb[20].mxu1 }
 0x127   : > { %v1179_v7 = vpack.c.bf16 %v580_v4, %v579_v63  ;;  %v443_v8 = vadd.f32 %v1651_v22, %v442_v5  ;;  %v1257_v9 = vpop.f32.mrb[21].mxu0  ;;  %v499_v10 = vadd.f32 %v1651_v22, %v498_v6  ;;  %v1285_v11 = vpop.f32.mrb[21].mxu1 }
 0x128   : > { %1189 = vst [vmem:[%s1660_s12 + $0x20] sm:$0xff] %v1144_v3   ;;  %v445_v12 = vpop.f32.mrb[22].mxu0  ;;  %v501_v13 = vpop.f32.mrb[22].mxu1 }
 0x129   : > { %1196 = vst [vmem:[%s1660_s12 + $0x58] sm:$0xff] %v1179_v7   ;;  %v541_v14 = vmul.f32 0.2, %v443_v8  ;;  %v446_v15 = vadd.f32 %v1651_v22, %v445_v12  ;;  %v1258_v16 = vpop.f32.mrb[23].mxu0  ;;  %vm529_vm5 = vcmp.gt.f32.partialorder %v499_v10, 0.0  ;;  %v1286_v17 = vpop.f32.mrb[23].mxu1  ;;  %v502_v19 = vadd.f32 %v1651_v22, %v501_v13 }
 0x12a   : > { %vm515_vm6 = vcmp.gt.f32.partialorder %v443_v8, 0.0  ;;  %v555_v18 = vmul.f32 0.2, %v499_v10 }
 0x12b   : > { %vm516_vm7 = vcmp.gt.f32.partialorder %v446_v15, 0.0  ;;  %v542_v20 = vmul.f32 0.2, %v446_v15  ;;  %vm530_vm8 = vcmp.gt.f32.partialorder %v502_v19, 0.0  ;;  %v556_v23 = vmul.f32 0.2, %v502_v19 }
 0x12c   : > { %v581_v21 = vsel %vm529_vm5, %v499_v10, %v555_v18  ;;  %v567_v24 = vsel %vm515_vm6, %v443_v8, %v541_v14 }
 0x12d   : > { %v568_v25 = vsel %vm516_vm7, %v446_v15, %v542_v20  ;;  %v582_v27 = vsel %vm530_vm8, %v502_v19, %v556_v23 }
 0x12e   : > { %v1149_v26 = vpack.c.bf16 %v568_v25, %v567_v24  ;;  %v450_v28 = vpop.f32.mrb[24].mxu0  ;;  %v1184_v29 = vpack.c.bf16 %v582_v27, %v581_v21 }
 0x12f   : > { %v451_v30 = vadd.f32 %v1651_v22, %v450_v28  ;;  %v1261_v31 = vpop.f32.mrb[25].mxu0 }
 0x130   : > { %1190 = vst [vmem:[%s1660_s12 + $0x28] sm:$0xff] %v1149_v26   ;;  %v453_v32 = vpop.f32.mrb[26].mxu0  ;;  %1197 = vst [vmem:[%s1660_s12 + $0x60] sm:$0xff] %v1184_v29  }
 0x131   : > { %v543_v33 = vmul.f32 0.2, %v451_v30  ;;  %v454_v34 = vadd.f32 %v1651_v22, %v453_v32  ;;  %v1262_v35 = vpop.f32.mrb[27].mxu0  ;;  %vm517_vm9 = vcmp.gt.f32.partialorder %v451_v30, 0.0 }
 0x132   : > { %719 = sbr.rel (!%p1555_p4) target bundleno = 392 (0x188), region = 36 }
 0x133   : > { %vm518_vm10 = vcmp.gt.f32.partialorder %v454_v34, 0.0  ;;  %v544_v36 = vmul.f32 0.2, %v454_v34  ;;  %v569_v37 = vsel %vm517_vm9, %v451_v30, %v543_v33 }
 0x135   : > { %v570_v38 = vsel %vm518_vm10, %v454_v34, %v544_v36 }
 0x136   : > { %v1154_v39 = vpack.c.bf16 %v570_v38, %v569_v37 }
 0x138   : > { %1191 = vst [vmem:[%s1660_s12 + $0x30] sm:$0xff] %v1154_v39  }
 0x139   : > { %s1825_s27 = smov (!%p722_p8, %s721_s27), 26 }
 0x13a   : > { %s1082_s5 = sshll.u32 %s1825_s27, 6 }
 0x13b   : > { %p1085_p9 = scmp.eq.s32.totalorder %s1082_s5, 0 }
 0x13c   : > { %1416 = sdivrem.u32 (!%p1085_p9), %s1825_s27, 26 }
 0x13d   : > { %730 = sbr.rel (%p1085_p9) target bundleno = 392 (0x188), region = 40 }
 0x145   : > { %s1708_s20 = spop.drf %1416 }
 0x146   : > { %p1086_p10 = scmp.le.s32.totalorder %s1708_s20, 0 }
 0x147   : > { %s1818_s15 = smov (!%p1086_p10), %s1702_s4  ;;  %s1819_s25 = smov (!%p1086_p10), %s1660_s12 }
 0x148   : > { %985 = sbr.rel (%p1086_p10) target bundleno = 363 (0x16b), region = 112  ;;  %s1717_s6 = smov (!%p1086_p10), 0  }
 0x149   : > { %s1719_s7 = smov (!%p1086_p10), 0  }
 0x14f LB: >> { %v747_v22 = vld [vmem:[%s1482_s25] sm:$0xf]  ;;  %v749_v40 = vld [vmem:[%s1482_s25 + $0x4] sm:$0xf]  ;;  %v751_v41 = vld [vmem:[%s1482_s25 + $0x8] sm:$0xf]  ;;  %s1490_s7 = sphi %s1719_s7, %s741_s7   ;;  %s1486_s6 = sphi %s1717_s6, %s1820_s6   ;;  %s1482_s25 = sphi %s1819_s25, %s804_s25   ;;  %s1478_s15 = sphi %s1818_s15, %s805_s15  }
 0x150   : >> { %748 = vst [vmem:[%s1478_s15] sm:$0xf] %v747_v22  ;;  %750 = vst [vmem:[%s1478_s15 + $0x4] sm:$0xf] %v749_v40  ;;  %v753_v42 = vld [vmem:[%s1482_s25 + $0xc] sm:$0xf]  ;;  %s799_s8 = sadd.s32 1, %s1486_s6 }
 0x151   : >> { %752 = vst [vmem:[%s1478_s15 + $0x8] sm:$0xf] %v751_v41  ;;  %v755_v43 = vld [vmem:[%s1482_s25 + $0x10] sm:$0xf]  ;;  %v757_v44 = vld [vmem:[%s1482_s25 + $0x14] sm:$0xf]  ;;  %p800_p11 = scmp.ge.s32.totalorder %s799_s8, %s1708_s20 }
 0x152   : >> { %754 = vst [vmem:[%s1478_s15 + $0xc] sm:$0xf] %v753_v42  ;;  %756 = vst [vmem:[%s1478_s15 + $0x10] sm:$0xf] %v755_v43  ;;  %v759_v45 = vld [vmem:[%s1482_s25 + $0x18] sm:$0xf] }
 0x153   : >> { %758 = vst [vmem:[%s1478_s15 + $0x14] sm:$0xf] %v757_v44  ;;  %v761_v46 = vld [vmem:[%s1482_s25 + $0x1c] sm:$0xf]  ;;  %v763_v47 = vld [vmem:[%s1482_s25 + $0x20] sm:$0xf] }
 0x154   : >> { %760 = vst [vmem:[%s1478_s15 + $0x18] sm:$0xf] %v759_v45  ;;  %762 = vst [vmem:[%s1478_s15 + $0x1c] sm:$0xf] %v761_v46  ;;  %v765_v48 = vld [vmem:[%s1482_s25 + $0x24] sm:$0xf] }
 0x155   : >> { %764 = vst [vmem:[%s1478_s15 + $0x20] sm:$0xf] %v763_v47  ;;  %v767_v49 = vld [vmem:[%s1482_s25 + $0x28] sm:$0xf]  ;;  %v769_v50 = vld [vmem:[%s1482_s25 + $0x2c] sm:$0xf] }
 0x156   : >> { %766 = vst [vmem:[%s1478_s15 + $0x24] sm:$0xf] %v765_v48  ;;  %768 = vst [vmem:[%s1478_s15 + $0x28] sm:$0xf] %v767_v49  ;;  %v771_v51 = vld [vmem:[%s1482_s25 + $0x30] sm:$0xf] }
 0x157   : >> { %770 = vst [vmem:[%s1478_s15 + $0x2c] sm:$0xf] %v769_v50  ;;  %v773_v52 = vld [vmem:[%s1482_s25 + $0x34] sm:$0xf]  ;;  %v775_v53 = vld [vmem:[%s1482_s25 + $0x38] sm:$0xf] }
 0x158   : >> { %772 = vst [vmem:[%s1478_s15 + $0x30] sm:$0xf] %v771_v51  ;;  %774 = vst [vmem:[%s1478_s15 + $0x34] sm:$0xf] %v773_v52  ;;  %v777_v54 = vld [vmem:[%s1482_s25 + $0x3c] sm:$0xf] }
 0x159   : >> { %776 = vst [vmem:[%s1478_s15 + $0x38] sm:$0xf] %v775_v53  ;;  %v779_v55 = vld [vmem:[%s1482_s25 + $0x40] sm:$0xf]  ;;  %v781_v56 = vld [vmem:[%s1482_s25 + $0x44] sm:$0xf] }
 0x15a   : >> { %778 = vst [vmem:[%s1478_s15 + $0x3c] sm:$0xf] %v777_v54  ;;  %780 = vst [vmem:[%s1478_s15 + $0x40] sm:$0xf] %v779_v55  ;;  %v783_v57 = vld [vmem:[%s1482_s25 + $0x48] sm:$0xf] }
 0x15b   : >> { %782 = vst [vmem:[%s1478_s15 + $0x44] sm:$0xf] %v781_v56  ;;  %v785_v58 = vld [vmem:[%s1482_s25 + $0x4c] sm:$0xf]  ;;  %v787_v59 = vld [vmem:[%s1482_s25 + $0x50] sm:$0xf] }
 0x15c   : >> { %784 = vst [vmem:[%s1478_s15 + $0x48] sm:$0xf] %v783_v57  ;;  %786 = vst [vmem:[%s1478_s15 + $0x4c] sm:$0xf] %v785_v58  ;;  %v789_v60 = vld [vmem:[%s1482_s25 + $0x54] sm:$0xf] }
 0x15d   : >> { %788 = vst [vmem:[%s1478_s15 + $0x50] sm:$0xf] %v787_v59  ;;  %v791_v61 = vld [vmem:[%s1482_s25 + $0x58] sm:$0xf]  ;;  %v793_v62 = vld [vmem:[%s1482_s25 + $0x5c] sm:$0xf] }
 0x15e   : >> { %790 = vst [vmem:[%s1478_s15 + $0x54] sm:$0xf] %v789_v60  ;;  %792 = vst [vmem:[%s1478_s15 + $0x58] sm:$0xf] %v791_v61  ;;  %v795_v63 = vld [vmem:[%s1482_s25 + $0x60] sm:$0xf] }
 0x15f   : >> { %794 = vst [vmem:[%s1478_s15 + $0x5c] sm:$0xf] %v793_v62  ;;  %v797_v0 = vld [vmem:[%s1482_s25 + $0x64] sm:$0xf]  ;;  %796 = vst [vmem:[%s1478_s15 + $0x60] sm:$0xf] %v795_v63 }
 0x160   : >> { %798 = vst [vmem:[%s1478_s15 + $0x64] sm:$0xf] %v797_v0  ;;  %s1827_s8 = smov (%p800_p11, %s799_s8), 0  ;;  %s741_s7 = sadd.s32 1, %s1490_s7  }
 0x161   : >> { %s802_s9 = smul.u32 104, %s1827_s8  ;;  %p740_p12 = scmp.ge.s32.totalorder %s741_s7, %s1708_s20 }
 0x162   : >> { %s1820_s6 = smov %s1827_s8 }
 0x163   : >> { %s804_s25 = scalar_lea.vmem %s1660_s12, %s802_s9 [#allocation2]   ;;  %s805_s15 = scalar_lea.vmem %s1702_s4, %s802_s9  }
 0x164   : > { %743 = sbr.rel (!%p740_p12) target bundleno = 335 (0x14f), region = 118 }
 0x16b PF: > { %1418 = sdivrem.u32 %s1825_s27, 26 }
 0x16c   : > { %s1087_s10 = smul.u32 104, %s1708_s20 }
 0x16e   : > { %s810_s11 = scalar_lea.vmem %s1660_s12, %s1087_s10 [#allocation2]   ;;  %s812_s14 = scalar_lea.vmem %s1702_s4, %s1087_s10  }
 0x174   : > { %s1419_s17 = spop.drf %1418 }
 0x175   : > { %p1089_p13 = scmp.le.s32.totalorder %s1419_s17, 0 }
 0x176   : > { %s1492_s18 = smov (!%p1089_p13), %s812_s14   ;;  %s1496_s21 = smov (!%p1089_p13), %s810_s11  }
 0x177   : > { %999 = sbr.rel (%p1089_p13) target bundleno = 392 (0x188), region = 123  ;;  %s1500_s22 = smov (!%p1089_p13), 0  }
 0x178   : > { %s1504_s23 = smov (!%p1089_p13), 0  }
 0x17e LB: >> { %v822_v1 = vld [vmem:[%s1498_s21] sm:$0xf]  ;;  %s824_s24 = sadd.s32 1, %s1502_s22  ;;  %s816_s23 = sadd.s32 1, %s1506_s23   ;;  %s1506_s23 = sphi %s1504_s23, %s816_s23   ;;  %s1502_s22 = sphi %s1500_s22, %s1501_s22   ;;  %s1498_s21 = sphi %s1496_s21, %s829_s21   ;;  %s1494_s18 = sphi %s1492_s18, %s830_s18  }
 0x17f   : >> { %823 = vst [vmem:[%s1494_s18] sm:$0xf] %v822_v1  ;;  %p825_p0 = scmp.ge.s32.totalorder %s824_s24, %s1419_s17  ;;  %p815_p1 = scmp.ge.s32.totalorder %s816_s23, %s1419_s17 }
 0x181   : >> { %s1829_s24 = smov (%p825_p0, %s824_s24), 0  ;;  %818 = sbr.rel (!%p815_p1) target bundleno = 382 (0x17e), region = 129 }
 0x182   : >> { %s1090_s26 = sshll.u32 %s1829_s24, 2  ;;  %s1501_s22 = smov %s1829_s24  }
 0x183   : >> { %s829_s21 = scalar_lea.vmem %s810_s11, %s1090_s26 [#allocation2]   ;;  %s830_s18 = scalar_lea.vmem %s812_s14, %s1090_s26  }
 0x188 PF: > { %p10_p2 = scmp.ge.s32.totalorder %s1545_s16, 4   ;;  %s1821_s12 = smov %s1470_s13 }
 0x189   : > { %s1822_s13 = smov %s1553_s19  ;;  %s1823_s14 = smov %s1545_s16 }
 0x18a   :  { %12 = sbr.rel (!%p10_p2) target bundleno = 2 (0x2), region = 140 }

// kernel: discriminator_forward.4
= control target key start
LH: loop header
LB: loop body
LE: loop exit
PB: predicated region body
PF: predicated region fallthrough
CT: control target
= control target key end

     0   :  { %s3347_s12 = smov 0   ;;  %s3349_s13 = smov 0   ;;  %s3950_s0 = inlined_call_operand.vmem [shape: bf16[98,2048], index: 0, kind: input, shape index: {}]   ;;  %s3951_s1 = inlined_call_operand.vmem [shape: bf16[2048,128], index: 1, kind: input, shape index: {}]   ;;  %s3952_s2 = inlined_call_operand.vmem [shape: f32[1,128], index: 2, kind: input, shape index: {}]   ;;  %s3953_s3 = inlined_call_operand.vmem [shape: bf16[98,128], index: 3, kind: output, shape index: {}]  }
   0x1   :  { %s3351_s14 = smov 0  }
   0x2 LB: > { %s3360_s15 = sadd.s32 4294967295, %s3293_s14   ;;  %s3362_s16 = sadd.s32 1, %s3293_s14   ;;  %s3293_s14 = sphi %s3351_s14, %s3960_s14   ;;  %s3289_s13 = sphi %s3349_s13, %s3959_s13   ;;  %s3285_s12 = sphi %s3347_s12, %s3958_s12  }
   0x3   : > { %s85_s17 = ssub.s32 %s3293_s14, %s3362_s16  ;;  %s88_s18 = sadd.s32 1, %s3289_s13 }
   0x4   : > { %p86_p0 = scmp.eq.s32.totalorder %s85_s17, 0  ;;  %p98_p1 = scmp.ne.s32.totalorder %s3289_s13, %s3285_s12 }
   0x5   : > { %p99_p2 = scmp.eq.s32.totalorder %s3360_s15, 1  ;;  %p2445_p3 = scmp.ge.s32.totalorder %s3293_s14, 1 }
   0x6   : > { %s3370_s19 = scalar_select %p86_p0, %s3289_s13, %s88_s18  }
   0x7   : > { %p3372_p4 = por %p99_p2, %p98_p1  ;;  %p149_p5 = scmp.lt.s32.totalorder %s3293_s14, 3 }
   0x9   : > { %p150_p6 = pnand %p2445_p3, %p149_p5 }
   0xa   : > { %v3111_v0 = vld [vmem:[%s3951_s1 + $0x40] sm:$0xff] (!%p150_p6)   ;;  %v3115_v4 = vld [vmem:[%s3951_s1 + $0x48] sm:$0xff] (!%p150_p6)   ;;  %v3119_v8 = vld [vmem:[%s3951_s1 + $0x50] sm:$0xff] (!%p150_p6)   ;;  %s3425_s5 = sshll.u32 (!%p150_p6), %s3360_s15, 3 }
   0xb   : > { %153 = sbr.rel (%p150_p6) target bundleno = 445 (0x1bd), region = 32  ;;  %v3112_v1 = vld [vmem:[%s3951_s1 + $0xc0] sm:$0xff] (!%p150_p6)   ;;  %2703 = vmatprep.subr.bf16.mxu0 (!%p150_p6), %v3111_v0  ;;  %v3116_v5 = vld [vmem:[%s3951_s1 + $0xc8] sm:$0xff] (!%p150_p6)   ;;  %v3120_v9 = vld [vmem:[%s3951_s1 + $0xd0] sm:$0xff] (!%p150_p6)   ;;  %p184_p7 = scmp.lt.s32.totalorder (!%p150_p6), %s3425_s5, 12 }
   0xc   : > { %v3113_v2 = vld [vmem:[%s3951_s1] sm:$0xff] (!%p150_p6)   ;;  %2743 = vmatprep.subr.bf16.mxu1 (!%p150_p6), %v3112_v1  ;;  %v3117_v6 = vld [vmem:[%s3951_s1 + $0x8] sm:$0xff] (!%p150_p6)   ;;  %v3121_v10 = vld [vmem:[%s3951_s1 + $0x10] sm:$0xff] (!%p150_p6)  }
   0xd   : > { %v3114_v3 = vld [vmem:[%s3951_s1 + $0x80] sm:$0xff] (!%p150_p6)   ;;  %2704 = vmatpush3.bf16.msra.mxu0 (!%p150_p6), %v3113_v2  ;;  %v3118_v7 = vld [vmem:[%s3951_s1 + $0x88] sm:$0xff] (!%p150_p6)   ;;  %v3122_v11 = vld [vmem:[%s3951_s1 + $0x90] sm:$0xff] (!%p150_p6)  }
   0xe   : > { %2744 = vmatpush3.bf16.msra.mxu1 (!%p150_p6), %v3114_v3  ;;  %2705 = vmatprep.subr.bf16.mxu0 (!%p150_p6), %v3115_v4  ;;  %v3123_v12 = vld [vmem:[%s3951_s1 + $0x58] sm:$0xff] (!%p150_p6)   ;;  %v3127_v16 = vld [vmem:[%s3951_s1 + $0x60] sm:$0xff] (!%p150_p6)   ;;  %v3131_v20 = vld [vmem:[%s3951_s1 + $0x68] sm:$0xff] (!%p150_p6)  }
   0xf   : > { %2745 = vmatprep.subr.bf16.mxu1 (!%p150_p6), %v3116_v5  ;;  %v3124_v13 = vld [vmem:[%s3951_s1 + $0xd8] sm:$0xff] (!%p150_p6)   ;;  %v3128_v17 = vld [vmem:[%s3951_s1 + $0xe0] sm:$0xff] (!%p150_p6)   ;;  %v3132_v21 = vld [vmem:[%s3951_s1 + $0xe8] sm:$0xff] (!%p150_p6)  }
  0x10   : > { %v3125_v14 = vld [vmem:[%s3951_s1 + $0x18] sm:$0xff] (!%p150_p6)   ;;  %v3129_v18 = vld [vmem:[%s3951_s1 + $0x20] sm:$0xff] (!%p150_p6)   ;;  %v3133_v22 = vld [vmem:[%s3951_s1 + $0x28] sm:$0xff] (!%p150_p6)  }
  0x11   : > { %2706 = vmatpush3.bf16.msra.mxu0 (!%p150_p6), %v3117_v6  ;;  %v3126_v15 = vld [vmem:[%s3951_s1 + $0x98] sm:$0xff] (!%p150_p6)   ;;  %v3130_v19 = vld [vmem:[%s3951_s1 + $0xa0] sm:$0xff] (!%p150_p6)   ;;  %v3134_v23 = vld [vmem:[%s3951_s1 + $0xa8] sm:$0xff] (!%p150_p6)  }
  0x12   : > { %2746 = vmatpush3.bf16.msra.mxu1 %v3118_v7  ;;  %2707 = vmatprep.subr.bf16.mxu0 %v3119_v8  ;;  %s185_s26 = scalar_select %p184_p7, %s3425_s5, 12  ;;  %v3135_v24 = vld [vmem:[%s3951_s1 + $0x70] sm:$0xff]   ;;  %v3139_v28 = vld [vmem:[%s3951_s1 + $0x78] sm:$0xff]   ;;  %v3143_v40 = vld [vmem:[%s3951_s1 + $0x140] sm:$0xff]  }
  0x13   : > { %2747 = vmatprep.subr.bf16.mxu1 %v3120_v9  ;;  %v3136_v25 = vld [vmem:[%s3951_s1 + $0xf0] sm:$0xff]   ;;  %v3140_v29 = vld [vmem:[%s3951_s1 + $0xf8] sm:$0xff]   ;;  %v3144_v41 = vld [vmem:[%s3951_s1 + $0x1c0] sm:$0xff]   ;;  %s2208_s8 = ssub.s32 (%p3372_p4), 13, %s3425_s5 }
  0x14   : > { %v3137_v26 = vld [vmem:[%s3951_s1 + $0x30] sm:$0xff]   ;;  %s2668_s9 = sshll.u32 %s185_s26, 6  ;;  %v3141_v30 = vld [vmem:[%s3951_s1 + $0x38] sm:$0xff]   ;;  %v3145_v42 = vld [vmem:[%s3951_s1 + $0x100] sm:$0xff]   ;;  %p2209_p8 = scmp.lt.s32.totalorder (%p3372_p4), %s2208_s8, 8 }
  0x15   : > { %2708 = vmatpush3.bf16.msra.mxu0 %v3121_v10  ;;  %v3138_v27 = vld [vmem:[%s3951_s1 + $0xb0] sm:$0xff]   ;;  %s3474_s24 = scalar_lea.vmem %s3950_s0, %s2668_s9  ;;  %v3142_v31 = vld [vmem:[%s3951_s1 + $0xb8] sm:$0xff]   ;;  %v3146_v43 = vld [vmem:[%s3951_s1 + $0x180] sm:$0xff]   ;;  %s2677_s9 = sshll.u32 (%p3372_p4), %s3360_s15, 5 }
  0x16   : > { %2748 = vmatpush3.bf16.msra.mxu1 %v3122_v11  ;;  %2709 = vmatprep.subr.bf16.mxu0 %v3123_v12  ;;  %v201_v32 = vld [vmem:[%s3474_s24] sm:$0xff]  ;;  %v202_v34 = vld [vmem:[%s3474_s24 + $0x8] sm:$0xff]  ;;  %v3151_v56 = vld [vmem:[%s3951_s1 + $0x150] sm:$0xff]   ;;  %s3896_s14 = scalar_lea.vmem (%p3372_p4), %s3953_s3, %s2677_s9  }
  0x17   : > { %2749 = vmatprep.subr.bf16.mxu1 %v3124_v13  ;;  %v209_v33 = vld [vmem:[%s3474_s24 + $0x40] sm:$0xff]  ;;  %v210_v37 = vld [vmem:[%s3474_s24 + $0x48] sm:$0xff]  ;;  %v3152_v57 = vld [vmem:[%s3951_s1 + $0x1d0] sm:$0xff]  }
  0x18   : > { %v2451_v35 = vcombine.low %v201_v32, %v209_v33  ;;  %v2452_v36 = vcombine.high %v201_v32, %v209_v33  ;;  %v2453_v38 = vcombine.low %v202_v34, %v210_v37  ;;  %v2454_v39 = vcombine.high %v202_v34, %v210_v37  ;;  %v3147_v44 = vld [vmem:[%s3951_s1 + $0x148] sm:$0xff]   ;;  %v217_v48 = vld [vmem:[%s3474_s24 + $0x80] sm:$0xff]  ;;  %v3153_v58 = vld [vmem:[%s3951_s1 + $0x110] sm:$0xff]  }
  0x19   : > { %2710 = vmatpush3.bf16.msra.mxu0 %v3125_v14  ;;  %v3148_v45 = vld [vmem:[%s3951_s1 + $0x1c8] sm:$0xff]   ;;  %v225_v49 = vld [vmem:[%s3474_s24 + $0xc0] sm:$0xff]  ;;  %v3154_v59 = vld [vmem:[%s3951_s1 + $0x190] sm:$0xff]  }
  0x1a   : > { %2750 = vmatpush3.bf16.msra.mxu1 %v3126_v15  ;;  %2711 = vmatprep.subr.bf16.mxu0 %v3127_v16  ;;  %v3149_v46 = vld [vmem:[%s3951_s1 + $0x108] sm:$0xff]   ;;  %v2468_v50 = vcombine.high %v217_v48, %v225_v49  ;;  %v2467_v53 = vcombine.low %v217_v48, %v225_v49  ;;  %v3155_v60 = vld [vmem:[%s3951_s1 + $0x158] sm:$0xff]   ;;  %v233_v0 = vld [vmem:[%s3474_s24 + $0x100] sm:$0xff] }
  0x1b   : > { %2751 = vmatprep.subr.bf16.mxu1 %v3128_v17  ;;  %1648 = vmatprep.mubr.bf16.mxu0 %v2452_v36  ;;  %v3150_v47 = vld [vmem:[%s3951_s1 + $0x188] sm:$0xff]   ;;  %v3156_v61 = vld [vmem:[%s3951_s1 + $0x1d8] sm:$0xff]   ;;  %v241_v1 = vld [vmem:[%s3474_s24 + $0x140] sm:$0xff] }
  0x1c   : > { %1713 = vmatprep.mubr.bf16.mxu1 %v2454_v39  ;;  %v218_v51 = vld [vmem:[%s3474_s24 + $0x88] sm:$0xff]  ;;  %v3157_v62 = vld [vmem:[%s3951_s1 + $0x118] sm:$0xff]   ;;  %v2484_v4 = vcombine.high %v233_v0, %v241_v1  ;;  %v2483_v6 = vcombine.low %v233_v0, %v241_v1  ;;  %v3159_v8 = vld [vmem:[%s3951_s1 + $0x160] sm:$0xff]  }
  0x1d   : > { %2712 = vmatpush3.bf16.msra.mxu0 %v3129_v18  ;;  %v226_v52 = vld [vmem:[%s3474_s24 + $0xc8] sm:$0xff]  ;;  %v3158_v63 = vld [vmem:[%s3951_s1 + $0x198] sm:$0xff]   ;;  %v3160_v9 = vld [vmem:[%s3951_s1 + $0x1e0] sm:$0xff]  }
  0x1e   : > { %2752 = vmatpush3.bf16.msra.mxu1 %v3130_v19  ;;  %2713 = vmatprep.subr.bf16.mxu0 %v3131_v20  ;;  %v2470_v54 = vcombine.high %v218_v51, %v226_v52  ;;  %v2469_v55 = vcombine.low %v218_v51, %v226_v52  ;;  %v234_v2 = vld [vmem:[%s3474_s24 + $0x108] sm:$0xff]  ;;  %v3161_v10 = vld [vmem:[%s3951_s1 + $0x120] sm:$0xff]   ;;  %v203_v32 = vld [vmem:[%s3474_s24 + $0x10] sm:$0xff] }
  0x1f   : > { %2753 = vmatprep.subr.bf16.mxu1 %v3132_v21  ;;  %v242_v3 = vld [vmem:[%s3474_s24 + $0x148] sm:$0xff]  ;;  %v3162_v11 = vld [vmem:[%s3951_s1 + $0x1a0] sm:$0xff]   ;;  %v211_v33 = vld [vmem:[%s3474_s24 + $0x50] sm:$0xff] }
  0x20   : > { %v2486_v5 = vcombine.high %v234_v2, %v242_v3  ;;  %v2485_v7 = vcombine.low %v234_v2, %v242_v3  ;;  %v3163_v12 = vld [vmem:[%s3951_s1 + $0x168] sm:$0xff]   ;;  %v249_v16 = vld [vmem:[%s3474_s24 + $0x180] sm:$0xff]  ;;  %v2455_v34 = vcombine.low %v203_v32, %v211_v33  ;;  %v204_v36 = vld [vmem:[%s3474_s24 + $0x18] sm:$0xff] }
  0x21   : > { %2714 = vmatpush3.bf16.msra.mxu0 %v3133_v22  ;;  %v3164_v13 = vld [vmem:[%s3951_s1 + $0x1e8] sm:$0xff]   ;;  %v257_v17 = vld [vmem:[%s3474_s24 + $0x1c0] sm:$0xff]  ;;  %v212_v37 = vld [vmem:[%s3474_s24 + $0x58] sm:$0xff] }
  0x22   : > { %2754 = vmatpush3.bf16.msra.mxu1 %v3134_v23  ;;  %2715 = vmatprep.subr.bf16.mxu0 %v3135_v24  ;;  %v3165_v14 = vld [vmem:[%s3951_s1 + $0x128] sm:$0xff]   ;;  %v2500_v19 = vcombine.high %v249_v16, %v257_v17  ;;  %v2499_v21 = vcombine.low %v249_v16, %v257_v17  ;;  %v3167_v24 = vld [vmem:[%s3951_s1 + $0x170] sm:$0xff]   ;;  %v2458_v39 = vcombine.high %v204_v36, %v212_v37  ;;  %v228_v51 = vld [vmem:[%s3474_s24 + $0xd8] sm:$0xff] }
  0x23   : > { %2755 = vmatprep.subr.bf16.mxu1 %v3136_v25  ;;  %v3166_v15 = vld [vmem:[%s3951_s1 + $0x1a8] sm:$0xff]   ;;  %v3168_v25 = vld [vmem:[%s3951_s1 + $0x1f0] sm:$0xff]   ;;  %v236_v2 = vld [vmem:[%s3474_s24 + $0x118] sm:$0xff] }
  0x24   : > { %v250_v18 = vld [vmem:[%s3474_s24 + $0x188] sm:$0xff]  ;;  %v219_v48 = vld [vmem:[%s3474_s24 + $0x90] sm:$0xff] }
  0x25   : > { %2716 = vmatpush3.bf16.msra.mxu0 %v3137_v26  ;;  %v258_v20 = vld [vmem:[%s3474_s24 + $0x1c8] sm:$0xff]  ;;  %v3169_v26 = vld [vmem:[%s3951_s1 + $0x130] sm:$0xff]  }
  0x26   : > { %2756 = vmatpush3.bf16.msra.mxu1 %v3138_v27  ;;  %2717 = vmatprep.subr.bf16.mxu0 %v3139_v28  ;;  %v2502_v22 = vcombine.high %v250_v18, %v258_v20  ;;  %v2501_v23 = vcombine.low %v250_v18, %v258_v20  ;;  %v3170_v27 = vld [vmem:[%s3951_s1 + $0x1b0] sm:$0xff]   ;;  %v3171_v28 = vld [vmem:[%s3951_s1 + $0x178] sm:$0xff]  }
  0x27   : > { %2757 = vmatprep.subr.bf16.mxu1 %v3140_v29  ;;  %v3172_v29 = vld [vmem:[%s3951_s1 + $0x1f8] sm:$0xff]   ;;  %v227_v49 = vld [vmem:[%s3474_s24 + $0xd0] sm:$0xff] }
  0x28   : > { %v2472_v52 = vcombine.high %v219_v48, %v227_v49  ;;  %v235_v0 = vld [vmem:[%s3474_s24 + $0x110] sm:$0xff]  ;;  %v260_v20 = vld [vmem:[%s3474_s24 + $0x1d8] sm:$0xff] }
  0x29   : > { %2718 = vmatpush3.bf16.msra.mxu0 %v3141_v30  ;;  %v3173_v30 = vld [vmem:[%s3951_s1 + $0x138] sm:$0xff]   ;;  %v243_v1 = vld [vmem:[%s3474_s24 + $0x150] sm:$0xff] }
  0x2a   : > { %2758 = vmatpush3.bf16.msra.mxu1 %v3142_v31  ;;  %2783 = vmatprep.subr.bf16.mxu0 %v3143_v40  ;;  %v3174_v31 = vld [vmem:[%s3951_s1 + $0x1b8] sm:$0xff]   ;;  %v3175_v40 = vld [vmem:[%s3951_s1 + $0x240] sm:$0xff]   ;;  %v2488_v3 = vcombine.high %v235_v0, %v243_v1  ;;  %v251_v16 = vld [vmem:[%s3474_s24 + $0x190] sm:$0xff] }
  0x2b   : > { %2823 = vmatprep.subr.bf16.mxu1 %v3144_v41  ;;  %v3176_v41 = vld [vmem:[%s3951_s1 + $0x2c0] sm:$0xff]   ;;  %v259_v17 = vld [vmem:[%s3474_s24 + $0x1d0] sm:$0xff] }
  0x2c   : > { %1649 = vmatmul.mubr.bf16.vlgmr.msra.gmra.mrb[0].mxu0 %v2451_v35  ;;  %v2456_v35 = vcombine.high %v203_v32, %v211_v33  ;;  %v2504_v18 = vcombine.high %v251_v16, %v259_v17  ;;  %v205_v32 = vld [vmem:[%s3474_s24 + $0x20] sm:$0xff] }
  0x2d   : > { %1714 = vmatmul.mubr.bf16.vlgmr.msra.gmra.mrb[0].mxu1 %v2453_v38  ;;  %2784 = vmatpush3.bf16.msra.mxu0 %v3145_v42  ;;  %v2457_v38 = vcombine.low %v204_v36, %v212_v37  ;;  %v3177_v42 = vld [vmem:[%s3951_s1 + $0x200] sm:$0xff]  }
  0x2e   : > { %2824 = vmatpush3.bf16.msra.mxu1 %v3146_v43  ;;  %2785 = vmatprep.subr.bf16.mxu0 %v3147_v44  ;;  %v3178_v43 = vld [vmem:[%s3951_s1 + $0x280] sm:$0xff]   ;;  %v3179_v44 = vld [vmem:[%s3951_s1 + $0x248] sm:$0xff]  }
  0x2f   : > { %2825 = vmatprep.subr.bf16.mxu1 %v3148_v45  ;;  %1656 = vmatprep.mubr.bf16.mxu0 %v2468_v50  ;;  %v3180_v45 = vld [vmem:[%s3951_s1 + $0x2c8] sm:$0xff]   ;;  %v220_v50 = vld [vmem:[%s3474_s24 + $0x98] sm:$0xff]  ;;  %v213_v33 = vld [vmem:[%s3474_s24 + $0x60] sm:$0xff] }
  0x30   : > { %1721 = vmatprep.mubr.bf16.mxu1 %v2470_v54  ;;  %v2471_v54 = vcombine.low %v219_v48, %v227_v49  ;;  %v2459_v36 = vcombine.low %v205_v32, %v213_v33  ;;  %v2460_v37 = vcombine.high %v205_v32, %v213_v33  ;;  %v221_v48 = vld [vmem:[%s3474_s24 + $0xa0] sm:$0xff]  ;;  %v207_v32 = vld [vmem:[%s3474_s24 + $0x30] sm:$0xff] }
  0x31   : > { %2786 = vmatpush3.bf16.msra.mxu0 %v3149_v46  ;;  %v3181_v46 = vld [vmem:[%s3951_s1 + $0x208] sm:$0xff]   ;;  %v229_v49 = vld [vmem:[%s3474_s24 + $0xe0] sm:$0xff]  ;;  %v215_v33 = vld [vmem:[%s3474_s24 + $0x70] sm:$0xff] }
  0x32   : > { %2826 = vmatpush3.bf16.msra.mxu1 %v3150_v47  ;;  %2787 = vmatprep.subr.bf16.mxu0 %v3151_v56  ;;  %v3182_v47 = vld [vmem:[%s3951_s1 + $0x288] sm:$0xff]   ;;  %v3183_v56 = vld [vmem:[%s3951_s1 + $0x250] sm:$0xff]  }
  0x33   : > { %2827 = vmatprep.subr.bf16.mxu1 %v3152_v57  ;;  %v3184_v57 = vld [vmem:[%s3951_s1 + $0x2d0] sm:$0xff]  }
  0x34   : > { %1657 = vmatmul.mubr.bf16.gmra.mrb[4].mxu0 %v2467_v53  ;;  %v2474_v53 = vcombine.high %v220_v50, %v228_v51 }
  0x35   : > { %1722 = vmatmul.mubr.bf16.gmra.mrb[4].mxu1 %v2469_v55  ;;  %2788 = vmatpush3.bf16.msra.mxu0 %v3153_v58  ;;  %v2473_v55 = vcombine.low %v220_v50, %v228_v51  ;;  %v3185_v58 = vld [vmem:[%s3951_s1 + $0x210] sm:$0xff]   ;;  %v222_v50 = vld [vmem:[%s3474_s24 + $0xa8] sm:$0xff]  ;;  %v2476_v51 = vcombine.high %v221_v48, %v229_v49 }
  0x36   : > { %2828 = vmatpush3.bf16.msra.mxu1 %v3154_v59  ;;  %2789 = vmatprep.subr.bf16.mxu0 %v3155_v60  ;;  %v3186_v59 = vld [vmem:[%s3951_s1 + $0x290] sm:$0xff]   ;;  %v3187_v60 = vld [vmem:[%s3951_s1 + $0x258] sm:$0xff]  }
  0x37   : > { %2829 = vmatprep.subr.bf16.mxu1 %v3156_v61  ;;  %1664 = vmatprep.mubr.bf16.mxu0 %v2484_v4  ;;  %v3188_v61 = vld [vmem:[%s3951_s1 + $0x2d8] sm:$0xff]  }
  0x38   : > { %1729 = vmatprep.mubr.bf16.mxu1 %v2486_v5  ;;  %v244_v4 = vld [vmem:[%s3474_s24 + $0x158] sm:$0xff]  ;;  %v2487_v5 = vcombine.low %v235_v0, %v243_v1  ;;  %v237_v0 = vld [vmem:[%s3474_s24 + $0x120] sm:$0xff] }
  0x39   : > { %2790 = vmatpush3.bf16.msra.mxu0 %v3157_v62  ;;  %v3189_v62 = vld [vmem:[%s3951_s1 + $0x218] sm:$0xff]   ;;  %v245_v1 = vld [vmem:[%s3474_s24 + $0x160] sm:$0xff] }
  0x3a   : > { %2830 = vmatpush3.bf16.msra.mxu1 %v3158_v63  ;;  %2791 = vmatprep.subr.bf16.mxu0 %v3159_v8  ;;  %v3190_v63 = vld [vmem:[%s3951_s1 + $0x298] sm:$0xff]   ;;  %v3191_v8 = vld [vmem:[%s3951_s1 + $0x260] sm:$0xff]  }
  0x3b   : > { %2831 = vmatprep.subr.bf16.mxu1 %v3160_v9  ;;  %v3192_v9 = vld [vmem:[%s3951_s1 + $0x2e0] sm:$0xff]  }
  0x3c   : > { %1665 = vmatmul.mubr.bf16.gmra.mrb[8].mxu0 %v2483_v6  ;;  %v2490_v6 = vcombine.high %v236_v2, %v244_v4 }
  0x3d   : > { %1730 = vmatmul.mubr.bf16.gmra.mrb[8].mxu1 %v2485_v7  ;;  %2792 = vmatpush3.bf16.msra.mxu0 %v3161_v10  ;;  %v2489_v7 = vcombine.low %v236_v2, %v244_v4  ;;  %v3193_v10 = vld [vmem:[%s3951_s1 + $0x220] sm:$0xff]   ;;  %v2492_v2 = vcombine.high %v237_v0, %v245_v1  ;;  %v246_v4 = vld [vmem:[%s3474_s24 + $0x168] sm:$0xff] }
  0x3e   : > { %2832 = vmatpush3.bf16.msra.mxu1 %v3162_v11  ;;  %2793 = vmatprep.subr.bf16.mxu0 %v3163_v12  ;;  %v3194_v11 = vld [vmem:[%s3951_s1 + $0x2a0] sm:$0xff]   ;;  %v3195_v12 = vld [vmem:[%s3951_s1 + $0x268] sm:$0xff]  }
  0x3f   : > { %2833 = vmatprep.subr.bf16.mxu1 %v3164_v13  ;;  %1672 = vmatprep.mubr.bf16.mxu0 %v2500_v19  ;;  %v3196_v13 = vld [vmem:[%s3951_s1 + $0x2e8] sm:$0xff]   ;;  %v252_v19 = vld [vmem:[%s3474_s24 + $0x198] sm:$0xff] }
  0x40   : > { %1737 = vmatprep.mubr.bf16.mxu1 %v2502_v22  ;;  %v2506_v22 = vcombine.high %v252_v19, %v260_v20 }
  0x41   : > { %2794 = vmatpush3.bf16.msra.mxu0 %v3165_v14  ;;  %v3197_v14 = vld [vmem:[%s3951_s1 + $0x228] sm:$0xff]  }
  0x42   : > { %2834 = vmatpush3.bf16.msra.mxu1 %v3166_v15  ;;  %2795 = vmatprep.subr.bf16.mxu0 %v3167_v24  ;;  %v3198_v15 = vld [vmem:[%s3951_s1 + $0x2a8] sm:$0xff]   ;;  %v3199_v24 = vld [vmem:[%s3951_s1 + $0x270] sm:$0xff]  }
  0x43   : > { %2835 = vmatprep.subr.bf16.mxu1 %v3168_v25  ;;  %v3200_v25 = vld [vmem:[%s3951_s1 + $0x2f0] sm:$0xff]  }
  0x44   : > { %1673 = vmatmul.mubr.bf16.gmra.mrb[12].mxu0 %v2499_v21  ;;  %v2503_v21 = vcombine.low %v251_v16, %v259_v17  ;;  %v253_v16 = vld [vmem:[%s3474_s24 + $0x1a0] sm:$0xff] }
  0x45   : > { %1738 = vmatmul.mubr.bf16.gmra.mrb[12].mxu1 %v2501_v23  ;;  %2796 = vmatpush3.bf16.msra.mxu0 %v3169_v26  ;;  %v2505_v23 = vcombine.low %v252_v19, %v260_v20  ;;  %v3201_v26 = vld [vmem:[%s3951_s1 + $0x230] sm:$0xff]   ;;  %v261_v17 = vld [vmem:[%s3474_s24 + $0x1e0] sm:$0xff]  ;;  %v262_v19 = vld [vmem:[%s3474_s24 + $0x1e8] sm:$0xff] }
  0x46   : > { %2836 = vmatpush3.bf16.msra.mxu1 %v3170_v27  ;;  %2797 = vmatprep.subr.bf16.mxu0 %v3171_v28  ;;  %v3202_v27 = vld [vmem:[%s3951_s1 + $0x2b0] sm:$0xff]   ;;  %v3203_v28 = vld [vmem:[%s3951_s1 + $0x278] sm:$0xff]   ;;  %v2508_v20 = vcombine.high %v253_v16, %v261_v17 }
  0x47   : > { %2837 = vmatprep.subr.bf16.mxu1 %v3172_v29  ;;  %1778 = vmatprep.mubr.bf16.mxu0 %v2456_v35  ;;  %v3204_v29 = vld [vmem:[%s3951_s1 + $0x2f8] sm:$0xff]   ;;  %v214_v35 = vld [vmem:[%s3474_s24 + $0x68] sm:$0xff] }
  0x48   : > { %1843 = vmatprep.mubr.bf16.mxu1 %v2458_v39 }
  0x49   : > { %2798 = vmatpush3.bf16.msra.mxu0 %v3173_v30  ;;  %v3205_v30 = vld [vmem:[%s3951_s1 + $0x238] sm:$0xff]  }
  0x4a   : > { %2838 = vmatpush3.bf16.msra.mxu1 %v3174_v31  ;;  %2863 = vmatprep.subr.bf16.mxu0 %v3175_v40  ;;  %v3206_v31 = vld [vmem:[%s3951_s1 + $0x2b8] sm:$0xff]   ;;  %v3207_v40 = vld [vmem:[%s3951_s1 + $0x340] sm:$0xff]  }
  0x4b   : > { %2903 = vmatprep.subr.bf16.mxu1 %v3176_v41  ;;  %v3208_v41 = vld [vmem:[%s3951_s1 + $0x3c0] sm:$0xff]  }
  0x4c   : > { %1779 = vmatmul.mubr.bf16.vlgmr.msra.gmra.mrb[16].mxu0 %v2455_v34  ;;  %v206_v34 = vld [vmem:[%s3474_s24 + $0x28] sm:$0xff] }
  0x4d   : > { %1844 = vmatmul.mubr.bf16.vlgmr.msra.gmra.mrb[16].mxu1 %v2457_v38  ;;  %2864 = vmatpush3.bf16.msra.mxu0 %v3177_v42  ;;  %v2461_v38 = vcombine.low %v206_v34, %v214_v35  ;;  %v2462_v39 = vcombine.high %v206_v34, %v214_v35  ;;  %v3209_v42 = vld [vmem:[%s3951_s1 + $0x300] sm:$0xff]   ;;  %v208_v34 = vld [vmem:[%s3474_s24 + $0x38] sm:$0xff]  ;;  %v2463_v35 = vcombine.low %v207_v32, %v215_v33 }
  0x4e   : > { %2904 = vmatpush3.bf16.msra.mxu1 %v3178_v43  ;;  %2865 = vmatprep.subr.bf16.mxu0 %v3179_v44  ;;  %v3210_v43 = vld [vmem:[%s3951_s1 + $0x380] sm:$0xff]   ;;  %v3211_v44 = vld [vmem:[%s3951_s1 + $0x348] sm:$0xff]  }
  0x4f   : > { %2905 = vmatprep.subr.bf16.mxu1 %v3180_v45  ;;  %1786 = vmatprep.mubr.bf16.mxu0 %v2472_v52  ;;  %v3212_v45 = vld [vmem:[%s3951_s1 + $0x3c8] sm:$0xff]  }
  0x50   : > { %1851 = vmatprep.mubr.bf16.mxu1 %v2474_v53  ;;  %v230_v52 = vld [vmem:[%s3474_s24 + $0xe8] sm:$0xff]  ;;  %v2475_v53 = vcombine.low %v221_v48, %v229_v49  ;;  %v240_v48 = vld [vmem:[%s3474_s24 + $0x138] sm:$0xff] }
  0x51   : > { %2866 = vmatpush3.bf16.msra.mxu0 %v3181_v46  ;;  %v3213_v46 = vld [vmem:[%s3951_s1 + $0x308] sm:$0xff]   ;;  %v248_v49 = vld [vmem:[%s3474_s24 + $0x178] sm:$0xff] }
  0x52   : > { %2906 = vmatpush3.bf16.msra.mxu1 %v3182_v47  ;;  %2867 = vmatprep.subr.bf16.mxu0 %v3183_v56  ;;  %v3214_v47 = vld [vmem:[%s3951_s1 + $0x388] sm:$0xff]   ;;  %v3215_v56 = vld [vmem:[%s3951_s1 + $0x350] sm:$0xff]  }
  0x53   : > { %2907 = vmatprep.subr.bf16.mxu1 %v3184_v57  ;;  %v3216_v57 = vld [vmem:[%s3951_s1 + $0x3d0] sm:$0xff]  }
  0x54   : > { %1787 = vmatmul.mubr.bf16.gmra.mrb[20].mxu0 %v2471_v54  ;;  %v2478_v54 = vcombine.high %v222_v50, %v230_v52 }
  0x55   : > { %1852 = vmatmul.mubr.bf16.gmra.mrb[20].mxu1 %v2473_v55  ;;  %2868 = vmatpush3.bf16.msra.mxu0 %v3185_v58  ;;  %v2477_v55 = vcombine.low %v222_v50, %v230_v52  ;;  %v3217_v58 = vld [vmem:[%s3951_s1 + $0x310] sm:$0xff]  }
  0x56   : > { %2908 = vmatpush3.bf16.msra.mxu1 %v3186_v59  ;;  %2869 = vmatprep.subr.bf16.mxu0 %v3187_v60  ;;  %v3218_v59 = vld [vmem:[%s3951_s1 + $0x390] sm:$0xff]   ;;  %v3219_v60 = vld [vmem:[%s3951_s1 + $0x358] sm:$0xff]  }
  0x57   : > { %2909 = vmatprep.subr.bf16.mxu1 %v3188_v61  ;;  %1794 = vmatprep.mubr.bf16.mxu0 %v2488_v3  ;;  %v3220_v61 = vld [vmem:[%s3951_s1 + $0x3d8] sm:$0xff]   ;;  %v238_v3 = vld [vmem:[%s3474_s24 + $0x128] sm:$0xff] }
  0x58   : > { %1859 = vmatprep.mubr.bf16.mxu1 %v2490_v6  ;;  %v2494_v6 = vcombine.high %v238_v3, %v246_v4 }
  0x59   : > { %2870 = vmatpush3.bf16.msra.mxu0 %v3189_v62  ;;  %v3221_v62 = vld [vmem:[%s3951_s1 + $0x318] sm:$0xff]  }
  0x5a   : > { %2910 = vmatpush3.bf16.msra.mxu1 %v3190_v63  ;;  %2871 = vmatprep.subr.bf16.mxu0 %v3191_v8  ;;  %v3222_v63 = vld [vmem:[%s3951_s1 + $0x398] sm:$0xff]   ;;  %v3223_v8 = vld [vmem:[%s3951_s1 + $0x360] sm:$0xff]  }
  0x5b   : > { %2911 = vmatprep.subr.bf16.mxu1 %v3192_v9  ;;  %v3224_v9 = vld [vmem:[%s3951_s1 + $0x3e0] sm:$0xff]  }
  0x5c   : > { %1795 = vmatmul.mubr.bf16.gmra.mrb[24].mxu0 %v2487_v5  ;;  %v2491_v5 = vcombine.low %v237_v0, %v245_v1 }
  0x5d   : > { %1860 = vmatmul.mubr.bf16.gmra.mrb[24].mxu1 %v2489_v7  ;;  %2872 = vmatpush3.bf16.msra.mxu0 %v3193_v10  ;;  %v2493_v7 = vcombine.low %v238_v3, %v246_v4  ;;  %v3225_v10 = vld [vmem:[%s3951_s1 + $0x320] sm:$0xff]  }
  0x5e   : > { %2912 = vmatpush3.bf16.msra.mxu1 %v3194_v11  ;;  %2873 = vmatprep.subr.bf16.mxu0 %v3195_v12  ;;  %v3226_v11 = vld [vmem:[%s3951_s1 + $0x3a0] sm:$0xff]   ;;  %v3227_v12 = vld [vmem:[%s3951_s1 + $0x368] sm:$0xff]  }
  0x5f   : > { %2913 = vmatprep.subr.bf16.mxu1 %v3196_v13  ;;  %1802 = vmatprep.mubr.bf16.mxu0 %v2504_v18  ;;  %v3228_v13 = vld [vmem:[%s3951_s1 + $0x3e8] sm:$0xff]  }
  0x60   : > { %1867 = vmatprep.mubr.bf16.mxu1 %v2506_v22  ;;  %v254_v18 = vld [vmem:[%s3474_s24 + $0x1a8] sm:$0xff]  ;;  %v2507_v22 = vcombine.low %v253_v16, %v261_v17 }
  0x61   : > { %2874 = vmatpush3.bf16.msra.mxu0 %v3197_v14  ;;  %v3229_v14 = vld [vmem:[%s3951_s1 + $0x328] sm:$0xff]  }
  0x62   : > { %2914 = vmatpush3.bf16.msra.mxu1 %v3198_v15  ;;  %2875 = vmatprep.subr.bf16.mxu0 %v3199_v24  ;;  %v3230_v15 = vld [vmem:[%s3951_s1 + $0x3a8] sm:$0xff]   ;;  %v3231_v24 = vld [vmem:[%s3951_s1 + $0x370] sm:$0xff]  }
  0x63   : > { %2915 = vmatprep.subr.bf16.mxu1 %v3200_v25  ;;  %v3232_v25 = vld [vmem:[%s3951_s1 + $0x3f0] sm:$0xff]  }
  0x64   : > { %1803 = vmatmul.mubr.bf16.gmra.mrb[28].mxu0 %v2503_v21  ;;  %v2510_v21 = vcombine.high %v254_v18, %v262_v19 }
  0x65   : > { %1868 = vmatmul.mubr.bf16.gmra.mrb[28].mxu1 %v2505_v23  ;;  %2876 = vmatpush3.bf16.msra.mxu0 %v3201_v26  ;;  %v2509_v23 = vcombine.low %v254_v18, %v262_v19  ;;  %v3233_v26 = vld [vmem:[%s3951_s1 + $0x330] sm:$0xff]  }
  0x66   : > { %2916 = vmatpush3.bf16.msra.mxu1 %v3202_v27  ;;  %2877 = vmatprep.subr.bf16.mxu0 %v3203_v28  ;;  %v3234_v27 = vld [vmem:[%s3951_s1 + $0x3b0] sm:$0xff]   ;;  %v3235_v28 = vld [vmem:[%s3951_s1 + $0x378] sm:$0xff]  }
  0x67   : > { %2917 = vmatprep.subr.bf16.mxu1 %v3204_v29  ;;  %1908 = vmatprep.mubr.bf16.mxu0 %v2460_v37  ;;  %v3236_v29 = vld [vmem:[%s3951_s1 + $0x3f8] sm:$0xff]  }
  0x68   : > { %1973 = vmatprep.mubr.bf16.mxu1 %v2462_v39  ;;  %v216_v37 = vld [vmem:[%s3474_s24 + $0x78] sm:$0xff]  ;;  %v231_v39 = vld [vmem:[%s3474_s24 + $0xf0] sm:$0xff] }
  0x69   : > { %2878 = vmatpush3.bf16.msra.mxu0 %v3205_v30  ;;  %v3237_v30 = vld [vmem:[%s3951_s1 + $0x338] sm:$0xff]  }
  0x6a   : > { %2918 = vmatpush3.bf16.msra.mxu1 %v3206_v31  ;;  %2943 = vmatprep.subr.bf16.mxu0 %v3207_v40  ;;  %v3238_v31 = vld [vmem:[%s3951_s1 + $0x3b8] sm:$0xff]   ;;  %v2465_v40 = vcombine.low %v208_v34, %v216_v37 }
  0x6b   : > { %2983 = vmatprep.subr.bf16.mxu1 %v3208_v41  ;;  %v2466_v41 = vcombine.high %v208_v34, %v216_v37 }
  0x6c   : > { %1909 = vmatmul.mubr.bf16.vlgmr.msra.gmra.mrb[32].mxu0 %v2459_v36  ;;  %v2464_v36 = vcombine.high %v207_v32, %v215_v33 }
  0x6d   : > { %1974 = vmatmul.mubr.bf16.vlgmr.msra.gmra.mrb[32].mxu1 %v2461_v38  ;;  %2944 = vmatpush3.bf16.msra.mxu0 %v3209_v42  ;;  %v223_v38 = vld [vmem:[%s3474_s24 + $0xb0] sm:$0xff] }
  0x6e   : > { %2984 = vmatpush3.bf16.msra.mxu1 %v3210_v43  ;;  %2945 = vmatprep.subr.bf16.mxu0 %v3211_v44  ;;  %v2480_v42 = vcombine.high %v223_v38, %v231_v39  ;;  %v224_v43 = vld [vmem:[%s3474_s24 + $0xb8] sm:$0xff]  ;;  %v2479_v50 = vcombine.low %v223_v38, %v231_v39 }
  0x6f   : > { %2985 = vmatprep.subr.bf16.mxu1 %v3212_v45  ;;  %1916 = vmatprep.mubr.bf16.mxu0 %v2476_v51  ;;  %v232_v44 = vld [vmem:[%s3474_s24 + $0xf8] sm:$0xff] }
  0x70   : > { %1981 = vmatprep.mubr.bf16.mxu1 %v2478_v54  ;;  %v2482_v45 = vcombine.high %v224_v43, %v232_v44  ;;  %v2481_v51 = vcombine.low %v224_v43, %v232_v44  ;;  %v255_v54 = vld [vmem:[%s3474_s24 + $0x1b0] sm:$0xff] }
  0x71   : > { %2946 = vmatpush3.bf16.msra.mxu0 %v3213_v46  ;;  %v239_v46 = vld [vmem:[%s3474_s24 + $0x130] sm:$0xff] }
  0x72   : > { %2986 = vmatpush3.bf16.msra.mxu1 %v3214_v47  ;;  %2947 = vmatprep.subr.bf16.mxu0 %v3215_v56  ;;  %v247_v47 = vld [vmem:[%s3474_s24 + $0x170] sm:$0xff]  ;;  %v256_v56 = vld [vmem:[%s3474_s24 + $0x1b8] sm:$0xff] }
  0x73   : > { %2987 = vmatprep.subr.bf16.mxu1 %v3216_v57  ;;  %v2496_v52 = vcombine.high %v239_v46, %v247_v47  ;;  %v264_v57 = vld [vmem:[%s3474_s24 + $0x1f8] sm:$0xff] }
  0x74   : > { %1917 = vmatmul.mubr.bf16.gmra.mrb[36].mxu0 %v2475_v53  ;;  %v2498_v53 = vcombine.high %v240_v48, %v248_v49 }
  0x75   : > { %1982 = vmatmul.mubr.bf16.gmra.mrb[36].mxu1 %v2477_v55  ;;  %2948 = vmatpush3.bf16.msra.mxu0 %v3217_v58  ;;  %v263_v55 = vld [vmem:[%s3474_s24 + $0x1f0] sm:$0xff]  ;;  %v2495_v58 = vcombine.low %v239_v46, %v247_v47  ;;  %s175_s24 = sand.u32 1, %s3285_s12  }
  0x76   : > { %2988 = vmatpush3.bf16.msra.mxu1 %v3218_v59  ;;  %2949 = vmatprep.subr.bf16.mxu0 %v3219_v60  ;;  %v2497_v59 = vcombine.low %v240_v48, %v248_v49  ;;  %v2512_v60 = vcombine.high %v255_v54, %v263_v55  ;;  %s2446_s7 = sshll.u32 %s175_s24, 5 }
  0x77   : > { %2989 = vmatprep.subr.bf16.mxu1 %v3220_v61  ;;  %1924 = vmatprep.mubr.bf16.mxu0 %v2492_v2  ;;  %v2514_v61 = vcombine.high %v256_v56, %v264_v57  ;;  %v2450_v2 = vld [vmem:[%s3952_s2] ss:$0 sm:$0xff]  ;;  %s3879_s12 = scalar_lea.vmem [#allocation2], %s2446_s7  }
  0x78   : > { %1989 = vmatprep.mubr.bf16.mxu1 %v2494_v6 }
  0x79   : > { %2950 = vmatpush3.bf16.msra.mxu0 %v3221_v62  ;;  %v2511_v62 = vcombine.low %v255_v54, %v263_v55 }
  0x7a   : > { %2990 = vmatpush3.bf16.msra.mxu1 %v3222_v63  ;;  %2951 = vmatprep.subr.bf16.mxu0 %v3223_v8  ;;  %v2513_v63 = vcombine.low %v256_v56, %v264_v57 }
  0x7b   : > { %2991 = vmatprep.subr.bf16.mxu1 %v3224_v9 }
  0x7c   : > { %1925 = vmatmul.mubr.bf16.gmra.mrb[40].mxu0 %v2491_v5 }
  0x7d   : > { %1990 = vmatmul.mubr.bf16.gmra.mrb[40].mxu1 %v2493_v7  ;;  %2952 = vmatpush3.bf16.msra.mxu0 %v3225_v10 }
  0x7e   : > { %2992 = vmatpush3.bf16.msra.mxu1 %v3226_v11  ;;  %2953 = vmatprep.subr.bf16.mxu0 %v3227_v12 }
  0x7f   : > { %2993 = vmatprep.subr.bf16.mxu1 %v3228_v13  ;;  %1932 = vmatprep.mubr.bf16.mxu0 %v2508_v20 }
  0x80   : > { %1997 = vmatprep.mubr.bf16.mxu1 %v2510_v21 }
  0x81   : > { %2954 = vmatpush3.bf16.msra.mxu0 %v3229_v14 }
  0x82   : > { %2994 = vmatpush3.bf16.msra.mxu1 %v3230_v15  ;;  %2955 = vmatprep.subr.bf16.mxu0 %v3231_v24 }
  0x83   : > { %2995 = vmatprep.subr.bf16.mxu1 %v3232_v25 }
  0x84   : > { %1933 = vmatmul.mubr.bf16.gmra.mrb[44].mxu0 %v2507_v22 }
  0x85   : > { %1998 = vmatmul.mubr.bf16.gmra.mrb[44].mxu1 %v2509_v23  ;;  %2956 = vmatpush3.bf16.msra.mxu0 %v3233_v26 }
  0x86   : > { %2996 = vmatpush3.bf16.msra.mxu1 %v3234_v27  ;;  %2957 = vmatprep.subr.bf16.mxu0 %v3235_v28 }
  0x87   : > { %2997 = vmatprep.subr.bf16.mxu1 %v3236_v29  ;;  %2038 = vmatprep.mubr.bf16.mxu0 %v2464_v36 }
  0x88   : > { %2103 = vmatprep.mubr.bf16.mxu1 %v2466_v41 }
  0x89   : > { %2958 = vmatpush3.bf16.msra.mxu0 %v3237_v30 }
  0x8a   : > { %2998 = vmatpush3.bf16.msra.mxu1 %v3238_v31 }
  0x8c   : > { %2039 = vmatmul.mubr.bf16.vlgmr.msra.gmra.mrb[48].mxu0 %v2463_v35 }
  0x8d   : > { %2104 = vmatmul.mubr.bf16.vlgmr.msra.gmra.mrb[48].mxu1 %v2465_v40  ;;  %2046 = vmatprep.mubr.bf16.mxu0 %v2480_v42 }
  0x8e   : > { %2111 = vmatprep.mubr.bf16.mxu1 %v2482_v45 }
  0x94   : > { %2047 = vmatmul.mubr.bf16.gmra.mrb[52].mxu0 %v2479_v50 }
  0x95   : > { %2112 = vmatmul.mubr.bf16.gmra.mrb[52].mxu1 %v2481_v51  ;;  %2054 = vmatprep.mubr.bf16.mxu0 %v2496_v52 }
  0x96   : > { %2119 = vmatprep.mubr.bf16.mxu1 %v2498_v53 }
  0x9c   : > { %2055 = vmatmul.mubr.bf16.gmra.mrb[56].mxu0 %v2495_v58 }
  0x9d   : > { %2120 = vmatmul.mubr.bf16.gmra.mrb[56].mxu1 %v2497_v59  ;;  %2062 = vmatprep.mubr.bf16.mxu0 %v2512_v60 }
  0x9e   : > { %2127 = vmatprep.mubr.bf16.mxu1 %v2514_v61 }
  0xa4   : > { %2063 = vmatmul.mubr.bf16.gmra.mrb[60].mxu0 %v2511_v62 }
  0xa5   : > { %2128 = vmatmul.mubr.bf16.gmra.mrb[60].mxu1 %v2513_v63 }
  0xff   : > { %v2719_v0 = vpop.f32.mrb[0].mxu0 }
 0x100   : > { %v2759_v1 = vpop.f32.mrb[0].mxu1  ;;  %v2720_v3 = vpop.f32.mrb[1].mxu0 }
 0x101   : > { %v2721_v4 = vadd.f32 %v2720_v3, %v2719_v0  ;;  %v2760_v5 = vpop.f32.mrb[1].mxu1  ;;  %v2722_v6 = vpop.f32.mrb[2].mxu0 }
 0x102   : > { %v2761_v7 = vadd.f32 %v2760_v5, %v2759_v1  ;;  %v2762_v8 = vpop.f32.mrb[2].mxu1  ;;  %v2723_v9 = vpop.f32.mrb[3].mxu0 }
 0x103   : > { %v1651_v10 = vadd.f32 %v2721_v4, %v2450_v2  ;;  %v2724_v11 = vadd.f32 %v2723_v9, %v2722_v6  ;;  %v2763_v12 = vpop.f32.mrb[3].mxu1 }
 0x104   : > { %v2764_v13 = vadd.f32 %v2763_v12, %v2762_v8 }
 0x105   : > { %v1716_v14 = vadd.f32 %v2761_v7, %v1651_v10  ;;  %v1654_v15 = vadd.f32 %v2724_v11, %v2450_v2 }
 0x107   : > { %v3837_v16 = vadd.f32 %v2764_v13, %v1654_v15  ;;  %v2725_v17 = vpop.f32.mrb[4].mxu0 }
 0x108   : > { %v2765_v18 = vpop.f32.mrb[4].mxu1  ;;  %v2726_v19 = vpop.f32.mrb[5].mxu0 }
 0x109   : > { %v2727_v20 = vadd.f32 %v2726_v19, %v2725_v17  ;;  %v2766_v21 = vpop.f32.mrb[5].mxu1  ;;  %v2728_v22 = vpop.f32.mrb[6].mxu0 }
 0x10a   : > { %v2767_v23 = vadd.f32 %v2766_v21, %v2765_v18  ;;  %v2768_v24 = vpop.f32.mrb[6].mxu1  ;;  %v2729_v25 = vpop.f32.mrb[7].mxu0 }
 0x10b   : > { %v1659_v26 = vadd.f32 %v2727_v20, %v2450_v2  ;;  %v2730_v27 = vadd.f32 %v2729_v25, %v2728_v22  ;;  %v2769_v28 = vpop.f32.mrb[7].mxu1 }
 0x10c   : > { %v2770_v29 = vadd.f32 %v2769_v28, %v2768_v24 }
 0x10d   : > { %v1724_v30 = vadd.f32 %v2767_v23, %v1659_v26  ;;  %v1662_v31 = vadd.f32 %v2730_v27, %v2450_v2 }
 0x10f   : > { %v3839_v32 = vadd.f32 %v2770_v29, %v1662_v31  ;;  %v2731_v33 = vpop.f32.mrb[8].mxu0 }
 0x110   : > { %v2771_v34 = vpop.f32.mrb[8].mxu1  ;;  %v2732_v35 = vpop.f32.mrb[9].mxu0 }
 0x111   : > { %v2772_v36 = vpop.f32.mrb[9].mxu1  ;;  %v2733_v37 = vadd.f32 %v2732_v35, %v2731_v33  ;;  %v2734_v39 = vpop.f32.mrb[10].mxu0 }
 0x112   : > { %v2773_v38 = vadd.f32 %v2772_v36, %v2771_v34  ;;  %v2774_v40 = vpop.f32.mrb[10].mxu1  ;;  %v2735_v41 = vpop.f32.mrb[11].mxu0 }
 0x113   : > { %v2775_v42 = vpop.f32.mrb[11].mxu1  ;;  %v1667_v43 = vadd.f32 %v2733_v37, %v2450_v2  ;;  %v2736_v44 = vadd.f32 %v2735_v41, %v2734_v39 }
 0x114   : > { %v2776_v45 = vadd.f32 %v2775_v42, %v2774_v40 }
 0x115   : > { %v1732_v46 = vadd.f32 %v2773_v38, %v1667_v43  ;;  %v1670_v47 = vadd.f32 %v2736_v44, %v2450_v2 }
 0x117   : > { %v3841_v48 = vadd.f32 %v2776_v45, %v1670_v47  ;;  %v2737_v49 = vpop.f32.mrb[12].mxu0 }
 0x118   : > { %v2777_v50 = vpop.f32.mrb[12].mxu1  ;;  %v2738_v51 = vpop.f32.mrb[13].mxu0 }
 0x119   : > { %v2739_v52 = vadd.f32 %v2738_v51, %v2737_v49  ;;  %v2778_v53 = vpop.f32.mrb[13].mxu1  ;;  %v2740_v54 = vpop.f32.mrb[14].mxu0 }
 0x11a   : > { %v2779_v55 = vadd.f32 %v2778_v53, %v2777_v50  ;;  %v2780_v56 = vpop.f32.mrb[14].mxu1  ;;  %v2741_v57 = vpop.f32.mrb[15].mxu0 }
 0x11b   : > { %v1675_v58 = vadd.f32 %v2739_v52, %v2450_v2  ;;  %v2742_v59 = vadd.f32 %v2741_v57, %v2740_v54  ;;  %v2781_v60 = vpop.f32.mrb[15].mxu1 }
 0x11c   : > { %v2782_v61 = vadd.f32 %v2781_v60, %v2780_v56 }
 0x11d   : > { %v1740_v62 = vadd.f32 %v2779_v55, %v1675_v58  ;;  %v1678_v63 = vadd.f32 %v2742_v59, %v2450_v2 }
 0x11f   : > { %v3843_v0 = vadd.f32 %v2782_v61, %v1678_v63  ;;  %v2799_v1 = vpop.f32.mrb[16].mxu0 }
 0x120   : > { %v2839_v3 = vpop.f32.mrb[16].mxu1  ;;  %v2800_v4 = vpop.f32.mrb[17].mxu0 }
 0x121   : > { %v2801_v5 = vadd.f32 %v2800_v4, %v2799_v1  ;;  %v2840_v6 = vpop.f32.mrb[17].mxu1  ;;  %v2802_v7 = vpop.f32.mrb[18].mxu0 }
 0x122   : > { %v2841_v8 = vadd.f32 %v2840_v6, %v2839_v3  ;;  %v2842_v9 = vpop.f32.mrb[18].mxu1  ;;  %v2803_v10 = vpop.f32.mrb[19].mxu0 }
 0x123   : > { %v1781_v11 = vadd.f32 %v2801_v5, %v1716_v14  ;;  %v2804_v12 = vadd.f32 %v2803_v10, %v2802_v7  ;;  %v2843_v13 = vpop.f32.mrb[19].mxu1 }
 0x124   : > { %v2844_v15 = vadd.f32 %v2843_v13, %v2842_v9 }
 0x125   : > { %v1846_v17 = vadd.f32 %v2841_v8, %v1781_v11  ;;  %v1784_v18 = vadd.f32 %v2804_v12, %v3837_v16 }
 0x127   : > { %v3846_v19 = vadd.f32 %v2844_v15, %v1784_v18  ;;  %v2805_v2 = vpop.f32.mrb[20].mxu0 }
 0x128   : > { %v2845_v20 = vpop.f32.mrb[20].mxu1  ;;  %v2806_v21 = vpop.f32.mrb[21].mxu0 }
 0x129   : > { %v2846_v22 = vpop.f32.mrb[21].mxu1  ;;  %v2807_v23 = vadd.f32 %v2806_v21, %v2805_v2  ;;  %v2808_v25 = vpop.f32.mrb[22].mxu0 }
 0x12a   : > { %v2847_v24 = vadd.f32 %v2846_v22, %v2845_v20  ;;  %v2848_v26 = vpop.f32.mrb[22].mxu1  ;;  %v2809_v27 = vpop.f32.mrb[23].mxu0 }
 0x12b   : > { %v2849_v28 = vpop.f32.mrb[23].mxu1  ;;  %v1789_v29 = vadd.f32 %v2807_v23, %v1724_v30  ;;  %v2810_v14 = vadd.f32 %v2809_v27, %v2808_v25 }
 0x12c   : > { %v2850_v31 = vadd.f32 %v2849_v28, %v2848_v26 }
 0x12d   : > { %v1854_v33 = vadd.f32 %v2847_v24, %v1789_v29  ;;  %v1792_v34 = vadd.f32 %v2810_v14, %v3839_v32 }
 0x12f   : > { %v3849_v35 = vadd.f32 %v2850_v31, %v1792_v34  ;;  %v2811_v16 = vpop.f32.mrb[24].mxu0 }
 0x130   : > { %v2851_v36 = vpop.f32.mrb[24].mxu1  ;;  %v2812_v37 = vpop.f32.mrb[25].mxu0 }
 0x131   : > { %v2813_v38 = vadd.f32 %v2812_v37, %v2811_v16  ;;  %v2852_v39 = vpop.f32.mrb[25].mxu1  ;;  %v2814_v40 = vpop.f32.mrb[26].mxu0 }
 0x132   : > { %v2853_v41 = vadd.f32 %v2852_v39, %v2851_v36  ;;  %v2854_v42 = vpop.f32.mrb[26].mxu1  ;;  %v2815_v43 = vpop.f32.mrb[27].mxu0 }
 0x133   : > { %v1797_v44 = vadd.f32 %v2813_v38, %v1732_v46  ;;  %v2816_v45 = vadd.f32 %v2815_v43, %v2814_v40  ;;  %v2855_v47 = vpop.f32.mrb[27].mxu1 }
 0x134   : > { %v2856_v30 = vadd.f32 %v2855_v47, %v2854_v42 }
 0x135   : > { %v1862_v49 = vadd.f32 %v2853_v41, %v1797_v44  ;;  %v1800_v50 = vadd.f32 %v2816_v45, %v3841_v48 }
 0x137   : > { %v3852_v51 = vadd.f32 %v2856_v30, %v1800_v50  ;;  %v2817_v32 = vpop.f32.mrb[28].mxu0 }
 0x138   : > { %v2857_v52 = vpop.f32.mrb[28].mxu1  ;;  %v2818_v53 = vpop.f32.mrb[29].mxu0 }
 0x139   : > { %v2819_v54 = vadd.f32 %v2818_v53, %v2817_v32  ;;  %v2858_v55 = vpop.f32.mrb[29].mxu1  ;;  %v2820_v56 = vpop.f32.mrb[30].mxu0 }
 0x13a   : > { %v2859_v57 = vadd.f32 %v2858_v55, %v2857_v52  ;;  %v2860_v58 = vpop.f32.mrb[30].mxu1  ;;  %v2821_v59 = vpop.f32.mrb[31].mxu0 }
 0x13b   : > { %v1805_v60 = vadd.f32 %v2819_v54, %v1740_v62  ;;  %v2822_v61 = vadd.f32 %v2821_v59, %v2820_v56  ;;  %v2861_v46 = vpop.f32.mrb[31].mxu1 }
 0x13c   : > { %v2862_v63 = vadd.f32 %v2861_v46, %v2860_v58 }
 0x13d   : > { %v1870_v1 = vadd.f32 %v2859_v57, %v1805_v60  ;;  %v1808_v3 = vadd.f32 %v2822_v61, %v3843_v0 }
 0x13f   : > { %v3855_v4 = vadd.f32 %v2862_v63, %v1808_v3  ;;  %v2879_v48 = vpop.f32.mrb[32].mxu0 }
 0x140   : > { %v2919_v5 = vpop.f32.mrb[32].mxu1  ;;  %v2880_v6 = vpop.f32.mrb[33].mxu0 }
 0x141   : > { %v2920_v7 = vpop.f32.mrb[33].mxu1  ;;  %v2881_v8 = vadd.f32 %v2880_v6, %v2879_v48  ;;  %v2882_v10 = vpop.f32.mrb[34].mxu0 }
 0x142   : > { %v2921_v9 = vadd.f32 %v2920_v7, %v2919_v5  ;;  %v2922_v11 = vpop.f32.mrb[34].mxu1  ;;  %v2883_v12 = vpop.f32.mrb[35].mxu0 }
 0x143   : > { %v2923_v13 = vpop.f32.mrb[35].mxu1  ;;  %v1911_v15 = vadd.f32 %v2881_v8, %v1846_v17  ;;  %v2884_v62 = vadd.f32 %v2883_v12, %v2882_v10 }
 0x144   : > { %v2924_v18 = vadd.f32 %v2923_v13, %v2922_v11 }
 0x145   : > { %v1976_v2 = vadd.f32 %v2921_v9, %v1911_v15  ;;  %v1914_v20 = vadd.f32 %v2884_v62, %v3846_v19 }
 0x147   : > { %v3858_v21 = vadd.f32 %v2924_v18, %v1914_v20  ;;  %v2885_v0 = vpop.f32.mrb[36].mxu0 }
 0x148   : > { %v2925_v22 = vpop.f32.mrb[36].mxu1  ;;  %v2886_v23 = vpop.f32.mrb[37].mxu0 }
 0x149   : > { %v2887_v24 = vadd.f32 %v2886_v23, %v2885_v0  ;;  %v2926_v25 = vpop.f32.mrb[37].mxu1  ;;  %v2888_v26 = vpop.f32.mrb[38].mxu0 }
 0x14a   : > { %v2927_v27 = vadd.f32 %v2926_v25, %v2925_v22  ;;  %v2928_v28 = vpop.f32.mrb[38].mxu1  ;;  %v2889_v29 = vpop.f32.mrb[39].mxu0 }
 0x14b   : > { %v1919_v14 = vadd.f32 %v2887_v24, %v1854_v33  ;;  %v2890_v31 = vadd.f32 %v2889_v29, %v2888_v26  ;;  %v2929_v34 = vpop.f32.mrb[39].mxu1 }
 0x14c   : > { %v2930_v17 = vadd.f32 %v2929_v34, %v2928_v28 }
 0x14d   : > { %v3860_v16 = vadd.f32 %v2927_v27, %v1919_v14  ;;  %v1922_v36 = vadd.f32 %v2890_v31, %v3849_v35 }
 0x14f   : > { %v3863_v19 = vadd.f32 %v2930_v17, %v1922_v36  ;;  %v2891_v37 = vpop.f32.mrb[40].mxu0 }
 0x150   : > { %v2931_v38 = vpop.f32.mrb[40].mxu1  ;;  %v2892_v39 = vpop.f32.mrb[41].mxu0 }
 0x151   : > { %v2893_v40 = vadd.f32 %v2892_v39, %v2891_v37  ;;  %v2932_v41 = vpop.f32.mrb[41].mxu1  ;;  %v2894_v42 = vpop.f32.mrb[42].mxu0 }
 0x152   : > { %v2933_v43 = vadd.f32 %v2932_v41, %v2931_v38  ;;  %v2934_v44 = vpop.f32.mrb[42].mxu1  ;;  %v2895_v45 = vpop.f32.mrb[43].mxu0 }
 0x153   : > { %v1927_v47 = vadd.f32 %v2893_v40, %v1862_v49  ;;  %v2896_v33 = vadd.f32 %v2895_v45, %v2894_v42  ;;  %v2935_v30 = vpop.f32.mrb[43].mxu1 }
 0x154   : > { %v2936_v50 = vadd.f32 %v2935_v30, %v2934_v44 }
 0x155   : > { %v3865_v32 = vadd.f32 %v2933_v43, %v1927_v47  ;;  %v1930_v52 = vadd.f32 %v2896_v33, %v3852_v51 }
 0x157   : > { %v3868_v35 = vadd.f32 %v2936_v50, %v1930_v52  ;;  %v2897_v53 = vpop.f32.mrb[44].mxu0 }
 0x158   : > { %v2937_v54 = vpop.f32.mrb[44].mxu1  ;;  %v2898_v55 = vpop.f32.mrb[45].mxu0 }
 0x159   : > { %v2938_v56 = vpop.f32.mrb[45].mxu1  ;;  %v2899_v57 = vadd.f32 %v2898_v55, %v2897_v53  ;;  %v2900_v59 = vpop.f32.mrb[46].mxu0 }
 0x15a   : > { %v2939_v58 = vadd.f32 %v2938_v56, %v2937_v54  ;;  %v2940_v60 = vpop.f32.mrb[46].mxu1  ;;  %v2901_v61 = vpop.f32.mrb[47].mxu0 }
 0x15b   : > { %v2941_v46 = vpop.f32.mrb[47].mxu1  ;;  %v1935_v49 = vadd.f32 %v2899_v57, %v1870_v1  ;;  %v2902_v63 = vadd.f32 %v2901_v61, %v2900_v59 }
 0x15c   : > { %v2942_v3 = vadd.f32 %v2941_v46, %v2940_v60 }
 0x15d   : > { %v3870_v48 = vadd.f32 %v2939_v58, %v1935_v49  ;;  %v1938_v5 = vadd.f32 %v2902_v63, %v3855_v4 }
 0x15f   : > { %v3873_v51 = vadd.f32 %v2942_v3, %v1938_v5  ;;  %v2959_v6 = vpop.f32.mrb[48].mxu0 }
 0x160   : > { %v2999_v7 = vpop.f32.mrb[48].mxu1  ;;  %v2960_v8 = vpop.f32.mrb[49].mxu0 }
 0x161   : > { %v2961_v9 = vadd.f32 %v2960_v8, %v2959_v6  ;;  %v3000_v10 = vpop.f32.mrb[49].mxu1  ;;  %v2962_v11 = vpop.f32.mrb[50].mxu0 }
 0x162   : > { %v3001_v12 = vadd.f32 %v3000_v10, %v2999_v7  ;;  %v3002_v13 = vpop.f32.mrb[50].mxu1  ;;  %v2963_v15 = vpop.f32.mrb[51].mxu0 }
 0x163   : > { %v2041_v62 = vadd.f32 %v2961_v9, %v1976_v2  ;;  %v2964_v1 = vadd.f32 %v2963_v15, %v2962_v11  ;;  %v3003_v18 = vpop.f32.mrb[51].mxu1 }
 0x164   : > { %v3004_v20 = vadd.f32 %v3003_v18, %v3002_v13 }
 0x165   : > { %v2106_v0 = vadd.f32 %v3001_v12, %v2041_v62  ;;  %v2044_v22 = vadd.f32 %v2964_v1, %v3858_v21 }
 0x167   : > { %v2144_v4 = vmul.f32 0.2, %v2106_v0  ;;  %v2109_v23 = vadd.f32 %v3004_v20, %v2044_v22  ;;  %v2965_v24 = vpop.f32.mrb[52].mxu0  ;;  %vm2136_vm0 = vcmp.gt.f32.partialorder %v2106_v0, 0.0 }
 0x168   : > { %v3005_v25 = vpop.f32.mrb[52].mxu1  ;;  %v2966_v26 = vpop.f32.mrb[53].mxu0 }
 0x169   : > { %vm2137_vm1 = vcmp.gt.f32.partialorder %v2109_v23, 0.0  ;;  %v2145_v27 = vmul.f32 0.2, %v2109_v23  ;;  %v2967_v28 = vadd.f32 %v2966_v26, %v2965_v24  ;;  %v3006_v29 = vpop.f32.mrb[53].mxu1  ;;  %v2968_v14 = vpop.f32.mrb[54].mxu0  ;;  %v2152_v17 = vsel %vm2136_vm0, %v2106_v0, %v2144_v4 }
 0x16a   : > { %v3007_v2 = vadd.f32 %v3006_v29, %v3005_v25  ;;  %v3008_v31 = vpop.f32.mrb[54].mxu1  ;;  %v2969_v34 = vpop.f32.mrb[55].mxu0 }
 0x16b   : > { %v2153_v36 = vsel %vm2137_vm1, %v2109_v23, %v2145_v27  ;;  %v2049_v21 = vadd.f32 %v2967_v28, %v3860_v16  ;;  %v2970_v37 = vadd.f32 %v2969_v34, %v2968_v14  ;;  %v3009_v38 = vpop.f32.mrb[55].mxu1 }
 0x16c   : > { %v2683_v39 = vpack.c.bf16 %v2153_v36, %v2152_v17  ;;  %v3010_v40 = vadd.f32 %v3009_v38, %v3008_v31 }
 0x16d   : > { %v2114_v41 = vadd.f32 %v3007_v2, %v2049_v21  ;;  %v2052_v42 = vadd.f32 %v2970_v37, %v3863_v19 }
 0x16e   : > { %2684 = vst [vmem:[%s3879_s12] sm:$0xff] %v2683_v39  }
 0x16f   : > { %v2146_v43 = vmul.f32 0.2, %v2114_v41  ;;  %v2117_v44 = vadd.f32 %v3010_v40, %v2052_v42  ;;  %v2971_v45 = vpop.f32.mrb[56].mxu0  ;;  %vm2138_vm2 = vcmp.gt.f32.partialorder %v2114_v41, 0.0 }
 0x170   : > { %v3011_v47 = vpop.f32.mrb[56].mxu1  ;;  %v2972_v33 = vpop.f32.mrb[57].mxu0 }
 0x171   : > { %vm2139_vm3 = vcmp.gt.f32.partialorder %v2117_v44, 0.0  ;;  %v2147_v30 = vmul.f32 0.2, %v2117_v44  ;;  %v2973_v16 = vadd.f32 %v2972_v33, %v2971_v45  ;;  %v3012_v50 = vpop.f32.mrb[57].mxu1  ;;  %v2974_v52 = vpop.f32.mrb[58].mxu0  ;;  %v2154_v19 = vsel %vm2138_vm2, %v2114_v41, %v2146_v43 }
 0x172   : > { %v3013_v53 = vadd.f32 %v3012_v50, %v3011_v47  ;;  %v3014_v54 = vpop.f32.mrb[58].mxu1  ;;  %v2975_v55 = vpop.f32.mrb[59].mxu0 }
 0x173   : > { %v2155_v56 = vsel %vm2139_vm3, %v2117_v44, %v2147_v30  ;;  %v2057_v57 = vadd.f32 %v2973_v16, %v3865_v32  ;;  %v2976_v58 = vadd.f32 %v2975_v55, %v2974_v52  ;;  %v3015_v59 = vpop.f32.mrb[59].mxu1 }
 0x174   : > { %v2688_v60 = vpack.c.bf16 %v2155_v56, %v2154_v19  ;;  %v3016_v61 = vadd.f32 %v3015_v59, %v3014_v54 }
 0x175   : > { %v2122_v46 = vadd.f32 %v3013_v53, %v2057_v57  ;;  %v2060_v49 = vadd.f32 %v2976_v58, %v3868_v35 }
 0x176   : > { %2700 = vst [vmem:[%s3879_s12 + $0x8] sm:$0xff] %v2688_v60  }
 0x177   : > { %v2148_v63 = vmul.f32 0.2, %v2122_v46  ;;  %v2125_v3 = vadd.f32 %v3016_v61, %v2060_v49  ;;  %v2977_v5 = vpop.f32.mrb[60].mxu0  ;;  %vm2140_vm4 = vcmp.gt.f32.partialorder %v2122_v46, 0.0 }
 0x178   : > { %v3017_v6 = vpop.f32.mrb[60].mxu1  ;;  %v2978_v7 = vpop.f32.mrb[61].mxu0 }
 0x179   : > { %vm2141_vm5 = vcmp.gt.f32.partialorder %v2125_v3, 0.0  ;;  %v2149_v8 = vmul.f32 0.2, %v2125_v3  ;;  %v2979_v9 = vadd.f32 %v2978_v7, %v2977_v5  ;;  %v3018_v10 = vpop.f32.mrb[61].mxu1  ;;  %v2980_v32 = vpop.f32.mrb[62].mxu0  ;;  %v2156_v15 = vsel %vm2140_vm4, %v2122_v46, %v2148_v63 }
 0x17a   : > { %v3019_v11 = vadd.f32 %v3018_v10, %v3017_v6  ;;  %v3020_v12 = vpop.f32.mrb[62].mxu1  ;;  %v2981_v13 = vpop.f32.mrb[63].mxu0 }
 0x17b   : > { %v2157_v62 = vsel %vm2141_vm5, %v2125_v3, %v2149_v8  ;;  %v2065_v35 = vadd.f32 %v2979_v9, %v3870_v48  ;;  %v2982_v1 = vadd.f32 %v2981_v13, %v2980_v32  ;;  %v3021_v18 = vpop.f32.mrb[63].mxu1 }
 0x17c   : > { %v2693_v20 = vpack.c.bf16 %v2157_v62, %v2156_v15  ;;  %v3022_v0 = vadd.f32 %v3021_v18, %v3020_v12 }
 0x17d   : > { %v2130_v22 = vadd.f32 %v3019_v11, %v2065_v35  ;;  %v2068_v4 = vadd.f32 %v2982_v1, %v3873_v51 }
 0x17e   : > { %2701 = vst [vmem:[%s3879_s12 + $0x10] sm:$0xff] %v2693_v20  }
 0x17f   : > { %v2150_v23 = vmul.f32 0.2, %v2130_v22  ;;  %v2133_v24 = vadd.f32 %v3022_v0, %v2068_v4  ;;  %vm2142_vm6 = vcmp.gt.f32.partialorder %v2130_v22, 0.0 }
 0x180   : > { %2206 = sbr.rel (!%p3372_p4) target bundleno = 445 (0x1bd), region = 36 }
 0x181   : > { %vm2143_vm7 = vcmp.gt.f32.partialorder %v2133_v24, 0.0  ;;  %v2151_v25 = vmul.f32 0.2, %v2133_v24  ;;  %v2158_v26 = vsel %vm2142_vm6, %v2130_v22, %v2150_v23 }
 0x183   : > { %v2159_v27 = vsel %vm2143_vm7, %v2133_v24, %v2151_v25 }
 0x184   : > { %v2698_v28 = vpack.c.bf16 %v2159_v27, %v2158_v26 }
 0x186   : > { %2702 = vst [vmem:[%s3879_s12 + $0x18] sm:$0xff] %v2698_v28  }
 0x187   : > { %s3962_s8 = smov (!%p2209_p8, %s2208_s8), 8 }
 0x188   : > { %s2653_s17 = sshll.u32 %s3962_s8, 6 }
 0x189   : > { %p2656_p9 = scmp.eq.s32.totalorder %s2653_s17, 0 }
 0x18a   : > { %s3902_s18 = sshrl.u32 (!%p2656_p9), %s3962_s8, 3 }
 0x18b   : > { %2217 = sbr.rel (%p2656_p9) target bundleno = 445 (0x1bd), region = 40  ;;  %p2657_p10 = scmp.le.s32.totalorder (!%p2656_p9), %s3902_s18, 0 }
 0x192   : > { %2398 = sbr.rel (%p2657_p10) target bundleno = 424 (0x1a8), region = 112  ;;  %s3955_s15 = smov (!%p2657_p10), %s3896_s14 }
 0x193   : > { %s3956_s20 = smov (!%p2657_p10), %s3879_s12  ;;  %s3911_s5 = smov (!%p2657_p10), 0  }
 0x194   : > { %s3913_s21 = smov (!%p2657_p10), 0  }
 0x199 LB: >> { %v2233_v48 = vld [vmem:[%s3301_s20] sm:$0xf]  ;;  %v2235_v51 = vld [vmem:[%s3301_s20 + $0x4] sm:$0xf]  ;;  %v2237_v29 = vld [vmem:[%s3301_s20 + $0x8] sm:$0xf]  ;;  %s3309_s21 = sphi %s3913_s21, %s2227_s21   ;;  %s3305_s5 = sphi %s3911_s5, %s3957_s5   ;;  %s3301_s20 = sphi %s3956_s20, %s2254_s20   ;;  %s3297_s15 = sphi %s3955_s15, %s2255_s15  }
 0x19a   : >> { %2234 = vst [vmem:[%s3297_s15] sm:$0xf] %v2233_v48  ;;  %2236 = vst [vmem:[%s3297_s15 + $0x4] sm:$0xf] %v2235_v51  ;;  %v2239_v14 = vld [vmem:[%s3301_s20 + $0xc] sm:$0xf]  ;;  %s2249_s22 = sadd.s32 1, %s3305_s5 }
 0x19b   : >> { %2238 = vst [vmem:[%s3297_s15 + $0x8] sm:$0xf] %v2237_v29  ;;  %v2241_v2 = vld [vmem:[%s3301_s20 + $0x10] sm:$0xf]  ;;  %v2243_v31 = vld [vmem:[%s3301_s20 + $0x14] sm:$0xf]  ;;  %p2250_p11 = scmp.ge.s32.totalorder %s2249_s22, %s3902_s18 }
 0x19c   : >> { %2240 = vst [vmem:[%s3297_s15 + $0xc] sm:$0xf] %v2239_v14  ;;  %2242 = vst [vmem:[%s3297_s15 + $0x10] sm:$0xf] %v2241_v2  ;;  %v2245_v34 = vld [vmem:[%s3301_s20 + $0x18] sm:$0xf] }
 0x19d   : >> { %2244 = vst [vmem:[%s3297_s15 + $0x14] sm:$0xf] %v2243_v31  ;;  %v2247_v17 = vld [vmem:[%s3301_s20 + $0x1c] sm:$0xf]  ;;  %2246 = vst [vmem:[%s3297_s15 + $0x18] sm:$0xf] %v2245_v34 }
 0x19e   : >> { %2248 = vst [vmem:[%s3297_s15 + $0x1c] sm:$0xf] %v2247_v17  ;;  %s3964_s22 = smov (%p2250_p11, %s2249_s22), 0  ;;  %s2227_s21 = sadd.s32 1, %s3309_s21  }
 0x19f   : >> { %s2658_s23 = sshll.u32 %s3964_s22, 5  ;;  %p2226_p12 = scmp.ge.s32.totalorder %s2227_s21, %s3902_s18 }
 0x1a0   : >> { %s2254_s20 = scalar_lea.vmem %s3879_s12, %s2658_s23 [#allocation2]   ;;  %s2255_s15 = scalar_lea.vmem %s3896_s14, %s2658_s23  }
 0x1a1   : >> { %s3957_s5 = smov %s3964_s22  ;;  %2229 = sbr.rel (!%p2226_p12) target bundleno = 409 (0x199), region = 118 }
 0x1a8 PF: > { %s3932_s25 = sand.u32 7, %s3962_s8   ;;  %s2678_s26 = sshll.u32 %s3902_s18, 5 }
 0x1a9   : > { %s2260_s27 = scalar_lea.vmem %s3879_s12, %s2678_s26 [#allocation2]   ;;  %s2262_s28 = scalar_lea.vmem %s3896_s14, %s2678_s26  }
 0x1aa   : > { %p2663_p13 = scmp.le.s32.totalorder %s3932_s25, 0 }
 0x1ab   : > { %s3311_s29 = smov (!%p2663_p13), %s2262_s28   ;;  %s3315_s30 = smov (!%p2663_p13), %s2260_s27  }
 0x1ac   : > { %2412 = sbr.rel (%p2663_p13) target bundleno = 445 (0x1bd), region = 123  ;;  %s3319_s4 = smov (!%p2663_p13), 0  }
 0x1ad   : > { %s3323_s6 = smov (!%p2663_p13), 0  }
 0x1b3 LB: >> { %v2272_v36 = vld [vmem:[%s3317_s30] sm:$0xf]  ;;  %s2274_s24 = sadd.s32 1, %s3321_s4  ;;  %s2266_s6 = sadd.s32 1, %s3325_s6   ;;  %s3325_s6 = sphi %s3323_s6, %s2266_s6   ;;  %s3321_s4 = sphi %s3319_s4, %s3320_s4   ;;  %s3317_s30 = sphi %s3315_s30, %s2279_s30   ;;  %s3313_s29 = sphi %s3311_s29, %s2280_s29  }
 0x1b4   : >> { %2273 = vst [vmem:[%s3313_s29] sm:$0xf] %v2272_v36  ;;  %p2275_p0 = scmp.ge.s32.totalorder %s2274_s24, %s3932_s25  ;;  %p2265_p1 = scmp.ge.s32.totalorder %s2266_s6, %s3932_s25 }
 0x1b6   : >> { %s3966_s24 = smov (%p2275_p0, %s2274_s24), 0  ;;  %2268 = sbr.rel (!%p2265_p1) target bundleno = 435 (0x1b3), region = 129 }
 0x1b7   : >> { %s2664_s7 = sshll.u32 %s3966_s24, 2  ;;  %s3320_s4 = smov %s3966_s24  }
 0x1b8   : >> { %s2279_s30 = scalar_lea.vmem %s2260_s27, %s2664_s7 [#allocation2]   ;;  %s2280_s29 = scalar_lea.vmem %s2262_s28, %s2664_s7  }
 0x1bd PF: > { %p10_p2 = scmp.ge.s32.totalorder %s3362_s16, 4   ;;  %s3958_s12 = smov %s3289_s13 }
 0x1be   : > { %s3959_s13 = smov %s3370_s19  ;;  %s3960_s14 = smov %s3362_s16 }
 0x1bf   :  { %12 = sbr.rel (!%p10_p2) target bundleno = 2 (0x2), region = 140 }

// kernel: discriminator_forward.5
= control target key start
LH: loop header
LB: loop body
LE: loop exit
PB: predicated region body
PF: predicated region fallthrough
CT: control target
= control target key end

     0   :  { %v1600_v36 = vlaneseq  ;;  %v16072_v37 = vmov 1966171168   ;;  %vm11912_vm4 = vcmask 1041408   ;;  %vm11934_vm5 = vcmask 1024   ;;  %s21104_s1 = inlined_call_operand.vmem [shape: bf16[6272,512], index: 1, kind: input, shape index: {}]   ;;  %s21105_s0 = inlined_call_operand.vmem [shape: bf16[2,6272], index: 0, kind: input, shape index: {}]   ;;  %s21106_s4 = inlined_call_operand.<no memory space> [shape: f32[1,1], index: 4, kind: input, shape index: {}]   ;;  %s21107_s2 = inlined_call_operand.vmem [shape: f32[1,512], index: 2, kind: input, shape index: {}]   ;;  %s21108_s3 = inlined_call_operand.vmem [shape: f32[1,512], index: 3, kind: input, shape index: {}]   ;;  %s21109_s5 = inlined_call_operand.vmem [shape: f32[2,1], index: 5, kind: output, shape index: {}]  }
   0x1   :  { %v13708_v0 = vld [vmem:[%s21104_s1 + $0x4] ss:$16 sps:$4 sm:$0xff]   ;;  %v13710_v1 = vld [vmem:[%s21104_s1 + $0xc] ss:$16 sps:$4 sm:$0xff]   ;;  %v13712_v2 = vld [vmem:[%s21104_s1] ss:$16 sps:$4 sm:$0xff]   ;;  %v1629_v38 = vunpack.c.l.s4 %v16072_v37 }
   0x2   :  { %9824 = vmatprep.subr.bf16.mxu0 %v13708_v0  ;;  %v13713_v3 = vld [vmem:[%s21104_s1 + $0x8] ss:$16 sps:$4 sm:$0xff]   ;;  %10849 = vmatprep.subr.bf16.mxu1 %v13710_v1  ;;  %v13714_v4 = vld [vmem:[%s21104_s1 + $0x24] ss:$16 sps:$4 sm:$0xff]   ;;  %v13716_v5 = vld [vmem:[%s21104_s1 + $0x2c] ss:$16 sps:$4 sm:$0xff]  }
   0x3   :  { %9825 = vmatpush1.bf16.msra.mxu0 %v13712_v2  ;;  %10850 = vmatpush1.bf16.msra.mxu1 %v13713_v3  ;;  %v13718_v6 = vld [vmem:[%s21104_s1 + $0x20] ss:$16 sps:$4 sm:$0xff]   ;;  %v13719_v7 = vld [vmem:[%s21104_s1 + $0x28] ss:$16 sps:$4 sm:$0xff]   ;;  %v13720_v8 = vld [vmem:[%s21104_s1 + $0x44] ss:$16 sps:$4 sm:$0xff]   ;;  %v1630_v43 = vunpack.c.0.s8 %v1629_v38 }
   0x4   :  { %9826 = vmatprep.subr.bf16.mxu0 %v13714_v4  ;;  %10851 = vmatprep.subr.bf16.mxu1 %v13716_v5  ;;  %v13722_v9 = vld [vmem:[%s21104_s1 + $0x4c] ss:$16 sps:$4 sm:$0xff]   ;;  %v13724_v10 = vld [vmem:[%s21104_s1 + $0x40] ss:$16 sps:$4 sm:$0xff]   ;;  %v13725_v11 = vld [vmem:[%s21104_s1 + $0x48] ss:$16 sps:$4 sm:$0xff]  }
   0x5   :  { %v13726_v12 = vld [vmem:[%s21104_s1 + $0x64] ss:$16 sps:$4 sm:$0xff]   ;;  %v13728_v13 = vld [vmem:[%s21104_s1 + $0x6c] ss:$16 sps:$4 sm:$0xff]   ;;  %v13730_v14 = vld [vmem:[%s21104_s1 + $0x60] ss:$16 sps:$4 sm:$0xff]  }
   0x6   :  { %v13731_v15 = vld [vmem:[%s21104_s1 + $0x68] ss:$16 sps:$4 sm:$0xff]   ;;  %v13732_v16 = vld [vmem:[%s21104_s1 + $0x84] ss:$16 sps:$4 sm:$0xff]   ;;  %v13734_v17 = vld [vmem:[%s21104_s1 + $0x8c] ss:$16 sps:$4 sm:$0xff]  }
   0x7   :  { %9827 = vmatpush1.bf16.msra.mxu0 %v13718_v6  ;;  %10852 = vmatpush1.bf16.msra.mxu1 %v13719_v7  ;;  %v13736_v18 = vld [vmem:[%s21104_s1 + $0x80] ss:$16 sps:$4 sm:$0xff]   ;;  %v13737_v19 = vld [vmem:[%s21104_s1 + $0x88] ss:$16 sps:$4 sm:$0xff]   ;;  %v13738_v20 = vld [vmem:[%s21104_s1 + $0xa4] ss:$16 sps:$4 sm:$0xff]  }
   0x8   :  { %9828 = vmatprep.subr.bf16.mxu0 %v13720_v8  ;;  %10853 = vmatprep.subr.bf16.mxu1 %v13722_v9  ;;  %v13740_v21 = vld [vmem:[%s21104_s1 + $0xac] ss:$16 sps:$4 sm:$0xff]   ;;  %v13742_v22 = vld [vmem:[%s21104_s1 + $0xa0] ss:$16 sps:$4 sm:$0xff]   ;;  %v13743_v23 = vld [vmem:[%s21104_s1 + $0xa8] ss:$16 sps:$4 sm:$0xff]  }
   0x9   :  { %v13744_v24 = vld [vmem:[%s21104_s1 + $0xc4] ss:$16 sps:$4 sm:$0xff]   ;;  %v13746_v25 = vld [vmem:[%s21104_s1 + $0xcc] ss:$16 sps:$4 sm:$0xff]   ;;  %v13748_v26 = vld [vmem:[%s21104_s1 + $0xc0] ss:$16 sps:$4 sm:$0xff]  }
   0xa   :  { %v13749_v27 = vld [vmem:[%s21104_s1 + $0xc8] ss:$16 sps:$4 sm:$0xff]   ;;  %v13750_v28 = vld [vmem:[%s21104_s1 + $0xe4] ss:$16 sps:$4 sm:$0xff]   ;;  %v13752_v29 = vld [vmem:[%s21104_s1 + $0xec] ss:$16 sps:$4 sm:$0xff]  }
   0xb   :  { %9829 = vmatpush1.bf16.msra.mxu0 %v13724_v10  ;;  %10854 = vmatpush1.bf16.msra.mxu1 %v13725_v11  ;;  %v13754_v30 = vld [vmem:[%s21104_s1 + $0xe0] ss:$16 sps:$4 sm:$0xff]   ;;  %v13755_v31 = vld [vmem:[%s21104_s1 + $0xe8] ss:$16 sps:$4 sm:$0xff]   ;;  %v13756_v32 = vld [vmem:[%s21104_s1 + $0x104] ss:$16 sps:$4 sm:$0xff]  }
   0xc   :  { %9830 = vmatprep.subr.bf16.mxu0 %v13726_v12  ;;  %10855 = vmatprep.subr.bf16.mxu1 %v13728_v13  ;;  %v13758_v33 = vld [vmem:[%s21104_s1 + $0x10c] ss:$16 sps:$4 sm:$0xff]   ;;  %v13760_v34 = vld [vmem:[%s21104_s1 + $0x100] ss:$16 sps:$4 sm:$0xff]   ;;  %v13761_v35 = vld [vmem:[%s21104_s1 + $0x108] ss:$16 sps:$4 sm:$0xff]  }
   0xd   :  { %v13762_v39 = vld [vmem:[%s21104_s1 + $0x124] ss:$16 sps:$4 sm:$0xff]   ;;  %v13764_v40 = vld [vmem:[%s21104_s1 + $0x12c] ss:$16 sps:$4 sm:$0xff]   ;;  %v13766_v41 = vld [vmem:[%s21104_s1 + $0x120] ss:$16 sps:$4 sm:$0xff]  }
   0xe   :  { %v16221_v42 = vshrl.u32 %v1600_v36, 7  ;;  %v13767_v44 = vld [vmem:[%s21104_s1 + $0x128] ss:$16 sps:$4 sm:$0xff]   ;;  %v13768_v45 = vld [vmem:[%s21104_s1 + $0x144] ss:$16 sps:$4 sm:$0xff]  }
   0xf   :  { %9831 = vmatpush1.bf16.msra.mxu0 %v13730_v14  ;;  %10856 = vmatpush1.bf16.msra.mxu1 %v13731_v15  ;;  %v13770_v46 = vld [vmem:[%s21104_s1 + $0x14c] ss:$16 sps:$4 sm:$0xff]   ;;  %v13772_v47 = vld [vmem:[%s21104_s1 + $0x140] ss:$16 sps:$4 sm:$0xff]   ;;  %v13773_v48 = vld [vmem:[%s21104_s1 + $0x148] ss:$16 sps:$4 sm:$0xff]  }
  0x10   :  { %9832 = vmatprep.subr.bf16.mxu0 %v13732_v16  ;;  %10857 = vmatprep.subr.bf16.mxu1 %v13734_v17  ;;  %v16239_v49 = vsub.s32 %v1630_v43, %v16221_v42  ;;  %v13774_v50 = vld [vmem:[%s21104_s1 + $0x164] ss:$16 sps:$4 sm:$0xff]   ;;  %v13776_v51 = vld [vmem:[%s21104_s1 + $0x16c] ss:$16 sps:$4 sm:$0xff]   ;;  %v13778_v53 = vld [vmem:[%s21104_s1 + $0x160] ss:$16 sps:$4 sm:$0xff]  }
  0x11   :  { %v16250_v52 = vld [vmem:[%s21105_s0] sm:$0xff]  ;;  %v13779_v55 = vld [vmem:[%s21104_s1 + $0x168] ss:$16 sps:$4 sm:$0xff]   ;;  %v13782_v57 = vld [vmem:[%s21104_s1 + $0x18c] ss:$16 sps:$4 sm:$0xff]  }
  0x12   :  { %v1634_v54 = vrot.slane %v16250_v52, %v16239_v49  ;;  %v13780_v56 = vld [vmem:[%s21104_s1 + $0x184] ss:$16 sps:$4 sm:$0xff]   ;;  %v13784_v59 = vld [vmem:[%s21104_s1 + $0x180] ss:$16 sps:$4 sm:$0xff]   ;;  %v13785_v61 = vld [vmem:[%s21104_s1 + $0x188] ss:$16 sps:$4 sm:$0xff]  }
  0x13   :  { %9833 = vmatpush1.bf16.msra.mxu0 %v13736_v18  ;;  %10858 = vmatpush1.bf16.msra.mxu1 %v13737_v19  ;;  %v13786_v62 = vld [vmem:[%s21104_s1 + $0x1a4] ss:$16 sps:$4 sm:$0xff]   ;;  %v13788_v63 = vld [vmem:[%s21104_s1 + $0x1ac] ss:$16 sps:$4 sm:$0xff]   ;;  %v13790_v0 = vld [vmem:[%s21104_s1 + $0x1a0] ss:$16 sps:$4 sm:$0xff]  }
  0x14   :  { %9834 = vmatprep.subr.bf16.mxu0 %v13738_v20  ;;  %10859 = vmatprep.subr.bf16.mxu1 %v13740_v21  ;;  %v1642_v58 = vcombine.high %v1634_v54, %v1634_v54  ;;  %v13791_v1 = vld [vmem:[%s21104_s1 + $0x1a8] ss:$16 sps:$4 sm:$0xff]   ;;  %v13792_v2 = vld [vmem:[%s21104_s1 + $0x1c4] ss:$16 sps:$4 sm:$0xff]   ;;  %v13794_v3 = vld [vmem:[%s21104_s1 + $0x1cc] ss:$16 sps:$4 sm:$0xff]   ;;  %v16319_v13 = vrot.slane %v1634_v54, %v16239_v49 }
  0x15   :  { %v13796_v4 = vld [vmem:[%s21104_s1 + $0x1c0] ss:$16 sps:$4 sm:$0xff]   ;;  %v13797_v5 = vld [vmem:[%s21104_s1 + $0x1c8] ss:$16 sps:$4 sm:$0xff]   ;;  %v13798_v6 = vld [vmem:[%s21104_s1 + $0x1e4] ss:$16 sps:$4 sm:$0xff]  }
  0x16   :  { %v1664_v60 = vrot.slane %v1642_v58, %v16239_v49  ;;  %v13800_v7 = vld [vmem:[%s21104_s1 + $0x1ec] ss:$16 sps:$4 sm:$0xff]   ;;  %v13802_v8 = vld [vmem:[%s21104_s1 + $0x1e0] ss:$16 sps:$4 sm:$0xff]   ;;  %v13803_v9 = vld [vmem:[%s21104_s1 + $0x1e8] ss:$16 sps:$4 sm:$0xff]  }
  0x17   :  { %9835 = vmatpush1.bf16.msra.mxu0 %v13742_v22  ;;  %10860 = vmatpush1.bf16.msra.mxu1 %v13743_v23  ;;  %v13806_v10 = vld [vmem:[%s21104_s1 + $0x204] ss:$16 sps:$4 sm:$0xff]   ;;  %v13809_v11 = vld [vmem:[%s21104_s1 + $0x20c] ss:$16 sps:$4 sm:$0xff]   ;;  %v13804_v12 = vld [vmem:[%s21104_s1 + $0x200] ss:$16 sps:$4 sm:$0xff]  }
  0x18   :  { %9836 = vmatprep.subr.bf16.mxu0 %v13744_v24  ;;  %10861 = vmatprep.subr.bf16.mxu1 %v13746_v25  ;;  %v13807_v14 = vld [vmem:[%s21104_s1 + $0x208] ss:$16 sps:$4 sm:$0xff]   ;;  %v13812_v15 = vld [vmem:[%s21104_s1 + $0x224] ss:$16 sps:$4 sm:$0xff]   ;;  %v13815_v16 = vld [vmem:[%s21104_s1 + $0x22c] ss:$16 sps:$4 sm:$0xff]   ;;  %v1674_v17 = vcombine.high %v1664_v60, %v1664_v60 }
  0x19   :  { %9856 = vmatprep.mubr.bf16.mxu0 %v1664_v60  ;;  %10881 = vmatprep.mubr.bf16.mxu1 %v1664_v60  ;;  %v13810_v18 = vld [vmem:[%s21104_s1 + $0x220] ss:$16 sps:$4 sm:$0xff]   ;;  %v13813_v19 = vld [vmem:[%s21104_s1 + $0x228] ss:$16 sps:$4 sm:$0xff]   ;;  %v13818_v20 = vld [vmem:[%s21104_s1 + $0x244] ss:$16 sps:$4 sm:$0xff]  }
  0x1a   :  { %v13821_v21 = vld [vmem:[%s21104_s1 + $0x24c] ss:$16 sps:$4 sm:$0xff]   ;;  %v13816_v22 = vld [vmem:[%s21104_s1 + $0x240] ss:$16 sps:$4 sm:$0xff]   ;;  %v13819_v23 = vld [vmem:[%s21104_s1 + $0x248] ss:$16 sps:$4 sm:$0xff]  }
  0x1b   :  { %9837 = vmatpush1.bf16.msra.mxu0 %v13748_v26  ;;  %10862 = vmatpush1.bf16.msra.mxu1 %v13749_v27  ;;  %v13824_v24 = vld [vmem:[%s21104_s1 + $0x264] ss:$16 sps:$4 sm:$0xff]   ;;  %v13827_v25 = vld [vmem:[%s21104_s1 + $0x26c] ss:$16 sps:$4 sm:$0xff]   ;;  %v13822_v26 = vld [vmem:[%s21104_s1 + $0x260] ss:$16 sps:$4 sm:$0xff]  }
  0x1c   :  { %9838 = vmatprep.subr.bf16.mxu0 %v13750_v28  ;;  %10863 = vmatprep.subr.bf16.mxu1 %v13752_v29  ;;  %v13825_v27 = vld [vmem:[%s21104_s1 + $0x268] ss:$16 sps:$4 sm:$0xff]   ;;  %v13830_v28 = vld [vmem:[%s21104_s1 + $0x284] ss:$16 sps:$4 sm:$0xff]   ;;  %v13833_v29 = vld [vmem:[%s21104_s1 + $0x28c] ss:$16 sps:$4 sm:$0xff]  }
  0x1d   :  { %v13842_v36 = vld [vmem:[%s21104_s1 + $0x2c4] ss:$16 sps:$4 sm:$0xff]   ;;  %v13845_v37 = vld [vmem:[%s21104_s1 + $0x2cc] ss:$16 sps:$4 sm:$0xff]   ;;  %v13840_v38 = vld [vmem:[%s21104_s1 + $0x2c0] ss:$16 sps:$4 sm:$0xff]  }
  0x1e   :  { %v13846_v43 = vld [vmem:[%s21104_s1 + $0x2e0] ss:$16 sps:$4 sm:$0xff]   ;;  %v13861_v54 = vld [vmem:[%s21104_s1 + $0x328] ss:$16 sps:$4 sm:$0xff]   ;;  %v13875_v60 = vld [vmem:[%s21104_s1 + $0x36c] ss:$16 sps:$4 sm:$0xff]  }
  0x1f   :  { %9839 = vmatpush1.bf16.msra.mxu0 %v13754_v30  ;;  %10864 = vmatpush1.bf16.msra.mxu1 %v13755_v31  ;;  %v13828_v30 = vld [vmem:[%s21104_s1 + $0x280] ss:$16 sps:$4 sm:$0xff]   ;;  %v13831_v31 = vld [vmem:[%s21104_s1 + $0x288] ss:$16 sps:$4 sm:$0xff]  }
  0x20   :  { %9840 = vmatprep.subr.bf16.mxu0 %v13756_v32  ;;  %10865 = vmatprep.subr.bf16.mxu1 %v13758_v33  ;;  %v13836_v32 = vld [vmem:[%s21104_s1 + $0x2a4] ss:$16 sps:$4 sm:$0xff]   ;;  %v13839_v33 = vld [vmem:[%s21104_s1 + $0x2ac] ss:$16 sps:$4 sm:$0xff]   ;;  %v13867_v58 = vld [vmem:[%s21104_s1 + $0x348] ss:$16 sps:$4 sm:$0xff]  }
  0x23   :  { %9841 = vmatpush1.bf16.msra.mxu0 %v13760_v34  ;;  %10866 = vmatpush1.bf16.msra.mxu1 %v13761_v35  ;;  %v13834_v34 = vld [vmem:[%s21104_s1 + $0x2a0] ss:$16 sps:$4 sm:$0xff]   ;;  %v13837_v35 = vld [vmem:[%s21104_s1 + $0x2a8] ss:$16 sps:$4 sm:$0xff]  }
  0x24   :  { %9842 = vmatprep.subr.bf16.mxu0 %v13762_v39  ;;  %10867 = vmatprep.subr.bf16.mxu1 %v13764_v40  ;;  %v13843_v39 = vld [vmem:[%s21104_s1 + $0x2c8] ss:$16 sps:$4 sm:$0xff]   ;;  %v13848_v40 = vld [vmem:[%s21104_s1 + $0x2e4] ss:$16 sps:$4 sm:$0xff]  }
  0x27   :  { %9843 = vmatpush1.bf16.msra.mxu0 %v13766_v41  ;;  %10868 = vmatpush1.bf16.msra.mxu1 %v13767_v44  ;;  %v13851_v41 = vld [vmem:[%s21104_s1 + $0x2ec] ss:$16 sps:$4 sm:$0xff]   ;;  %v13849_v44 = vld [vmem:[%s21104_s1 + $0x2e8] ss:$16 sps:$4 sm:$0xff]  }
  0x28   :  { %9844 = vmatprep.subr.bf16.mxu0 %v13768_v45  ;;  %10869 = vmatprep.subr.bf16.mxu1 %v13770_v46  ;;  %v13854_v45 = vld [vmem:[%s21104_s1 + $0x304] ss:$16 sps:$4 sm:$0xff]   ;;  %v13857_v46 = vld [vmem:[%s21104_s1 + $0x30c] ss:$16 sps:$4 sm:$0xff]  }
  0x2b   :  { %9845 = vmatpush1.bf16.msra.mxu0 %v13772_v47  ;;  %10870 = vmatpush1.bf16.msra.mxu1 %v13773_v48  ;;  %v13852_v47 = vld [vmem:[%s21104_s1 + $0x300] ss:$16 sps:$4 sm:$0xff]   ;;  %v13855_v48 = vld [vmem:[%s21104_s1 + $0x308] ss:$16 sps:$4 sm:$0xff]  }
  0x2c   :  { %9846 = vmatprep.subr.bf16.mxu0 %v13774_v50  ;;  %10871 = vmatprep.subr.bf16.mxu1 %v13776_v51  ;;  %v13860_v50 = vld [vmem:[%s21104_s1 + $0x324] ss:$16 sps:$4 sm:$0xff]   ;;  %v13863_v51 = vld [vmem:[%s21104_s1 + $0x32c] ss:$16 sps:$4 sm:$0xff]  }
  0x2f   :  { %9847 = vmatpush1.bf16.msra.mxu0 %v13778_v53  ;;  %10872 = vmatpush1.bf16.msra.mxu1 %v13779_v55  ;;  %v13858_v53 = vld [vmem:[%s21104_s1 + $0x320] ss:$16 sps:$4 sm:$0xff]   ;;  %v13866_v55 = vld [vmem:[%s21104_s1 + $0x344] ss:$16 sps:$4 sm:$0xff]  }
  0x30   :  { %9848 = vmatprep.subr.bf16.mxu0 %v13780_v56  ;;  %10873 = vmatprep.subr.bf16.mxu1 %v13782_v57  ;;  %v13869_v56 = vld [vmem:[%s21104_s1 + $0x34c] ss:$16 sps:$4 sm:$0xff]   ;;  %v13864_v57 = vld [vmem:[%s21104_s1 + $0x340] ss:$16 sps:$4 sm:$0xff]  }
  0x33   :  { %9849 = vmatpush1.bf16.msra.mxu0 %v13784_v59  ;;  %10874 = vmatpush1.bf16.msra.mxu1 %v13785_v61  ;;  %v13872_v59 = vld [vmem:[%s21104_s1 + $0x364] ss:$16 sps:$4 sm:$0xff]   ;;  %v13870_v61 = vld [vmem:[%s21104_s1 + $0x360] ss:$16 sps:$4 sm:$0xff]  }
  0x34   :  { %9850 = vmatprep.subr.bf16.mxu0 %v13786_v62  ;;  %10875 = vmatprep.subr.bf16.mxu1 %v13788_v63  ;;  %v13873_v62 = vld [vmem:[%s21104_s1 + $0x368] ss:$16 sps:$4 sm:$0xff]   ;;  %v13878_v63 = vld [vmem:[%s21104_s1 + $0x384] ss:$16 sps:$4 sm:$0xff]  }
  0x37   :  { %9851 = vmatpush1.bf16.msra.mxu0 %v13790_v0  ;;  %10876 = vmatpush1.bf16.msra.mxu1 %v13791_v1  ;;  %v13881_v0 = vld [vmem:[%s21104_s1 + $0x38c] ss:$16 sps:$4 sm:$0xff]   ;;  %v13876_v1 = vld [vmem:[%s21104_s1 + $0x380] ss:$16 sps:$4 sm:$0xff]  }
  0x38   :  { %9852 = vmatprep.subr.bf16.mxu0 %v13792_v2  ;;  %10877 = vmatprep.subr.bf16.mxu1 %v13794_v3  ;;  %v13879_v2 = vld [vmem:[%s21104_s1 + $0x388] ss:$16 sps:$4 sm:$0xff]   ;;  %v13884_v3 = vld [vmem:[%s21104_s1 + $0x3a4] ss:$16 sps:$4 sm:$0xff]  }
  0x3b   :  { %9853 = vmatpush1.bf16.msra.mxu0 %v13796_v4  ;;  %10878 = vmatpush1.bf16.msra.mxu1 %v13797_v5  ;;  %v13887_v4 = vld [vmem:[%s21104_s1 + $0x3ac] ss:$16 sps:$4 sm:$0xff]   ;;  %v13882_v5 = vld [vmem:[%s21104_s1 + $0x3a0] ss:$16 sps:$4 sm:$0xff]  }
  0x3c   :  { %9854 = vmatprep.subr.bf16.mxu0 %v13798_v6  ;;  %10879 = vmatprep.subr.bf16.mxu1 %v13800_v7  ;;  %v13885_v6 = vld [vmem:[%s21104_s1 + $0x3a8] ss:$16 sps:$4 sm:$0xff]   ;;  %v13890_v7 = vld [vmem:[%s21104_s1 + $0x3c4] ss:$16 sps:$4 sm:$0xff]  }
  0x3f   :  { %9855 = vmatpush1.bf16.msra.mxu0 %v13802_v8  ;;  %10880 = vmatpush1.bf16.msra.mxu1 %v13803_v9  ;;  %v13893_v8 = vld [vmem:[%s21104_s1 + $0x3cc] ss:$16 sps:$4 sm:$0xff]   ;;  %v1627_v9 = vcombine.high %v16250_v52, %v16250_v52 }
  0x40   :  { %9865 = vmatprep.subr.bf16.mxu0 %v13806_v10  ;;  %10890 = vmatprep.subr.bf16.mxu1 %v13809_v11  ;;  %v13888_v10 = vld [vmem:[%s21104_s1 + $0x3c0] ss:$16 sps:$4 sm:$0xff]   ;;  %v13891_v11 = vld [vmem:[%s21104_s1 + $0x3c8] ss:$16 sps:$4 sm:$0xff]   ;;  %v13899_v52 = vld [vmem:[%s21104_s1 + $0x3ec] ss:$16 sps:$4 sm:$0xff]  }
  0x42   :  { %9857 = vmatmul.mubr.bf16.vlgmr.msra.gmra.mrb[0].mxu0 %v16319_v13  ;;  %10882 = vmatmul.mubr.bf16.vlgmr.msra.gmra.mrb[0].mxu1 %v16319_v13 }
  0x43   :  { %9866 = vmatpush1.bf16.msra.mxu0 %v13804_v12  ;;  %10891 = vmatpush1.bf16.msra.mxu1 %v13807_v14  ;;  %v13896_v12 = vld [vmem:[%s21104_s1 + $0x3e4] ss:$16 sps:$4 sm:$0xff]   ;;  %v16503_v14 = vrot.slane %v1627_v9, %v16239_v49  ;;  %v13975_v9 = vld [vmem:[%s21104_s1 + $0x588] ss:$16 sps:$4 sm:$0xff]  }
  0x44   :  { %9867 = vmatprep.subr.bf16.mxu0 %v13812_v15  ;;  %10892 = vmatprep.subr.bf16.mxu1 %v13815_v16  ;;  %v13894_v15 = vld [vmem:[%s21104_s1 + $0x3e0] ss:$16 sps:$4 sm:$0xff]   ;;  %v13897_v16 = vld [vmem:[%s21104_s1 + $0x3e8] ss:$16 sps:$4 sm:$0xff]  }
  0x45   :  { %9897 = vmatprep.mubr.bf16.mxu0 %v1674_v17  ;;  %10922 = vmatprep.mubr.bf16.mxu1 %v1674_v17  ;;  %v13902_v17 = vld [vmem:[%s21104_s1 + $0x404] ss:$16 sps:$4 sm:$0xff]  }
  0x47   :  { %9868 = vmatpush1.bf16.msra.mxu0 %v13810_v18  ;;  %10893 = vmatpush1.bf16.msra.mxu1 %v13813_v19  ;;  %v13905_v18 = vld [vmem:[%s21104_s1 + $0x40c] ss:$16 sps:$4 sm:$0xff]   ;;  %v1643_v19 = vcombine.high %v16503_v14, %v16503_v14 }
  0x48   :  { %9869 = vmatprep.subr.bf16.mxu0 %v13818_v20  ;;  %10894 = vmatprep.subr.bf16.mxu1 %v13821_v21  ;;  %v13900_v20 = vld [vmem:[%s21104_s1 + $0x400] ss:$16 sps:$4 sm:$0xff]   ;;  %v1672_v21 = vcombine.high %v16319_v13, %v16319_v13 }
  0x49   :  { %v13906_v13 = vld [vmem:[%s21104_s1 + $0x420] ss:$16 sps:$4 sm:$0xff]  }
  0x4b   :  { %9870 = vmatpush1.bf16.msra.mxu0 %v13816_v22  ;;  %10895 = vmatpush1.bf16.msra.mxu1 %v13819_v23  ;;  %v13903_v22 = vld [vmem:[%s21104_s1 + $0x408] ss:$16 sps:$4 sm:$0xff]   ;;  %v13908_v23 = vld [vmem:[%s21104_s1 + $0x424] ss:$16 sps:$4 sm:$0xff]  }
  0x4c   :  { %9871 = vmatprep.subr.bf16.mxu0 %v13824_v24  ;;  %10896 = vmatprep.subr.bf16.mxu1 %v13827_v25  ;;  %v13911_v24 = vld [vmem:[%s21104_s1 + $0x42c] ss:$16 sps:$4 sm:$0xff]   ;;  %v16534_v25 = vrot.slane %v1643_v19, %v16239_v49  ;;  %v13992_v19 = vld [vmem:[%s21104_s1 + $0x5e4] ss:$16 sps:$4 sm:$0xff]  }
  0x4f   :  { %9872 = vmatpush1.bf16.msra.mxu0 %v13822_v26  ;;  %10897 = vmatpush1.bf16.msra.mxu1 %v13825_v27  ;;  %v13909_v26 = vld [vmem:[%s21104_s1 + $0x428] ss:$16 sps:$4 sm:$0xff]   ;;  %v13914_v27 = vld [vmem:[%s21104_s1 + $0x444] ss:$16 sps:$4 sm:$0xff]  }
  0x50   :  { %9873 = vmatprep.subr.bf16.mxu0 %v13830_v28  ;;  %10898 = vmatprep.subr.bf16.mxu1 %v13833_v29  ;;  %v13917_v28 = vld [vmem:[%s21104_s1 + $0x44c] ss:$16 sps:$4 sm:$0xff]   ;;  %v13912_v29 = vld [vmem:[%s21104_s1 + $0x440] ss:$16 sps:$4 sm:$0xff]  }
  0x53   :  { %9874 = vmatpush1.bf16.msra.mxu0 %v13828_v30  ;;  %10899 = vmatpush1.bf16.msra.mxu1 %v13831_v31  ;;  %v13915_v30 = vld [vmem:[%s21104_s1 + $0x448] ss:$16 sps:$4 sm:$0xff]   ;;  %v13920_v31 = vld [vmem:[%s21104_s1 + $0x464] ss:$16 sps:$4 sm:$0xff]  }
  0x54   :  { %9875 = vmatprep.subr.bf16.mxu0 %v13836_v32  ;;  %10900 = vmatprep.subr.bf16.mxu1 %v13839_v33  ;;  %v13923_v32 = vld [vmem:[%s21104_s1 + $0x46c] ss:$16 sps:$4 sm:$0xff]   ;;  %v13918_v33 = vld [vmem:[%s21104_s1 + $0x460] ss:$16 sps:$4 sm:$0xff]  }
  0x57   :  { %9876 = vmatpush1.bf16.msra.mxu0 %v13834_v34  ;;  %10901 = vmatpush1.bf16.msra.mxu1 %v13837_v35  ;;  %v13921_v34 = vld [vmem:[%s21104_s1 + $0x468] ss:$16 sps:$4 sm:$0xff]   ;;  %v13926_v35 = vld [vmem:[%s21104_s1 + $0x484] ss:$16 sps:$4 sm:$0xff]  }
  0x58   :  { %9877 = vmatprep.subr.bf16.mxu0 %v13842_v36  ;;  %10902 = vmatprep.subr.bf16.mxu1 %v13845_v37  ;;  %v13929_v36 = vld [vmem:[%s21104_s1 + $0x48c] ss:$16 sps:$4 sm:$0xff]   ;;  %v13924_v37 = vld [vmem:[%s21104_s1 + $0x480] ss:$16 sps:$4 sm:$0xff]  }
  0x5b   :  { %9878 = vmatpush1.bf16.msra.mxu0 %v13840_v38  ;;  %10903 = vmatpush1.bf16.msra.mxu1 %v13843_v39  ;;  %v13927_v38 = vld [vmem:[%s21104_s1 + $0x488] ss:$16 sps:$4 sm:$0xff]   ;;  %v13932_v39 = vld [vmem:[%s21104_s1 + $0x4a4] ss:$16 sps:$4 sm:$0xff]  }
  0x5c   :  { %9879 = vmatprep.subr.bf16.mxu0 %v13848_v40  ;;  %10904 = vmatprep.subr.bf16.mxu1 %v13851_v41  ;;  %v13935_v40 = vld [vmem:[%s21104_s1 + $0x4ac] ss:$16 sps:$4 sm:$0xff]   ;;  %v13930_v41 = vld [vmem:[%s21104_s1 + $0x4a0] ss:$16 sps:$4 sm:$0xff]  }
  0x5f   :  { %9880 = vmatpush1.bf16.msra.mxu0 %v13846_v43  ;;  %10905 = vmatpush1.bf16.msra.mxu1 %v13849_v44  ;;  %v13933_v43 = vld [vmem:[%s21104_s1 + $0x4a8] ss:$16 sps:$4 sm:$0xff]   ;;  %v13938_v44 = vld [vmem:[%s21104_s1 + $0x4c4] ss:$16 sps:$4 sm:$0xff]  }
  0x60   :  { %9881 = vmatprep.subr.bf16.mxu0 %v13854_v45  ;;  %10906 = vmatprep.subr.bf16.mxu1 %v13857_v46  ;;  %v13941_v45 = vld [vmem:[%s21104_s1 + $0x4cc] ss:$16 sps:$4 sm:$0xff]   ;;  %v13936_v46 = vld [vmem:[%s21104_s1 + $0x4c0] ss:$16 sps:$4 sm:$0xff]  }
  0x63   :  { %9882 = vmatpush1.bf16.msra.mxu0 %v13852_v47  ;;  %10907 = vmatpush1.bf16.msra.mxu1 %v13855_v48  ;;  %v13939_v47 = vld [vmem:[%s21104_s1 + $0x4c8] ss:$16 sps:$4 sm:$0xff]   ;;  %v13944_v48 = vld [vmem:[%s21104_s1 + $0x4e4] ss:$16 sps:$4 sm:$0xff]  }
  0x64   :  { %9883 = vmatprep.subr.bf16.mxu0 %v13860_v50  ;;  %10908 = vmatprep.subr.bf16.mxu1 %v13863_v51  ;;  %v13947_v50 = vld [vmem:[%s21104_s1 + $0x4ec] ss:$16 sps:$4 sm:$0xff]   ;;  %v13942_v51 = vld [vmem:[%s21104_s1 + $0x4e0] ss:$16 sps:$4 sm:$0xff]  }
  0x67   :  { %9884 = vmatpush1.bf16.msra.mxu0 %v13858_v53  ;;  %10909 = vmatpush1.bf16.msra.mxu1 %v13861_v54  ;;  %v13945_v53 = vld [vmem:[%s21104_s1 + $0x4e8] ss:$16 sps:$4 sm:$0xff]   ;;  %v13950_v54 = vld [vmem:[%s21104_s1 + $0x504] ss:$16 sps:$4 sm:$0xff]  }
  0x68   :  { %9885 = vmatprep.subr.bf16.mxu0 %v13866_v55  ;;  %10910 = vmatprep.subr.bf16.mxu1 %v13869_v56  ;;  %v13953_v55 = vld [vmem:[%s21104_s1 + $0x50c] ss:$16 sps:$4 sm:$0xff]   ;;  %v13948_v56 = vld [vmem:[%s21104_s1 + $0x500] ss:$16 sps:$4 sm:$0xff]  }
  0x6b   :  { %9886 = vmatpush1.bf16.msra.mxu0 %v13864_v57  ;;  %10911 = vmatpush1.bf16.msra.mxu1 %v13867_v58  ;;  %v13951_v57 = vld [vmem:[%s21104_s1 + $0x508] ss:$16 sps:$4 sm:$0xff]   ;;  %v13956_v58 = vld [vmem:[%s21104_s1 + $0x524] ss:$16 sps:$4 sm:$0xff]  }
  0x6c   :  { %9887 = vmatprep.subr.bf16.mxu0 %v13872_v59  ;;  %10912 = vmatprep.subr.bf16.mxu1 %v13875_v60  ;;  %v13959_v59 = vld [vmem:[%s21104_s1 + $0x52c] ss:$16 sps:$4 sm:$0xff]   ;;  %v13954_v60 = vld [vmem:[%s21104_s1 + $0x520] ss:$16 sps:$4 sm:$0xff]  }
  0x6f   :  { %9888 = vmatpush1.bf16.msra.mxu0 %v13870_v61  ;;  %10913 = vmatpush1.bf16.msra.mxu1 %v13873_v62  ;;  %v13957_v61 = vld [vmem:[%s21104_s1 + $0x528] ss:$16 sps:$4 sm:$0xff]   ;;  %v13962_v62 = vld [vmem:[%s21104_s1 + $0x544] ss:$16 sps:$4 sm:$0xff]  }
  0x70   :  { %9889 = vmatprep.subr.bf16.mxu0 %v13878_v63  ;;  %10914 = vmatprep.subr.bf16.mxu1 %v13881_v0  ;;  %v13965_v63 = vld [vmem:[%s21104_s1 + $0x54c] ss:$16 sps:$4 sm:$0xff]   ;;  %v13960_v0 = vld [vmem:[%s21104_s1 + $0x540] ss:$16 sps:$4 sm:$0xff]  }
  0x73   :  { %9890 = vmatpush1.bf16.msra.mxu0 %v13876_v1  ;;  %10915 = vmatpush1.bf16.msra.mxu1 %v13879_v2  ;;  %v13963_v1 = vld [vmem:[%s21104_s1 + $0x548] ss:$16 sps:$4 sm:$0xff]   ;;  %v13968_v2 = vld [vmem:[%s21104_s1 + $0x564] ss:$16 sps:$4 sm:$0xff]  }
  0x74   :  { %9891 = vmatprep.subr.bf16.mxu0 %v13884_v3  ;;  %10916 = vmatprep.subr.bf16.mxu1 %v13887_v4  ;;  %v13971_v3 = vld [vmem:[%s21104_s1 + $0x56c] ss:$16 sps:$4 sm:$0xff]   ;;  %v13966_v4 = vld [vmem:[%s21104_s1 + $0x560] ss:$16 sps:$4 sm:$0xff]  }
  0x77   :  { %9892 = vmatpush1.bf16.msra.mxu0 %v13882_v5  ;;  %10917 = vmatpush1.bf16.msra.mxu1 %v13885_v6  ;;  %v13969_v5 = vld [vmem:[%s21104_s1 + $0x568] ss:$16 sps:$4 sm:$0xff]   ;;  %v13974_v6 = vld [vmem:[%s21104_s1 + $0x584] ss:$16 sps:$4 sm:$0xff]  }
  0x78   :  { %9893 = vmatprep.subr.bf16.mxu0 %v13890_v7  ;;  %10918 = vmatprep.subr.bf16.mxu1 %v13893_v8  ;;  %v13977_v7 = vld [vmem:[%s21104_s1 + $0x58c] ss:$16 sps:$4 sm:$0xff]   ;;  %v13972_v8 = vld [vmem:[%s21104_s1 + $0x580] ss:$16 sps:$4 sm:$0xff]  }
  0x7b   :  { %9894 = vmatpush1.bf16.msra.mxu0 %v13888_v10  ;;  %10919 = vmatpush1.bf16.msra.mxu1 %v13891_v11  ;;  %v13980_v10 = vld [vmem:[%s21104_s1 + $0x5a4] ss:$16 sps:$4 sm:$0xff]   ;;  %v13983_v11 = vld [vmem:[%s21104_s1 + $0x5ac] ss:$16 sps:$4 sm:$0xff]  }
  0x7c   :  { %9895 = vmatprep.subr.bf16.mxu0 %v13896_v12  ;;  %10920 = vmatprep.subr.bf16.mxu1 %v13899_v52  ;;  %v13978_v12 = vld [vmem:[%s21104_s1 + $0x5a0] ss:$16 sps:$4 sm:$0xff]   ;;  %v13981_v52 = vld [vmem:[%s21104_s1 + $0x5a8] ss:$16 sps:$4 sm:$0xff]  }
  0x7f   :  { %9896 = vmatpush1.bf16.msra.mxu0 %v13894_v15  ;;  %10921 = vmatpush1.bf16.msra.mxu1 %v13897_v16  ;;  %v13986_v15 = vld [vmem:[%s21104_s1 + $0x5c4] ss:$16 sps:$4 sm:$0xff]   ;;  %v13989_v16 = vld [vmem:[%s21104_s1 + $0x5cc] ss:$16 sps:$4 sm:$0xff]  }
  0x80   :  { %9906 = vmatprep.subr.bf16.mxu0 %v13902_v17  ;;  %10931 = vmatprep.subr.bf16.mxu1 %v13905_v18  ;;  %v13984_v17 = vld [vmem:[%s21104_s1 + $0x5c0] ss:$16 sps:$4 sm:$0xff]   ;;  %v13987_v18 = vld [vmem:[%s21104_s1 + $0x5c8] ss:$16 sps:$4 sm:$0xff]  }
  0x82   :  { %9898 = vmatmul.mubr.bf16.vlgmr.msra.gmra.mrb[0].mxu0 %v1672_v21  ;;  %10923 = vmatmul.mubr.bf16.vlgmr.msra.gmra.mrb[0].mxu1 %v1672_v21  ;;  %v13990_v21 = vld [vmem:[%s21104_s1 + $0x5e0] ss:$16 sps:$4 sm:$0xff]  }
  0x83   :  { %9907 = vmatpush1.bf16.msra.mxu0 %v13900_v20  ;;  %10932 = vmatpush1.bf16.msra.mxu1 %v13903_v22  ;;  %v13995_v20 = vld [vmem:[%s21104_s1 + $0x5ec] ss:$16 sps:$4 sm:$0xff]   ;;  %v13993_v22 = vld [vmem:[%s21104_s1 + $0x5e8] ss:$16 sps:$4 sm:$0xff]  }
  0x84   :  { %9908 = vmatprep.subr.bf16.mxu0 %v13908_v23  ;;  %10933 = vmatprep.subr.bf16.mxu1 %v13911_v24  ;;  %v13999_v23 = vld [vmem:[%s21104_s1 + $0x604] ss:$16 sps:$4 sm:$0xff]   ;;  %v14002_v24 = vld [vmem:[%s21104_s1 + $0x60c] ss:$16 sps:$4 sm:$0xff]  }
  0x85   :  { %9938 = vmatprep.mubr.bf16.mxu0 %v16534_v25  ;;  %10963 = vmatprep.mubr.bf16.mxu1 %v16534_v25 }
  0x87   :  { %9909 = vmatpush1.bf16.msra.mxu0 %v13906_v13  ;;  %10934 = vmatpush1.bf16.msra.mxu1 %v13909_v26  ;;  %v13997_v13 = vld [vmem:[%s21104_s1 + $0x600] ss:$16 sps:$4 sm:$0xff]   ;;  %v16723_v26 = vrot.slane %v16503_v14, %v16239_v49  ;;  %v1675_v14 = vcombine.high %v16534_v25, %v16534_v25  ;;  %v14011_v25 = vld [vmem:[%s21104_s1 + $0x644] ss:$16 sps:$4 sm:$0xff]  }
  0x88   :  { %9910 = vmatprep.subr.bf16.mxu0 %v13914_v27  ;;  %10935 = vmatprep.subr.bf16.mxu1 %v13917_v28  ;;  %v14000_v27 = vld [vmem:[%s21104_s1 + $0x608] ss:$16 sps:$4 sm:$0xff]   ;;  %v14005_v28 = vld [vmem:[%s21104_s1 + $0x624] ss:$16 sps:$4 sm:$0xff]  }
  0x8b   :  { %9911 = vmatpush1.bf16.msra.mxu0 %v13912_v29  ;;  %10936 = vmatpush1.bf16.msra.mxu1 %v13915_v30  ;;  %v14008_v29 = vld [vmem:[%s21104_s1 + $0x62c] ss:$16 sps:$4 sm:$0xff]   ;;  %v14003_v30 = vld [vmem:[%s21104_s1 + $0x620] ss:$16 sps:$4 sm:$0xff]  }
  0x8c   :  { %9912 = vmatprep.subr.bf16.mxu0 %v13920_v31  ;;  %10937 = vmatprep.subr.bf16.mxu1 %v13923_v32  ;;  %v14006_v31 = vld [vmem:[%s21104_s1 + $0x628] ss:$16 sps:$4 sm:$0xff]   ;;  %v14014_v32 = vld [vmem:[%s21104_s1 + $0x64c] ss:$16 sps:$4 sm:$0xff]  }
  0x8f   :  { %9913 = vmatpush1.bf16.msra.mxu0 %v13918_v33  ;;  %10938 = vmatpush1.bf16.msra.mxu1 %v13921_v34  ;;  %v14009_v33 = vld [vmem:[%s21104_s1 + $0x640] ss:$16 sps:$4 sm:$0xff]   ;;  %v14012_v34 = vld [vmem:[%s21104_s1 + $0x648] ss:$16 sps:$4 sm:$0xff]  }
  0x90   :  { %9914 = vmatprep.subr.bf16.mxu0 %v13926_v35  ;;  %10939 = vmatprep.subr.bf16.mxu1 %v13929_v36  ;;  %v14017_v35 = vld [vmem:[%s21104_s1 + $0x664] ss:$16 sps:$4 sm:$0xff]   ;;  %v14020_v36 = vld [vmem:[%s21104_s1 + $0x66c] ss:$16 sps:$4 sm:$0xff]  }
  0x93   :  { %9915 = vmatpush1.bf16.msra.mxu0 %v13924_v37  ;;  %10940 = vmatpush1.bf16.msra.mxu1 %v13927_v38  ;;  %v14015_v37 = vld [vmem:[%s21104_s1 + $0x660] ss:$16 sps:$4 sm:$0xff]   ;;  %v14018_v38 = vld [vmem:[%s21104_s1 + $0x668] ss:$16 sps:$4 sm:$0xff]  }
  0x94   :  { %9916 = vmatprep.subr.bf16.mxu0 %v13932_v39  ;;  %10941 = vmatprep.subr.bf16.mxu1 %v13935_v40  ;;  %v14023_v39 = vld [vmem:[%s21104_s1 + $0x684] ss:$16 sps:$4 sm:$0xff]   ;;  %v14026_v40 = vld [vmem:[%s21104_s1 + $0x68c] ss:$16 sps:$4 sm:$0xff]  }
  0x97   :  { %9917 = vmatpush1.bf16.msra.mxu0 %v13930_v41  ;;  %10942 = vmatpush1.bf16.msra.mxu1 %v13933_v43  ;;  %v14021_v41 = vld [vmem:[%s21104_s1 + $0x680] ss:$16 sps:$4 sm:$0xff]   ;;  %v14024_v43 = vld [vmem:[%s21104_s1 + $0x688] ss:$16 sps:$4 sm:$0xff]  }
  0x98   :  { %9918 = vmatprep.subr.bf16.mxu0 %v13938_v44  ;;  %10943 = vmatprep.subr.bf16.mxu1 %v13941_v45  ;;  %v14029_v44 = vld [vmem:[%s21104_s1 + $0x6a4] ss:$16 sps:$4 sm:$0xff]   ;;  %v14032_v45 = vld [vmem:[%s21104_s1 + $0x6ac] ss:$16 sps:$4 sm:$0xff]  }
  0x9b   :  { %9919 = vmatpush1.bf16.msra.mxu0 %v13936_v46  ;;  %10944 = vmatpush1.bf16.msra.mxu1 %v13939_v47  ;;  %v14027_v46 = vld [vmem:[%s21104_s1 + $0x6a0] ss:$16 sps:$4 sm:$0xff]   ;;  %v14030_v47 = vld [vmem:[%s21104_s1 + $0x6a8] ss:$16 sps:$4 sm:$0xff]  }
  0x9c   :  { %9920 = vmatprep.subr.bf16.mxu0 %v13944_v48  ;;  %10945 = vmatprep.subr.bf16.mxu1 %v13947_v50  ;;  %v14035_v48 = vld [vmem:[%s21104_s1 + $0x6c4] ss:$16 sps:$4 sm:$0xff]   ;;  %v14038_v50 = vld [vmem:[%s21104_s1 + $0x6cc] ss:$16 sps:$4 sm:$0xff]  }
  0x9f   :  { %9921 = vmatpush1.bf16.msra.mxu0 %v13942_v51  ;;  %10946 = vmatpush1.bf16.msra.mxu1 %v13945_v53  ;;  %v14033_v51 = vld [vmem:[%s21104_s1 + $0x6c0] ss:$16 sps:$4 sm:$0xff]   ;;  %v14036_v53 = vld [vmem:[%s21104_s1 + $0x6c8] ss:$16 sps:$4 sm:$0xff]  }
  0xa0   :  { %9922 = vmatprep.subr.bf16.mxu0 %v13950_v54  ;;  %10947 = vmatprep.subr.bf16.mxu1 %v13953_v55  ;;  %v14041_v54 = vld [vmem:[%s21104_s1 + $0x6e4] ss:$16 sps:$4 sm:$0xff]   ;;  %v14044_v55 = vld [vmem:[%s21104_s1 + $0x6ec] ss:$16 sps:$4 sm:$0xff]  }
  0xa3   :  { %9923 = vmatpush1.bf16.msra.mxu0 %v13948_v56  ;;  %10948 = vmatpush1.bf16.msra.mxu1 %v13951_v57  ;;  %v14039_v56 = vld [vmem:[%s21104_s1 + $0x6e0] ss:$16 sps:$4 sm:$0xff]   ;;  %v14042_v57 = vld [vmem:[%s21104_s1 + $0x6e8] ss:$16 sps:$4 sm:$0xff]  }
  0xa4   :  { %9924 = vmatprep.subr.bf16.mxu0 %v13956_v58  ;;  %10949 = vmatprep.subr.bf16.mxu1 %v13959_v59  ;;  %v14047_v58 = vld [vmem:[%s21104_s1 + $0x704] ss:$16 sps:$4 sm:$0xff]   ;;  %v14050_v59 = vld [vmem:[%s21104_s1 + $0x70c] ss:$16 sps:$4 sm:$0xff]  }
  0xa7   :  { %9925 = vmatpush1.bf16.msra.mxu0 %v13954_v60  ;;  %10950 = vmatpush1.bf16.msra.mxu1 %v13957_v61  ;;  %v14045_v60 = vld [vmem:[%s21104_s1 + $0x700] ss:$16 sps:$4 sm:$0xff]   ;;  %v14048_v61 = vld [vmem:[%s21104_s1 + $0x708] ss:$16 sps:$4 sm:$0xff]  }
  0xa8   :  { %9926 = vmatprep.subr.bf16.mxu0 %v13962_v62  ;;  %10951 = vmatprep.subr.bf16.mxu1 %v13965_v63  ;;  %v14053_v62 = vld [vmem:[%s21104_s1 + $0x724] ss:$16 sps:$4 sm:$0xff]   ;;  %v14056_v63 = vld [vmem:[%s21104_s1 + $0x72c] ss:$16 sps:$4 sm:$0xff]  }
  0xab   :  { %9927 = vmatpush1.bf16.msra.mxu0 %v13960_v0  ;;  %10952 = vmatpush1.bf16.msra.mxu1 %v13963_v1  ;;  %v14051_v0 = vld [vmem:[%s21104_s1 + $0x720] ss:$16 sps:$4 sm:$0xff]   ;;  %v14054_v1 = vld [vmem:[%s21104_s1 + $0x728] ss:$16 sps:$4 sm:$0xff]  }
  0xac   :  { %9928 = vmatprep.subr.bf16.mxu0 %v13968_v2  ;;  %10953 = vmatprep.subr.bf16.mxu1 %v13971_v3  ;;  %v14059_v2 = vld [vmem:[%s21104_s1 + $0x744] ss:$16 sps:$4 sm:$0xff]   ;;  %v14062_v3 = vld [vmem:[%s21104_s1 + $0x74c] ss:$16 sps:$4 sm:$0xff]  }
  0xaf   :  { %9929 = vmatpush1.bf16.msra.mxu0 %v13966_v4  ;;  %10954 = vmatpush1.bf16.msra.mxu1 %v13969_v5  ;;  %v14057_v4 = vld [vmem:[%s21104_s1 + $0x740] ss:$16 sps:$4 sm:$0xff]   ;;  %v14060_v5 = vld [vmem:[%s21104_s1 + $0x748] ss:$16 sps:$4 sm:$0xff]  }
  0xb0   :  { %9930 = vmatprep.subr.bf16.mxu0 %v13974_v6  ;;  %10955 = vmatprep.subr.bf16.mxu1 %v13977_v7  ;;  %v14065_v6 = vld [vmem:[%s21104_s1 + $0x764] ss:$16 sps:$4 sm:$0xff]   ;;  %v14068_v7 = vld [vmem:[%s21104_s1 + $0x76c] ss:$16 sps:$4 sm:$0xff]  }
  0xb3   :  { %9931 = vmatpush1.bf16.msra.mxu0 %v13972_v8  ;;  %10956 = vmatpush1.bf16.msra.mxu1 %v13975_v9  ;;  %v14063_v8 = vld [vmem:[%s21104_s1 + $0x760] ss:$16 sps:$4 sm:$0xff]   ;;  %v14066_v9 = vld [vmem:[%s21104_s1 + $0x768] ss:$16 sps:$4 sm:$0xff]  }
  0xb4   :  { %9932 = vmatprep.subr.bf16.mxu0 %v13980_v10  ;;  %10957 = vmatprep.subr.bf16.mxu1 %v13983_v11  ;;  %v14071_v10 = vld [vmem:[%s21104_s1 + $0x784] ss:$16 sps:$4 sm:$0xff]   ;;  %v14074_v11 = vld [vmem:[%s21104_s1 + $0x78c] ss:$16 sps:$4 sm:$0xff]  }
  0xb7   :  { %9933 = vmatpush1.bf16.msra.mxu0 %v13978_v12  ;;  %10958 = vmatpush1.bf16.msra.mxu1 %v13981_v52  ;;  %v14069_v12 = vld [vmem:[%s21104_s1 + $0x780] ss:$16 sps:$4 sm:$0xff]   ;;  %v14072_v52 = vld [vmem:[%s21104_s1 + $0x788] ss:$16 sps:$4 sm:$0xff]  }
  0xb8   :  { %9934 = vmatprep.subr.bf16.mxu0 %v13986_v15  ;;  %10959 = vmatprep.subr.bf16.mxu1 %v13989_v16  ;;  %v14077_v15 = vld [vmem:[%s21104_s1 + $0x7a4] ss:$16 sps:$4 sm:$0xff]   ;;  %v14080_v16 = vld [vmem:[%s21104_s1 + $0x7ac] ss:$16 sps:$4 sm:$0xff]  }
  0xbb   :  { %9935 = vmatpush1.bf16.msra.mxu0 %v13984_v17  ;;  %10960 = vmatpush1.bf16.msra.mxu1 %v13987_v18  ;;  %v14075_v17 = vld [vmem:[%s21104_s1 + $0x7a0] ss:$16 sps:$4 sm:$0xff]   ;;  %v14078_v18 = vld [vmem:[%s21104_s1 + $0x7a8] ss:$16 sps:$4 sm:$0xff]  }
  0xbc   :  { %9936 = vmatprep.subr.bf16.mxu0 %v13992_v19  ;;  %10961 = vmatprep.subr.bf16.mxu1 %v13995_v20  ;;  %v14083_v19 = vld [vmem:[%s21104_s1 + $0x7c4] ss:$16 sps:$4 sm:$0xff]   ;;  %v14086_v20 = vld [vmem:[%s21104_s1 + $0x7cc] ss:$16 sps:$4 sm:$0xff]  }
  0xbf   :  { %9937 = vmatpush1.bf16.msra.mxu0 %v13990_v21  ;;  %10962 = vmatpush1.bf16.msra.mxu1 %v13993_v22  ;;  %v16897_v21 = vld.sshfl [vmem:[%s21105_s0 + $0x8] sm:$0xff pattern:$0x75316420]  ;;  %v14081_v22 = vld [vmem:[%s21104_s1 + $0x7c0] ss:$16 sps:$4 sm:$0xff]  }
  0xc0   :  { %9947 = vmatprep.subr.bf16.mxu0 %v13999_v23  ;;  %10972 = vmatprep.subr.bf16.mxu1 %v14002_v24  ;;  %v14084_v23 = vld [vmem:[%s21104_s1 + $0x7c8] ss:$16 sps:$4 sm:$0xff]   ;;  %v14089_v24 = vld [vmem:[%s21104_s1 + $0x7e4] ss:$16 sps:$4 sm:$0xff]  }
  0xc2   :  { %9939 = vmatmul.mubr.bf16.vlgmr.msra.gmra.mrb[0].mxu0 %v16723_v26  ;;  %10964 = vmatmul.mubr.bf16.vlgmr.msra.gmra.mrb[0].mxu1 %v16723_v26 }
  0xc3   :  { %9948 = vmatpush1.bf16.msra.mxu0 %v13997_v13  ;;  %10973 = vmatpush1.bf16.msra.mxu1 %v14000_v27  ;;  %v14092_v13 = vld [vmem:[%s21104_s1 + $0x7ec] ss:$16 sps:$4 sm:$0xff]   ;;  %v14087_v27 = vld [vmem:[%s21104_s1 + $0x7e0] ss:$16 sps:$4 sm:$0xff]  }
  0xc4   :  { %9949 = vmatprep.subr.bf16.mxu0 %v14005_v28  ;;  %10974 = vmatprep.subr.bf16.mxu1 %v14008_v29  ;;  %v14090_v28 = vld [vmem:[%s21104_s1 + $0x7e8] ss:$16 sps:$4 sm:$0xff]   ;;  %v14095_v29 = vld [vmem:[%s21104_s1 + $0x804] ss:$16 sps:$4 sm:$0xff]  }
  0xc5   :  { %9979 = vmatprep.mubr.bf16.mxu0 %v1675_v14  ;;  %11004 = vmatprep.mubr.bf16.mxu1 %v1675_v14  ;;  %v14098_v14 = vld [vmem:[%s21104_s1 + $0x80c] ss:$16 sps:$4 sm:$0xff]  }
  0xc7   :  { %9950 = vmatpush1.bf16.msra.mxu0 %v14003_v30  ;;  %10975 = vmatpush1.bf16.msra.mxu1 %v14006_v31  ;;  %v1691_v30 = vcombine.high %v16897_v21, %v16897_v21  ;;  %v1673_v31 = vcombine.high %v16723_v26, %v16723_v26  ;;  %v14104_v26 = vld [vmem:[%s21104_s1 + $0x82c] ss:$16 sps:$4 sm:$0xff]  }
  0xc8   :  { %9951 = vmatprep.subr.bf16.mxu0 %v14011_v25  ;;  %10976 = vmatprep.subr.bf16.mxu1 %v14014_v32  ;;  %v14093_v25 = vld [vmem:[%s21104_s1 + $0x800] ss:$16 sps:$4 sm:$0xff]   ;;  %v14096_v32 = vld [vmem:[%s21104_s1 + $0x808] ss:$16 sps:$4 sm:$0xff]  }
  0xcb   :  { %9952 = vmatpush1.bf16.msra.mxu0 %v14009_v33  ;;  %10977 = vmatpush1.bf16.msra.mxu1 %v14012_v34  ;;  %v14101_v33 = vld [vmem:[%s21104_s1 + $0x824] ss:$16 sps:$4 sm:$0xff]   ;;  %v16940_v34 = vrot.slane %v1691_v30, %v16239_v49 }
  0xcc   :  { %9953 = vmatprep.subr.bf16.mxu0 %v14017_v35  ;;  %10978 = vmatprep.subr.bf16.mxu1 %v14020_v36  ;;  %v14099_v35 = vld [vmem:[%s21104_s1 + $0x820] ss:$16 sps:$4 sm:$0xff]   ;;  %v14102_v36 = vld [vmem:[%s21104_s1 + $0x828] ss:$16 sps:$4 sm:$0xff]   ;;  %v14185_v30 = vld [vmem:[%s21104_s1 + $0x9e4] ss:$16 sps:$4 sm:$0xff]  }
  0xcf   :  { %9954 = vmatpush1.bf16.msra.mxu0 %v14015_v37  ;;  %10979 = vmatpush1.bf16.msra.mxu1 %v14018_v38  ;;  %v14107_v37 = vld [vmem:[%s21104_s1 + $0x844] ss:$16 sps:$4 sm:$0xff]   ;;  %v14110_v38 = vld [vmem:[%s21104_s1 + $0x84c] ss:$16 sps:$4 sm:$0xff]  }
  0xd0   :  { %9955 = vmatprep.subr.bf16.mxu0 %v14023_v39  ;;  %10980 = vmatprep.subr.bf16.mxu1 %v14026_v40  ;;  %v14105_v39 = vld [vmem:[%s21104_s1 + $0x840] ss:$16 sps:$4 sm:$0xff]   ;;  %v14108_v40 = vld [vmem:[%s21104_s1 + $0x848] ss:$16 sps:$4 sm:$0xff]  }
  0xd3   :  { %9956 = vmatpush1.bf16.msra.mxu0 %v14021_v41  ;;  %10981 = vmatpush1.bf16.msra.mxu1 %v14024_v43  ;;  %v14113_v41 = vld [vmem:[%s21104_s1 + $0x864] ss:$16 sps:$4 sm:$0xff]   ;;  %v14116_v43 = vld [vmem:[%s21104_s1 + $0x86c] ss:$16 sps:$4 sm:$0xff]  }
  0xd4   :  { %9957 = vmatprep.subr.bf16.mxu0 %v14029_v44  ;;  %10982 = vmatprep.subr.bf16.mxu1 %v14032_v45  ;;  %v14111_v44 = vld [vmem:[%s21104_s1 + $0x860] ss:$16 sps:$4 sm:$0xff]   ;;  %v14114_v45 = vld [vmem:[%s21104_s1 + $0x868] ss:$16 sps:$4 sm:$0xff]  }
  0xd7   :  { %9958 = vmatpush1.bf16.msra.mxu0 %v14027_v46  ;;  %10983 = vmatpush1.bf16.msra.mxu1 %v14030_v47  ;;  %v14119_v46 = vld [vmem:[%s21104_s1 + $0x884] ss:$16 sps:$4 sm:$0xff]   ;;  %v14122_v47 = vld [vmem:[%s21104_s1 + $0x88c] ss:$16 sps:$4 sm:$0xff]  }
  0xd8   :  { %9959 = vmatprep.subr.bf16.mxu0 %v14035_v48  ;;  %10984 = vmatprep.subr.bf16.mxu1 %v14038_v50  ;;  %v14117_v48 = vld [vmem:[%s21104_s1 + $0x880] ss:$16 sps:$4 sm:$0xff]   ;;  %v14120_v50 = vld [vmem:[%s21104_s1 + $0x888] ss:$16 sps:$4 sm:$0xff]  }
  0xdb   :  { %9960 = vmatpush1.bf16.msra.mxu0 %v14033_v51  ;;  %10985 = vmatpush1.bf16.msra.mxu1 %v14036_v53  ;;  %v14125_v51 = vld [vmem:[%s21104_s1 + $0x8a4] ss:$16 sps:$4 sm:$0xff]   ;;  %v14128_v53 = vld [vmem:[%s21104_s1 + $0x8ac] ss:$16 sps:$4 sm:$0xff]  }
  0xdc   :  { %9961 = vmatprep.subr.bf16.mxu0 %v14041_v54  ;;  %10986 = vmatprep.subr.bf16.mxu1 %v14044_v55  ;;  %v14123_v54 = vld [vmem:[%s21104_s1 + $0x8a0] ss:$16 sps:$4 sm:$0xff]   ;;  %v14126_v55 = vld [vmem:[%s21104_s1 + $0x8a8] ss:$16 sps:$4 sm:$0xff]  }
  0xdf   :  { %9962 = vmatpush1.bf16.msra.mxu0 %v14039_v56  ;;  %10987 = vmatpush1.bf16.msra.mxu1 %v14042_v57  ;;  %v14131_v56 = vld [vmem:[%s21104_s1 + $0x8c4] ss:$16 sps:$4 sm:$0xff]   ;;  %v14134_v57 = vld [vmem:[%s21104_s1 + $0x8cc] ss:$16 sps:$4 sm:$0xff]  }
  0xe0   :  { %9963 = vmatprep.subr.bf16.mxu0 %v14047_v58  ;;  %10988 = vmatprep.subr.bf16.mxu1 %v14050_v59  ;;  %v14129_v58 = vld [vmem:[%s21104_s1 + $0x8c0] ss:$16 sps:$4 sm:$0xff]   ;;  %v14132_v59 = vld [vmem:[%s21104_s1 + $0x8c8] ss:$16 sps:$4 sm:$0xff]  }
  0xe3   :  { %9964 = vmatpush1.bf16.msra.mxu0 %v14045_v60  ;;  %10989 = vmatpush1.bf16.msra.mxu1 %v14048_v61  ;;  %v14137_v60 = vld [vmem:[%s21104_s1 + $0x8e4] ss:$16 sps:$4 sm:$0xff]   ;;  %v14140_v61 = vld [vmem:[%s21104_s1 + $0x8ec] ss:$16 sps:$4 sm:$0xff]  }
  0xe4   :  { %9965 = vmatprep.subr.bf16.mxu0 %v14053_v62  ;;  %10990 = vmatprep.subr.bf16.mxu1 %v14056_v63  ;;  %v14135_v62 = vld [vmem:[%s21104_s1 + $0x8e0] ss:$16 sps:$4 sm:$0xff]   ;;  %v14138_v63 = vld [vmem:[%s21104_s1 + $0x8e8] ss:$16 sps:$4 sm:$0xff]  }
  0xe7   :  { %9966 = vmatpush1.bf16.msra.mxu0 %v14051_v0  ;;  %10991 = vmatpush1.bf16.msra.mxu1 %v14054_v1  ;;  %v14143_v0 = vld [vmem:[%s21104_s1 + $0x904] ss:$16 sps:$4 sm:$0xff]   ;;  %v14146_v1 = vld [vmem:[%s21104_s1 + $0x90c] ss:$16 sps:$4 sm:$0xff]  }
  0xe8   :  { %9967 = vmatprep.subr.bf16.mxu0 %v14059_v2  ;;  %10992 = vmatprep.subr.bf16.mxu1 %v14062_v3  ;;  %v14141_v2 = vld [vmem:[%s21104_s1 + $0x900] ss:$16 sps:$4 sm:$0xff]   ;;  %v14144_v3 = vld [vmem:[%s21104_s1 + $0x908] ss:$16 sps:$4 sm:$0xff]  }
  0xeb   :  { %9968 = vmatpush1.bf16.msra.mxu0 %v14057_v4  ;;  %10993 = vmatpush1.bf16.msra.mxu1 %v14060_v5  ;;  %v14149_v4 = vld [vmem:[%s21104_s1 + $0x924] ss:$16 sps:$4 sm:$0xff]   ;;  %v14152_v5 = vld [vmem:[%s21104_s1 + $0x92c] ss:$16 sps:$4 sm:$0xff]  }
  0xec   :  { %9969 = vmatprep.subr.bf16.mxu0 %v14065_v6  ;;  %10994 = vmatprep.subr.bf16.mxu1 %v14068_v7  ;;  %v14147_v6 = vld [vmem:[%s21104_s1 + $0x920] ss:$16 sps:$4 sm:$0xff]   ;;  %v14150_v7 = vld [vmem:[%s21104_s1 + $0x928] ss:$16 sps:$4 sm:$0xff]  }
  0xef   :  { %9970 = vmatpush1.bf16.msra.mxu0 %v14063_v8  ;;  %10995 = vmatpush1.bf16.msra.mxu1 %v14066_v9  ;;  %v14155_v8 = vld [vmem:[%s21104_s1 + $0x944] ss:$16 sps:$4 sm:$0xff]   ;;  %v14158_v9 = vld [vmem:[%s21104_s1 + $0x94c] ss:$16 sps:$4 sm:$0xff]  }
  0xf0   :  { %9971 = vmatprep.subr.bf16.mxu0 %v14071_v10  ;;  %10996 = vmatprep.subr.bf16.mxu1 %v14074_v11  ;;  %v14153_v10 = vld [vmem:[%s21104_s1 + $0x940] ss:$16 sps:$4 sm:$0xff]   ;;  %v14156_v11 = vld [vmem:[%s21104_s1 + $0x948] ss:$16 sps:$4 sm:$0xff]  }
  0xf3   :  { %9972 = vmatpush1.bf16.msra.mxu0 %v14069_v12  ;;  %10997 = vmatpush1.bf16.msra.mxu1 %v14072_v52  ;;  %v14161_v12 = vld [vmem:[%s21104_s1 + $0x964] ss:$16 sps:$4 sm:$0xff]   ;;  %v14164_v52 = vld [vmem:[%s21104_s1 + $0x96c] ss:$16 sps:$4 sm:$0xff]  }
  0xf4   :  { %9973 = vmatprep.subr.bf16.mxu0 %v14077_v15  ;;  %10998 = vmatprep.subr.bf16.mxu1 %v14080_v16  ;;  %v14159_v15 = vld [vmem:[%s21104_s1 + $0x960] ss:$16 sps:$4 sm:$0xff]   ;;  %v14162_v16 = vld [vmem:[%s21104_s1 + $0x968] ss:$16 sps:$4 sm:$0xff]  }
  0xf7   :  { %9974 = vmatpush1.bf16.msra.mxu0 %v14075_v17  ;;  %10999 = vmatpush1.bf16.msra.mxu1 %v14078_v18  ;;  %v14167_v17 = vld [vmem:[%s21104_s1 + $0x984] ss:$16 sps:$4 sm:$0xff]   ;;  %v14170_v18 = vld [vmem:[%s21104_s1 + $0x98c] ss:$16 sps:$4 sm:$0xff]  }
  0xf8   :  { %9975 = vmatprep.subr.bf16.mxu0 %v14083_v19  ;;  %11000 = vmatprep.subr.bf16.mxu1 %v14086_v20  ;;  %v14165_v19 = vld [vmem:[%s21104_s1 + $0x980] ss:$16 sps:$4 sm:$0xff]   ;;  %v14168_v20 = vld [vmem:[%s21104_s1 + $0x988] ss:$16 sps:$4 sm:$0xff]  }
  0xfb   :  { %9976 = vmatpush1.bf16.msra.mxu0 %v14081_v22  ;;  %11001 = vmatpush1.bf16.msra.mxu1 %v14084_v23  ;;  %v14173_v22 = vld [vmem:[%s21104_s1 + $0x9a4] ss:$16 sps:$4 sm:$0xff]   ;;  %v14176_v23 = vld [vmem:[%s21104_s1 + $0x9ac] ss:$16 sps:$4 sm:$0xff]  }
  0xfc   :  { %9977 = vmatprep.subr.bf16.mxu0 %v14089_v24  ;;  %11002 = vmatprep.subr.bf16.mxu1 %v14092_v13  ;;  %v14171_v24 = vld [vmem:[%s21104_s1 + $0x9a0] ss:$16 sps:$4 sm:$0xff]   ;;  %v14174_v13 = vld [vmem:[%s21104_s1 + $0x9a8] ss:$16 sps:$4 sm:$0xff]  }
  0xff   :  { %9978 = vmatpush1.bf16.msra.mxu0 %v14087_v27  ;;  %11003 = vmatpush1.bf16.msra.mxu1 %v14090_v28  ;;  %v14179_v27 = vld [vmem:[%s21104_s1 + $0x9c4] ss:$16 sps:$4 sm:$0xff]   ;;  %v14182_v28 = vld [vmem:[%s21104_s1 + $0x9cc] ss:$16 sps:$4 sm:$0xff]  }
 0x100   :  { %9988 = vmatprep.subr.bf16.mxu0 %v14095_v29  ;;  %11013 = vmatprep.subr.bf16.mxu1 %v14098_v14  ;;  %v14177_v29 = vld [vmem:[%s21104_s1 + $0x9c0] ss:$16 sps:$4 sm:$0xff]   ;;  %v14180_v14 = vld [vmem:[%s21104_s1 + $0x9c8] ss:$16 sps:$4 sm:$0xff]  }
 0x102   :  { %9980 = vmatmul.mubr.bf16.vlgmr.msra.gmra.mrb[0].mxu0 %v1673_v31  ;;  %11005 = vmatmul.mubr.bf16.vlgmr.msra.gmra.mrb[0].mxu1 %v1673_v31  ;;  %v14188_v31 = vld [vmem:[%s21104_s1 + $0x9ec] ss:$16 sps:$4 sm:$0xff]  }
 0x103   :  { %9989 = vmatpush1.bf16.msra.mxu0 %v14093_v25  ;;  %11014 = vmatpush1.bf16.msra.mxu1 %v14096_v32  ;;  %v14183_v25 = vld [vmem:[%s21104_s1 + $0x9e0] ss:$16 sps:$4 sm:$0xff]   ;;  %v14186_v32 = vld [vmem:[%s21104_s1 + $0x9e8] ss:$16 sps:$4 sm:$0xff]  }
 0x104   :  { %9990 = vmatprep.subr.bf16.mxu0 %v14101_v33  ;;  %11015 = vmatprep.subr.bf16.mxu1 %v14104_v26  ;;  %v14191_v33 = vld [vmem:[%s21104_s1 + $0xa04] ss:$16 sps:$4 sm:$0xff]   ;;  %v14194_v26 = vld [vmem:[%s21104_s1 + $0xa0c] ss:$16 sps:$4 sm:$0xff]  }
 0x105   :  { %10020 = vmatprep.mubr.bf16.mxu0 %v16940_v34  ;;  %11045 = vmatprep.mubr.bf16.mxu1 %v16940_v34 }
 0x107   :  { %9991 = vmatpush1.bf16.msra.mxu0 %v14099_v35  ;;  %11016 = vmatpush1.bf16.msra.mxu1 %v14102_v36  ;;  %v17126_v35 = vrot.slane %v16897_v21, %v16239_v49  ;;  %v14189_v36 = vld [vmem:[%s21104_s1 + $0xa00] ss:$16 sps:$4 sm:$0xff]   ;;  %v14200_v21 = vld [vmem:[%s21104_s1 + $0xa2c] ss:$16 sps:$4 sm:$0xff]  }
 0x108   :  { %9992 = vmatprep.subr.bf16.mxu0 %v14107_v37  ;;  %11017 = vmatprep.subr.bf16.mxu1 %v14110_v38  ;;  %v14192_v37 = vld [vmem:[%s21104_s1 + $0xa08] ss:$16 sps:$4 sm:$0xff]   ;;  %v14197_v38 = vld [vmem:[%s21104_s1 + $0xa24] ss:$16 sps:$4 sm:$0xff]  }
 0x10b   :  { %9993 = vmatpush1.bf16.msra.mxu0 %v14105_v39  ;;  %11018 = vmatpush1.bf16.msra.mxu1 %v14108_v40  ;;  %v1723_v39 = vcombine.high %v16940_v34, %v16940_v34  ;;  %v14195_v40 = vld [vmem:[%s21104_s1 + $0xa20] ss:$16 sps:$4 sm:$0xff]   ;;  %v14203_v34 = vld [vmem:[%s21104_s1 + $0xa44] ss:$16 sps:$4 sm:$0xff]  }
 0x10c   :  { %9994 = vmatprep.subr.bf16.mxu0 %v14113_v41  ;;  %11019 = vmatprep.subr.bf16.mxu1 %v14116_v43  ;;  %v14198_v41 = vld [vmem:[%s21104_s1 + $0xa28] ss:$16 sps:$4 sm:$0xff]   ;;  %v14206_v43 = vld [vmem:[%s21104_s1 + $0xa4c] ss:$16 sps:$4 sm:$0xff]  }
 0x10f   :  { %9995 = vmatpush1.bf16.msra.mxu0 %v14111_v44  ;;  %11020 = vmatpush1.bf16.msra.mxu1 %v14114_v45  ;;  %v14201_v44 = vld [vmem:[%s21104_s1 + $0xa40] ss:$16 sps:$4 sm:$0xff]   ;;  %v14204_v45 = vld [vmem:[%s21104_s1 + $0xa48] ss:$16 sps:$4 sm:$0xff]  }
 0x110   :  { %9996 = vmatprep.subr.bf16.mxu0 %v14119_v46  ;;  %11021 = vmatprep.subr.bf16.mxu1 %v14122_v47  ;;  %v14209_v46 = vld [vmem:[%s21104_s1 + $0xa64] ss:$16 sps:$4 sm:$0xff]   ;;  %v14212_v47 = vld [vmem:[%s21104_s1 + $0xa6c] ss:$16 sps:$4 sm:$0xff]  }
 0x113   :  { %9997 = vmatpush1.bf16.msra.mxu0 %v14117_v48  ;;  %11022 = vmatpush1.bf16.msra.mxu1 %v14120_v50  ;;  %v14207_v48 = vld [vmem:[%s21104_s1 + $0xa60] ss:$16 sps:$4 sm:$0xff]   ;;  %v14210_v50 = vld [vmem:[%s21104_s1 + $0xa68] ss:$16 sps:$4 sm:$0xff]  }
 0x114   :  { %9998 = vmatprep.subr.bf16.mxu0 %v14125_v51  ;;  %11023 = vmatprep.subr.bf16.mxu1 %v14128_v53  ;;  %v14215_v51 = vld [vmem:[%s21104_s1 + $0xa84] ss:$16 sps:$4 sm:$0xff]   ;;  %v14218_v53 = vld [vmem:[%s21104_s1 + $0xa8c] ss:$16 sps:$4 sm:$0xff]  }
 0x117   :  { %9999 = vmatpush1.bf16.msra.mxu0 %v14123_v54  ;;  %11024 = vmatpush1.bf16.msra.mxu1 %v14126_v55  ;;  %v14213_v54 = vld [vmem:[%s21104_s1 + $0xa80] ss:$16 sps:$4 sm:$0xff]   ;;  %v14216_v55 = vld [vmem:[%s21104_s1 + $0xa88] ss:$16 sps:$4 sm:$0xff]  }
 0x118   :  { %10000 = vmatprep.subr.bf16.mxu0 %v14131_v56  ;;  %11025 = vmatprep.subr.bf16.mxu1 %v14134_v57  ;;  %v14221_v56 = vld [vmem:[%s21104_s1 + $0xaa4] ss:$16 sps:$4 sm:$0xff]   ;;  %v14224_v57 = vld [vmem:[%s21104_s1 + $0xaac] ss:$16 sps:$4 sm:$0xff]  }
 0x11b   :  { %10001 = vmatpush1.bf16.msra.mxu0 %v14129_v58  ;;  %11026 = vmatpush1.bf16.msra.mxu1 %v14132_v59  ;;  %v14219_v58 = vld [vmem:[%s21104_s1 + $0xaa0] ss:$16 sps:$4 sm:$0xff]   ;;  %v14222_v59 = vld [vmem:[%s21104_s1 + $0xaa8] ss:$16 sps:$4 sm:$0xff]  }
 0x11c   :  { %10002 = vmatprep.subr.bf16.mxu0 %v14137_v60  ;;  %11027 = vmatprep.subr.bf16.mxu1 %v14140_v61  ;;  %v14227_v60 = vld [vmem:[%s21104_s1 + $0xac4] ss:$16 sps:$4 sm:$0xff]   ;;  %v14230_v61 = vld [vmem:[%s21104_s1 + $0xacc] ss:$16 sps:$4 sm:$0xff]  }
 0x11f   :  { %10003 = vmatpush1.bf16.msra.mxu0 %v14135_v62  ;;  %11028 = vmatpush1.bf16.msra.mxu1 %v14138_v63  ;;  %v14225_v62 = vld [vmem:[%s21104_s1 + $0xac0] ss:$16 sps:$4 sm:$0xff]   ;;  %v14228_v63 = vld [vmem:[%s21104_s1 + $0xac8] ss:$16 sps:$4 sm:$0xff]  }
 0x120   :  { %10004 = vmatprep.subr.bf16.mxu0 %v14143_v0  ;;  %11029 = vmatprep.subr.bf16.mxu1 %v14146_v1  ;;  %v14233_v0 = vld [vmem:[%s21104_s1 + $0xae4] ss:$16 sps:$4 sm:$0xff]   ;;  %v14236_v1 = vld [vmem:[%s21104_s1 + $0xaec] ss:$16 sps:$4 sm:$0xff]  }
 0x123   :  { %10005 = vmatpush1.bf16.msra.mxu0 %v14141_v2  ;;  %11030 = vmatpush1.bf16.msra.mxu1 %v14144_v3  ;;  %v14231_v2 = vld [vmem:[%s21104_s1 + $0xae0] ss:$16 sps:$4 sm:$0xff]   ;;  %v14234_v3 = vld [vmem:[%s21104_s1 + $0xae8] ss:$16 sps:$4 sm:$0xff]  }
 0x124   :  { %10006 = vmatprep.subr.bf16.mxu0 %v14149_v4  ;;  %11031 = vmatprep.subr.bf16.mxu1 %v14152_v5  ;;  %v14239_v4 = vld [vmem:[%s21104_s1 + $0xb04] ss:$16 sps:$4 sm:$0xff]   ;;  %v14242_v5 = vld [vmem:[%s21104_s1 + $0xb0c] ss:$16 sps:$4 sm:$0xff]  }
 0x127   :  { %10007 = vmatpush1.bf16.msra.mxu0 %v14147_v6  ;;  %11032 = vmatpush1.bf16.msra.mxu1 %v14150_v7  ;;  %v14237_v6 = vld [vmem:[%s21104_s1 + $0xb00] ss:$16 sps:$4 sm:$0xff]   ;;  %v14240_v7 = vld [vmem:[%s21104_s1 + $0xb08] ss:$16 sps:$4 sm:$0xff]  }
 0x128   :  { %10008 = vmatprep.subr.bf16.mxu0 %v14155_v8  ;;  %11033 = vmatprep.subr.bf16.mxu1 %v14158_v9  ;;  %v14245_v8 = vld [vmem:[%s21104_s1 + $0xb24] ss:$16 sps:$4 sm:$0xff]   ;;  %v14248_v9 = vld [vmem:[%s21104_s1 + $0xb2c] ss:$16 sps:$4 sm:$0xff]  }
 0x12b   :  { %10009 = vmatpush1.bf16.msra.mxu0 %v14153_v10  ;;  %11034 = vmatpush1.bf16.msra.mxu1 %v14156_v11  ;;  %v14243_v10 = vld [vmem:[%s21104_s1 + $0xb20] ss:$16 sps:$4 sm:$0xff]   ;;  %v14246_v11 = vld [vmem:[%s21104_s1 + $0xb28] ss:$16 sps:$4 sm:$0xff]  }
 0x12c   :  { %10010 = vmatprep.subr.bf16.mxu0 %v14161_v12  ;;  %11035 = vmatprep.subr.bf16.mxu1 %v14164_v52  ;;  %v14251_v12 = vld [vmem:[%s21104_s1 + $0xb44] ss:$16 sps:$4 sm:$0xff]   ;;  %v14254_v52 = vld [vmem:[%s21104_s1 + $0xb4c] ss:$16 sps:$4 sm:$0xff]  }
 0x12f   :  { %10011 = vmatpush1.bf16.msra.mxu0 %v14159_v15  ;;  %11036 = vmatpush1.bf16.msra.mxu1 %v14162_v16  ;;  %v14249_v15 = vld [vmem:[%s21104_s1 + $0xb40] ss:$16 sps:$4 sm:$0xff]   ;;  %v14252_v16 = vld [vmem:[%s21104_s1 + $0xb48] ss:$16 sps:$4 sm:$0xff]  }
 0x130   :  { %10012 = vmatprep.subr.bf16.mxu0 %v14167_v17  ;;  %11037 = vmatprep.subr.bf16.mxu1 %v14170_v18  ;;  %v14257_v17 = vld [vmem:[%s21104_s1 + $0xb64] ss:$16 sps:$4 sm:$0xff]   ;;  %v14260_v18 = vld [vmem:[%s21104_s1 + $0xb6c] ss:$16 sps:$4 sm:$0xff]  }
 0x133   :  { %10013 = vmatpush1.bf16.msra.mxu0 %v14165_v19  ;;  %11038 = vmatpush1.bf16.msra.mxu1 %v14168_v20  ;;  %v14255_v19 = vld [vmem:[%s21104_s1 + $0xb60] ss:$16 sps:$4 sm:$0xff]   ;;  %v14258_v20 = vld [vmem:[%s21104_s1 + $0xb68] ss:$16 sps:$4 sm:$0xff]  }
 0x134   :  { %10014 = vmatprep.subr.bf16.mxu0 %v14173_v22  ;;  %11039 = vmatprep.subr.bf16.mxu1 %v14176_v23  ;;  %v14263_v22 = vld [vmem:[%s21104_s1 + $0xb84] ss:$16 sps:$4 sm:$0xff]   ;;  %v14266_v23 = vld [vmem:[%s21104_s1 + $0xb8c] ss:$16 sps:$4 sm:$0xff]  }
 0x137   :  { %10015 = vmatpush1.bf16.msra.mxu0 %v14171_v24  ;;  %11040 = vmatpush1.bf16.msra.mxu1 %v14174_v13  ;;  %v14261_v24 = vld [vmem:[%s21104_s1 + $0xb80] ss:$16 sps:$4 sm:$0xff]   ;;  %v14264_v13 = vld [vmem:[%s21104_s1 + $0xb88] ss:$16 sps:$4 sm:$0xff]  }
 0x138   :  { %10016 = vmatprep.subr.bf16.mxu0 %v14179_v27  ;;  %11041 = vmatprep.subr.bf16.mxu1 %v14182_v28  ;;  %v14269_v27 = vld [vmem:[%s21104_s1 + $0xba4] ss:$16 sps:$4 sm:$0xff]   ;;  %v14272_v28 = vld [vmem:[%s21104_s1 + $0xbac] ss:$16 sps:$4 sm:$0xff]  }
 0x13b   :  { %10017 = vmatpush1.bf16.msra.mxu0 %v14177_v29  ;;  %11042 = vmatpush1.bf16.msra.mxu1 %v14180_v14  ;;  %v14267_v29 = vld [vmem:[%s21104_s1 + $0xba0] ss:$16 sps:$4 sm:$0xff]   ;;  %v14270_v14 = vld [vmem:[%s21104_s1 + $0xba8] ss:$16 sps:$4 sm:$0xff]  }
 0x13c   :  { %10018 = vmatprep.subr.bf16.mxu0 %v14185_v30  ;;  %11043 = vmatprep.subr.bf16.mxu1 %v14188_v31  ;;  %v14275_v30 = vld [vmem:[%s21104_s1 + $0xbc4] ss:$16 sps:$4 sm:$0xff]   ;;  %v14278_v31 = vld [vmem:[%s21104_s1 + $0xbcc] ss:$16 sps:$4 sm:$0xff]  }
 0x13f   :  { %10019 = vmatpush1.bf16.msra.mxu0 %v14183_v25  ;;  %11044 = vmatpush1.bf16.msra.mxu1 %v14186_v32  ;;  %v16068_v25 = vld [vmem:[%s21105_s0 + $0x8] sm:$0xff] }
 0x140   :  { %10029 = vmatprep.subr.bf16.mxu0 %v14191_v33  ;;  %11054 = vmatprep.subr.bf16.mxu1 %v14194_v26  ;;  %v1676_v32 = vcombine.high %v16068_v25, %v16068_v25  ;;  %v14273_v33 = vld [vmem:[%s21104_s1 + $0xbc0] ss:$16 sps:$4 sm:$0xff]   ;;  %v14276_v26 = vld [vmem:[%s21104_s1 + $0xbc8] ss:$16 sps:$4 sm:$0xff]  }
 0x141   :  { %v14357_v25 = vld [vmem:[%s21104_s1 + $0xd80] ss:$16 sps:$4 sm:$0xff]  }
 0x142   :  { %10021 = vmatmul.mubr.bf16.vlgmr.msra.gmra.mrb[0].mxu0 %v17126_v35  ;;  %11046 = vmatmul.mubr.bf16.vlgmr.msra.gmra.mrb[0].mxu1 %v17126_v35 }
 0x143   :  { %10030 = vmatpush1.bf16.msra.mxu0 %v14189_v36  ;;  %11055 = vmatpush1.bf16.msra.mxu1 %v14192_v37  ;;  %v14281_v36 = vld [vmem:[%s21104_s1 + $0xbe4] ss:$16 sps:$4 sm:$0xff]   ;;  %v14284_v37 = vld [vmem:[%s21104_s1 + $0xbec] ss:$16 sps:$4 sm:$0xff]  }
 0x144   :  { %10031 = vmatprep.subr.bf16.mxu0 %v14197_v38  ;;  %11056 = vmatprep.subr.bf16.mxu1 %v14200_v21  ;;  %v17316_v38 = vrot.slane %v1676_v32, %v16239_v49  ;;  %v14279_v21 = vld [vmem:[%s21104_s1 + $0xbe0] ss:$16 sps:$4 sm:$0xff]   ;;  %v14360_v32 = vld [vmem:[%s21104_s1 + $0xd88] ss:$16 sps:$4 sm:$0xff]  }
 0x145   :  { %10061 = vmatprep.mubr.bf16.mxu0 %v1723_v39  ;;  %11086 = vmatprep.mubr.bf16.mxu1 %v1723_v39  ;;  %v14282_v39 = vld [vmem:[%s21104_s1 + $0xbe8] ss:$16 sps:$4 sm:$0xff]  }
 0x147   :  { %10032 = vmatpush1.bf16.msra.mxu0 %v14195_v40  ;;  %11057 = vmatpush1.bf16.msra.mxu1 %v14198_v41  ;;  %v14287_v40 = vld [vmem:[%s21104_s1 + $0xc04] ss:$16 sps:$4 sm:$0xff]   ;;  %v14290_v41 = vld [vmem:[%s21104_s1 + $0xc0c] ss:$16 sps:$4 sm:$0xff]  }
 0x148   :  { %10033 = vmatprep.subr.bf16.mxu0 %v14203_v34  ;;  %11058 = vmatprep.subr.bf16.mxu1 %v14206_v43  ;;  %v1692_v34 = vcombine.high %v17316_v38, %v17316_v38  ;;  %v1721_v43 = vcombine.high %v17126_v35, %v17126_v35  ;;  %v14296_v35 = vld [vmem:[%s21104_s1 + $0xc2c] ss:$16 sps:$4 sm:$0xff]  }
 0x14b   :  { %10034 = vmatpush1.bf16.msra.mxu0 %v14201_v44  ;;  %11059 = vmatpush1.bf16.msra.mxu1 %v14204_v45  ;;  %v14285_v44 = vld [vmem:[%s21104_s1 + $0xc00] ss:$16 sps:$4 sm:$0xff]   ;;  %v14288_v45 = vld [vmem:[%s21104_s1 + $0xc08] ss:$16 sps:$4 sm:$0xff]  }
 0x14c   :  { %10035 = vmatprep.subr.bf16.mxu0 %v14209_v46  ;;  %11060 = vmatprep.subr.bf16.mxu1 %v14212_v47  ;;  %v14293_v46 = vld [vmem:[%s21104_s1 + $0xc24] ss:$16 sps:$4 sm:$0xff]   ;;  %v17347_v47 = vrot.slane %v1692_v34, %v16239_v49 }
 0x14d   :  { %v14377_v34 = vld [vmem:[%s21104_s1 + $0xde4] ss:$16 sps:$4 sm:$0xff]  }
 0x14f   :  { %10036 = vmatpush1.bf16.msra.mxu0 %v14207_v48  ;;  %11061 = vmatpush1.bf16.msra.mxu1 %v14210_v50  ;;  %v14291_v48 = vld [vmem:[%s21104_s1 + $0xc20] ss:$16 sps:$4 sm:$0xff]   ;;  %v14294_v50 = vld [vmem:[%s21104_s1 + $0xc28] ss:$16 sps:$4 sm:$0xff]  }
 0x150   :  { %10037 = vmatprep.subr.bf16.mxu0 %v14215_v51  ;;  %11062 = vmatprep.subr.bf16.mxu1 %v14218_v53  ;;  %v14299_v51 = vld [vmem:[%s21104_s1 + $0xc44] ss:$16 sps:$4 sm:$0xff]   ;;  %v14302_v53 = vld [vmem:[%s21104_s1 + $0xc4c] ss:$16 sps:$4 sm:$0xff]  }
 0x153   :  { %10038 = vmatpush1.bf16.msra.mxu0 %v14213_v54  ;;  %11063 = vmatpush1.bf16.msra.mxu1 %v14216_v55  ;;  %v14297_v54 = vld [vmem:[%s21104_s1 + $0xc40] ss:$16 sps:$4 sm:$0xff]   ;;  %v14300_v55 = vld [vmem:[%s21104_s1 + $0xc48] ss:$16 sps:$4 sm:$0xff]  }
 0x154   :  { %10039 = vmatprep.subr.bf16.mxu0 %v14221_v56  ;;  %11064 = vmatprep.subr.bf16.mxu1 %v14224_v57  ;;  %v14305_v56 = vld [vmem:[%s21104_s1 + $0xc64] ss:$16 sps:$4 sm:$0xff]   ;;  %v14308_v57 = vld [vmem:[%s21104_s1 + $0xc6c] ss:$16 sps:$4 sm:$0xff]  }
 0x157   :  { %10040 = vmatpush1.bf16.msra.mxu0 %v14219_v58  ;;  %11065 = vmatpush1.bf16.msra.mxu1 %v14222_v59  ;;  %v14303_v58 = vld [vmem:[%s21104_s1 + $0xc60] ss:$16 sps:$4 sm:$0xff]   ;;  %v14306_v59 = vld [vmem:[%s21104_s1 + $0xc68] ss:$16 sps:$4 sm:$0xff]  }
 0x158   :  { %10041 = vmatprep.subr.bf16.mxu0 %v14227_v60  ;;  %11066 = vmatprep.subr.bf16.mxu1 %v14230_v61  ;;  %v14311_v60 = vld [vmem:[%s21104_s1 + $0xc84] ss:$16 sps:$4 sm:$0xff]   ;;  %v14314_v61 = vld [vmem:[%s21104_s1 + $0xc8c] ss:$16 sps:$4 sm:$0xff]  }
 0x15b   :  { %10042 = vmatpush1.bf16.msra.mxu0 %v14225_v62  ;;  %11067 = vmatpush1.bf16.msra.mxu1 %v14228_v63  ;;  %v14309_v62 = vld [vmem:[%s21104_s1 + $0xc80] ss:$16 sps:$4 sm:$0xff]   ;;  %v14312_v63 = vld [vmem:[%s21104_s1 + $0xc88] ss:$16 sps:$4 sm:$0xff]  }
 0x15c   :  { %10043 = vmatprep.subr.bf16.mxu0 %v14233_v0  ;;  %11068 = vmatprep.subr.bf16.mxu1 %v14236_v1  ;;  %v14317_v0 = vld [vmem:[%s21104_s1 + $0xca4] ss:$16 sps:$4 sm:$0xff]   ;;  %v14320_v1 = vld [vmem:[%s21104_s1 + $0xcac] ss:$16 sps:$4 sm:$0xff]  }
 0x15f   :  { %10044 = vmatpush1.bf16.msra.mxu0 %v14231_v2  ;;  %11069 = vmatpush1.bf16.msra.mxu1 %v14234_v3  ;;  %v14315_v2 = vld [vmem:[%s21104_s1 + $0xca0] ss:$16 sps:$4 sm:$0xff]   ;;  %v14318_v3 = vld [vmem:[%s21104_s1 + $0xca8] ss:$16 sps:$4 sm:$0xff]  }
 0x160   :  { %10045 = vmatprep.subr.bf16.mxu0 %v14239_v4  ;;  %11070 = vmatprep.subr.bf16.mxu1 %v14242_v5  ;;  %v14323_v4 = vld [vmem:[%s21104_s1 + $0xcc4] ss:$16 sps:$4 sm:$0xff]   ;;  %v14326_v5 = vld [vmem:[%s21104_s1 + $0xccc] ss:$16 sps:$4 sm:$0xff]  }
 0x163   :  { %10046 = vmatpush1.bf16.msra.mxu0 %v14237_v6  ;;  %11071 = vmatpush1.bf16.msra.mxu1 %v14240_v7  ;;  %v14321_v6 = vld [vmem:[%s21104_s1 + $0xcc0] ss:$16 sps:$4 sm:$0xff]   ;;  %v14324_v7 = vld [vmem:[%s21104_s1 + $0xcc8] ss:$16 sps:$4 sm:$0xff]  }
 0x164   :  { %10047 = vmatprep.subr.bf16.mxu0 %v14245_v8  ;;  %11072 = vmatprep.subr.bf16.mxu1 %v14248_v9  ;;  %v14329_v8 = vld [vmem:[%s21104_s1 + $0xce4] ss:$16 sps:$4 sm:$0xff]   ;;  %v14332_v9 = vld [vmem:[%s21104_s1 + $0xcec] ss:$16 sps:$4 sm:$0xff]  }
 0x167   :  { %10048 = vmatpush1.bf16.msra.mxu0 %v14243_v10  ;;  %11073 = vmatpush1.bf16.msra.mxu1 %v14246_v11  ;;  %v14327_v10 = vld [vmem:[%s21104_s1 + $0xce0] ss:$16 sps:$4 sm:$0xff]   ;;  %v14330_v11 = vld [vmem:[%s21104_s1 + $0xce8] ss:$16 sps:$4 sm:$0xff]  }
 0x168   :  { %10049 = vmatprep.subr.bf16.mxu0 %v14251_v12  ;;  %11074 = vmatprep.subr.bf16.mxu1 %v14254_v52  ;;  %v14335_v12 = vld [vmem:[%s21104_s1 + $0xd04] ss:$16 sps:$4 sm:$0xff]   ;;  %v14338_v52 = vld [vmem:[%s21104_s1 + $0xd0c] ss:$16 sps:$4 sm:$0xff]  }
 0x16b   :  { %10050 = vmatpush1.bf16.msra.mxu0 %v14249_v15  ;;  %11075 = vmatpush1.bf16.msra.mxu1 %v14252_v16  ;;  %v14333_v15 = vld [vmem:[%s21104_s1 + $0xd00] ss:$16 sps:$4 sm:$0xff]   ;;  %v14336_v16 = vld [vmem:[%s21104_s1 + $0xd08] ss:$16 sps:$4 sm:$0xff]  }
 0x16c   :  { %10051 = vmatprep.subr.bf16.mxu0 %v14257_v17  ;;  %11076 = vmatprep.subr.bf16.mxu1 %v14260_v18  ;;  %v14341_v17 = vld [vmem:[%s21104_s1 + $0xd24] ss:$16 sps:$4 sm:$0xff]   ;;  %v14344_v18 = vld [vmem:[%s21104_s1 + $0xd2c] ss:$16 sps:$4 sm:$0xff]  }
 0x16f   :  { %10052 = vmatpush1.bf16.msra.mxu0 %v14255_v19  ;;  %11077 = vmatpush1.bf16.msra.mxu1 %v14258_v20  ;;  %v14339_v19 = vld [vmem:[%s21104_s1 + $0xd20] ss:$16 sps:$4 sm:$0xff]   ;;  %v14342_v20 = vld [vmem:[%s21104_s1 + $0xd28] ss:$16 sps:$4 sm:$0xff]  }
 0x170   :  { %10053 = vmatprep.subr.bf16.mxu0 %v14263_v22  ;;  %11078 = vmatprep.subr.bf16.mxu1 %v14266_v23  ;;  %v14347_v22 = vld [vmem:[%s21104_s1 + $0xd44] ss:$16 sps:$4 sm:$0xff]   ;;  %v14350_v23 = vld [vmem:[%s21104_s1 + $0xd4c] ss:$16 sps:$4 sm:$0xff]  }
 0x173   :  { %10054 = vmatpush1.bf16.msra.mxu0 %v14261_v24  ;;  %11079 = vmatpush1.bf16.msra.mxu1 %v14264_v13  ;;  %v14345_v24 = vld [vmem:[%s21104_s1 + $0xd40] ss:$16 sps:$4 sm:$0xff]   ;;  %v14348_v13 = vld [vmem:[%s21104_s1 + $0xd48] ss:$16 sps:$4 sm:$0xff]  }
 0x174   :  { %10055 = vmatprep.subr.bf16.mxu0 %v14269_v27  ;;  %11080 = vmatprep.subr.bf16.mxu1 %v14272_v28  ;;  %v14353_v27 = vld [vmem:[%s21104_s1 + $0xd64] ss:$16 sps:$4 sm:$0xff]   ;;  %v14356_v28 = vld [vmem:[%s21104_s1 + $0xd6c] ss:$16 sps:$4 sm:$0xff]  }
 0x177   :  { %10056 = vmatpush1.bf16.msra.mxu0 %v14267_v29  ;;  %11081 = vmatpush1.bf16.msra.mxu1 %v14270_v14  ;;  %v14351_v29 = vld [vmem:[%s21104_s1 + $0xd60] ss:$16 sps:$4 sm:$0xff]   ;;  %v14354_v14 = vld [vmem:[%s21104_s1 + $0xd68] ss:$16 sps:$4 sm:$0xff]  }
 0x178   :  { %10057 = vmatprep.subr.bf16.mxu0 %v14275_v30  ;;  %11082 = vmatprep.subr.bf16.mxu1 %v14278_v31  ;;  %v14359_v30 = vld [vmem:[%s21104_s1 + $0xd84] ss:$16 sps:$4 sm:$0xff]   ;;  %v14362_v31 = vld [vmem:[%s21104_s1 + $0xd8c] ss:$16 sps:$4 sm:$0xff]  }
 0x17b   :  { %10058 = vmatpush1.bf16.msra.mxu0 %v14273_v33  ;;  %11083 = vmatpush1.bf16.msra.mxu1 %v14276_v26  ;;  %v14365_v33 = vld [vmem:[%s21104_s1 + $0xda4] ss:$16 sps:$4 sm:$0xff]   ;;  %v14368_v26 = vld [vmem:[%s21104_s1 + $0xdac] ss:$16 sps:$4 sm:$0xff]  }
 0x17c   :  { %10059 = vmatprep.subr.bf16.mxu0 %v14281_v36  ;;  %11084 = vmatprep.subr.bf16.mxu1 %v14284_v37  ;;  %v14363_v36 = vld [vmem:[%s21104_s1 + $0xda0] ss:$16 sps:$4 sm:$0xff]   ;;  %v14366_v37 = vld [vmem:[%s21104_s1 + $0xda8] ss:$16 sps:$4 sm:$0xff]  }
 0x17f   :  { %10060 = vmatpush1.bf16.msra.mxu0 %v14279_v21  ;;  %11085 = vmatpush1.bf16.msra.mxu1 %v14282_v39  ;;  %v14371_v21 = vld [vmem:[%s21104_s1 + $0xdc4] ss:$16 sps:$4 sm:$0xff]   ;;  %v14374_v39 = vld [vmem:[%s21104_s1 + $0xdcc] ss:$16 sps:$4 sm:$0xff]  }
 0x180   :  { %10070 = vmatprep.subr.bf16.mxu0 %v14287_v40  ;;  %11095 = vmatprep.subr.bf16.mxu1 %v14290_v41  ;;  %v14369_v40 = vld [vmem:[%s21104_s1 + $0xdc0] ss:$16 sps:$4 sm:$0xff]   ;;  %v14372_v41 = vld [vmem:[%s21104_s1 + $0xdc8] ss:$16 sps:$4 sm:$0xff]  }
 0x182   :  { %10062 = vmatmul.mubr.bf16.vlgmr.msra.gmra.mrb[0].mxu0 %v1721_v43  ;;  %11087 = vmatmul.mubr.bf16.vlgmr.msra.gmra.mrb[0].mxu1 %v1721_v43  ;;  %v14380_v43 = vld [vmem:[%s21104_s1 + $0xdec] ss:$16 sps:$4 sm:$0xff]  }
 0x183   :  { %10071 = vmatpush1.bf16.msra.mxu0 %v14285_v44  ;;  %11096 = vmatpush1.bf16.msra.mxu1 %v14288_v45  ;;  %v14375_v44 = vld [vmem:[%s21104_s1 + $0xde0] ss:$16 sps:$4 sm:$0xff]   ;;  %v14378_v45 = vld [vmem:[%s21104_s1 + $0xde8] ss:$16 sps:$4 sm:$0xff]  }
 0x184   :  { %10072 = vmatprep.subr.bf16.mxu0 %v14293_v46  ;;  %11097 = vmatprep.subr.bf16.mxu1 %v14296_v35  ;;  %v14384_v46 = vld [vmem:[%s21104_s1 + $0xe04] ss:$16 sps:$4 sm:$0xff]   ;;  %v14387_v35 = vld [vmem:[%s21104_s1 + $0xe0c] ss:$16 sps:$4 sm:$0xff]  }
 0x185   :  { %10102 = vmatprep.mubr.bf16.mxu0 %v17347_v47  ;;  %11127 = vmatprep.mubr.bf16.mxu1 %v17347_v47 }
 0x187   :  { %10073 = vmatpush1.bf16.msra.mxu0 %v14291_v48  ;;  %11098 = vmatpush1.bf16.msra.mxu1 %v14294_v50  ;;  %v17533_v48 = vrot.slane %v17316_v38, %v16239_v49  ;;  %v14382_v50 = vld [vmem:[%s21104_s1 + $0xe00] ss:$16 sps:$4 sm:$0xff]   ;;  %v14393_v38 = vld [vmem:[%s21104_s1 + $0xe2c] ss:$16 sps:$4 sm:$0xff]  }
 0x188   :  { %10074 = vmatprep.subr.bf16.mxu0 %v14299_v51  ;;  %11099 = vmatprep.subr.bf16.mxu1 %v14302_v53  ;;  %v14385_v51 = vld [vmem:[%s21104_s1 + $0xe08] ss:$16 sps:$4 sm:$0xff]   ;;  %v14390_v53 = vld [vmem:[%s21104_s1 + $0xe24] ss:$16 sps:$4 sm:$0xff]  }
 0x18b   :  { %10075 = vmatpush1.bf16.msra.mxu0 %v14297_v54  ;;  %11100 = vmatpush1.bf16.msra.mxu1 %v14300_v55  ;;  %v1724_v54 = vcombine.high %v17347_v47, %v17347_v47  ;;  %v14388_v55 = vld [vmem:[%s21104_s1 + $0xe20] ss:$16 sps:$4 sm:$0xff]   ;;  %v14396_v47 = vld [vmem:[%s21104_s1 + $0xe44] ss:$16 sps:$4 sm:$0xff]  }
 0x18c   :  { %10076 = vmatprep.subr.bf16.mxu0 %v14305_v56  ;;  %11101 = vmatprep.subr.bf16.mxu1 %v14308_v57  ;;  %v14391_v56 = vld [vmem:[%s21104_s1 + $0xe28] ss:$16 sps:$4 sm:$0xff]   ;;  %v14399_v57 = vld [vmem:[%s21104_s1 + $0xe4c] ss:$16 sps:$4 sm:$0xff]  }
 0x18f   :  { %10077 = vmatpush1.bf16.msra.mxu0 %v14303_v58  ;;  %11102 = vmatpush1.bf16.msra.mxu1 %v14306_v59  ;;  %v14394_v58 = vld [vmem:[%s21104_s1 + $0xe40] ss:$16 sps:$4 sm:$0xff]   ;;  %v14397_v59 = vld [vmem:[%s21104_s1 + $0xe48] ss:$16 sps:$4 sm:$0xff]  }
 0x190   :  { %10078 = vmatprep.subr.bf16.mxu0 %v14311_v60  ;;  %11103 = vmatprep.subr.bf16.mxu1 %v14314_v61  ;;  %v14402_v60 = vld [vmem:[%s21104_s1 + $0xe64] ss:$16 sps:$4 sm:$0xff]   ;;  %v14405_v61 = vld [vmem:[%s21104_s1 + $0xe6c] ss:$16 sps:$4 sm:$0xff]  }
 0x193   :  { %10079 = vmatpush1.bf16.msra.mxu0 %v14309_v62  ;;  %11104 = vmatpush1.bf16.msra.mxu1 %v14312_v63  ;;  %v14400_v62 = vld [vmem:[%s21104_s1 + $0xe60] ss:$16 sps:$4 sm:$0xff]   ;;  %v14403_v63 = vld [vmem:[%s21104_s1 + $0xe68] ss:$16 sps:$4 sm:$0xff]  }
 0x194   :  { %10080 = vmatprep.subr.bf16.mxu0 %v14317_v0  ;;  %11105 = vmatprep.subr.bf16.mxu1 %v14320_v1  ;;  %v14408_v0 = vld [vmem:[%s21104_s1 + $0xe84] ss:$16 sps:$4 sm:$0xff]   ;;  %v14411_v1 = vld [vmem:[%s21104_s1 + $0xe8c] ss:$16 sps:$4 sm:$0xff]  }
 0x197   :  { %10081 = vmatpush1.bf16.msra.mxu0 %v14315_v2  ;;  %11106 = vmatpush1.bf16.msra.mxu1 %v14318_v3  ;;  %v14406_v2 = vld [vmem:[%s21104_s1 + $0xe80] ss:$16 sps:$4 sm:$0xff]   ;;  %v14409_v3 = vld [vmem:[%s21104_s1 + $0xe88] ss:$16 sps:$4 sm:$0xff]  }
 0x198   :  { %10082 = vmatprep.subr.bf16.mxu0 %v14323_v4  ;;  %11107 = vmatprep.subr.bf16.mxu1 %v14326_v5  ;;  %v14414_v4 = vld [vmem:[%s21104_s1 + $0xea4] ss:$16 sps:$4 sm:$0xff]   ;;  %v14417_v5 = vld [vmem:[%s21104_s1 + $0xeac] ss:$16 sps:$4 sm:$0xff]  }
 0x19b   :  { %10083 = vmatpush1.bf16.msra.mxu0 %v14321_v6  ;;  %11108 = vmatpush1.bf16.msra.mxu1 %v14324_v7  ;;  %v14412_v6 = vld [vmem:[%s21104_s1 + $0xea0] ss:$16 sps:$4 sm:$0xff]   ;;  %v14415_v7 = vld [vmem:[%s21104_s1 + $0xea8] ss:$16 sps:$4 sm:$0xff]  }
 0x19c   :  { %10084 = vmatprep.subr.bf16.mxu0 %v14329_v8  ;;  %11109 = vmatprep.subr.bf16.mxu1 %v14332_v9  ;;  %v14420_v8 = vld [vmem:[%s21104_s1 + $0xec4] ss:$16 sps:$4 sm:$0xff]   ;;  %v14423_v9 = vld [vmem:[%s21104_s1 + $0xecc] ss:$16 sps:$4 sm:$0xff]  }
 0x19f   :  { %10085 = vmatpush1.bf16.msra.mxu0 %v14327_v10  ;;  %11110 = vmatpush1.bf16.msra.mxu1 %v14330_v11  ;;  %v14418_v10 = vld [vmem:[%s21104_s1 + $0xec0] ss:$16 sps:$4 sm:$0xff]   ;;  %v14421_v11 = vld [vmem:[%s21104_s1 + $0xec8] ss:$16 sps:$4 sm:$0xff]  }
 0x1a0   :  { %10086 = vmatprep.subr.bf16.mxu0 %v14335_v12  ;;  %11111 = vmatprep.subr.bf16.mxu1 %v14338_v52  ;;  %v14426_v12 = vld [vmem:[%s21104_s1 + $0xee4] ss:$16 sps:$4 sm:$0xff]   ;;  %v14429_v52 = vld [vmem:[%s21104_s1 + $0xeec] ss:$16 sps:$4 sm:$0xff]  }
 0x1a3   :  { %10087 = vmatpush1.bf16.msra.mxu0 %v14333_v15  ;;  %11112 = vmatpush1.bf16.msra.mxu1 %v14336_v16  ;;  %v14424_v15 = vld [vmem:[%s21104_s1 + $0xee0] ss:$16 sps:$4 sm:$0xff]   ;;  %v14427_v16 = vld [vmem:[%s21104_s1 + $0xee8] ss:$16 sps:$4 sm:$0xff]  }
 0x1a4   :  { %10088 = vmatprep.subr.bf16.mxu0 %v14341_v17  ;;  %11113 = vmatprep.subr.bf16.mxu1 %v14344_v18  ;;  %v14432_v17 = vld [vmem:[%s21104_s1 + $0xf04] ss:$16 sps:$4 sm:$0xff]   ;;  %v14435_v18 = vld [vmem:[%s21104_s1 + $0xf0c] ss:$16 sps:$4 sm:$0xff]  }
 0x1a7   :  { %10089 = vmatpush1.bf16.msra.mxu0 %v14339_v19  ;;  %11114 = vmatpush1.bf16.msra.mxu1 %v14342_v20  ;;  %v14430_v19 = vld [vmem:[%s21104_s1 + $0xf00] ss:$16 sps:$4 sm:$0xff]   ;;  %v14433_v20 = vld [vmem:[%s21104_s1 + $0xf08] ss:$16 sps:$4 sm:$0xff]  }
 0x1a8   :  { %10090 = vmatprep.subr.bf16.mxu0 %v14347_v22  ;;  %11115 = vmatprep.subr.bf16.mxu1 %v14350_v23  ;;  %v14438_v22 = vld [vmem:[%s21104_s1 + $0xf24] ss:$16 sps:$4 sm:$0xff]   ;;  %v14441_v23 = vld [vmem:[%s21104_s1 + $0xf2c] ss:$16 sps:$4 sm:$0xff]  }
 0x1ab   :  { %10091 = vmatpush1.bf16.msra.mxu0 %v14345_v24  ;;  %11116 = vmatpush1.bf16.msra.mxu1 %v14348_v13  ;;  %v14436_v24 = vld [vmem:[%s21104_s1 + $0xf20] ss:$16 sps:$4 sm:$0xff]   ;;  %v14439_v13 = vld [vmem:[%s21104_s1 + $0xf28] ss:$16 sps:$4 sm:$0xff]  }
 0x1ac   :  { %10092 = vmatprep.subr.bf16.mxu0 %v14353_v27  ;;  %11117 = vmatprep.subr.bf16.mxu1 %v14356_v28  ;;  %v14444_v27 = vld [vmem:[%s21104_s1 + $0xf44] ss:$16 sps:$4 sm:$0xff]   ;;  %v14447_v28 = vld [vmem:[%s21104_s1 + $0xf4c] ss:$16 sps:$4 sm:$0xff]  }
 0x1af   :  { %10093 = vmatpush1.bf16.msra.mxu0 %v14351_v29  ;;  %11118 = vmatpush1.bf16.msra.mxu1 %v14354_v14  ;;  %v14442_v29 = vld [vmem:[%s21104_s1 + $0xf40] ss:$16 sps:$4 sm:$0xff]   ;;  %v14445_v14 = vld [vmem:[%s21104_s1 + $0xf48] ss:$16 sps:$4 sm:$0xff]  }
 0x1b0   :  { %10094 = vmatprep.subr.bf16.mxu0 %v14359_v30  ;;  %11119 = vmatprep.subr.bf16.mxu1 %v14362_v31  ;;  %v14450_v30 = vld [vmem:[%s21104_s1 + $0xf64] ss:$16 sps:$4 sm:$0xff]   ;;  %v14453_v31 = vld [vmem:[%s21104_s1 + $0xf6c] ss:$16 sps:$4 sm:$0xff]  }
 0x1b3   :  { %10095 = vmatpush1.bf16.msra.mxu0 %v14357_v25  ;;  %11120 = vmatpush1.bf16.msra.mxu1 %v14360_v32  ;;  %v14448_v25 = vld [vmem:[%s21104_s1 + $0xf60] ss:$16 sps:$4 sm:$0xff]   ;;  %v14451_v32 = vld [vmem:[%s21104_s1 + $0xf68] ss:$16 sps:$4 sm:$0xff]  }
 0x1b4   :  { %10096 = vmatprep.subr.bf16.mxu0 %v14365_v33  ;;  %11121 = vmatprep.subr.bf16.mxu1 %v14368_v26  ;;  %v14456_v33 = vld [vmem:[%s21104_s1 + $0xf84] ss:$16 sps:$4 sm:$0xff]   ;;  %v14459_v26 = vld [vmem:[%s21104_s1 + $0xf8c] ss:$16 sps:$4 sm:$0xff]  }
 0x1b7   :  { %10097 = vmatpush1.bf16.msra.mxu0 %v14363_v36  ;;  %11122 = vmatpush1.bf16.msra.mxu1 %v14366_v37  ;;  %v14454_v36 = vld [vmem:[%s21104_s1 + $0xf80] ss:$16 sps:$4 sm:$0xff]   ;;  %v14457_v37 = vld [vmem:[%s21104_s1 + $0xf88] ss:$16 sps:$4 sm:$0xff]  }
 0x1b8   :  { %10098 = vmatprep.subr.bf16.mxu0 %v14371_v21  ;;  %11123 = vmatprep.subr.bf16.mxu1 %v14374_v39  ;;  %v14462_v21 = vld [vmem:[%s21104_s1 + $0xfa4] ss:$16 sps:$4 sm:$0xff]   ;;  %v14465_v39 = vld [vmem:[%s21104_s1 + $0xfac] ss:$16 sps:$4 sm:$0xff]  }
 0x1bb   :  { %10099 = vmatpush1.bf16.msra.mxu0 %v14369_v40  ;;  %11124 = vmatpush1.bf16.msra.mxu1 %v14372_v41  ;;  %v14460_v40 = vld [vmem:[%s21104_s1 + $0xfa0] ss:$16 sps:$4 sm:$0xff]   ;;  %v14463_v41 = vld [vmem:[%s21104_s1 + $0xfa8] ss:$16 sps:$4 sm:$0xff]  }
 0x1bc   :  { %10100 = vmatprep.subr.bf16.mxu0 %v14377_v34  ;;  %11125 = vmatprep.subr.bf16.mxu1 %v14380_v43  ;;  %v14468_v34 = vld [vmem:[%s21104_s1 + $0xfc4] ss:$16 sps:$4 sm:$0xff]   ;;  %v14471_v43 = vld [vmem:[%s21104_s1 + $0xfcc] ss:$16 sps:$4 sm:$0xff]  }
 0x1bf   :  { %10101 = vmatpush1.bf16.msra.mxu0 %v14375_v44  ;;  %11126 = vmatpush1.bf16.msra.mxu1 %v14378_v45  ;;  %v17710_v44 = vld.sshfl [vmem:[%s21105_s0 + $0x10] sm:$0xff pattern:$0x75316420] }
 0x1c0   :  { %10111 = vmatprep.subr.bf16.mxu0 %v14384_v46  ;;  %11136 = vmatprep.subr.bf16.mxu1 %v14387_v35  ;;  %v14466_v45 = vld [vmem:[%s21104_s1 + $0xfc0] ss:$16 sps:$4 sm:$0xff]   ;;  %v14469_v46 = vld [vmem:[%s21104_s1 + $0xfc8] ss:$16 sps:$4 sm:$0xff]   ;;  %v14474_v35 = vld [vmem:[%s21104_s1 + $0xfe4] ss:$16 sps:$4 sm:$0xff]  }
 0x1c2   :  { %10103 = vmatmul.mubr.bf16.vlgmr.msra.gmra.mrb[0].mxu0 %v17533_v48  ;;  %11128 = vmatmul.mubr.bf16.vlgmr.msra.gmra.mrb[0].mxu1 %v17533_v48 }
 0x1c3   :  { %10112 = vmatpush1.bf16.msra.mxu0 %v14382_v50  ;;  %11137 = vmatpush1.bf16.msra.mxu1 %v14385_v51  ;;  %v14477_v50 = vld [vmem:[%s21104_s1 + $0xfec] ss:$16 sps:$4 sm:$0xff]   ;;  %v14472_v51 = vld [vmem:[%s21104_s1 + $0xfe0] ss:$16 sps:$4 sm:$0xff]  }
 0x1c4   :  { %10113 = vmatprep.subr.bf16.mxu0 %v14390_v53  ;;  %11138 = vmatprep.subr.bf16.mxu1 %v14393_v38  ;;  %v14475_v53 = vld [vmem:[%s21104_s1 + $0xfe8] ss:$16 sps:$4 sm:$0xff]   ;;  %v14480_v38 = vld [vmem:[%s21104_s1 + $0x1004] ss:$16 sps:$4 sm:$0xff]  }
 0x1c5   :  { %10143 = vmatprep.mubr.bf16.mxu0 %v1724_v54  ;;  %11168 = vmatprep.mubr.bf16.mxu1 %v1724_v54  ;;  %v14483_v54 = vld [vmem:[%s21104_s1 + $0x100c] ss:$16 sps:$4 sm:$0xff]  }
 0x1c7   :  { %10114 = vmatpush1.bf16.msra.mxu0 %v14388_v55  ;;  %11139 = vmatpush1.bf16.msra.mxu1 %v14391_v56  ;;  %v1740_v55 = vcombine.high %v17710_v44, %v17710_v44  ;;  %v1722_v56 = vcombine.high %v17533_v48, %v17533_v48  ;;  %v14489_v48 = vld [vmem:[%s21104_s1 + $0x102c] ss:$16 sps:$4 sm:$0xff]  }
 0x1c8   :  { %10115 = vmatprep.subr.bf16.mxu0 %v14396_v47  ;;  %11140 = vmatprep.subr.bf16.mxu1 %v14399_v57  ;;  %v14478_v47 = vld [vmem:[%s21104_s1 + $0x1000] ss:$16 sps:$4 sm:$0xff]   ;;  %v14481_v57 = vld [vmem:[%s21104_s1 + $0x1008] ss:$16 sps:$4 sm:$0xff]  }
 0x1cb   :  { %10116 = vmatpush1.bf16.msra.mxu0 %v14394_v58  ;;  %11141 = vmatpush1.bf16.msra.mxu1 %v14397_v59  ;;  %v14486_v58 = vld [vmem:[%s21104_s1 + $0x1024] ss:$16 sps:$4 sm:$0xff]   ;;  %v17753_v59 = vrot.slane %v1740_v55, %v16239_v49 }
 0x1cc   :  { %10117 = vmatprep.subr.bf16.mxu0 %v14402_v60  ;;  %11142 = vmatprep.subr.bf16.mxu1 %v14405_v61  ;;  %v14484_v60 = vld [vmem:[%s21104_s1 + $0x1020] ss:$16 sps:$4 sm:$0xff]   ;;  %v14487_v61 = vld [vmem:[%s21104_s1 + $0x1028] ss:$16 sps:$4 sm:$0xff]   ;;  %v14570_v55 = vld [vmem:[%s21104_s1 + $0x11e4] ss:$16 sps:$4 sm:$0xff]  }
 0x1cf   :  { %10118 = vmatpush1.bf16.msra.mxu0 %v14400_v62  ;;  %11143 = vmatpush1.bf16.msra.mxu1 %v14403_v63  ;;  %v14492_v62 = vld [vmem:[%s21104_s1 + $0x1044] ss:$16 sps:$4 sm:$0xff]   ;;  %v14495_v63 = vld [vmem:[%s21104_s1 + $0x104c] ss:$16 sps:$4 sm:$0xff]  }
 0x1d0   :  { %10119 = vmatprep.subr.bf16.mxu0 %v14408_v0  ;;  %11144 = vmatprep.subr.bf16.mxu1 %v14411_v1  ;;  %v14490_v0 = vld [vmem:[%s21104_s1 + $0x1040] ss:$16 sps:$4 sm:$0xff]   ;;  %v14493_v1 = vld [vmem:[%s21104_s1 + $0x1048] ss:$16 sps:$4 sm:$0xff]  }
 0x1d3   :  { %10120 = vmatpush1.bf16.msra.mxu0 %v14406_v2  ;;  %11145 = vmatpush1.bf16.msra.mxu1 %v14409_v3  ;;  %v14498_v2 = vld [vmem:[%s21104_s1 + $0x1064] ss:$16 sps:$4 sm:$0xff]   ;;  %v14501_v3 = vld [vmem:[%s21104_s1 + $0x106c] ss:$16 sps:$4 sm:$0xff]  }
 0x1d4   :  { %10121 = vmatprep.subr.bf16.mxu0 %v14414_v4  ;;  %11146 = vmatprep.subr.bf16.mxu1 %v14417_v5  ;;  %v14496_v4 = vld [vmem:[%s21104_s1 + $0x1060] ss:$16 sps:$4 sm:$0xff]   ;;  %v14499_v5 = vld [vmem:[%s21104_s1 + $0x1068] ss:$16 sps:$4 sm:$0xff]  }
 0x1d7   :  { %10122 = vmatpush1.bf16.msra.mxu0 %v14412_v6  ;;  %11147 = vmatpush1.bf16.msra.mxu1 %v14415_v7  ;;  %v14504_v6 = vld [vmem:[%s21104_s1 + $0x1084] ss:$16 sps:$4 sm:$0xff]   ;;  %v14507_v7 = vld [vmem:[%s21104_s1 + $0x108c] ss:$16 sps:$4 sm:$0xff]  }
 0x1d8   :  { %10123 = vmatprep.subr.bf16.mxu0 %v14420_v8  ;;  %11148 = vmatprep.subr.bf16.mxu1 %v14423_v9  ;;  %v14502_v8 = vld [vmem:[%s21104_s1 + $0x1080] ss:$16 sps:$4 sm:$0xff]   ;;  %v14505_v9 = vld [vmem:[%s21104_s1 + $0x1088] ss:$16 sps:$4 sm:$0xff]  }
 0x1db   :  { %10124 = vmatpush1.bf16.msra.mxu0 %v14418_v10  ;;  %11149 = vmatpush1.bf16.msra.mxu1 %v14421_v11  ;;  %v14510_v10 = vld [vmem:[%s21104_s1 + $0x10a4] ss:$16 sps:$4 sm:$0xff]   ;;  %v14513_v11 = vld [vmem:[%s21104_s1 + $0x10ac] ss:$16 sps:$4 sm:$0xff]  }
 0x1dc   :  { %10125 = vmatprep.subr.bf16.mxu0 %v14426_v12  ;;  %11150 = vmatprep.subr.bf16.mxu1 %v14429_v52  ;;  %v14508_v12 = vld [vmem:[%s21104_s1 + $0x10a0] ss:$16 sps:$4 sm:$0xff]   ;;  %v14511_v52 = vld [vmem:[%s21104_s1 + $0x10a8] ss:$16 sps:$4 sm:$0xff]  }
 0x1df   :  { %10126 = vmatpush1.bf16.msra.mxu0 %v14424_v15  ;;  %11151 = vmatpush1.bf16.msra.mxu1 %v14427_v16  ;;  %v14516_v15 = vld [vmem:[%s21104_s1 + $0x10c4] ss:$16 sps:$4 sm:$0xff]   ;;  %v14519_v16 = vld [vmem:[%s21104_s1 + $0x10cc] ss:$16 sps:$4 sm:$0xff]  }
 0x1e0   :  { %10127 = vmatprep.subr.bf16.mxu0 %v14432_v17  ;;  %11152 = vmatprep.subr.bf16.mxu1 %v14435_v18  ;;  %v14514_v17 = vld [vmem:[%s21104_s1 + $0x10c0] ss:$16 sps:$4 sm:$0xff]   ;;  %v14517_v18 = vld [vmem:[%s21104_s1 + $0x10c8] ss:$16 sps:$4 sm:$0xff]  }
 0x1e3   :  { %10128 = vmatpush1.bf16.msra.mxu0 %v14430_v19  ;;  %11153 = vmatpush1.bf16.msra.mxu1 %v14433_v20  ;;  %v14522_v19 = vld [vmem:[%s21104_s1 + $0x10e4] ss:$16 sps:$4 sm:$0xff]   ;;  %v14525_v20 = vld [vmem:[%s21104_s1 + $0x10ec] ss:$16 sps:$4 sm:$0xff]  }
 0x1e4   :  { %10129 = vmatprep.subr.bf16.mxu0 %v14438_v22  ;;  %11154 = vmatprep.subr.bf16.mxu1 %v14441_v23  ;;  %v14520_v22 = vld [vmem:[%s21104_s1 + $0x10e0] ss:$16 sps:$4 sm:$0xff]   ;;  %v14523_v23 = vld [vmem:[%s21104_s1 + $0x10e8] ss:$16 sps:$4 sm:$0xff]  }
 0x1e7   :  { %10130 = vmatpush1.bf16.msra.mxu0 %v14436_v24  ;;  %11155 = vmatpush1.bf16.msra.mxu1 %v14439_v13  ;;  %v14528_v24 = vld [vmem:[%s21104_s1 + $0x1104] ss:$16 sps:$4 sm:$0xff]   ;;  %v14531_v13 = vld [vmem:[%s21104_s1 + $0x110c] ss:$16 sps:$4 sm:$0xff]  }
 0x1e8   :  { %10131 = vmatprep.subr.bf16.mxu0 %v14444_v27  ;;  %11156 = vmatprep.subr.bf16.mxu1 %v14447_v28  ;;  %v14526_v27 = vld [vmem:[%s21104_s1 + $0x1100] ss:$16 sps:$4 sm:$0xff]   ;;  %v14529_v28 = vld [vmem:[%s21104_s1 + $0x1108] ss:$16 sps:$4 sm:$0xff]  }
 0x1eb   :  { %10132 = vmatpush1.bf16.msra.mxu0 %v14442_v29  ;;  %11157 = vmatpush1.bf16.msra.mxu1 %v14445_v14  ;;  %v14534_v29 = vld [vmem:[%s21104_s1 + $0x1124] ss:$16 sps:$4 sm:$0xff]   ;;  %v14537_v14 = vld [vmem:[%s21104_s1 + $0x112c] ss:$16 sps:$4 sm:$0xff]  }
 0x1ec   :  { %10133 = vmatprep.subr.bf16.mxu0 %v14450_v30  ;;  %11158 = vmatprep.subr.bf16.mxu1 %v14453_v31  ;;  %v14532_v30 = vld [vmem:[%s21104_s1 + $0x1120] ss:$16 sps:$4 sm:$0xff]   ;;  %v14535_v31 = vld [vmem:[%s21104_s1 + $0x1128] ss:$16 sps:$4 sm:$0xff]  }
 0x1ef   :  { %10134 = vmatpush1.bf16.msra.mxu0 %v14448_v25  ;;  %11159 = vmatpush1.bf16.msra.mxu1 %v14451_v32  ;;  %v14540_v25 = vld [vmem:[%s21104_s1 + $0x1144] ss:$16 sps:$4 sm:$0xff]   ;;  %v14543_v32 = vld [vmem:[%s21104_s1 + $0x114c] ss:$16 sps:$4 sm:$0xff]  }
 0x1f0   :  { %10135 = vmatprep.subr.bf16.mxu0 %v14456_v33  ;;  %11160 = vmatprep.subr.bf16.mxu1 %v14459_v26  ;;  %v14538_v33 = vld [vmem:[%s21104_s1 + $0x1140] ss:$16 sps:$4 sm:$0xff]   ;;  %v14541_v26 = vld [vmem:[%s21104_s1 + $0x1148] ss:$16 sps:$4 sm:$0xff]  }
 0x1f3   :  { %10136 = vmatpush1.bf16.msra.mxu0 %v14454_v36  ;;  %11161 = vmatpush1.bf16.msra.mxu1 %v14457_v37  ;;  %v14546_v36 = vld [vmem:[%s21104_s1 + $0x1164] ss:$16 sps:$4 sm:$0xff]   ;;  %v14549_v37 = vld [vmem:[%s21104_s1 + $0x116c] ss:$16 sps:$4 sm:$0xff]  }
 0x1f4   :  { %10137 = vmatprep.subr.bf16.mxu0 %v14462_v21  ;;  %11162 = vmatprep.subr.bf16.mxu1 %v14465_v39  ;;  %v14544_v21 = vld [vmem:[%s21104_s1 + $0x1160] ss:$16 sps:$4 sm:$0xff]   ;;  %v14547_v39 = vld [vmem:[%s21104_s1 + $0x1168] ss:$16 sps:$4 sm:$0xff]  }
 0x1f7   :  { %10138 = vmatpush1.bf16.msra.mxu0 %v14460_v40  ;;  %11163 = vmatpush1.bf16.msra.mxu1 %v14463_v41  ;;  %v14552_v40 = vld [vmem:[%s21104_s1 + $0x1184] ss:$16 sps:$4 sm:$0xff]   ;;  %v14555_v41 = vld [vmem:[%s21104_s1 + $0x118c] ss:$16 sps:$4 sm:$0xff]  }
 0x1f8   :  { %10139 = vmatprep.subr.bf16.mxu0 %v14468_v34  ;;  %11164 = vmatprep.subr.bf16.mxu1 %v14471_v43  ;;  %v14550_v34 = vld [vmem:[%s21104_s1 + $0x1180] ss:$16 sps:$4 sm:$0xff]   ;;  %v14553_v43 = vld [vmem:[%s21104_s1 + $0x1188] ss:$16 sps:$4 sm:$0xff]  }
 0x1fb   :  { %10140 = vmatpush1.bf16.msra.mxu0 %v14466_v45  ;;  %11165 = vmatpush1.bf16.msra.mxu1 %v14469_v46  ;;  %v14558_v45 = vld [vmem:[%s21104_s1 + $0x11a4] ss:$16 sps:$4 sm:$0xff]   ;;  %v14561_v46 = vld [vmem:[%s21104_s1 + $0x11ac] ss:$16 sps:$4 sm:$0xff]  }
 0x1fc   :  { %10141 = vmatprep.subr.bf16.mxu0 %v14474_v35  ;;  %11166 = vmatprep.subr.bf16.mxu1 %v14477_v50  ;;  %v14556_v35 = vld [vmem:[%s21104_s1 + $0x11a0] ss:$16 sps:$4 sm:$0xff]   ;;  %v14559_v50 = vld [vmem:[%s21104_s1 + $0x11a8] ss:$16 sps:$4 sm:$0xff]  }
 0x1ff   :  { %10142 = vmatpush1.bf16.msra.mxu0 %v14472_v51  ;;  %11167 = vmatpush1.bf16.msra.mxu1 %v14475_v53  ;;  %v14564_v51 = vld [vmem:[%s21104_s1 + $0x11c4] ss:$16 sps:$4 sm:$0xff]   ;;  %v14567_v53 = vld [vmem:[%s21104_s1 + $0x11cc] ss:$16 sps:$4 sm:$0xff]  }
 0x200   :  { %10152 = vmatprep.subr.bf16.mxu0 %v14480_v38  ;;  %11177 = vmatprep.subr.bf16.mxu1 %v14483_v54  ;;  %v14562_v38 = vld [vmem:[%s21104_s1 + $0x11c0] ss:$16 sps:$4 sm:$0xff]   ;;  %v14565_v54 = vld [vmem:[%s21104_s1 + $0x11c8] ss:$16 sps:$4 sm:$0xff]  }
 0x202   :  { %10144 = vmatmul.mubr.bf16.vlgmr.msra.gmra.mrb[0].mxu0 %v1722_v56  ;;  %11169 = vmatmul.mubr.bf16.vlgmr.msra.gmra.mrb[0].mxu1 %v1722_v56  ;;  %v14573_v56 = vld [vmem:[%s21104_s1 + $0x11ec] ss:$16 sps:$4 sm:$0xff]  }
 0x203   :  { %10153 = vmatpush1.bf16.msra.mxu0 %v14478_v47  ;;  %11178 = vmatpush1.bf16.msra.mxu1 %v14481_v57  ;;  %v14568_v47 = vld [vmem:[%s21104_s1 + $0x11e0] ss:$16 sps:$4 sm:$0xff]   ;;  %v14571_v57 = vld [vmem:[%s21104_s1 + $0x11e8] ss:$16 sps:$4 sm:$0xff]  }
 0x204   :  { %10154 = vmatprep.subr.bf16.mxu0 %v14486_v58  ;;  %11179 = vmatprep.subr.bf16.mxu1 %v14489_v48  ;;  %v14576_v58 = vld [vmem:[%s21104_s1 + $0x1204] ss:$16 sps:$4 sm:$0xff]   ;;  %v14579_v48 = vld [vmem:[%s21104_s1 + $0x120c] ss:$16 sps:$4 sm:$0xff]  }
 0x205   :  { %10184 = vmatprep.mubr.bf16.mxu0 %v17753_v59  ;;  %11209 = vmatprep.mubr.bf16.mxu1 %v17753_v59 }
 0x207   :  { %10155 = vmatpush1.bf16.msra.mxu0 %v14484_v60  ;;  %11180 = vmatpush1.bf16.msra.mxu1 %v14487_v61  ;;  %v17939_v60 = vrot.slane %v17710_v44, %v16239_v49  ;;  %v14574_v61 = vld [vmem:[%s21104_s1 + $0x1200] ss:$16 sps:$4 sm:$0xff]   ;;  %v14585_v44 = vld [vmem:[%s21104_s1 + $0x122c] ss:$16 sps:$4 sm:$0xff]  }
 0x208   :  { %10156 = vmatprep.subr.bf16.mxu0 %v14492_v62  ;;  %11181 = vmatprep.subr.bf16.mxu1 %v14495_v63  ;;  %v14577_v62 = vld [vmem:[%s21104_s1 + $0x1208] ss:$16 sps:$4 sm:$0xff]   ;;  %v14582_v63 = vld [vmem:[%s21104_s1 + $0x1224] ss:$16 sps:$4 sm:$0xff]  }
 0x20b   :  { %10157 = vmatpush1.bf16.msra.mxu0 %v14490_v0  ;;  %11182 = vmatpush1.bf16.msra.mxu1 %v14493_v1  ;;  %v1772_v0 = vcombine.high %v17753_v59, %v17753_v59  ;;  %v14580_v1 = vld [vmem:[%s21104_s1 + $0x1220] ss:$16 sps:$4 sm:$0xff]   ;;  %v14588_v59 = vld [vmem:[%s21104_s1 + $0x1244] ss:$16 sps:$4 sm:$0xff]  }
 0x20c   :  { %10158 = vmatprep.subr.bf16.mxu0 %v14498_v2  ;;  %11183 = vmatprep.subr.bf16.mxu1 %v14501_v3  ;;  %v14583_v2 = vld [vmem:[%s21104_s1 + $0x1228] ss:$16 sps:$4 sm:$0xff]   ;;  %v14591_v3 = vld [vmem:[%s21104_s1 + $0x124c] ss:$16 sps:$4 sm:$0xff]  }
 0x20f   :  { %10159 = vmatpush1.bf16.msra.mxu0 %v14496_v4  ;;  %11184 = vmatpush1.bf16.msra.mxu1 %v14499_v5  ;;  %v14586_v4 = vld [vmem:[%s21104_s1 + $0x1240] ss:$16 sps:$4 sm:$0xff]   ;;  %v14589_v5 = vld [vmem:[%s21104_s1 + $0x1248] ss:$16 sps:$4 sm:$0xff]  }
 0x210   :  { %10160 = vmatprep.subr.bf16.mxu0 %v14504_v6  ;;  %11185 = vmatprep.subr.bf16.mxu1 %v14507_v7  ;;  %v14594_v6 = vld [vmem:[%s21104_s1 + $0x1264] ss:$16 sps:$4 sm:$0xff]   ;;  %v14597_v7 = vld [vmem:[%s21104_s1 + $0x126c] ss:$16 sps:$4 sm:$0xff]  }
 0x213   :  { %10161 = vmatpush1.bf16.msra.mxu0 %v14502_v8  ;;  %11186 = vmatpush1.bf16.msra.mxu1 %v14505_v9  ;;  %v14592_v8 = vld [vmem:[%s21104_s1 + $0x1260] ss:$16 sps:$4 sm:$0xff]   ;;  %v14595_v9 = vld [vmem:[%s21104_s1 + $0x1268] ss:$16 sps:$4 sm:$0xff]  }
 0x214   :  { %10162 = vmatprep.subr.bf16.mxu0 %v14510_v10  ;;  %11187 = vmatprep.subr.bf16.mxu1 %v14513_v11  ;;  %v14600_v10 = vld [vmem:[%s21104_s1 + $0x1284] ss:$16 sps:$4 sm:$0xff]   ;;  %v14603_v11 = vld [vmem:[%s21104_s1 + $0x128c] ss:$16 sps:$4 sm:$0xff]  }
 0x217   :  { %10163 = vmatpush1.bf16.msra.mxu0 %v14508_v12  ;;  %11188 = vmatpush1.bf16.msra.mxu1 %v14511_v52  ;;  %v14598_v12 = vld [vmem:[%s21104_s1 + $0x1280] ss:$16 sps:$4 sm:$0xff]   ;;  %v14601_v52 = vld [vmem:[%s21104_s1 + $0x1288] ss:$16 sps:$4 sm:$0xff]  }
 0x218   :  { %10164 = vmatprep.subr.bf16.mxu0 %v14516_v15  ;;  %11189 = vmatprep.subr.bf16.mxu1 %v14519_v16  ;;  %v14606_v15 = vld [vmem:[%s21104_s1 + $0x12a4] ss:$16 sps:$4 sm:$0xff]   ;;  %v14609_v16 = vld [vmem:[%s21104_s1 + $0x12ac] ss:$16 sps:$4 sm:$0xff]  }
 0x21b   :  { %10165 = vmatpush1.bf16.msra.mxu0 %v14514_v17  ;;  %11190 = vmatpush1.bf16.msra.mxu1 %v14517_v18  ;;  %v14604_v17 = vld [vmem:[%s21104_s1 + $0x12a0] ss:$16 sps:$4 sm:$0xff]   ;;  %v14607_v18 = vld [vmem:[%s21104_s1 + $0x12a8] ss:$16 sps:$4 sm:$0xff]  }
 0x21c   :  { %10166 = vmatprep.subr.bf16.mxu0 %v14522_v19  ;;  %11191 = vmatprep.subr.bf16.mxu1 %v14525_v20  ;;  %v14612_v19 = vld [vmem:[%s21104_s1 + $0x12c4] ss:$16 sps:$4 sm:$0xff]   ;;  %v14615_v20 = vld [vmem:[%s21104_s1 + $0x12cc] ss:$16 sps:$4 sm:$0xff]  }
 0x21f   :  { %10167 = vmatpush1.bf16.msra.mxu0 %v14520_v22  ;;  %11192 = vmatpush1.bf16.msra.mxu1 %v14523_v23  ;;  %v14610_v22 = vld [vmem:[%s21104_s1 + $0x12c0] ss:$16 sps:$4 sm:$0xff]   ;;  %v14613_v23 = vld [vmem:[%s21104_s1 + $0x12c8] ss:$16 sps:$4 sm:$0xff]  }
 0x220   :  { %10168 = vmatprep.subr.bf16.mxu0 %v14528_v24  ;;  %11193 = vmatprep.subr.bf16.mxu1 %v14531_v13  ;;  %v14618_v24 = vld [vmem:[%s21104_s1 + $0x12e4] ss:$16 sps:$4 sm:$0xff]   ;;  %v14621_v13 = vld [vmem:[%s21104_s1 + $0x12ec] ss:$16 sps:$4 sm:$0xff]  }
 0x223   :  { %10169 = vmatpush1.bf16.msra.mxu0 %v14526_v27  ;;  %11194 = vmatpush1.bf16.msra.mxu1 %v14529_v28  ;;  %v14616_v27 = vld [vmem:[%s21104_s1 + $0x12e0] ss:$16 sps:$4 sm:$0xff]   ;;  %v14619_v28 = vld [vmem:[%s21104_s1 + $0x12e8] ss:$16 sps:$4 sm:$0xff]  }
 0x224   :  { %10170 = vmatprep.subr.bf16.mxu0 %v14534_v29  ;;  %11195 = vmatprep.subr.bf16.mxu1 %v14537_v14  ;;  %v14624_v29 = vld [vmem:[%s21104_s1 + $0x1304] ss:$16 sps:$4 sm:$0xff]   ;;  %v14627_v14 = vld [vmem:[%s21104_s1 + $0x130c] ss:$16 sps:$4 sm:$0xff]  }
 0x227   :  { %10171 = vmatpush1.bf16.msra.mxu0 %v14532_v30  ;;  %11196 = vmatpush1.bf16.msra.mxu1 %v14535_v31  ;;  %v14622_v30 = vld [vmem:[%s21104_s1 + $0x1300] ss:$16 sps:$4 sm:$0xff]   ;;  %v14625_v31 = vld [vmem:[%s21104_s1 + $0x1308] ss:$16 sps:$4 sm:$0xff]  }
 0x228   :  { %10172 = vmatprep.subr.bf16.mxu0 %v14540_v25  ;;  %11197 = vmatprep.subr.bf16.mxu1 %v14543_v32  ;;  %v14630_v25 = vld [vmem:[%s21104_s1 + $0x1324] ss:$16 sps:$4 sm:$0xff]   ;;  %v14633_v32 = vld [vmem:[%s21104_s1 + $0x132c] ss:$16 sps:$4 sm:$0xff]  }
 0x22b   :  { %10173 = vmatpush1.bf16.msra.mxu0 %v14538_v33  ;;  %11198 = vmatpush1.bf16.msra.mxu1 %v14541_v26  ;;  %v14628_v33 = vld [vmem:[%s21104_s1 + $0x1320] ss:$16 sps:$4 sm:$0xff]   ;;  %v14631_v26 = vld [vmem:[%s21104_s1 + $0x1328] ss:$16 sps:$4 sm:$0xff]  }
 0x22c   :  { %10174 = vmatprep.subr.bf16.mxu0 %v14546_v36  ;;  %11199 = vmatprep.subr.bf16.mxu1 %v14549_v37  ;;  %v14636_v36 = vld [vmem:[%s21104_s1 + $0x1344] ss:$16 sps:$4 sm:$0xff]   ;;  %v14639_v37 = vld [vmem:[%s21104_s1 + $0x134c] ss:$16 sps:$4 sm:$0xff]  }
 0x22f   :  { %10175 = vmatpush1.bf16.msra.mxu0 %v14544_v21  ;;  %11200 = vmatpush1.bf16.msra.mxu1 %v14547_v39  ;;  %v14634_v21 = vld [vmem:[%s21104_s1 + $0x1340] ss:$16 sps:$4 sm:$0xff]   ;;  %v14637_v39 = vld [vmem:[%s21104_s1 + $0x1348] ss:$16 sps:$4 sm:$0xff]  }
 0x230   :  { %10176 = vmatprep.subr.bf16.mxu0 %v14552_v40  ;;  %11201 = vmatprep.subr.bf16.mxu1 %v14555_v41  ;;  %v14642_v40 = vld [vmem:[%s21104_s1 + $0x1364] ss:$16 sps:$4 sm:$0xff]   ;;  %v14645_v41 = vld [vmem:[%s21104_s1 + $0x136c] ss:$16 sps:$4 sm:$0xff]  }
 0x233   :  { %10177 = vmatpush1.bf16.msra.mxu0 %v14550_v34  ;;  %11202 = vmatpush1.bf16.msra.mxu1 %v14553_v43  ;;  %v14640_v34 = vld [vmem:[%s21104_s1 + $0x1360] ss:$16 sps:$4 sm:$0xff]   ;;  %v14643_v43 = vld [vmem:[%s21104_s1 + $0x1368] ss:$16 sps:$4 sm:$0xff]  }
 0x234   :  { %10178 = vmatprep.subr.bf16.mxu0 %v14558_v45  ;;  %11203 = vmatprep.subr.bf16.mxu1 %v14561_v46  ;;  %v14648_v45 = vld [vmem:[%s21104_s1 + $0x1384] ss:$16 sps:$4 sm:$0xff]   ;;  %v14651_v46 = vld [vmem:[%s21104_s1 + $0x138c] ss:$16 sps:$4 sm:$0xff]  }
 0x237   :  { %10179 = vmatpush1.bf16.msra.mxu0 %v14556_v35  ;;  %11204 = vmatpush1.bf16.msra.mxu1 %v14559_v50  ;;  %v14646_v35 = vld [vmem:[%s21104_s1 + $0x1380] ss:$16 sps:$4 sm:$0xff]   ;;  %v14649_v50 = vld [vmem:[%s21104_s1 + $0x1388] ss:$16 sps:$4 sm:$0xff]  }
 0x238   :  { %10180 = vmatprep.subr.bf16.mxu0 %v14564_v51  ;;  %11205 = vmatprep.subr.bf16.mxu1 %v14567_v53  ;;  %v14654_v51 = vld [vmem:[%s21104_s1 + $0x13a4] ss:$16 sps:$4 sm:$0xff]   ;;  %v14657_v53 = vld [vmem:[%s21104_s1 + $0x13ac] ss:$16 sps:$4 sm:$0xff]  }
 0x23b   :  { %10181 = vmatpush1.bf16.msra.mxu0 %v14562_v38  ;;  %11206 = vmatpush1.bf16.msra.mxu1 %v14565_v54  ;;  %v14652_v38 = vld [vmem:[%s21104_s1 + $0x13a0] ss:$16 sps:$4 sm:$0xff]   ;;  %v14655_v54 = vld [vmem:[%s21104_s1 + $0x13a8] ss:$16 sps:$4 sm:$0xff]  }
 0x23c   :  { %10182 = vmatprep.subr.bf16.mxu0 %v14570_v55  ;;  %11207 = vmatprep.subr.bf16.mxu1 %v14573_v56  ;;  %v14660_v55 = vld [vmem:[%s21104_s1 + $0x13c4] ss:$16 sps:$4 sm:$0xff]   ;;  %v14663_v56 = vld [vmem:[%s21104_s1 + $0x13cc] ss:$16 sps:$4 sm:$0xff]  }
 0x23f   :  { %10183 = vmatpush1.bf16.msra.mxu0 %v14568_v47  ;;  %11208 = vmatpush1.bf16.msra.mxu1 %v14571_v57  ;;  %v16069_v47 = vld [vmem:[%s21105_s0 + $0x10] sm:$0xff] }
 0x240   :  { %10193 = vmatprep.subr.bf16.mxu0 %v14576_v58  ;;  %11218 = vmatprep.subr.bf16.mxu1 %v14579_v48  ;;  %v1725_v57 = vcombine.high %v16069_v47, %v16069_v47  ;;  %v14658_v58 = vld [vmem:[%s21104_s1 + $0x13c0] ss:$16 sps:$4 sm:$0xff]   ;;  %v14661_v48 = vld [vmem:[%s21104_s1 + $0x13c8] ss:$16 sps:$4 sm:$0xff]  }
 0x241   :  { %v14742_v47 = vld [vmem:[%s21104_s1 + $0x1580] ss:$16 sps:$4 sm:$0xff]  }
 0x242   :  { %10185 = vmatmul.mubr.bf16.vlgmr.msra.gmra.mrb[0].mxu0 %v17939_v60  ;;  %11210 = vmatmul.mubr.bf16.vlgmr.msra.gmra.mrb[0].mxu1 %v17939_v60 }
 0x243   :  { %10194 = vmatpush1.bf16.msra.mxu0 %v14574_v61  ;;  %11219 = vmatpush1.bf16.msra.mxu1 %v14577_v62  ;;  %v14666_v61 = vld [vmem:[%s21104_s1 + $0x13e4] ss:$16 sps:$4 sm:$0xff]   ;;  %v14669_v62 = vld [vmem:[%s21104_s1 + $0x13ec] ss:$16 sps:$4 sm:$0xff]  }
 0x244   :  { %10195 = vmatprep.subr.bf16.mxu0 %v14582_v63  ;;  %11220 = vmatprep.subr.bf16.mxu1 %v14585_v44  ;;  %v18129_v63 = vrot.slane %v1725_v57, %v16239_v49  ;;  %v14664_v44 = vld [vmem:[%s21104_s1 + $0x13e0] ss:$16 sps:$4 sm:$0xff]   ;;  %v14745_v57 = vld [vmem:[%s21104_s1 + $0x1588] ss:$16 sps:$4 sm:$0xff]  }
 0x245   :  { %10225 = vmatprep.mubr.bf16.mxu0 %v1772_v0  ;;  %11250 = vmatprep.mubr.bf16.mxu1 %v1772_v0  ;;  %v14667_v0 = vld [vmem:[%s21104_s1 + $0x13e8] ss:$16 sps:$4 sm:$0xff]  }
 0x247   :  { %10196 = vmatpush1.bf16.msra.mxu0 %v14580_v1  ;;  %11221 = vmatpush1.bf16.msra.mxu1 %v14583_v2  ;;  %v14672_v1 = vld [vmem:[%s21104_s1 + $0x1404] ss:$16 sps:$4 sm:$0xff]   ;;  %v14675_v2 = vld [vmem:[%s21104_s1 + $0x140c] ss:$16 sps:$4 sm:$0xff]  }
 0x248   :  { %10197 = vmatprep.subr.bf16.mxu0 %v14588_v59  ;;  %11222 = vmatprep.subr.bf16.mxu1 %v14591_v3  ;;  %v1741_v59 = vcombine.high %v18129_v63, %v18129_v63  ;;  %v1770_v3 = vcombine.high %v17939_v60, %v17939_v60  ;;  %v14681_v60 = vld [vmem:[%s21104_s1 + $0x142c] ss:$16 sps:$4 sm:$0xff]  }
 0x24b   :  { %10198 = vmatpush1.bf16.msra.mxu0 %v14586_v4  ;;  %11223 = vmatpush1.bf16.msra.mxu1 %v14589_v5  ;;  %v14670_v4 = vld [vmem:[%s21104_s1 + $0x1400] ss:$16 sps:$4 sm:$0xff]   ;;  %v14673_v5 = vld [vmem:[%s21104_s1 + $0x1408] ss:$16 sps:$4 sm:$0xff]  }
 0x24c   :  { %10199 = vmatprep.subr.bf16.mxu0 %v14594_v6  ;;  %11224 = vmatprep.subr.bf16.mxu1 %v14597_v7  ;;  %v14678_v6 = vld [vmem:[%s21104_s1 + $0x1424] ss:$16 sps:$4 sm:$0xff]   ;;  %v18160_v7 = vrot.slane %v1741_v59, %v16239_v49 }
 0x24d   :  { %v14762_v59 = vld [vmem:[%s21104_s1 + $0x15e4] ss:$16 sps:$4 sm:$0xff]  }
 0x24f   :  { %10200 = vmatpush1.bf16.msra.mxu0 %v14592_v8  ;;  %11225 = vmatpush1.bf16.msra.mxu1 %v14595_v9  ;;  %v14676_v8 = vld [vmem:[%s21104_s1 + $0x1420] ss:$16 sps:$4 sm:$0xff]   ;;  %v14679_v9 = vld [vmem:[%s21104_s1 + $0x1428] ss:$16 sps:$4 sm:$0xff]  }
 0x250   :  { %10201 = vmatprep.subr.bf16.mxu0 %v14600_v10  ;;  %11226 = vmatprep.subr.bf16.mxu1 %v14603_v11  ;;  %v14684_v10 = vld [vmem:[%s21104_s1 + $0x1444] ss:$16 sps:$4 sm:$0xff]   ;;  %v14687_v11 = vld [vmem:[%s21104_s1 + $0x144c] ss:$16 sps:$4 sm:$0xff]  }
 0x253   :  { %10202 = vmatpush1.bf16.msra.mxu0 %v14598_v12  ;;  %11227 = vmatpush1.bf16.msra.mxu1 %v14601_v52  ;;  %v14682_v12 = vld [vmem:[%s21104_s1 + $0x1440] ss:$16 sps:$4 sm:$0xff]   ;;  %v14685_v52 = vld [vmem:[%s21104_s1 + $0x1448] ss:$16 sps:$4 sm:$0xff]  }
 0x254   :  { %10203 = vmatprep.subr.bf16.mxu0 %v14606_v15  ;;  %11228 = vmatprep.subr.bf16.mxu1 %v14609_v16  ;;  %v14690_v15 = vld [vmem:[%s21104_s1 + $0x1464] ss:$16 sps:$4 sm:$0xff]   ;;  %v14693_v16 = vld [vmem:[%s21104_s1 + $0x146c] ss:$16 sps:$4 sm:$0xff]  }
 0x257   :  { %10204 = vmatpush1.bf16.msra.mxu0 %v14604_v17  ;;  %11229 = vmatpush1.bf16.msra.mxu1 %v14607_v18  ;;  %v14688_v17 = vld [vmem:[%s21104_s1 + $0x1460] ss:$16 sps:$4 sm:$0xff]   ;;  %v14691_v18 = vld [vmem:[%s21104_s1 + $0x1468] ss:$16 sps:$4 sm:$0xff]  }
 0x258   :  { %10205 = vmatprep.subr.bf16.mxu0 %v14612_v19  ;;  %11230 = vmatprep.subr.bf16.mxu1 %v14615_v20  ;;  %v14696_v19 = vld [vmem:[%s21104_s1 + $0x1484] ss:$16 sps:$4 sm:$0xff]   ;;  %v14699_v20 = vld [vmem:[%s21104_s1 + $0x148c] ss:$16 sps:$4 sm:$0xff]  }
 0x25b   :  { %10206 = vmatpush1.bf16.msra.mxu0 %v14610_v22  ;;  %11231 = vmatpush1.bf16.msra.mxu1 %v14613_v23  ;;  %v14694_v22 = vld [vmem:[%s21104_s1 + $0x1480] ss:$16 sps:$4 sm:$0xff]   ;;  %v14697_v23 = vld [vmem:[%s21104_s1 + $0x1488] ss:$16 sps:$4 sm:$0xff]  }
 0x25c   :  { %10207 = vmatprep.subr.bf16.mxu0 %v14618_v24  ;;  %11232 = vmatprep.subr.bf16.mxu1 %v14621_v13  ;;  %v14702_v24 = vld [vmem:[%s21104_s1 + $0x14a4] ss:$16 sps:$4 sm:$0xff]   ;;  %v14705_v13 = vld [vmem:[%s21104_s1 + $0x14ac] ss:$16 sps:$4 sm:$0xff]  }
 0x25f   :  { %10208 = vmatpush1.bf16.msra.mxu0 %v14616_v27  ;;  %11233 = vmatpush1.bf16.msra.mxu1 %v14619_v28  ;;  %v14700_v27 = vld [vmem:[%s21104_s1 + $0x14a0] ss:$16 sps:$4 sm:$0xff]   ;;  %v14703_v28 = vld [vmem:[%s21104_s1 + $0x14a8] ss:$16 sps:$4 sm:$0xff]  }
 0x260   :  { %10209 = vmatprep.subr.bf16.mxu0 %v14624_v29  ;;  %11234 = vmatprep.subr.bf16.mxu1 %v14627_v14  ;;  %v14708_v29 = vld [vmem:[%s21104_s1 + $0x14c4] ss:$16 sps:$4 sm:$0xff]   ;;  %v14711_v14 = vld [vmem:[%s21104_s1 + $0x14cc] ss:$16 sps:$4 sm:$0xff]  }
 0x263   :  { %10210 = vmatpush1.bf16.msra.mxu0 %v14622_v30  ;;  %11235 = vmatpush1.bf16.msra.mxu1 %v14625_v31  ;;  %v14706_v30 = vld [vmem:[%s21104_s1 + $0x14c0] ss:$16 sps:$4 sm:$0xff]   ;;  %v14709_v31 = vld [vmem:[%s21104_s1 + $0x14c8] ss:$16 sps:$4 sm:$0xff]  }
 0x264   :  { %10211 = vmatprep.subr.bf16.mxu0 %v14630_v25  ;;  %11236 = vmatprep.subr.bf16.mxu1 %v14633_v32  ;;  %v14714_v25 = vld [vmem:[%s21104_s1 + $0x14e4] ss:$16 sps:$4 sm:$0xff]   ;;  %v14717_v32 = vld [vmem:[%s21104_s1 + $0x14ec] ss:$16 sps:$4 sm:$0xff]  }
 0x267   :  { %10212 = vmatpush1.bf16.msra.mxu0 %v14628_v33  ;;  %11237 = vmatpush1.bf16.msra.mxu1 %v14631_v26  ;;  %v14712_v33 = vld [vmem:[%s21104_s1 + $0x14e0] ss:$16 sps:$4 sm:$0xff]   ;;  %v14715_v26 = vld [vmem:[%s21104_s1 + $0x14e8] ss:$16 sps:$4 sm:$0xff]  }
 0x268   :  { %10213 = vmatprep.subr.bf16.mxu0 %v14636_v36  ;;  %11238 = vmatprep.subr.bf16.mxu1 %v14639_v37  ;;  %v14720_v36 = vld [vmem:[%s21104_s1 + $0x1504] ss:$16 sps:$4 sm:$0xff]   ;;  %v14723_v37 = vld [vmem:[%s21104_s1 + $0x150c] ss:$16 sps:$4 sm:$0xff]  }
 0x26b   :  { %10214 = vmatpush1.bf16.msra.mxu0 %v14634_v21  ;;  %11239 = vmatpush1.bf16.msra.mxu1 %v14637_v39  ;;  %v14718_v21 = vld [vmem:[%s21104_s1 + $0x1500] ss:$16 sps:$4 sm:$0xff]   ;;  %v14721_v39 = vld [vmem:[%s21104_s1 + $0x1508] ss:$16 sps:$4 sm:$0xff]  }
 0x26c   :  { %10215 = vmatprep.subr.bf16.mxu0 %v14642_v40  ;;  %11240 = vmatprep.subr.bf16.mxu1 %v14645_v41  ;;  %v14726_v40 = vld [vmem:[%s21104_s1 + $0x1524] ss:$16 sps:$4 sm:$0xff]   ;;  %v14729_v41 = vld [vmem:[%s21104_s1 + $0x152c] ss:$16 sps:$4 sm:$0xff]  }
 0x26f   :  { %10216 = vmatpush1.bf16.msra.mxu0 %v14640_v34  ;;  %11241 = vmatpush1.bf16.msra.mxu1 %v14643_v43  ;;  %v14724_v34 = vld [vmem:[%s21104_s1 + $0x1520] ss:$16 sps:$4 sm:$0xff]   ;;  %v14727_v43 = vld [vmem:[%s21104_s1 + $0x1528] ss:$16 sps:$4 sm:$0xff]  }
 0x270   :  { %10217 = vmatprep.subr.bf16.mxu0 %v14648_v45  ;;  %11242 = vmatprep.subr.bf16.mxu1 %v14651_v46  ;;  %v14732_v45 = vld [vmem:[%s21104_s1 + $0x1544] ss:$16 sps:$4 sm:$0xff]   ;;  %v14735_v46 = vld [vmem:[%s21104_s1 + $0x154c] ss:$16 sps:$4 sm:$0xff]  }
 0x273   :  { %10218 = vmatpush1.bf16.msra.mxu0 %v14646_v35  ;;  %11243 = vmatpush1.bf16.msra.mxu1 %v14649_v50  ;;  %v14730_v35 = vld [vmem:[%s21104_s1 + $0x1540] ss:$16 sps:$4 sm:$0xff]   ;;  %v14733_v50 = vld [vmem:[%s21104_s1 + $0x1548] ss:$16 sps:$4 sm:$0xff]  }
 0x274   :  { %10219 = vmatprep.subr.bf16.mxu0 %v14654_v51  ;;  %11244 = vmatprep.subr.bf16.mxu1 %v14657_v53  ;;  %v14738_v51 = vld [vmem:[%s21104_s1 + $0x1564] ss:$16 sps:$4 sm:$0xff]   ;;  %v14741_v53 = vld [vmem:[%s21104_s1 + $0x156c] ss:$16 sps:$4 sm:$0xff]  }
 0x277   :  { %10220 = vmatpush1.bf16.msra.mxu0 %v14652_v38  ;;  %11245 = vmatpush1.bf16.msra.mxu1 %v14655_v54  ;;  %v14736_v38 = vld [vmem:[%s21104_s1 + $0x1560] ss:$16 sps:$4 sm:$0xff]   ;;  %v14739_v54 = vld [vmem:[%s21104_s1 + $0x1568] ss:$16 sps:$4 sm:$0xff]  }
 0x278   :  { %10221 = vmatprep.subr.bf16.mxu0 %v14660_v55  ;;  %11246 = vmatprep.subr.bf16.mxu1 %v14663_v56  ;;  %v14744_v55 = vld [vmem:[%s21104_s1 + $0x1584] ss:$16 sps:$4 sm:$0xff]   ;;  %v14747_v56 = vld [vmem:[%s21104_s1 + $0x158c] ss:$16 sps:$4 sm:$0xff]  }
 0x27b   :  { %10222 = vmatpush1.bf16.msra.mxu0 %v14658_v58  ;;  %11247 = vmatpush1.bf16.msra.mxu1 %v14661_v48  ;;  %v14750_v58 = vld [vmem:[%s21104_s1 + $0x15a4] ss:$16 sps:$4 sm:$0xff]   ;;  %v14753_v48 = vld [vmem:[%s21104_s1 + $0x15ac] ss:$16 sps:$4 sm:$0xff]  }
 0x27c   :  { %10223 = vmatprep.subr.bf16.mxu0 %v14666_v61  ;;  %11248 = vmatprep.subr.bf16.mxu1 %v14669_v62  ;;  %v14748_v61 = vld [vmem:[%s21104_s1 + $0x15a0] ss:$16 sps:$4 sm:$0xff]   ;;  %v14751_v62 = vld [vmem:[%s21104_s1 + $0x15a8] ss:$16 sps:$4 sm:$0xff]  }
 0x27f   :  { %10224 = vmatpush1.bf16.msra.mxu0 %v14664_v44  ;;  %11249 = vmatpush1.bf16.msra.mxu1 %v14667_v0  ;;  %v14756_v44 = vld [vmem:[%s21104_s1 + $0x15c4] ss:$16 sps:$4 sm:$0xff]   ;;  %v14759_v0 = vld [vmem:[%s21104_s1 + $0x15cc] ss:$16 sps:$4 sm:$0xff]  }
 0x280   :  { %10234 = vmatprep.subr.bf16.mxu0 %v14672_v1  ;;  %11259 = vmatprep.subr.bf16.mxu1 %v14675_v2  ;;  %v14754_v1 = vld [vmem:[%s21104_s1 + $0x15c0] ss:$16 sps:$4 sm:$0xff]   ;;  %v14757_v2 = vld [vmem:[%s21104_s1 + $0x15c8] ss:$16 sps:$4 sm:$0xff]  }
 0x282   :  { %10226 = vmatmul.mubr.bf16.vlgmr.msra.gmra.mrb[0].mxu0 %v1770_v3  ;;  %11251 = vmatmul.mubr.bf16.vlgmr.msra.gmra.mrb[0].mxu1 %v1770_v3  ;;  %v14765_v3 = vld [vmem:[%s21104_s1 + $0x15ec] ss:$16 sps:$4 sm:$0xff]  }
 0x283   :  { %10235 = vmatpush1.bf16.msra.mxu0 %v14670_v4  ;;  %11260 = vmatpush1.bf16.msra.mxu1 %v14673_v5  ;;  %v14760_v4 = vld [vmem:[%s21104_s1 + $0x15e0] ss:$16 sps:$4 sm:$0xff]   ;;  %v14763_v5 = vld [vmem:[%s21104_s1 + $0x15e8] ss:$16 sps:$4 sm:$0xff]  }
 0x284   :  { %10236 = vmatprep.subr.bf16.mxu0 %v14678_v6  ;;  %11261 = vmatprep.subr.bf16.mxu1 %v14681_v60  ;;  %v14769_v6 = vld [vmem:[%s21104_s1 + $0x1604] ss:$16 sps:$4 sm:$0xff]   ;;  %v14772_v60 = vld [vmem:[%s21104_s1 + $0x160c] ss:$16 sps:$4 sm:$0xff]  }
 0x285   :  { %10266 = vmatprep.mubr.bf16.mxu0 %v18160_v7  ;;  %11291 = vmatprep.mubr.bf16.mxu1 %v18160_v7 }
 0x287   :  { %10237 = vmatpush1.bf16.msra.mxu0 %v14676_v8  ;;  %11262 = vmatpush1.bf16.msra.mxu1 %v14679_v9  ;;  %v18346_v8 = vrot.slane %v18129_v63, %v16239_v49  ;;  %v14767_v9 = vld [vmem:[%s21104_s1 + $0x1600] ss:$16 sps:$4 sm:$0xff]   ;;  %v14778_v63 = vld [vmem:[%s21104_s1 + $0x162c] ss:$16 sps:$4 sm:$0xff]  }
 0x288   :  { %10238 = vmatprep.subr.bf16.mxu0 %v14684_v10  ;;  %11263 = vmatprep.subr.bf16.mxu1 %v14687_v11  ;;  %v14770_v10 = vld [vmem:[%s21104_s1 + $0x1608] ss:$16 sps:$4 sm:$0xff]   ;;  %v14775_v11 = vld [vmem:[%s21104_s1 + $0x1624] ss:$16 sps:$4 sm:$0xff]  }
 0x28b   :  { %10239 = vmatpush1.bf16.msra.mxu0 %v14682_v12  ;;  %11264 = vmatpush1.bf16.msra.mxu1 %v14685_v52  ;;  %v1773_v12 = vcombine.high %v18160_v7, %v18160_v7  ;;  %v14773_v52 = vld [vmem:[%s21104_s1 + $0x1620] ss:$16 sps:$4 sm:$0xff]   ;;  %v14781_v7 = vld [vmem:[%s21104_s1 + $0x1644] ss:$16 sps:$4 sm:$0xff]  }
 0x28c   :  { %10240 = vmatprep.subr.bf16.mxu0 %v14690_v15  ;;  %11265 = vmatprep.subr.bf16.mxu1 %v14693_v16  ;;  %v14776_v15 = vld [vmem:[%s21104_s1 + $0x1628] ss:$16 sps:$4 sm:$0xff]   ;;  %v14784_v16 = vld [vmem:[%s21104_s1 + $0x164c] ss:$16 sps:$4 sm:$0xff]  }
 0x28f   :  { %10241 = vmatpush1.bf16.msra.mxu0 %v14688_v17  ;;  %11266 = vmatpush1.bf16.msra.mxu1 %v14691_v18  ;;  %v14779_v17 = vld [vmem:[%s21104_s1 + $0x1640] ss:$16 sps:$4 sm:$0xff]   ;;  %v14782_v18 = vld [vmem:[%s21104_s1 + $0x1648] ss:$16 sps:$4 sm:$0xff]  }
 0x290   :  { %10242 = vmatprep.subr.bf16.mxu0 %v14696_v19  ;;  %11267 = vmatprep.subr.bf16.mxu1 %v14699_v20  ;;  %v14787_v19 = vld [vmem:[%s21104_s1 + $0x1664] ss:$16 sps:$4 sm:$0xff]   ;;  %v14790_v20 = vld [vmem:[%s21104_s1 + $0x166c] ss:$16 sps:$4 sm:$0xff]  }
 0x293   :  { %10243 = vmatpush1.bf16.msra.mxu0 %v14694_v22  ;;  %11268 = vmatpush1.bf16.msra.mxu1 %v14697_v23  ;;  %v14785_v22 = vld [vmem:[%s21104_s1 + $0x1660] ss:$16 sps:$4 sm:$0xff]   ;;  %v14788_v23 = vld [vmem:[%s21104_s1 + $0x1668] ss:$16 sps:$4 sm:$0xff]  }
 0x294   :  { %10244 = vmatprep.subr.bf16.mxu0 %v14702_v24  ;;  %11269 = vmatprep.subr.bf16.mxu1 %v14705_v13  ;;  %v14793_v24 = vld [vmem:[%s21104_s1 + $0x1684] ss:$16 sps:$4 sm:$0xff]   ;;  %v14796_v13 = vld [vmem:[%s21104_s1 + $0x168c] ss:$16 sps:$4 sm:$0xff]  }
 0x297   :  { %10245 = vmatpush1.bf16.msra.mxu0 %v14700_v27  ;;  %11270 = vmatpush1.bf16.msra.mxu1 %v14703_v28  ;;  %v14791_v27 = vld [vmem:[%s21104_s1 + $0x1680] ss:$16 sps:$4 sm:$0xff]   ;;  %v14794_v28 = vld [vmem:[%s21104_s1 + $0x1688] ss:$16 sps:$4 sm:$0xff]  }
 0x298   :  { %10246 = vmatprep.subr.bf16.mxu0 %v14708_v29  ;;  %11271 = vmatprep.subr.bf16.mxu1 %v14711_v14  ;;  %v14799_v29 = vld [vmem:[%s21104_s1 + $0x16a4] ss:$16 sps:$4 sm:$0xff]   ;;  %v14802_v14 = vld [vmem:[%s21104_s1 + $0x16ac] ss:$16 sps:$4 sm:$0xff]  }
 0x29b   :  { %10247 = vmatpush1.bf16.msra.mxu0 %v14706_v30  ;;  %11272 = vmatpush1.bf16.msra.mxu1 %v14709_v31  ;;  %v14797_v30 = vld [vmem:[%s21104_s1 + $0x16a0] ss:$16 sps:$4 sm:$0xff]   ;;  %v14800_v31 = vld [vmem:[%s21104_s1 + $0x16a8] ss:$16 sps:$4 sm:$0xff]  }
 0x29c   :  { %10248 = vmatprep.subr.bf16.mxu0 %v14714_v25  ;;  %11273 = vmatprep.subr.bf16.mxu1 %v14717_v32  ;;  %v14805_v25 = vld [vmem:[%s21104_s1 + $0x16c4] ss:$16 sps:$4 sm:$0xff]   ;;  %v14808_v32 = vld [vmem:[%s21104_s1 + $0x16cc] ss:$16 sps:$4 sm:$0xff]  }
 0x29f   :  { %10249 = vmatpush1.bf16.msra.mxu0 %v14712_v33  ;;  %11274 = vmatpush1.bf16.msra.mxu1 %v14715_v26  ;;  %v14803_v33 = vld [vmem:[%s21104_s1 + $0x16c0] ss:$16 sps:$4 sm:$0xff]   ;;  %v14806_v26 = vld [vmem:[%s21104_s1 + $0x16c8] ss:$16 sps:$4 sm:$0xff]  }
 0x2a0   :  { %10250 = vmatprep.subr.bf16.mxu0 %v14720_v36  ;;  %11275 = vmatprep.subr.bf16.mxu1 %v14723_v37  ;;  %v14811_v36 = vld [vmem:[%s21104_s1 + $0x16e4] ss:$16 sps:$4 sm:$0xff]   ;;  %v14814_v37 = vld [vmem:[%s21104_s1 + $0x16ec] ss:$16 sps:$4 sm:$0xff]  }
 0x2a3   :  { %10251 = vmatpush1.bf16.msra.mxu0 %v14718_v21  ;;  %11276 = vmatpush1.bf16.msra.mxu1 %v14721_v39  ;;  %v14809_v21 = vld [vmem:[%s21104_s1 + $0x16e0] ss:$16 sps:$4 sm:$0xff]   ;;  %v14812_v39 = vld [vmem:[%s21104_s1 + $0x16e8] ss:$16 sps:$4 sm:$0xff]  }
 0x2a4   :  { %10252 = vmatprep.subr.bf16.mxu0 %v14726_v40  ;;  %11277 = vmatprep.subr.bf16.mxu1 %v14729_v41  ;;  %v14817_v40 = vld [vmem:[%s21104_s1 + $0x1704] ss:$16 sps:$4 sm:$0xff]   ;;  %v14820_v41 = vld [vmem:[%s21104_s1 + $0x170c] ss:$16 sps:$4 sm:$0xff]  }
 0x2a7   :  { %10253 = vmatpush1.bf16.msra.mxu0 %v14724_v34  ;;  %11278 = vmatpush1.bf16.msra.mxu1 %v14727_v43  ;;  %v14815_v34 = vld [vmem:[%s21104_s1 + $0x1700] ss:$16 sps:$4 sm:$0xff]   ;;  %v14818_v43 = vld [vmem:[%s21104_s1 + $0x1708] ss:$16 sps:$4 sm:$0xff]  }
 0x2a8   :  { %10254 = vmatprep.subr.bf16.mxu0 %v14732_v45  ;;  %11279 = vmatprep.subr.bf16.mxu1 %v14735_v46  ;;  %v14823_v45 = vld [vmem:[%s21104_s1 + $0x1724] ss:$16 sps:$4 sm:$0xff]   ;;  %v14826_v46 = vld [vmem:[%s21104_s1 + $0x172c] ss:$16 sps:$4 sm:$0xff]  }
 0x2ab   :  { %10255 = vmatpush1.bf16.msra.mxu0 %v14730_v35  ;;  %11280 = vmatpush1.bf16.msra.mxu1 %v14733_v50  ;;  %v14821_v35 = vld [vmem:[%s21104_s1 + $0x1720] ss:$16 sps:$4 sm:$0xff]   ;;  %v14824_v50 = vld [vmem:[%s21104_s1 + $0x1728] ss:$16 sps:$4 sm:$0xff]  }
 0x2ac   :  { %10256 = vmatprep.subr.bf16.mxu0 %v14738_v51  ;;  %11281 = vmatprep.subr.bf16.mxu1 %v14741_v53  ;;  %v14829_v51 = vld [vmem:[%s21104_s1 + $0x1744] ss:$16 sps:$4 sm:$0xff]   ;;  %v14832_v53 = vld [vmem:[%s21104_s1 + $0x174c] ss:$16 sps:$4 sm:$0xff]  }
 0x2af   :  { %10257 = vmatpush1.bf16.msra.mxu0 %v14736_v38  ;;  %11282 = vmatpush1.bf16.msra.mxu1 %v14739_v54  ;;  %v14827_v38 = vld [vmem:[%s21104_s1 + $0x1740] ss:$16 sps:$4 sm:$0xff]   ;;  %v14830_v54 = vld [vmem:[%s21104_s1 + $0x1748] ss:$16 sps:$4 sm:$0xff]  }
 0x2b0   :  { %10258 = vmatprep.subr.bf16.mxu0 %v14744_v55  ;;  %11283 = vmatprep.subr.bf16.mxu1 %v14747_v56  ;;  %v14835_v55 = vld [vmem:[%s21104_s1 + $0x1764] ss:$16 sps:$4 sm:$0xff]   ;;  %v14838_v56 = vld [vmem:[%s21104_s1 + $0x176c] ss:$16 sps:$4 sm:$0xff]  }
 0x2b3   :  { %10259 = vmatpush1.bf16.msra.mxu0 %v14742_v47  ;;  %11284 = vmatpush1.bf16.msra.mxu1 %v14745_v57  ;;  %v14833_v47 = vld [vmem:[%s21104_s1 + $0x1760] ss:$16 sps:$4 sm:$0xff]   ;;  %v14836_v57 = vld [vmem:[%s21104_s1 + $0x1768] ss:$16 sps:$4 sm:$0xff]  }
 0x2b4   :  { %10260 = vmatprep.subr.bf16.mxu0 %v14750_v58  ;;  %11285 = vmatprep.subr.bf16.mxu1 %v14753_v48  ;;  %v14841_v58 = vld [vmem:[%s21104_s1 + $0x1784] ss:$16 sps:$4 sm:$0xff]   ;;  %v14844_v48 = vld [vmem:[%s21104_s1 + $0x178c] ss:$16 sps:$4 sm:$0xff]  }
 0x2b7   :  { %10261 = vmatpush1.bf16.msra.mxu0 %v14748_v61  ;;  %11286 = vmatpush1.bf16.msra.mxu1 %v14751_v62  ;;  %v14839_v61 = vld [vmem:[%s21104_s1 + $0x1780] ss:$16 sps:$4 sm:$0xff]   ;;  %v14842_v62 = vld [vmem:[%s21104_s1 + $0x1788] ss:$16 sps:$4 sm:$0xff]  }
 0x2b8   :  { %10262 = vmatprep.subr.bf16.mxu0 %v14756_v44  ;;  %11287 = vmatprep.subr.bf16.mxu1 %v14759_v0  ;;  %v14847_v44 = vld [vmem:[%s21104_s1 + $0x17a4] ss:$16 sps:$4 sm:$0xff]   ;;  %v14850_v0 = vld [vmem:[%s21104_s1 + $0x17ac] ss:$16 sps:$4 sm:$0xff]  }
 0x2bb   :  { %10263 = vmatpush1.bf16.msra.mxu0 %v14754_v1  ;;  %11288 = vmatpush1.bf16.msra.mxu1 %v14757_v2  ;;  %v14845_v1 = vld [vmem:[%s21104_s1 + $0x17a0] ss:$16 sps:$4 sm:$0xff]   ;;  %v14848_v2 = vld [vmem:[%s21104_s1 + $0x17a8] ss:$16 sps:$4 sm:$0xff]  }
 0x2bc   :  { %10264 = vmatprep.subr.bf16.mxu0 %v14762_v59  ;;  %11289 = vmatprep.subr.bf16.mxu1 %v14765_v3  ;;  %v14853_v59 = vld [vmem:[%s21104_s1 + $0x17c4] ss:$16 sps:$4 sm:$0xff]   ;;  %v14856_v3 = vld [vmem:[%s21104_s1 + $0x17cc] ss:$16 sps:$4 sm:$0xff]  }
 0x2bf   :  { %10265 = vmatpush1.bf16.msra.mxu0 %v14760_v4  ;;  %11290 = vmatpush1.bf16.msra.mxu1 %v14763_v5  ;;  %v18523_v4 = vld [vmem:[%s21105_s0 + $0x18] sm:$0xff]  ;;  %v14851_v5 = vld [vmem:[%s21104_s1 + $0x17c0] ss:$16 sps:$4 sm:$0xff]  }
 0x2c0   :  { %10275 = vmatprep.subr.bf16.mxu0 %v14769_v6  ;;  %11300 = vmatprep.subr.bf16.mxu1 %v14772_v60  ;;  %v14854_v6 = vld [vmem:[%s21104_s1 + $0x17c8] ss:$16 sps:$4 sm:$0xff]   ;;  %v14859_v60 = vld [vmem:[%s21104_s1 + $0x17e4] ss:$16 sps:$4 sm:$0xff]  }
 0x2c2   :  { %10267 = vmatmul.mubr.bf16.vlgmr.msra.gmra.mrb[0].mxu0 %v18346_v8  ;;  %11292 = vmatmul.mubr.bf16.vlgmr.msra.gmra.mrb[0].mxu1 %v18346_v8 }
 0x2c3   :  { %10276 = vmatpush1.bf16.msra.mxu0 %v14767_v9  ;;  %11301 = vmatpush1.bf16.msra.mxu1 %v14770_v10  ;;  %v14862_v9 = vld [vmem:[%s21104_s1 + $0x17ec] ss:$16 sps:$4 sm:$0xff]   ;;  %v18539_v10 = vrot.slane %v18523_v4, %v16239_v49 }
 0x2c4   :  { %10277 = vmatprep.subr.bf16.mxu0 %v14775_v11  ;;  %11302 = vmatprep.subr.bf16.mxu1 %v14778_v63  ;;  %v14857_v11 = vld [vmem:[%s21104_s1 + $0x17e0] ss:$16 sps:$4 sm:$0xff]   ;;  %v14860_v63 = vld [vmem:[%s21104_s1 + $0x17e8] ss:$16 sps:$4 sm:$0xff]  }
 0x2c5   :  { %10307 = vmatprep.mubr.bf16.mxu0 %v1773_v12  ;;  %11332 = vmatprep.mubr.bf16.mxu1 %v1773_v12  ;;  %v14865_v12 = vld [vmem:[%s21104_s1 + $0x1804] ss:$16 sps:$4 sm:$0xff]  }
 0x2c7   :  { %10278 = vmatpush1.bf16.msra.mxu0 %v14773_v52  ;;  %11303 = vmatpush1.bf16.msra.mxu1 %v14776_v15  ;;  %v14868_v52 = vld [vmem:[%s21104_s1 + $0x180c] ss:$16 sps:$4 sm:$0xff]   ;;  %v1789_v15 = vcombine.high %v18539_v10, %v18539_v10 }
 0x2c8   :  { %10279 = vmatprep.subr.bf16.mxu0 %v14781_v7  ;;  %11304 = vmatprep.subr.bf16.mxu1 %v14784_v16  ;;  %v1771_v7 = vcombine.high %v18346_v8, %v18346_v8  ;;  %v14863_v16 = vld [vmem:[%s21104_s1 + $0x1800] ss:$16 sps:$4 sm:$0xff]   ;;  %v14874_v8 = vld [vmem:[%s21104_s1 + $0x182c] ss:$16 sps:$4 sm:$0xff]  }
 0x2cb   :  { %10280 = vmatpush1.bf16.msra.mxu0 %v14779_v17  ;;  %11305 = vmatpush1.bf16.msra.mxu1 %v14782_v18  ;;  %v14866_v17 = vld [vmem:[%s21104_s1 + $0x1808] ss:$16 sps:$4 sm:$0xff]   ;;  %v14871_v18 = vld [vmem:[%s21104_s1 + $0x1824] ss:$16 sps:$4 sm:$0xff]  }
 0x2cc   :  { %10281 = vmatprep.subr.bf16.mxu0 %v14787_v19  ;;  %11306 = vmatprep.subr.bf16.mxu1 %v14790_v20  ;;  %v18570_v19 = vrot.slane %v1789_v15, %v16239_v49  ;;  %v14869_v20 = vld [vmem:[%s21104_s1 + $0x1820] ss:$16 sps:$4 sm:$0xff]   ;;  %v14950_v15 = vld [vmem:[%s21104_s1 + $0x19c8] ss:$16 sps:$4 sm:$0xff]  }
 0x2cf   :  { %10282 = vmatpush1.bf16.msra.mxu0 %v14785_v22  ;;  %11307 = vmatpush1.bf16.msra.mxu1 %v14788_v23  ;;  %v14872_v22 = vld [vmem:[%s21104_s1 + $0x1828] ss:$16 sps:$4 sm:$0xff]   ;;  %v14877_v23 = vld [vmem:[%s21104_s1 + $0x1844] ss:$16 sps:$4 sm:$0xff]  }
 0x2d0   :  { %10283 = vmatprep.subr.bf16.mxu0 %v14793_v24  ;;  %11308 = vmatprep.subr.bf16.mxu1 %v14796_v13  ;;  %v14880_v24 = vld [vmem:[%s21104_s1 + $0x184c] ss:$16 sps:$4 sm:$0xff]   ;;  %v14875_v13 = vld [vmem:[%s21104_s1 + $0x1840] ss:$16 sps:$4 sm:$0xff]  }
 0x2d3   :  { %10284 = vmatpush1.bf16.msra.mxu0 %v14791_v27  ;;  %11309 = vmatpush1.bf16.msra.mxu1 %v14794_v28  ;;  %v14878_v27 = vld [vmem:[%s21104_s1 + $0x1848] ss:$16 sps:$4 sm:$0xff]   ;;  %v14883_v28 = vld [vmem:[%s21104_s1 + $0x1864] ss:$16 sps:$4 sm:$0xff]  }
 0x2d4   :  { %10285 = vmatprep.subr.bf16.mxu0 %v14799_v29  ;;  %11310 = vmatprep.subr.bf16.mxu1 %v14802_v14  ;;  %v14886_v29 = vld [vmem:[%s21104_s1 + $0x186c] ss:$16 sps:$4 sm:$0xff]   ;;  %v14881_v14 = vld [vmem:[%s21104_s1 + $0x1860] ss:$16 sps:$4 sm:$0xff]  }
 0x2d7   :  { %10286 = vmatpush1.bf16.msra.mxu0 %v14797_v30  ;;  %11311 = vmatpush1.bf16.msra.mxu1 %v14800_v31  ;;  %v14884_v30 = vld [vmem:[%s21104_s1 + $0x1868] ss:$16 sps:$4 sm:$0xff]   ;;  %v14889_v31 = vld [vmem:[%s21104_s1 + $0x1884] ss:$16 sps:$4 sm:$0xff]  }
 0x2d8   :  { %10287 = vmatprep.subr.bf16.mxu0 %v14805_v25  ;;  %11312 = vmatprep.subr.bf16.mxu1 %v14808_v32  ;;  %v14892_v25 = vld [vmem:[%s21104_s1 + $0x188c] ss:$16 sps:$4 sm:$0xff]   ;;  %v14887_v32 = vld [vmem:[%s21104_s1 + $0x1880] ss:$16 sps:$4 sm:$0xff]  }
 0x2db   :  { %10288 = vmatpush1.bf16.msra.mxu0 %v14803_v33  ;;  %11313 = vmatpush1.bf16.msra.mxu1 %v14806_v26  ;;  %v14890_v33 = vld [vmem:[%s21104_s1 + $0x1888] ss:$16 sps:$4 sm:$0xff]   ;;  %v14895_v26 = vld [vmem:[%s21104_s1 + $0x18a4] ss:$16 sps:$4 sm:$0xff]  }
 0x2dc   :  { %10289 = vmatprep.subr.bf16.mxu0 %v14811_v36  ;;  %11314 = vmatprep.subr.bf16.mxu1 %v14814_v37  ;;  %v14898_v36 = vld [vmem:[%s21104_s1 + $0x18ac] ss:$16 sps:$4 sm:$0xff]   ;;  %v14893_v37 = vld [vmem:[%s21104_s1 + $0x18a0] ss:$16 sps:$4 sm:$0xff]  }
 0x2df   :  { %10290 = vmatpush1.bf16.msra.mxu0 %v14809_v21  ;;  %11315 = vmatpush1.bf16.msra.mxu1 %v14812_v39  ;;  %v14896_v21 = vld [vmem:[%s21104_s1 + $0x18a8] ss:$16 sps:$4 sm:$0xff]   ;;  %v14901_v39 = vld [vmem:[%s21104_s1 + $0x18c4] ss:$16 sps:$4 sm:$0xff]  }
 0x2e0   :  { %10291 = vmatprep.subr.bf16.mxu0 %v14817_v40  ;;  %11316 = vmatprep.subr.bf16.mxu1 %v14820_v41  ;;  %v14904_v40 = vld [vmem:[%s21104_s1 + $0x18cc] ss:$16 sps:$4 sm:$0xff]   ;;  %v14899_v41 = vld [vmem:[%s21104_s1 + $0x18c0] ss:$16 sps:$4 sm:$0xff]  }
 0x2e3   :  { %10292 = vmatpush1.bf16.msra.mxu0 %v14815_v34  ;;  %11317 = vmatpush1.bf16.msra.mxu1 %v14818_v43  ;;  %v14902_v34 = vld [vmem:[%s21104_s1 + $0x18c8] ss:$16 sps:$4 sm:$0xff]   ;;  %v14907_v43 = vld [vmem:[%s21104_s1 + $0x18e4] ss:$16 sps:$4 sm:$0xff]  }
 0x2e4   :  { %10293 = vmatprep.subr.bf16.mxu0 %v14823_v45  ;;  %11318 = vmatprep.subr.bf16.mxu1 %v14826_v46  ;;  %v14910_v45 = vld [vmem:[%s21104_s1 + $0x18ec] ss:$16 sps:$4 sm:$0xff]   ;;  %v14905_v46 = vld [vmem:[%s21104_s1 + $0x18e0] ss:$16 sps:$4 sm:$0xff]  }
 0x2e7   :  { %10294 = vmatpush1.bf16.msra.mxu0 %v14821_v35  ;;  %11319 = vmatpush1.bf16.msra.mxu1 %v14824_v50  ;;  %v14908_v35 = vld [vmem:[%s21104_s1 + $0x18e8] ss:$16 sps:$4 sm:$0xff]   ;;  %v14913_v50 = vld [vmem:[%s21104_s1 + $0x1904] ss:$16 sps:$4 sm:$0xff]  }
 0x2e8   :  { %10295 = vmatprep.subr.bf16.mxu0 %v14829_v51  ;;  %11320 = vmatprep.subr.bf16.mxu1 %v14832_v53  ;;  %v14916_v51 = vld [vmem:[%s21104_s1 + $0x190c] ss:$16 sps:$4 sm:$0xff]   ;;  %v14911_v53 = vld [vmem:[%s21104_s1 + $0x1900] ss:$16 sps:$4 sm:$0xff]  }
 0x2eb   :  { %10296 = vmatpush1.bf16.msra.mxu0 %v14827_v38  ;;  %11321 = vmatpush1.bf16.msra.mxu1 %v14830_v54  ;;  %v14914_v38 = vld [vmem:[%s21104_s1 + $0x1908] ss:$16 sps:$4 sm:$0xff]   ;;  %v14919_v54 = vld [vmem:[%s21104_s1 + $0x1924] ss:$16 sps:$4 sm:$0xff]  }
 0x2ec   :  { %10297 = vmatprep.subr.bf16.mxu0 %v14835_v55  ;;  %11322 = vmatprep.subr.bf16.mxu1 %v14838_v56  ;;  %v14922_v55 = vld [vmem:[%s21104_s1 + $0x192c] ss:$16 sps:$4 sm:$0xff]   ;;  %v14917_v56 = vld [vmem:[%s21104_s1 + $0x1920] ss:$16 sps:$4 sm:$0xff]  }
 0x2ef   :  { %10298 = vmatpush1.bf16.msra.mxu0 %v14833_v47  ;;  %11323 = vmatpush1.bf16.msra.mxu1 %v14836_v57  ;;  %v14920_v47 = vld [vmem:[%s21104_s1 + $0x1928] ss:$16 sps:$4 sm:$0xff]   ;;  %v14925_v57 = vld [vmem:[%s21104_s1 + $0x1944] ss:$16 sps:$4 sm:$0xff]  }
 0x2f0   :  { %10299 = vmatprep.subr.bf16.mxu0 %v14841_v58  ;;  %11324 = vmatprep.subr.bf16.mxu1 %v14844_v48  ;;  %v14928_v58 = vld [vmem:[%s21104_s1 + $0x194c] ss:$16 sps:$4 sm:$0xff]   ;;  %v14923_v48 = vld [vmem:[%s21104_s1 + $0x1940] ss:$16 sps:$4 sm:$0xff]  }
 0x2f3   :  { %10300 = vmatpush1.bf16.msra.mxu0 %v14839_v61  ;;  %11325 = vmatpush1.bf16.msra.mxu1 %v14842_v62  ;;  %v14926_v61 = vld [vmem:[%s21104_s1 + $0x1948] ss:$16 sps:$4 sm:$0xff]   ;;  %v14931_v62 = vld [vmem:[%s21104_s1 + $0x1964] ss:$16 sps:$4 sm:$0xff]  }
 0x2f4   :  { %10301 = vmatprep.subr.bf16.mxu0 %v14847_v44  ;;  %11326 = vmatprep.subr.bf16.mxu1 %v14850_v0  ;;  %v14934_v44 = vld [vmem:[%s21104_s1 + $0x196c] ss:$16 sps:$4 sm:$0xff]   ;;  %v14929_v0 = vld [vmem:[%s21104_s1 + $0x1960] ss:$16 sps:$4 sm:$0xff]  }
 0x2f7   :  { %10302 = vmatpush1.bf16.msra.mxu0 %v14845_v1  ;;  %11327 = vmatpush1.bf16.msra.mxu1 %v14848_v2  ;;  %v14932_v1 = vld [vmem:[%s21104_s1 + $0x1968] ss:$16 sps:$4 sm:$0xff]   ;;  %v14937_v2 = vld [vmem:[%s21104_s1 + $0x1984] ss:$16 sps:$4 sm:$0xff]  }
 0x2f8   :  { %10303 = vmatprep.subr.bf16.mxu0 %v14853_v59  ;;  %11328 = vmatprep.subr.bf16.mxu1 %v14856_v3  ;;  %v14940_v59 = vld [vmem:[%s21104_s1 + $0x198c] ss:$16 sps:$4 sm:$0xff]   ;;  %v14935_v3 = vld [vmem:[%s21104_s1 + $0x1980] ss:$16 sps:$4 sm:$0xff]  }
 0x2fb   :  { %10304 = vmatpush1.bf16.msra.mxu0 %v14851_v5  ;;  %11329 = vmatpush1.bf16.msra.mxu1 %v14854_v6  ;;  %v14938_v5 = vld [vmem:[%s21104_s1 + $0x1988] ss:$16 sps:$4 sm:$0xff]   ;;  %v14943_v6 = vld [vmem:[%s21104_s1 + $0x19a4] ss:$16 sps:$4 sm:$0xff]  }
 0x2fc   :  { %10305 = vmatprep.subr.bf16.mxu0 %v14859_v60  ;;  %11330 = vmatprep.subr.bf16.mxu1 %v14862_v9  ;;  %v14946_v60 = vld [vmem:[%s21104_s1 + $0x19ac] ss:$16 sps:$4 sm:$0xff]   ;;  %v14941_v9 = vld [vmem:[%s21104_s1 + $0x19a0] ss:$16 sps:$4 sm:$0xff]  }
 0x2ff   :  { %10306 = vmatpush1.bf16.msra.mxu0 %v14857_v11  ;;  %11331 = vmatpush1.bf16.msra.mxu1 %v14860_v63  ;;  %v14944_v11 = vld [vmem:[%s21104_s1 + $0x19a8] ss:$16 sps:$4 sm:$0xff]   ;;  %v14949_v63 = vld [vmem:[%s21104_s1 + $0x19c4] ss:$16 sps:$4 sm:$0xff]  }
 0x300   :  { %10316 = vmatprep.subr.bf16.mxu0 %v14865_v12  ;;  %11341 = vmatprep.subr.bf16.mxu1 %v14868_v52  ;;  %v14952_v12 = vld [vmem:[%s21104_s1 + $0x19cc] ss:$16 sps:$4 sm:$0xff]   ;;  %v14947_v52 = vld [vmem:[%s21104_s1 + $0x19c0] ss:$16 sps:$4 sm:$0xff]  }
 0x302   :  { %10308 = vmatmul.mubr.bf16.vlgmr.msra.gmra.mrb[0].mxu0 %v1771_v7  ;;  %11333 = vmatmul.mubr.bf16.vlgmr.msra.gmra.mrb[0].mxu1 %v1771_v7  ;;  %v14955_v7 = vld [vmem:[%s21104_s1 + $0x19e4] ss:$16 sps:$4 sm:$0xff]  }
 0x303   :  { %10317 = vmatpush1.bf16.msra.mxu0 %v14863_v16  ;;  %11342 = vmatpush1.bf16.msra.mxu1 %v14866_v17  ;;  %v14958_v16 = vld [vmem:[%s21104_s1 + $0x19ec] ss:$16 sps:$4 sm:$0xff]   ;;  %v14953_v17 = vld [vmem:[%s21104_s1 + $0x19e0] ss:$16 sps:$4 sm:$0xff]  }
 0x304   :  { %10318 = vmatprep.subr.bf16.mxu0 %v14871_v18  ;;  %11343 = vmatprep.subr.bf16.mxu1 %v14874_v8  ;;  %v14956_v18 = vld [vmem:[%s21104_s1 + $0x19e8] ss:$16 sps:$4 sm:$0xff]   ;;  %v14961_v8 = vld [vmem:[%s21104_s1 + $0x1a04] ss:$16 sps:$4 sm:$0xff]  }
 0x305   :  { %10348 = vmatprep.mubr.bf16.mxu0 %v18570_v19  ;;  %11373 = vmatprep.mubr.bf16.mxu1 %v18570_v19 }
 0x307   :  { %10319 = vmatpush1.bf16.msra.mxu0 %v14869_v20  ;;  %11344 = vmatpush1.bf16.msra.mxu1 %v14872_v22  ;;  %v14964_v20 = vld [vmem:[%s21104_s1 + $0x1a0c] ss:$16 sps:$4 sm:$0xff]   ;;  %v18756_v22 = vrot.slane %v18539_v10, %v16239_v49 }
 0x308   :  { %10320 = vmatprep.subr.bf16.mxu0 %v14877_v23  ;;  %11345 = vmatprep.subr.bf16.mxu1 %v14880_v24  ;;  %v14959_v23 = vld [vmem:[%s21104_s1 + $0x1a00] ss:$16 sps:$4 sm:$0xff]   ;;  %v14962_v24 = vld [vmem:[%s21104_s1 + $0x1a08] ss:$16 sps:$4 sm:$0xff]   ;;  %v14970_v10 = vld [vmem:[%s21104_s1 + $0x1a2c] ss:$16 sps:$4 sm:$0xff]  }
 0x30b   :  { %10321 = vmatpush1.bf16.msra.mxu0 %v14875_v13  ;;  %11346 = vmatpush1.bf16.msra.mxu1 %v14878_v27  ;;  %v14967_v13 = vld [vmem:[%s21104_s1 + $0x1a24] ss:$16 sps:$4 sm:$0xff]   ;;  %v1821_v27 = vcombine.high %v18570_v19, %v18570_v19 }
 0x30c   :  { %10322 = vmatprep.subr.bf16.mxu0 %v14883_v28  ;;  %11347 = vmatprep.subr.bf16.mxu1 %v14886_v29  ;;  %v14965_v28 = vld [vmem:[%s21104_s1 + $0x1a20] ss:$16 sps:$4 sm:$0xff]   ;;  %v14968_v29 = vld [vmem:[%s21104_s1 + $0x1a28] ss:$16 sps:$4 sm:$0xff]   ;;  %v14973_v19 = vld [vmem:[%s21104_s1 + $0x1a44] ss:$16 sps:$4 sm:$0xff]  }
 0x30f   :  { %10323 = vmatpush1.bf16.msra.mxu0 %v14881_v14  ;;  %11348 = vmatpush1.bf16.msra.mxu1 %v14884_v30  ;;  %v14976_v14 = vld [vmem:[%s21104_s1 + $0x1a4c] ss:$16 sps:$4 sm:$0xff]   ;;  %v14971_v30 = vld [vmem:[%s21104_s1 + $0x1a40] ss:$16 sps:$4 sm:$0xff]  }
 0x310   :  { %10324 = vmatprep.subr.bf16.mxu0 %v14889_v31  ;;  %11349 = vmatprep.subr.bf16.mxu1 %v14892_v25  ;;  %v14974_v31 = vld [vmem:[%s21104_s1 + $0x1a48] ss:$16 sps:$4 sm:$0xff]   ;;  %v14979_v25 = vld [vmem:[%s21104_s1 + $0x1a64] ss:$16 sps:$4 sm:$0xff]  }
 0x313   :  { %10325 = vmatpush1.bf16.msra.mxu0 %v14887_v32  ;;  %11350 = vmatpush1.bf16.msra.mxu1 %v14890_v33  ;;  %v14982_v32 = vld [vmem:[%s21104_s1 + $0x1a6c] ss:$16 sps:$4 sm:$0xff]   ;;  %v14977_v33 = vld [vmem:[%s21104_s1 + $0x1a60] ss:$16 sps:$4 sm:$0xff]  }
 0x314   :  { %10326 = vmatprep.subr.bf16.mxu0 %v14895_v26  ;;  %11351 = vmatprep.subr.bf16.mxu1 %v14898_v36  ;;  %v14980_v26 = vld [vmem:[%s21104_s1 + $0x1a68] ss:$16 sps:$4 sm:$0xff]   ;;  %v14985_v36 = vld [vmem:[%s21104_s1 + $0x1a84] ss:$16 sps:$4 sm:$0xff]  }
 0x317   :  { %10327 = vmatpush1.bf16.msra.mxu0 %v14893_v37  ;;  %11352 = vmatpush1.bf16.msra.mxu1 %v14896_v21  ;;  %v14988_v37 = vld [vmem:[%s21104_s1 + $0x1a8c] ss:$16 sps:$4 sm:$0xff]   ;;  %v14983_v21 = vld [vmem:[%s21104_s1 + $0x1a80] ss:$16 sps:$4 sm:$0xff]  }
 0x318   :  { %10328 = vmatprep.subr.bf16.mxu0 %v14901_v39  ;;  %11353 = vmatprep.subr.bf16.mxu1 %v14904_v40  ;;  %v14986_v39 = vld [vmem:[%s21104_s1 + $0x1a88] ss:$16 sps:$4 sm:$0xff]   ;;  %v14991_v40 = vld [vmem:[%s21104_s1 + $0x1aa4] ss:$16 sps:$4 sm:$0xff]  }
 0x31b   :  { %10329 = vmatpush1.bf16.msra.mxu0 %v14899_v41  ;;  %11354 = vmatpush1.bf16.msra.mxu1 %v14902_v34  ;;  %v14994_v41 = vld [vmem:[%s21104_s1 + $0x1aac] ss:$16 sps:$4 sm:$0xff]   ;;  %v14989_v34 = vld [vmem:[%s21104_s1 + $0x1aa0] ss:$16 sps:$4 sm:$0xff]  }
 0x31c   :  { %10330 = vmatprep.subr.bf16.mxu0 %v14907_v43  ;;  %11355 = vmatprep.subr.bf16.mxu1 %v14910_v45  ;;  %v14992_v43 = vld [vmem:[%s21104_s1 + $0x1aa8] ss:$16 sps:$4 sm:$0xff]   ;;  %v14997_v45 = vld [vmem:[%s21104_s1 + $0x1ac4] ss:$16 sps:$4 sm:$0xff]  }
 0x31f   :  { %10331 = vmatpush1.bf16.msra.mxu0 %v14905_v46  ;;  %11356 = vmatpush1.bf16.msra.mxu1 %v14908_v35  ;;  %v15000_v46 = vld [vmem:[%s21104_s1 + $0x1acc] ss:$16 sps:$4 sm:$0xff]   ;;  %v14995_v35 = vld [vmem:[%s21104_s1 + $0x1ac0] ss:$16 sps:$4 sm:$0xff]  }
 0x320   :  { %10332 = vmatprep.subr.bf16.mxu0 %v14913_v50  ;;  %11357 = vmatprep.subr.bf16.mxu1 %v14916_v51  ;;  %v14998_v50 = vld [vmem:[%s21104_s1 + $0x1ac8] ss:$16 sps:$4 sm:$0xff]   ;;  %v15003_v51 = vld [vmem:[%s21104_s1 + $0x1ae4] ss:$16 sps:$4 sm:$0xff]  }
 0x323   :  { %10333 = vmatpush1.bf16.msra.mxu0 %v14911_v53  ;;  %11358 = vmatpush1.bf16.msra.mxu1 %v14914_v38  ;;  %v15006_v53 = vld [vmem:[%s21104_s1 + $0x1aec] ss:$16 sps:$4 sm:$0xff]   ;;  %v15001_v38 = vld [vmem:[%s21104_s1 + $0x1ae0] ss:$16 sps:$4 sm:$0xff]  }
 0x324   :  { %10334 = vmatprep.subr.bf16.mxu0 %v14919_v54  ;;  %11359 = vmatprep.subr.bf16.mxu1 %v14922_v55  ;;  %v15004_v54 = vld [vmem:[%s21104_s1 + $0x1ae8] ss:$16 sps:$4 sm:$0xff]   ;;  %v15009_v55 = vld [vmem:[%s21104_s1 + $0x1b04] ss:$16 sps:$4 sm:$0xff]  }
 0x327   :  { %10335 = vmatpush1.bf16.msra.mxu0 %v14917_v56  ;;  %11360 = vmatpush1.bf16.msra.mxu1 %v14920_v47  ;;  %v15012_v56 = vld [vmem:[%s21104_s1 + $0x1b0c] ss:$16 sps:$4 sm:$0xff]   ;;  %v15007_v47 = vld [vmem:[%s21104_s1 + $0x1b00] ss:$16 sps:$4 sm:$0xff]  }
 0x328   :  { %10336 = vmatprep.subr.bf16.mxu0 %v14925_v57  ;;  %11361 = vmatprep.subr.bf16.mxu1 %v14928_v58  ;;  %v15010_v57 = vld [vmem:[%s21104_s1 + $0x1b08] ss:$16 sps:$4 sm:$0xff]   ;;  %v15015_v58 = vld [vmem:[%s21104_s1 + $0x1b24] ss:$16 sps:$4 sm:$0xff]  }
 0x32b   :  { %10337 = vmatpush1.bf16.msra.mxu0 %v14923_v48  ;;  %11362 = vmatpush1.bf16.msra.mxu1 %v14926_v61  ;;  %v15018_v48 = vld [vmem:[%s21104_s1 + $0x1b2c] ss:$16 sps:$4 sm:$0xff]   ;;  %v15013_v61 = vld [vmem:[%s21104_s1 + $0x1b20] ss:$16 sps:$4 sm:$0xff]  }
 0x32c   :  { %10338 = vmatprep.subr.bf16.mxu0 %v14931_v62  ;;  %11363 = vmatprep.subr.bf16.mxu1 %v14934_v44  ;;  %v15016_v62 = vld [vmem:[%s21104_s1 + $0x1b28] ss:$16 sps:$4 sm:$0xff]   ;;  %v15021_v44 = vld [vmem:[%s21104_s1 + $0x1b44] ss:$16 sps:$4 sm:$0xff]  }
 0x32f   :  { %10339 = vmatpush1.bf16.msra.mxu0 %v14929_v0  ;;  %11364 = vmatpush1.bf16.msra.mxu1 %v14932_v1  ;;  %v15024_v0 = vld [vmem:[%s21104_s1 + $0x1b4c] ss:$16 sps:$4 sm:$0xff]   ;;  %v15019_v1 = vld [vmem:[%s21104_s1 + $0x1b40] ss:$16 sps:$4 sm:$0xff]  }
 0x330   :  { %10340 = vmatprep.subr.bf16.mxu0 %v14937_v2  ;;  %11365 = vmatprep.subr.bf16.mxu1 %v14940_v59  ;;  %v15022_v2 = vld [vmem:[%s21104_s1 + $0x1b48] ss:$16 sps:$4 sm:$0xff]   ;;  %v15027_v59 = vld [vmem:[%s21104_s1 + $0x1b64] ss:$16 sps:$4 sm:$0xff]  }
 0x333   :  { %10341 = vmatpush1.bf16.msra.mxu0 %v14935_v3  ;;  %11366 = vmatpush1.bf16.msra.mxu1 %v14938_v5  ;;  %v15030_v3 = vld [vmem:[%s21104_s1 + $0x1b6c] ss:$16 sps:$4 sm:$0xff]   ;;  %v15025_v5 = vld [vmem:[%s21104_s1 + $0x1b60] ss:$16 sps:$4 sm:$0xff]  }
 0x334   :  { %10342 = vmatprep.subr.bf16.mxu0 %v14943_v6  ;;  %11367 = vmatprep.subr.bf16.mxu1 %v14946_v60  ;;  %v15028_v6 = vld [vmem:[%s21104_s1 + $0x1b68] ss:$16 sps:$4 sm:$0xff]   ;;  %v15033_v60 = vld [vmem:[%s21104_s1 + $0x1b84] ss:$16 sps:$4 sm:$0xff]  }
 0x337   :  { %10343 = vmatpush1.bf16.msra.mxu0 %v14941_v9  ;;  %11368 = vmatpush1.bf16.msra.mxu1 %v14944_v11  ;;  %v15036_v9 = vld [vmem:[%s21104_s1 + $0x1b8c] ss:$16 sps:$4 sm:$0xff]   ;;  %v15031_v11 = vld [vmem:[%s21104_s1 + $0x1b80] ss:$16 sps:$4 sm:$0xff]  }
 0x338   :  { %10344 = vmatprep.subr.bf16.mxu0 %v14949_v63  ;;  %11369 = vmatprep.subr.bf16.mxu1 %v14952_v12  ;;  %v15034_v63 = vld [vmem:[%s21104_s1 + $0x1b88] ss:$16 sps:$4 sm:$0xff]   ;;  %v15039_v12 = vld [vmem:[%s21104_s1 + $0x1ba4] ss:$16 sps:$4 sm:$0xff]  }
 0x33b   :  { %10345 = vmatpush1.bf16.msra.mxu0 %v14947_v52  ;;  %11370 = vmatpush1.bf16.msra.mxu1 %v14950_v15  ;;  %v15042_v52 = vld [vmem:[%s21104_s1 + $0x1bac] ss:$16 sps:$4 sm:$0xff]   ;;  %v15037_v15 = vld [vmem:[%s21104_s1 + $0x1ba0] ss:$16 sps:$4 sm:$0xff]  }
 0x33c   :  { %10346 = vmatprep.subr.bf16.mxu0 %v14955_v7  ;;  %11371 = vmatprep.subr.bf16.mxu1 %v14958_v16  ;;  %v15040_v7 = vld [vmem:[%s21104_s1 + $0x1ba8] ss:$16 sps:$4 sm:$0xff]   ;;  %v15045_v16 = vld [vmem:[%s21104_s1 + $0x1bc4] ss:$16 sps:$4 sm:$0xff]  }
 0x33f   :  { %10347 = vmatpush1.bf16.msra.mxu0 %v14953_v17  ;;  %11372 = vmatpush1.bf16.msra.mxu1 %v14956_v18  ;;  %v15048_v17 = vld [vmem:[%s21104_s1 + $0x1bcc] ss:$16 sps:$4 sm:$0xff]   ;;  %v1774_v18 = vcombine.high %v18523_v4, %v18523_v4 }
 0x340   :  { %10357 = vmatprep.subr.bf16.mxu0 %v14961_v8  ;;  %11382 = vmatprep.subr.bf16.mxu1 %v14964_v20  ;;  %v15043_v8 = vld [vmem:[%s21104_s1 + $0x1bc0] ss:$16 sps:$4 sm:$0xff]   ;;  %v15046_v20 = vld [vmem:[%s21104_s1 + $0x1bc8] ss:$16 sps:$4 sm:$0xff]   ;;  %v15054_v4 = vld [vmem:[%s21104_s1 + $0x1bec] ss:$16 sps:$4 sm:$0xff]  }
 0x342   :  { %10349 = vmatmul.mubr.bf16.vlgmr.msra.gmra.mrb[0].mxu0 %v18756_v22  ;;  %11374 = vmatmul.mubr.bf16.vlgmr.msra.gmra.mrb[0].mxu1 %v18756_v22 }
 0x343   :  { %10358 = vmatpush1.bf16.msra.mxu0 %v14959_v23  ;;  %11383 = vmatpush1.bf16.msra.mxu1 %v14962_v24  ;;  %v15051_v23 = vld [vmem:[%s21104_s1 + $0x1be4] ss:$16 sps:$4 sm:$0xff]   ;;  %v18945_v24 = vrot.slane %v1774_v18, %v16239_v49  ;;  %v15130_v18 = vld [vmem:[%s21104_s1 + $0x1d88] ss:$16 sps:$4 sm:$0xff]  }
 0x344   :  { %10359 = vmatprep.subr.bf16.mxu0 %v14967_v13  ;;  %11384 = vmatprep.subr.bf16.mxu1 %v14970_v10  ;;  %v15049_v13 = vld [vmem:[%s21104_s1 + $0x1be0] ss:$16 sps:$4 sm:$0xff]   ;;  %v15052_v10 = vld [vmem:[%s21104_s1 + $0x1be8] ss:$16 sps:$4 sm:$0xff]  }
 0x345   :  { %10389 = vmatprep.mubr.bf16.mxu0 %v1821_v27  ;;  %11414 = vmatprep.mubr.bf16.mxu1 %v1821_v27  ;;  %v15057_v27 = vld [vmem:[%s21104_s1 + $0x1c04] ss:$16 sps:$4 sm:$0xff]  }
 0x347   :  { %10360 = vmatpush1.bf16.msra.mxu0 %v14965_v28  ;;  %11385 = vmatpush1.bf16.msra.mxu1 %v14968_v29  ;;  %v15060_v28 = vld [vmem:[%s21104_s1 + $0x1c0c] ss:$16 sps:$4 sm:$0xff]   ;;  %v1790_v29 = vcombine.high %v18945_v24, %v18945_v24 }
 0x348   :  { %10361 = vmatprep.subr.bf16.mxu0 %v14973_v19  ;;  %11386 = vmatprep.subr.bf16.mxu1 %v14976_v14  ;;  %v1819_v19 = vcombine.high %v18756_v22, %v18756_v22  ;;  %v15055_v14 = vld [vmem:[%s21104_s1 + $0x1c00] ss:$16 sps:$4 sm:$0xff]   ;;  %v15066_v22 = vld [vmem:[%s21104_s1 + $0x1c2c] ss:$16 sps:$4 sm:$0xff]  }
 0x34b   :  { %10362 = vmatpush1.bf16.msra.mxu0 %v14971_v30  ;;  %11387 = vmatpush1.bf16.msra.mxu1 %v14974_v31  ;;  %v15058_v30 = vld [vmem:[%s21104_s1 + $0x1c08] ss:$16 sps:$4 sm:$0xff]   ;;  %v15063_v31 = vld [vmem:[%s21104_s1 + $0x1c24] ss:$16 sps:$4 sm:$0xff]  }
 0x34c   :  { %10363 = vmatprep.subr.bf16.mxu0 %v14979_v25  ;;  %11388 = vmatprep.subr.bf16.mxu1 %v14982_v32  ;;  %v18976_v25 = vrot.slane %v1790_v29, %v16239_v49  ;;  %v15061_v32 = vld [vmem:[%s21104_s1 + $0x1c20] ss:$16 sps:$4 sm:$0xff]   ;;  %v15147_v29 = vld [vmem:[%s21104_s1 + $0x1de4] ss:$16 sps:$4 sm:$0xff]  }
 0x34f   :  { %10364 = vmatpush1.bf16.msra.mxu0 %v14977_v33  ;;  %11389 = vmatpush1.bf16.msra.mxu1 %v14980_v26  ;;  %v15064_v33 = vld [vmem:[%s21104_s1 + $0x1c28] ss:$16 sps:$4 sm:$0xff]   ;;  %v15069_v26 = vld [vmem:[%s21104_s1 + $0x1c44] ss:$16 sps:$4 sm:$0xff]  }
 0x350   :  { %10365 = vmatprep.subr.bf16.mxu0 %v14985_v36  ;;  %11390 = vmatprep.subr.bf16.mxu1 %v14988_v37  ;;  %v15072_v36 = vld [vmem:[%s21104_s1 + $0x1c4c] ss:$16 sps:$4 sm:$0xff]   ;;  %v15067_v37 = vld [vmem:[%s21104_s1 + $0x1c40] ss:$16 sps:$4 sm:$0xff]  }
 0x353   :  { %10366 = vmatpush1.bf16.msra.mxu0 %v14983_v21  ;;  %11391 = vmatpush1.bf16.msra.mxu1 %v14986_v39  ;;  %v15070_v21 = vld [vmem:[%s21104_s1 + $0x1c48] ss:$16 sps:$4 sm:$0xff]   ;;  %v15075_v39 = vld [vmem:[%s21104_s1 + $0x1c64] ss:$16 sps:$4 sm:$0xff]  }
 0x354   :  { %10367 = vmatprep.subr.bf16.mxu0 %v14991_v40  ;;  %11392 = vmatprep.subr.bf16.mxu1 %v14994_v41  ;;  %v15078_v40 = vld [vmem:[%s21104_s1 + $0x1c6c] ss:$16 sps:$4 sm:$0xff]   ;;  %v15073_v41 = vld [vmem:[%s21104_s1 + $0x1c60] ss:$16 sps:$4 sm:$0xff]  }
 0x357   :  { %10368 = vmatpush1.bf16.msra.mxu0 %v14989_v34  ;;  %11393 = vmatpush1.bf16.msra.mxu1 %v14992_v43  ;;  %v15076_v34 = vld [vmem:[%s21104_s1 + $0x1c68] ss:$16 sps:$4 sm:$0xff]   ;;  %v15081_v43 = vld [vmem:[%s21104_s1 + $0x1c84] ss:$16 sps:$4 sm:$0xff]  }
 0x358   :  { %10369 = vmatprep.subr.bf16.mxu0 %v14997_v45  ;;  %11394 = vmatprep.subr.bf16.mxu1 %v15000_v46  ;;  %v15084_v45 = vld [vmem:[%s21104_s1 + $0x1c8c] ss:$16 sps:$4 sm:$0xff]   ;;  %v15079_v46 = vld [vmem:[%s21104_s1 + $0x1c80] ss:$16 sps:$4 sm:$0xff]  }
 0x35b   :  { %10370 = vmatpush1.bf16.msra.mxu0 %v14995_v35  ;;  %11395 = vmatpush1.bf16.msra.mxu1 %v14998_v50  ;;  %v15082_v35 = vld [vmem:[%s21104_s1 + $0x1c88] ss:$16 sps:$4 sm:$0xff]   ;;  %v15087_v50 = vld [vmem:[%s21104_s1 + $0x1ca4] ss:$16 sps:$4 sm:$0xff]  }
 0x35c   :  { %10371 = vmatprep.subr.bf16.mxu0 %v15003_v51  ;;  %11396 = vmatprep.subr.bf16.mxu1 %v15006_v53  ;;  %v15090_v51 = vld [vmem:[%s21104_s1 + $0x1cac] ss:$16 sps:$4 sm:$0xff]   ;;  %v15085_v53 = vld [vmem:[%s21104_s1 + $0x1ca0] ss:$16 sps:$4 sm:$0xff]  }
 0x35f   :  { %10372 = vmatpush1.bf16.msra.mxu0 %v15001_v38  ;;  %11397 = vmatpush1.bf16.msra.mxu1 %v15004_v54  ;;  %v15088_v38 = vld [vmem:[%s21104_s1 + $0x1ca8] ss:$16 sps:$4 sm:$0xff]   ;;  %v15093_v54 = vld [vmem:[%s21104_s1 + $0x1cc4] ss:$16 sps:$4 sm:$0xff]  }
 0x360   :  { %10373 = vmatprep.subr.bf16.mxu0 %v15009_v55  ;;  %11398 = vmatprep.subr.bf16.mxu1 %v15012_v56  ;;  %v15096_v55 = vld [vmem:[%s21104_s1 + $0x1ccc] ss:$16 sps:$4 sm:$0xff]   ;;  %v15091_v56 = vld [vmem:[%s21104_s1 + $0x1cc0] ss:$16 sps:$4 sm:$0xff]  }
 0x363   :  { %10374 = vmatpush1.bf16.msra.mxu0 %v15007_v47  ;;  %11399 = vmatpush1.bf16.msra.mxu1 %v15010_v57  ;;  %v15094_v47 = vld [vmem:[%s21104_s1 + $0x1cc8] ss:$16 sps:$4 sm:$0xff]   ;;  %v15099_v57 = vld [vmem:[%s21104_s1 + $0x1ce4] ss:$16 sps:$4 sm:$0xff]  }
 0x364   :  { %10375 = vmatprep.subr.bf16.mxu0 %v15015_v58  ;;  %11400 = vmatprep.subr.bf16.mxu1 %v15018_v48  ;;  %v15102_v58 = vld [vmem:[%s21104_s1 + $0x1cec] ss:$16 sps:$4 sm:$0xff]   ;;  %v15097_v48 = vld [vmem:[%s21104_s1 + $0x1ce0] ss:$16 sps:$4 sm:$0xff]  }
 0x367   :  { %10376 = vmatpush1.bf16.msra.mxu0 %v15013_v61  ;;  %11401 = vmatpush1.bf16.msra.mxu1 %v15016_v62  ;;  %v15100_v61 = vld [vmem:[%s21104_s1 + $0x1ce8] ss:$16 sps:$4 sm:$0xff]   ;;  %v15105_v62 = vld [vmem:[%s21104_s1 + $0x1d04] ss:$16 sps:$4 sm:$0xff]  }
 0x368   :  { %10377 = vmatprep.subr.bf16.mxu0 %v15021_v44  ;;  %11402 = vmatprep.subr.bf16.mxu1 %v15024_v0  ;;  %v15108_v44 = vld [vmem:[%s21104_s1 + $0x1d0c] ss:$16 sps:$4 sm:$0xff]   ;;  %v15103_v0 = vld [vmem:[%s21104_s1 + $0x1d00] ss:$16 sps:$4 sm:$0xff]  }
 0x36b   :  { %10378 = vmatpush1.bf16.msra.mxu0 %v15019_v1  ;;  %11403 = vmatpush1.bf16.msra.mxu1 %v15022_v2  ;;  %v15106_v1 = vld [vmem:[%s21104_s1 + $0x1d08] ss:$16 sps:$4 sm:$0xff]   ;;  %v15111_v2 = vld [vmem:[%s21104_s1 + $0x1d24] ss:$16 sps:$4 sm:$0xff]  }
 0x36c   :  { %10379 = vmatprep.subr.bf16.mxu0 %v15027_v59  ;;  %11404 = vmatprep.subr.bf16.mxu1 %v15030_v3  ;;  %v15114_v59 = vld [vmem:[%s21104_s1 + $0x1d2c] ss:$16 sps:$4 sm:$0xff]   ;;  %v15109_v3 = vld [vmem:[%s21104_s1 + $0x1d20] ss:$16 sps:$4 sm:$0xff]  }
 0x36f   :  { %10380 = vmatpush1.bf16.msra.mxu0 %v15025_v5  ;;  %11405 = vmatpush1.bf16.msra.mxu1 %v15028_v6  ;;  %v15112_v5 = vld [vmem:[%s21104_s1 + $0x1d28] ss:$16 sps:$4 sm:$0xff]   ;;  %v15117_v6 = vld [vmem:[%s21104_s1 + $0x1d44] ss:$16 sps:$4 sm:$0xff]  }
 0x370   :  { %10381 = vmatprep.subr.bf16.mxu0 %v15033_v60  ;;  %11406 = vmatprep.subr.bf16.mxu1 %v15036_v9  ;;  %v15120_v60 = vld [vmem:[%s21104_s1 + $0x1d4c] ss:$16 sps:$4 sm:$0xff]   ;;  %v15115_v9 = vld [vmem:[%s21104_s1 + $0x1d40] ss:$16 sps:$4 sm:$0xff]  }
 0x373   :  { %10382 = vmatpush1.bf16.msra.mxu0 %v15031_v11  ;;  %11407 = vmatpush1.bf16.msra.mxu1 %v15034_v63  ;;  %v15118_v11 = vld [vmem:[%s21104_s1 + $0x1d48] ss:$16 sps:$4 sm:$0xff]   ;;  %v15123_v63 = vld [vmem:[%s21104_s1 + $0x1d64] ss:$16 sps:$4 sm:$0xff]  }
 0x374   :  { %10383 = vmatprep.subr.bf16.mxu0 %v15039_v12  ;;  %11408 = vmatprep.subr.bf16.mxu1 %v15042_v52  ;;  %v15126_v12 = vld [vmem:[%s21104_s1 + $0x1d6c] ss:$16 sps:$4 sm:$0xff]   ;;  %v15121_v52 = vld [vmem:[%s21104_s1 + $0x1d60] ss:$16 sps:$4 sm:$0xff]  }
 0x377   :  { %10384 = vmatpush1.bf16.msra.mxu0 %v15037_v15  ;;  %11409 = vmatpush1.bf16.msra.mxu1 %v15040_v7  ;;  %v15124_v15 = vld [vmem:[%s21104_s1 + $0x1d68] ss:$16 sps:$4 sm:$0xff]   ;;  %v15129_v7 = vld [vmem:[%s21104_s1 + $0x1d84] ss:$16 sps:$4 sm:$0xff]  }
 0x378   :  { %10385 = vmatprep.subr.bf16.mxu0 %v15045_v16  ;;  %11410 = vmatprep.subr.bf16.mxu1 %v15048_v17  ;;  %v15132_v16 = vld [vmem:[%s21104_s1 + $0x1d8c] ss:$16 sps:$4 sm:$0xff]   ;;  %v15127_v17 = vld [vmem:[%s21104_s1 + $0x1d80] ss:$16 sps:$4 sm:$0xff]  }
 0x37b   :  { %10386 = vmatpush1.bf16.msra.mxu0 %v15043_v8  ;;  %11411 = vmatpush1.bf16.msra.mxu1 %v15046_v20  ;;  %v15135_v8 = vld [vmem:[%s21104_s1 + $0x1da4] ss:$16 sps:$4 sm:$0xff]   ;;  %v15138_v20 = vld [vmem:[%s21104_s1 + $0x1dac] ss:$16 sps:$4 sm:$0xff]  }
 0x37c   :  { %10387 = vmatprep.subr.bf16.mxu0 %v15051_v23  ;;  %11412 = vmatprep.subr.bf16.mxu1 %v15054_v4  ;;  %v15133_v23 = vld [vmem:[%s21104_s1 + $0x1da0] ss:$16 sps:$4 sm:$0xff]   ;;  %v15136_v4 = vld [vmem:[%s21104_s1 + $0x1da8] ss:$16 sps:$4 sm:$0xff]  }
 0x37f   :  { %10388 = vmatpush1.bf16.msra.mxu0 %v15049_v13  ;;  %11413 = vmatpush1.bf16.msra.mxu1 %v15052_v10  ;;  %v15141_v13 = vld [vmem:[%s21104_s1 + $0x1dc4] ss:$16 sps:$4 sm:$0xff]   ;;  %v15144_v10 = vld [vmem:[%s21104_s1 + $0x1dcc] ss:$16 sps:$4 sm:$0xff]  }
 0x380   :  { %10398 = vmatprep.subr.bf16.mxu0 %v15057_v27  ;;  %11423 = vmatprep.subr.bf16.mxu1 %v15060_v28  ;;  %v15139_v27 = vld [vmem:[%s21104_s1 + $0x1dc0] ss:$16 sps:$4 sm:$0xff]   ;;  %v15142_v28 = vld [vmem:[%s21104_s1 + $0x1dc8] ss:$16 sps:$4 sm:$0xff]  }
 0x382   :  { %10390 = vmatmul.mubr.bf16.vlgmr.msra.gmra.mrb[0].mxu0 %v1819_v19  ;;  %11415 = vmatmul.mubr.bf16.vlgmr.msra.gmra.mrb[0].mxu1 %v1819_v19  ;;  %v15150_v19 = vld [vmem:[%s21104_s1 + $0x1dec] ss:$16 sps:$4 sm:$0xff]  }
 0x383   :  { %10399 = vmatpush1.bf16.msra.mxu0 %v15055_v14  ;;  %11424 = vmatpush1.bf16.msra.mxu1 %v15058_v30  ;;  %v15145_v14 = vld [vmem:[%s21104_s1 + $0x1de0] ss:$16 sps:$4 sm:$0xff]   ;;  %v15148_v30 = vld [vmem:[%s21104_s1 + $0x1de8] ss:$16 sps:$4 sm:$0xff]  }
 0x384   :  { %10400 = vmatprep.subr.bf16.mxu0 %v15063_v31  ;;  %11425 = vmatprep.subr.bf16.mxu1 %v15066_v22  ;;  %v15154_v31 = vld [vmem:[%s21104_s1 + $0x1e04] ss:$16 sps:$4 sm:$0xff]   ;;  %v15157_v22 = vld [vmem:[%s21104_s1 + $0x1e0c] ss:$16 sps:$4 sm:$0xff]  }
 0x385   :  { %10430 = vmatprep.mubr.bf16.mxu0 %v18976_v25  ;;  %11455 = vmatprep.mubr.bf16.mxu1 %v18976_v25 }
 0x387   :  { %10401 = vmatpush1.bf16.msra.mxu0 %v15061_v32  ;;  %11426 = vmatpush1.bf16.msra.mxu1 %v15064_v33  ;;  %v19162_v32 = vrot.slane %v18945_v24, %v16239_v49  ;;  %v15152_v33 = vld [vmem:[%s21104_s1 + $0x1e00] ss:$16 sps:$4 sm:$0xff]   ;;  %v15163_v24 = vld [vmem:[%s21104_s1 + $0x1e2c] ss:$16 sps:$4 sm:$0xff]  }
 0x388   :  { %10402 = vmatprep.subr.bf16.mxu0 %v15069_v26  ;;  %11427 = vmatprep.subr.bf16.mxu1 %v15072_v36  ;;  %v15155_v26 = vld [vmem:[%s21104_s1 + $0x1e08] ss:$16 sps:$4 sm:$0xff]   ;;  %v15160_v36 = vld [vmem:[%s21104_s1 + $0x1e24] ss:$16 sps:$4 sm:$0xff]  }
 0x38b   :  { %10403 = vmatpush1.bf16.msra.mxu0 %v15067_v37  ;;  %11428 = vmatpush1.bf16.msra.mxu1 %v15070_v21  ;;  %v1822_v37 = vcombine.high %v18976_v25, %v18976_v25  ;;  %v15158_v21 = vld [vmem:[%s21104_s1 + $0x1e20] ss:$16 sps:$4 sm:$0xff]   ;;  %v15166_v25 = vld [vmem:[%s21104_s1 + $0x1e44] ss:$16 sps:$4 sm:$0xff]  }
 0x38c   :  { %10404 = vmatprep.subr.bf16.mxu0 %v15075_v39  ;;  %11429 = vmatprep.subr.bf16.mxu1 %v15078_v40  ;;  %v15161_v39 = vld [vmem:[%s21104_s1 + $0x1e28] ss:$16 sps:$4 sm:$0xff]   ;;  %v15169_v40 = vld [vmem:[%s21104_s1 + $0x1e4c] ss:$16 sps:$4 sm:$0xff]  }
 0x38f   :  { %10405 = vmatpush1.bf16.msra.mxu0 %v15073_v41  ;;  %11430 = vmatpush1.bf16.msra.mxu1 %v15076_v34  ;;  %v15164_v41 = vld [vmem:[%s21104_s1 + $0x1e40] ss:$16 sps:$4 sm:$0xff]   ;;  %v15167_v34 = vld [vmem:[%s21104_s1 + $0x1e48] ss:$16 sps:$4 sm:$0xff]  }
 0x390   :  { %10406 = vmatprep.subr.bf16.mxu0 %v15081_v43  ;;  %11431 = vmatprep.subr.bf16.mxu1 %v15084_v45  ;;  %v15172_v43 = vld [vmem:[%s21104_s1 + $0x1e64] ss:$16 sps:$4 sm:$0xff]   ;;  %v15175_v45 = vld [vmem:[%s21104_s1 + $0x1e6c] ss:$16 sps:$4 sm:$0xff]  }
 0x393   :  { %10407 = vmatpush1.bf16.msra.mxu0 %v15079_v46  ;;  %11432 = vmatpush1.bf16.msra.mxu1 %v15082_v35  ;;  %v15170_v46 = vld [vmem:[%s21104_s1 + $0x1e60] ss:$16 sps:$4 sm:$0xff]   ;;  %v15173_v35 = vld [vmem:[%s21104_s1 + $0x1e68] ss:$16 sps:$4 sm:$0xff]  }
 0x394   :  { %10408 = vmatprep.subr.bf16.mxu0 %v15087_v50  ;;  %11433 = vmatprep.subr.bf16.mxu1 %v15090_v51  ;;  %v15178_v50 = vld [vmem:[%s21104_s1 + $0x1e84] ss:$16 sps:$4 sm:$0xff]   ;;  %v15181_v51 = vld [vmem:[%s21104_s1 + $0x1e8c] ss:$16 sps:$4 sm:$0xff]  }
 0x397   :  { %10409 = vmatpush1.bf16.msra.mxu0 %v15085_v53  ;;  %11434 = vmatpush1.bf16.msra.mxu1 %v15088_v38  ;;  %v15176_v53 = vld [vmem:[%s21104_s1 + $0x1e80] ss:$16 sps:$4 sm:$0xff]   ;;  %v15179_v38 = vld [vmem:[%s21104_s1 + $0x1e88] ss:$16 sps:$4 sm:$0xff]  }
 0x398   :  { %10410 = vmatprep.subr.bf16.mxu0 %v15093_v54  ;;  %11435 = vmatprep.subr.bf16.mxu1 %v15096_v55  ;;  %v15184_v54 = vld [vmem:[%s21104_s1 + $0x1ea4] ss:$16 sps:$4 sm:$0xff]   ;;  %v15187_v55 = vld [vmem:[%s21104_s1 + $0x1eac] ss:$16 sps:$4 sm:$0xff]  }
 0x39b   :  { %10411 = vmatpush1.bf16.msra.mxu0 %v15091_v56  ;;  %11436 = vmatpush1.bf16.msra.mxu1 %v15094_v47  ;;  %v15182_v56 = vld [vmem:[%s21104_s1 + $0x1ea0] ss:$16 sps:$4 sm:$0xff]   ;;  %v15185_v47 = vld [vmem:[%s21104_s1 + $0x1ea8] ss:$16 sps:$4 sm:$0xff]  }
 0x39c   :  { %10412 = vmatprep.subr.bf16.mxu0 %v15099_v57  ;;  %11437 = vmatprep.subr.bf16.mxu1 %v15102_v58  ;;  %v15190_v57 = vld [vmem:[%s21104_s1 + $0x1ec4] ss:$16 sps:$4 sm:$0xff]   ;;  %v15193_v58 = vld [vmem:[%s21104_s1 + $0x1ecc] ss:$16 sps:$4 sm:$0xff]  }
 0x39f   :  { %10413 = vmatpush1.bf16.msra.mxu0 %v15097_v48  ;;  %11438 = vmatpush1.bf16.msra.mxu1 %v15100_v61  ;;  %v15188_v48 = vld [vmem:[%s21104_s1 + $0x1ec0] ss:$16 sps:$4 sm:$0xff]   ;;  %v15191_v61 = vld [vmem:[%s21104_s1 + $0x1ec8] ss:$16 sps:$4 sm:$0xff]  }
 0x3a0   :  { %10414 = vmatprep.subr.bf16.mxu0 %v15105_v62  ;;  %11439 = vmatprep.subr.bf16.mxu1 %v15108_v44  ;;  %v15196_v62 = vld [vmem:[%s21104_s1 + $0x1ee4] ss:$16 sps:$4 sm:$0xff]   ;;  %v15199_v44 = vld [vmem:[%s21104_s1 + $0x1eec] ss:$16 sps:$4 sm:$0xff]  }
 0x3a3   :  { %10415 = vmatpush1.bf16.msra.mxu0 %v15103_v0  ;;  %11440 = vmatpush1.bf16.msra.mxu1 %v15106_v1  ;;  %v15194_v0 = vld [vmem:[%s21104_s1 + $0x1ee0] ss:$16 sps:$4 sm:$0xff]   ;;  %v15197_v1 = vld [vmem:[%s21104_s1 + $0x1ee8] ss:$16 sps:$4 sm:$0xff]  }
 0x3a4   :  { %10416 = vmatprep.subr.bf16.mxu0 %v15111_v2  ;;  %11441 = vmatprep.subr.bf16.mxu1 %v15114_v59  ;;  %v15202_v2 = vld [vmem:[%s21104_s1 + $0x1f04] ss:$16 sps:$4 sm:$0xff]   ;;  %v15205_v59 = vld [vmem:[%s21104_s1 + $0x1f0c] ss:$16 sps:$4 sm:$0xff]  }
 0x3a7   :  { %10417 = vmatpush1.bf16.msra.mxu0 %v15109_v3  ;;  %11442 = vmatpush1.bf16.msra.mxu1 %v15112_v5  ;;  %v15200_v3 = vld [vmem:[%s21104_s1 + $0x1f00] ss:$16 sps:$4 sm:$0xff]   ;;  %v15203_v5 = vld [vmem:[%s21104_s1 + $0x1f08] ss:$16 sps:$4 sm:$0xff]  }
 0x3a8   :  { %10418 = vmatprep.subr.bf16.mxu0 %v15117_v6  ;;  %11443 = vmatprep.subr.bf16.mxu1 %v15120_v60  ;;  %v15208_v6 = vld [vmem:[%s21104_s1 + $0x1f24] ss:$16 sps:$4 sm:$0xff]   ;;  %v15211_v60 = vld [vmem:[%s21104_s1 + $0x1f2c] ss:$16 sps:$4 sm:$0xff]  }
 0x3ab   :  { %10419 = vmatpush1.bf16.msra.mxu0 %v15115_v9  ;;  %11444 = vmatpush1.bf16.msra.mxu1 %v15118_v11  ;;  %v15206_v9 = vld [vmem:[%s21104_s1 + $0x1f20] ss:$16 sps:$4 sm:$0xff]   ;;  %v15209_v11 = vld [vmem:[%s21104_s1 + $0x1f28] ss:$16 sps:$4 sm:$0xff]  }
 0x3ac   :  { %10420 = vmatprep.subr.bf16.mxu0 %v15123_v63  ;;  %11445 = vmatprep.subr.bf16.mxu1 %v15126_v12  ;;  %v15214_v63 = vld [vmem:[%s21104_s1 + $0x1f44] ss:$16 sps:$4 sm:$0xff]   ;;  %v15217_v12 = vld [vmem:[%s21104_s1 + $0x1f4c] ss:$16 sps:$4 sm:$0xff]  }
 0x3af   :  { %10421 = vmatpush1.bf16.msra.mxu0 %v15121_v52  ;;  %11446 = vmatpush1.bf16.msra.mxu1 %v15124_v15  ;;  %v15212_v52 = vld [vmem:[%s21104_s1 + $0x1f40] ss:$16 sps:$4 sm:$0xff]   ;;  %v15215_v15 = vld [vmem:[%s21104_s1 + $0x1f48] ss:$16 sps:$4 sm:$0xff]  }
 0x3b0   :  { %10422 = vmatprep.subr.bf16.mxu0 %v15129_v7  ;;  %11447 = vmatprep.subr.bf16.mxu1 %v15132_v16  ;;  %v15220_v7 = vld [vmem:[%s21104_s1 + $0x1f64] ss:$16 sps:$4 sm:$0xff]   ;;  %v15223_v16 = vld [vmem:[%s21104_s1 + $0x1f6c] ss:$16 sps:$4 sm:$0xff]  }
 0x3b3   :  { %10423 = vmatpush1.bf16.msra.mxu0 %v15127_v17  ;;  %11448 = vmatpush1.bf16.msra.mxu1 %v15130_v18  ;;  %v15218_v17 = vld [vmem:[%s21104_s1 + $0x1f60] ss:$16 sps:$4 sm:$0xff]   ;;  %v15221_v18 = vld [vmem:[%s21104_s1 + $0x1f68] ss:$16 sps:$4 sm:$0xff]  }
 0x3b4   :  { %10424 = vmatprep.subr.bf16.mxu0 %v15135_v8  ;;  %11449 = vmatprep.subr.bf16.mxu1 %v15138_v20  ;;  %v15226_v8 = vld [vmem:[%s21104_s1 + $0x1f84] ss:$16 sps:$4 sm:$0xff]   ;;  %v15229_v20 = vld [vmem:[%s21104_s1 + $0x1f8c] ss:$16 sps:$4 sm:$0xff]  }
 0x3b7   :  { %10425 = vmatpush1.bf16.msra.mxu0 %v15133_v23  ;;  %11450 = vmatpush1.bf16.msra.mxu1 %v15136_v4  ;;  %v15224_v23 = vld [vmem:[%s21104_s1 + $0x1f80] ss:$16 sps:$4 sm:$0xff]   ;;  %v15227_v4 = vld [vmem:[%s21104_s1 + $0x1f88] ss:$16 sps:$4 sm:$0xff]  }
 0x3b8   :  { %10426 = vmatprep.subr.bf16.mxu0 %v15141_v13  ;;  %11451 = vmatprep.subr.bf16.mxu1 %v15144_v10  ;;  %v15232_v13 = vld [vmem:[%s21104_s1 + $0x1fa4] ss:$16 sps:$4 sm:$0xff]   ;;  %v15235_v10 = vld [vmem:[%s21104_s1 + $0x1fac] ss:$16 sps:$4 sm:$0xff]  }
 0x3bb   :  { %10427 = vmatpush1.bf16.msra.mxu0 %v15139_v27  ;;  %11452 = vmatpush1.bf16.msra.mxu1 %v15142_v28  ;;  %v15230_v27 = vld [vmem:[%s21104_s1 + $0x1fa0] ss:$16 sps:$4 sm:$0xff]   ;;  %v15233_v28 = vld [vmem:[%s21104_s1 + $0x1fa8] ss:$16 sps:$4 sm:$0xff]  }
 0x3bc   :  { %10428 = vmatprep.subr.bf16.mxu0 %v15147_v29  ;;  %11453 = vmatprep.subr.bf16.mxu1 %v15150_v19  ;;  %v15238_v29 = vld [vmem:[%s21104_s1 + $0x1fc4] ss:$16 sps:$4 sm:$0xff]   ;;  %v15241_v19 = vld [vmem:[%s21104_s1 + $0x1fcc] ss:$16 sps:$4 sm:$0xff]  }
 0x3bf   :  { %10429 = vmatpush1.bf16.msra.mxu0 %v15145_v14  ;;  %11454 = vmatpush1.bf16.msra.mxu1 %v15148_v30  ;;  %v19339_v14 = vld [vmem:[%s21105_s0 + $0x20] sm:$0xff] }
 0x3c0   :  { %10439 = vmatprep.subr.bf16.mxu0 %v15154_v31  ;;  %11464 = vmatprep.subr.bf16.mxu1 %v15157_v22  ;;  %v15236_v30 = vld [vmem:[%s21104_s1 + $0x1fc0] ss:$16 sps:$4 sm:$0xff]   ;;  %v15239_v31 = vld [vmem:[%s21104_s1 + $0x1fc8] ss:$16 sps:$4 sm:$0xff]   ;;  %v15244_v22 = vld [vmem:[%s21104_s1 + $0x1fe4] ss:$16 sps:$4 sm:$0xff]  }
 0x3c2   :  { %10431 = vmatmul.mubr.bf16.vlgmr.msra.gmra.mrb[0].mxu0 %v19162_v32  ;;  %11456 = vmatmul.mubr.bf16.vlgmr.msra.gmra.mrb[0].mxu1 %v19162_v32 }
 0x3c3   :  { %10440 = vmatpush1.bf16.msra.mxu0 %v15152_v33  ;;  %11465 = vmatpush1.bf16.msra.mxu1 %v15155_v26  ;;  %v15247_v33 = vld [vmem:[%s21104_s1 + $0x1fec] ss:$16 sps:$4 sm:$0xff]   ;;  %v19355_v26 = vrot.slane %v19339_v14, %v16239_v49 }
 0x3c4   :  { %10441 = vmatprep.subr.bf16.mxu0 %v15160_v36  ;;  %11466 = vmatprep.subr.bf16.mxu1 %v15163_v24  ;;  %v15242_v36 = vld [vmem:[%s21104_s1 + $0x1fe0] ss:$16 sps:$4 sm:$0xff]   ;;  %v15245_v24 = vld [vmem:[%s21104_s1 + $0x1fe8] ss:$16 sps:$4 sm:$0xff]  }
 0x3c5   :  { %10471 = vmatprep.mubr.bf16.mxu0 %v1822_v37  ;;  %11496 = vmatprep.mubr.bf16.mxu1 %v1822_v37  ;;  %v15250_v37 = vld [vmem:[%s21104_s1 + $0x2004] ss:$16 sps:$4 sm:$0xff]  }
 0x3c7   :  { %10442 = vmatpush1.bf16.msra.mxu0 %v15158_v21  ;;  %11467 = vmatpush1.bf16.msra.mxu1 %v15161_v39  ;;  %v15253_v21 = vld [vmem:[%s21104_s1 + $0x200c] ss:$16 sps:$4 sm:$0xff]   ;;  %v1838_v39 = vcombine.high %v19355_v26, %v19355_v26 }
 0x3c8   :  { %10443 = vmatprep.subr.bf16.mxu0 %v15166_v25  ;;  %11468 = vmatprep.subr.bf16.mxu1 %v15169_v40  ;;  %v1820_v25 = vcombine.high %v19162_v32, %v19162_v32  ;;  %v15248_v40 = vld [vmem:[%s21104_s1 + $0x2000] ss:$16 sps:$4 sm:$0xff]   ;;  %v15259_v32 = vld [vmem:[%s21104_s1 + $0x202c] ss:$16 sps:$4 sm:$0xff]  }
 0x3cb   :  { %10444 = vmatpush1.bf16.msra.mxu0 %v15164_v41  ;;  %11469 = vmatpush1.bf16.msra.mxu1 %v15167_v34  ;;  %v15251_v41 = vld [vmem:[%s21104_s1 + $0x2008] ss:$16 sps:$4 sm:$0xff]   ;;  %v15256_v34 = vld [vmem:[%s21104_s1 + $0x2024] ss:$16 sps:$4 sm:$0xff]  }
 0x3cc   :  { %10445 = vmatprep.subr.bf16.mxu0 %v15172_v43  ;;  %11470 = vmatprep.subr.bf16.mxu1 %v15175_v45  ;;  %v19386_v43 = vrot.slane %v1838_v39, %v16239_v49  ;;  %v15254_v45 = vld [vmem:[%s21104_s1 + $0x2020] ss:$16 sps:$4 sm:$0xff]   ;;  %v15335_v39 = vld [vmem:[%s21104_s1 + $0x21c8] ss:$16 sps:$4 sm:$0xff]  }
 0x3cf   :  { %10446 = vmatpush1.bf16.msra.mxu0 %v15170_v46  ;;  %11471 = vmatpush1.bf16.msra.mxu1 %v15173_v35  ;;  %v15257_v46 = vld [vmem:[%s21104_s1 + $0x2028] ss:$16 sps:$4 sm:$0xff]   ;;  %v15262_v35 = vld [vmem:[%s21104_s1 + $0x2044] ss:$16 sps:$4 sm:$0xff]  }
 0x3d0   :  { %10447 = vmatprep.subr.bf16.mxu0 %v15178_v50  ;;  %11472 = vmatprep.subr.bf16.mxu1 %v15181_v51  ;;  %v15265_v50 = vld [vmem:[%s21104_s1 + $0x204c] ss:$16 sps:$4 sm:$0xff]   ;;  %v15260_v51 = vld [vmem:[%s21104_s1 + $0x2040] ss:$16 sps:$4 sm:$0xff]  }
 0x3d3   :  { %10448 = vmatpush1.bf16.msra.mxu0 %v15176_v53  ;;  %11473 = vmatpush1.bf16.msra.mxu1 %v15179_v38  ;;  %v15263_v53 = vld [vmem:[%s21104_s1 + $0x2048] ss:$16 sps:$4 sm:$0xff]   ;;  %v15268_v38 = vld [vmem:[%s21104_s1 + $0x2064] ss:$16 sps:$4 sm:$0xff]  }
 0x3d4   :  { %10449 = vmatprep.subr.bf16.mxu0 %v15184_v54  ;;  %11474 = vmatprep.subr.bf16.mxu1 %v15187_v55  ;;  %v15271_v54 = vld [vmem:[%s21104_s1 + $0x206c] ss:$16 sps:$4 sm:$0xff]   ;;  %v15266_v55 = vld [vmem:[%s21104_s1 + $0x2060] ss:$16 sps:$4 sm:$0xff]  }
 0x3d7   :  { %10450 = vmatpush1.bf16.msra.mxu0 %v15182_v56  ;;  %11475 = vmatpush1.bf16.msra.mxu1 %v15185_v47  ;;  %v15269_v56 = vld [vmem:[%s21104_s1 + $0x2068] ss:$16 sps:$4 sm:$0xff]   ;;  %v15274_v47 = vld [vmem:[%s21104_s1 + $0x2084] ss:$16 sps:$4 sm:$0xff]  }
 0x3d8   :  { %10451 = vmatprep.subr.bf16.mxu0 %v15190_v57  ;;  %11476 = vmatprep.subr.bf16.mxu1 %v15193_v58  ;;  %v15277_v57 = vld [vmem:[%s21104_s1 + $0x208c] ss:$16 sps:$4 sm:$0xff]   ;;  %v15272_v58 = vld [vmem:[%s21104_s1 + $0x2080] ss:$16 sps:$4 sm:$0xff]  }
 0x3db   :  { %10452 = vmatpush1.bf16.msra.mxu0 %v15188_v48  ;;  %11477 = vmatpush1.bf16.msra.mxu1 %v15191_v61  ;;  %v15275_v48 = vld [vmem:[%s21104_s1 + $0x2088] ss:$16 sps:$4 sm:$0xff]   ;;  %v15280_v61 = vld [vmem:[%s21104_s1 + $0x20a4] ss:$16 sps:$4 sm:$0xff]  }
 0x3dc   :  { %10453 = vmatprep.subr.bf16.mxu0 %v15196_v62  ;;  %11478 = vmatprep.subr.bf16.mxu1 %v15199_v44  ;;  %v15283_v62 = vld [vmem:[%s21104_s1 + $0x20ac] ss:$16 sps:$4 sm:$0xff]   ;;  %v15278_v44 = vld [vmem:[%s21104_s1 + $0x20a0] ss:$16 sps:$4 sm:$0xff]  }
 0x3df   :  { %10454 = vmatpush1.bf16.msra.mxu0 %v15194_v0  ;;  %11479 = vmatpush1.bf16.msra.mxu1 %v15197_v1  ;;  %v15281_v0 = vld [vmem:[%s21104_s1 + $0x20a8] ss:$16 sps:$4 sm:$0xff]   ;;  %v15286_v1 = vld [vmem:[%s21104_s1 + $0x20c4] ss:$16 sps:$4 sm:$0xff]  }
 0x3e0   :  { %10455 = vmatprep.subr.bf16.mxu0 %v15202_v2  ;;  %11480 = vmatprep.subr.bf16.mxu1 %v15205_v59  ;;  %v15289_v2 = vld [vmem:[%s21104_s1 + $0x20cc] ss:$16 sps:$4 sm:$0xff]   ;;  %v15284_v59 = vld [vmem:[%s21104_s1 + $0x20c0] ss:$16 sps:$4 sm:$0xff]  }
 0x3e3   :  { %10456 = vmatpush1.bf16.msra.mxu0 %v15200_v3  ;;  %11481 = vmatpush1.bf16.msra.mxu1 %v15203_v5  ;;  %v15287_v3 = vld [vmem:[%s21104_s1 + $0x20c8] ss:$16 sps:$4 sm:$0xff]   ;;  %v15292_v5 = vld [vmem:[%s21104_s1 + $0x20e4] ss:$16 sps:$4 sm:$0xff]  }
 0x3e4   :  { %10457 = vmatprep.subr.bf16.mxu0 %v15208_v6  ;;  %11482 = vmatprep.subr.bf16.mxu1 %v15211_v60  ;;  %v15295_v6 = vld [vmem:[%s21104_s1 + $0x20ec] ss:$16 sps:$4 sm:$0xff]   ;;  %v15290_v60 = vld [vmem:[%s21104_s1 + $0x20e0] ss:$16 sps:$4 sm:$0xff]  }
 0x3e7   :  { %10458 = vmatpush1.bf16.msra.mxu0 %v15206_v9  ;;  %11483 = vmatpush1.bf16.msra.mxu1 %v15209_v11  ;;  %v15293_v9 = vld [vmem:[%s21104_s1 + $0x20e8] ss:$16 sps:$4 sm:$0xff]   ;;  %v15298_v11 = vld [vmem:[%s21104_s1 + $0x2104] ss:$16 sps:$4 sm:$0xff]  }
 0x3e8   :  { %10459 = vmatprep.subr.bf16.mxu0 %v15214_v63  ;;  %11484 = vmatprep.subr.bf16.mxu1 %v15217_v12  ;;  %v15301_v63 = vld [vmem:[%s21104_s1 + $0x210c] ss:$16 sps:$4 sm:$0xff]   ;;  %v15296_v12 = vld [vmem:[%s21104_s1 + $0x2100] ss:$16 sps:$4 sm:$0xff]  }
 0x3eb   :  { %10460 = vmatpush1.bf16.msra.mxu0 %v15212_v52  ;;  %11485 = vmatpush1.bf16.msra.mxu1 %v15215_v15  ;;  %v15299_v52 = vld [vmem:[%s21104_s1 + $0x2108] ss:$16 sps:$4 sm:$0xff]   ;;  %v15304_v15 = vld [vmem:[%s21104_s1 + $0x2124] ss:$16 sps:$4 sm:$0xff]  }
 0x3ec   :  { %10461 = vmatprep.subr.bf16.mxu0 %v15220_v7  ;;  %11486 = vmatprep.subr.bf16.mxu1 %v15223_v16  ;;  %v15307_v7 = vld [vmem:[%s21104_s1 + $0x212c] ss:$16 sps:$4 sm:$0xff]   ;;  %v15302_v16 = vld [vmem:[%s21104_s1 + $0x2120] ss:$16 sps:$4 sm:$0xff]  }
 0x3ef   :  { %10462 = vmatpush1.bf16.msra.mxu0 %v15218_v17  ;;  %11487 = vmatpush1.bf16.msra.mxu1 %v15221_v18  ;;  %v15305_v17 = vld [vmem:[%s21104_s1 + $0x2128] ss:$16 sps:$4 sm:$0xff]   ;;  %v15310_v18 = vld [vmem:[%s21104_s1 + $0x2144] ss:$16 sps:$4 sm:$0xff]  }
 0x3f0   :  { %10463 = vmatprep.subr.bf16.mxu0 %v15226_v8  ;;  %11488 = vmatprep.subr.bf16.mxu1 %v15229_v20  ;;  %v15313_v8 = vld [vmem:[%s21104_s1 + $0x214c] ss:$16 sps:$4 sm:$0xff]   ;;  %v15308_v20 = vld [vmem:[%s21104_s1 + $0x2140] ss:$16 sps:$4 sm:$0xff]  }
 0x3f3   :  { %10464 = vmatpush1.bf16.msra.mxu0 %v15224_v23  ;;  %11489 = vmatpush1.bf16.msra.mxu1 %v15227_v4  ;;  %v15311_v23 = vld [vmem:[%s21104_s1 + $0x2148] ss:$16 sps:$4 sm:$0xff]   ;;  %v15316_v4 = vld [vmem:[%s21104_s1 + $0x2164] ss:$16 sps:$4 sm:$0xff]  }
 0x3f4   :  { %10465 = vmatprep.subr.bf16.mxu0 %v15232_v13  ;;  %11490 = vmatprep.subr.bf16.mxu1 %v15235_v10  ;;  %v15319_v13 = vld [vmem:[%s21104_s1 + $0x216c] ss:$16 sps:$4 sm:$0xff]   ;;  %v15314_v10 = vld [vmem:[%s21104_s1 + $0x2160] ss:$16 sps:$4 sm:$0xff]  }
 0x3f7   :  { %10466 = vmatpush1.bf16.msra.mxu0 %v15230_v27  ;;  %11491 = vmatpush1.bf16.msra.mxu1 %v15233_v28  ;;  %v15317_v27 = vld [vmem:[%s21104_s1 + $0x2168] ss:$16 sps:$4 sm:$0xff]   ;;  %v15322_v28 = vld [vmem:[%s21104_s1 + $0x2184] ss:$16 sps:$4 sm:$0xff]  }
 0x3f8   :  { %10467 = vmatprep.subr.bf16.mxu0 %v15238_v29  ;;  %11492 = vmatprep.subr.bf16.mxu1 %v15241_v19  ;;  %v15325_v29 = vld [vmem:[%s21104_s1 + $0x218c] ss:$16 sps:$4 sm:$0xff]   ;;  %v15320_v19 = vld [vmem:[%s21104_s1 + $0x2180] ss:$16 sps:$4 sm:$0xff]  }
 0x3fb   :  { %10468 = vmatpush1.bf16.msra.mxu0 %v15236_v30  ;;  %11493 = vmatpush1.bf16.msra.mxu1 %v15239_v31  ;;  %v15323_v30 = vld [vmem:[%s21104_s1 + $0x2188] ss:$16 sps:$4 sm:$0xff]   ;;  %v15328_v31 = vld [vmem:[%s21104_s1 + $0x21a4] ss:$16 sps:$4 sm:$0xff]  }
 0x3fc   :  { %10469 = vmatprep.subr.bf16.mxu0 %v15244_v22  ;;  %11494 = vmatprep.subr.bf16.mxu1 %v15247_v33  ;;  %v15331_v22 = vld [vmem:[%s21104_s1 + $0x21ac] ss:$16 sps:$4 sm:$0xff]   ;;  %v15326_v33 = vld [vmem:[%s21104_s1 + $0x21a0] ss:$16 sps:$4 sm:$0xff]  }
 0x3ff   :  { %10470 = vmatpush1.bf16.msra.mxu0 %v15242_v36  ;;  %11495 = vmatpush1.bf16.msra.mxu1 %v15245_v24  ;;  %v15329_v36 = vld [vmem:[%s21104_s1 + $0x21a8] ss:$16 sps:$4 sm:$0xff]   ;;  %v15334_v24 = vld [vmem:[%s21104_s1 + $0x21c4] ss:$16 sps:$4 sm:$0xff]  }
 0x400   :  { %10480 = vmatprep.subr.bf16.mxu0 %v15250_v37  ;;  %11505 = vmatprep.subr.bf16.mxu1 %v15253_v21  ;;  %v15337_v37 = vld [vmem:[%s21104_s1 + $0x21cc] ss:$16 sps:$4 sm:$0xff]   ;;  %v15332_v21 = vld [vmem:[%s21104_s1 + $0x21c0] ss:$16 sps:$4 sm:$0xff]  }
 0x402   :  { %10472 = vmatmul.mubr.bf16.vlgmr.msra.gmra.mrb[0].mxu0 %v1820_v25  ;;  %11497 = vmatmul.mubr.bf16.vlgmr.msra.gmra.mrb[0].mxu1 %v1820_v25  ;;  %v15340_v25 = vld [vmem:[%s21104_s1 + $0x21e4] ss:$16 sps:$4 sm:$0xff]  }
 0x403   :  { %10481 = vmatpush1.bf16.msra.mxu0 %v15248_v40  ;;  %11506 = vmatpush1.bf16.msra.mxu1 %v15251_v41  ;;  %v15343_v40 = vld [vmem:[%s21104_s1 + $0x21ec] ss:$16 sps:$4 sm:$0xff]   ;;  %v15338_v41 = vld [vmem:[%s21104_s1 + $0x21e0] ss:$16 sps:$4 sm:$0xff]  }
 0x404   :  { %10482 = vmatprep.subr.bf16.mxu0 %v15256_v34  ;;  %11507 = vmatprep.subr.bf16.mxu1 %v15259_v32  ;;  %v15341_v34 = vld [vmem:[%s21104_s1 + $0x21e8] ss:$16 sps:$4 sm:$0xff]   ;;  %v15346_v32 = vld [vmem:[%s21104_s1 + $0x2204] ss:$16 sps:$4 sm:$0xff]  }
 0x405   :  { %10512 = vmatprep.mubr.bf16.mxu0 %v19386_v43  ;;  %11537 = vmatprep.mubr.bf16.mxu1 %v19386_v43 }
 0x407   :  { %10483 = vmatpush1.bf16.msra.mxu0 %v15254_v45  ;;  %11508 = vmatpush1.bf16.msra.mxu1 %v15257_v46  ;;  %v15349_v45 = vld [vmem:[%s21104_s1 + $0x220c] ss:$16 sps:$4 sm:$0xff]   ;;  %v19572_v46 = vrot.slane %v19355_v26, %v16239_v49 }
 0x408   :  { %10484 = vmatprep.subr.bf16.mxu0 %v15262_v35  ;;  %11509 = vmatprep.subr.bf16.mxu1 %v15265_v50  ;;  %v15344_v35 = vld [vmem:[%s21104_s1 + $0x2200] ss:$16 sps:$4 sm:$0xff]   ;;  %v15347_v50 = vld [vmem:[%s21104_s1 + $0x2208] ss:$16 sps:$4 sm:$0xff]   ;;  %v15355_v26 = vld [vmem:[%s21104_s1 + $0x222c] ss:$16 sps:$4 sm:$0xff]  }
 0x40b   :  { %10485 = vmatpush1.bf16.msra.mxu0 %v15260_v51  ;;  %11510 = vmatpush1.bf16.msra.mxu1 %v15263_v53  ;;  %v15352_v51 = vld [vmem:[%s21104_s1 + $0x2224] ss:$16 sps:$4 sm:$0xff]   ;;  %v1870_v53 = vcombine.high %v19386_v43, %v19386_v43 }
 0x40c   :  { %10486 = vmatprep.subr.bf16.mxu0 %v15268_v38  ;;  %11511 = vmatprep.subr.bf16.mxu1 %v15271_v54  ;;  %v15350_v38 = vld [vmem:[%s21104_s1 + $0x2220] ss:$16 sps:$4 sm:$0xff]   ;;  %v15353_v54 = vld [vmem:[%s21104_s1 + $0x2228] ss:$16 sps:$4 sm:$0xff]   ;;  %v15358_v43 = vld [vmem:[%s21104_s1 + $0x2244] ss:$16 sps:$4 sm:$0xff]  }
 0x40f   :  { %10487 = vmatpush1.bf16.msra.mxu0 %v15266_v55  ;;  %11512 = vmatpush1.bf16.msra.mxu1 %v15269_v56  ;;  %v15361_v55 = vld [vmem:[%s21104_s1 + $0x224c] ss:$16 sps:$4 sm:$0xff]   ;;  %v15356_v56 = vld [vmem:[%s21104_s1 + $0x2240] ss:$16 sps:$4 sm:$0xff]  }
 0x410   :  { %10488 = vmatprep.subr.bf16.mxu0 %v15274_v47  ;;  %11513 = vmatprep.subr.bf16.mxu1 %v15277_v57  ;;  %v15359_v47 = vld [vmem:[%s21104_s1 + $0x2248] ss:$16 sps:$4 sm:$0xff]   ;;  %v15364_v57 = vld [vmem:[%s21104_s1 + $0x2264] ss:$16 sps:$4 sm:$0xff]  }
 0x413   :  { %10489 = vmatpush1.bf16.msra.mxu0 %v15272_v58  ;;  %11514 = vmatpush1.bf16.msra.mxu1 %v15275_v48  ;;  %v15367_v58 = vld [vmem:[%s21104_s1 + $0x226c] ss:$16 sps:$4 sm:$0xff]   ;;  %v15362_v48 = vld [vmem:[%s21104_s1 + $0x2260] ss:$16 sps:$4 sm:$0xff]  }
 0x414   :  { %10490 = vmatprep.subr.bf16.mxu0 %v15280_v61  ;;  %11515 = vmatprep.subr.bf16.mxu1 %v15283_v62  ;;  %v15365_v61 = vld [vmem:[%s21104_s1 + $0x2268] ss:$16 sps:$4 sm:$0xff]   ;;  %v15370_v62 = vld [vmem:[%s21104_s1 + $0x2284] ss:$16 sps:$4 sm:$0xff]  }
 0x417   :  { %10491 = vmatpush1.bf16.msra.mxu0 %v15278_v44  ;;  %11516 = vmatpush1.bf16.msra.mxu1 %v15281_v0  ;;  %v15373_v44 = vld [vmem:[%s21104_s1 + $0x228c] ss:$16 sps:$4 sm:$0xff]   ;;  %v15368_v0 = vld [vmem:[%s21104_s1 + $0x2280] ss:$16 sps:$4 sm:$0xff]  }
 0x418   :  { %10492 = vmatprep.subr.bf16.mxu0 %v15286_v1  ;;  %11517 = vmatprep.subr.bf16.mxu1 %v15289_v2  ;;  %v15371_v1 = vld [vmem:[%s21104_s1 + $0x2288] ss:$16 sps:$4 sm:$0xff]   ;;  %v15376_v2 = vld [vmem:[%s21104_s1 + $0x22a4] ss:$16 sps:$4 sm:$0xff]  }
 0x41b   :  { %10493 = vmatpush1.bf16.msra.mxu0 %v15284_v59  ;;  %11518 = vmatpush1.bf16.msra.mxu1 %v15287_v3  ;;  %v15379_v59 = vld [vmem:[%s21104_s1 + $0x22ac] ss:$16 sps:$4 sm:$0xff]   ;;  %v15374_v3 = vld [vmem:[%s21104_s1 + $0x22a0] ss:$16 sps:$4 sm:$0xff]  }
 0x41c   :  { %10494 = vmatprep.subr.bf16.mxu0 %v15292_v5  ;;  %11519 = vmatprep.subr.bf16.mxu1 %v15295_v6  ;;  %v15377_v5 = vld [vmem:[%s21104_s1 + $0x22a8] ss:$16 sps:$4 sm:$0xff]   ;;  %v15382_v6 = vld [vmem:[%s21104_s1 + $0x22c4] ss:$16 sps:$4 sm:$0xff]  }
 0x41f   :  { %10495 = vmatpush1.bf16.msra.mxu0 %v15290_v60  ;;  %11520 = vmatpush1.bf16.msra.mxu1 %v15293_v9  ;;  %v15385_v60 = vld [vmem:[%s21104_s1 + $0x22cc] ss:$16 sps:$4 sm:$0xff]   ;;  %v15380_v9 = vld [vmem:[%s21104_s1 + $0x22c0] ss:$16 sps:$4 sm:$0xff]  }
 0x420   :  { %10496 = vmatprep.subr.bf16.mxu0 %v15298_v11  ;;  %11521 = vmatprep.subr.bf16.mxu1 %v15301_v63  ;;  %v15383_v11 = vld [vmem:[%s21104_s1 + $0x22c8] ss:$16 sps:$4 sm:$0xff]   ;;  %v15388_v63 = vld [vmem:[%s21104_s1 + $0x22e4] ss:$16 sps:$4 sm:$0xff]  }
 0x423   :  { %10497 = vmatpush1.bf16.msra.mxu0 %v15296_v12  ;;  %11522 = vmatpush1.bf16.msra.mxu1 %v15299_v52  ;;  %v15391_v12 = vld [vmem:[%s21104_s1 + $0x22ec] ss:$16 sps:$4 sm:$0xff]   ;;  %v15386_v52 = vld [vmem:[%s21104_s1 + $0x22e0] ss:$16 sps:$4 sm:$0xff]  }
 0x424   :  { %10498 = vmatprep.subr.bf16.mxu0 %v15304_v15  ;;  %11523 = vmatprep.subr.bf16.mxu1 %v15307_v7  ;;  %v15389_v15 = vld [vmem:[%s21104_s1 + $0x22e8] ss:$16 sps:$4 sm:$0xff]   ;;  %v15394_v7 = vld [vmem:[%s21104_s1 + $0x2304] ss:$16 sps:$4 sm:$0xff]  }
 0x427   :  { %10499 = vmatpush1.bf16.msra.mxu0 %v15302_v16  ;;  %11524 = vmatpush1.bf16.msra.mxu1 %v15305_v17  ;;  %v15397_v16 = vld [vmem:[%s21104_s1 + $0x230c] ss:$16 sps:$4 sm:$0xff]   ;;  %v15392_v17 = vld [vmem:[%s21104_s1 + $0x2300] ss:$16 sps:$4 sm:$0xff]  }
 0x428   :  { %10500 = vmatprep.subr.bf16.mxu0 %v15310_v18  ;;  %11525 = vmatprep.subr.bf16.mxu1 %v15313_v8  ;;  %v15395_v18 = vld [vmem:[%s21104_s1 + $0x2308] ss:$16 sps:$4 sm:$0xff]   ;;  %v15400_v8 = vld [vmem:[%s21104_s1 + $0x2324] ss:$16 sps:$4 sm:$0xff]  }
 0x42b   :  { %10501 = vmatpush1.bf16.msra.mxu0 %v15308_v20  ;;  %11526 = vmatpush1.bf16.msra.mxu1 %v15311_v23  ;;  %v15403_v20 = vld [vmem:[%s21104_s1 + $0x232c] ss:$16 sps:$4 sm:$0xff]   ;;  %v15398_v23 = vld [vmem:[%s21104_s1 + $0x2320] ss:$16 sps:$4 sm:$0xff]  }
 0x42c   :  { %10502 = vmatprep.subr.bf16.mxu0 %v15316_v4  ;;  %11527 = vmatprep.subr.bf16.mxu1 %v15319_v13  ;;  %v15401_v4 = vld [vmem:[%s21104_s1 + $0x2328] ss:$16 sps:$4 sm:$0xff]   ;;  %v15406_v13 = vld [vmem:[%s21104_s1 + $0x2344] ss:$16 sps:$4 sm:$0xff]  }
 0x42f   :  { %10503 = vmatpush1.bf16.msra.mxu0 %v15314_v10  ;;  %11528 = vmatpush1.bf16.msra.mxu1 %v15317_v27  ;;  %v15409_v10 = vld [vmem:[%s21104_s1 + $0x234c] ss:$16 sps:$4 sm:$0xff]   ;;  %v15404_v27 = vld [vmem:[%s21104_s1 + $0x2340] ss:$16 sps:$4 sm:$0xff]  }
 0x430   :  { %10504 = vmatprep.subr.bf16.mxu0 %v15322_v28  ;;  %11529 = vmatprep.subr.bf16.mxu1 %v15325_v29  ;;  %v15407_v28 = vld [vmem:[%s21104_s1 + $0x2348] ss:$16 sps:$4 sm:$0xff]   ;;  %v15412_v29 = vld [vmem:[%s21104_s1 + $0x2364] ss:$16 sps:$4 sm:$0xff]  }
 0x433   :  { %10505 = vmatpush1.bf16.msra.mxu0 %v15320_v19  ;;  %11530 = vmatpush1.bf16.msra.mxu1 %v15323_v30  ;;  %v15415_v19 = vld [vmem:[%s21104_s1 + $0x236c] ss:$16 sps:$4 sm:$0xff]   ;;  %v15410_v30 = vld [vmem:[%s21104_s1 + $0x2360] ss:$16 sps:$4 sm:$0xff]  }
 0x434   :  { %10506 = vmatprep.subr.bf16.mxu0 %v15328_v31  ;;  %11531 = vmatprep.subr.bf16.mxu1 %v15331_v22  ;;  %v15413_v31 = vld [vmem:[%s21104_s1 + $0x2368] ss:$16 sps:$4 sm:$0xff]   ;;  %v15418_v22 = vld [vmem:[%s21104_s1 + $0x2384] ss:$16 sps:$4 sm:$0xff]  }
 0x437   :  { %10507 = vmatpush1.bf16.msra.mxu0 %v15326_v33  ;;  %11532 = vmatpush1.bf16.msra.mxu1 %v15329_v36  ;;  %v15421_v33 = vld [vmem:[%s21104_s1 + $0x238c] ss:$16 sps:$4 sm:$0xff]   ;;  %v15416_v36 = vld [vmem:[%s21104_s1 + $0x2380] ss:$16 sps:$4 sm:$0xff]  }
 0x438   :  { %10508 = vmatprep.subr.bf16.mxu0 %v15334_v24  ;;  %11533 = vmatprep.subr.bf16.mxu1 %v15337_v37  ;;  %v15419_v24 = vld [vmem:[%s21104_s1 + $0x2388] ss:$16 sps:$4 sm:$0xff]   ;;  %v15424_v37 = vld [vmem:[%s21104_s1 + $0x23a4] ss:$16 sps:$4 sm:$0xff]  }
 0x43b   :  { %10509 = vmatpush1.bf16.msra.mxu0 %v15332_v21  ;;  %11534 = vmatpush1.bf16.msra.mxu1 %v15335_v39  ;;  %v15427_v21 = vld [vmem:[%s21104_s1 + $0x23ac] ss:$16 sps:$4 sm:$0xff]   ;;  %v15422_v39 = vld [vmem:[%s21104_s1 + $0x23a0] ss:$16 sps:$4 sm:$0xff]  }
 0x43c   :  { %10510 = vmatprep.subr.bf16.mxu0 %v15340_v25  ;;  %11535 = vmatprep.subr.bf16.mxu1 %v15343_v40  ;;  %v15425_v25 = vld [vmem:[%s21104_s1 + $0x23a8] ss:$16 sps:$4 sm:$0xff]   ;;  %v15430_v40 = vld [vmem:[%s21104_s1 + $0x23c4] ss:$16 sps:$4 sm:$0xff]  }
 0x43f   :  { %10511 = vmatpush1.bf16.msra.mxu0 %v15338_v41  ;;  %11536 = vmatpush1.bf16.msra.mxu1 %v15341_v34  ;;  %v15433_v41 = vld [vmem:[%s21104_s1 + $0x23cc] ss:$16 sps:$4 sm:$0xff]   ;;  %v1823_v34 = vcombine.high %v19339_v14, %v19339_v14 }
 0x440   :  { %10521 = vmatprep.subr.bf16.mxu0 %v15346_v32  ;;  %11546 = vmatprep.subr.bf16.mxu1 %v15349_v45  ;;  %v15428_v32 = vld [vmem:[%s21104_s1 + $0x23c0] ss:$16 sps:$4 sm:$0xff]   ;;  %v15431_v45 = vld [vmem:[%s21104_s1 + $0x23c8] ss:$16 sps:$4 sm:$0xff]   ;;  %v15439_v14 = vld [vmem:[%s21104_s1 + $0x23ec] ss:$16 sps:$4 sm:$0xff]  }
 0x442   :  { %10513 = vmatmul.mubr.bf16.vlgmr.msra.gmra.mrb[0].mxu0 %v19572_v46  ;;  %11538 = vmatmul.mubr.bf16.vlgmr.msra.gmra.mrb[0].mxu1 %v19572_v46 }
 0x443   :  { %10522 = vmatpush1.bf16.msra.mxu0 %v15344_v35  ;;  %11547 = vmatpush1.bf16.msra.mxu1 %v15347_v50  ;;  %v15436_v35 = vld [vmem:[%s21104_s1 + $0x23e4] ss:$16 sps:$4 sm:$0xff]   ;;  %v19761_v50 = vrot.slane %v1823_v34, %v16239_v49  ;;  %v15515_v34 = vld [vmem:[%s21104_s1 + $0x2588] ss:$16 sps:$4 sm:$0xff]  }
 0x444   :  { %10523 = vmatprep.subr.bf16.mxu0 %v15352_v51  ;;  %11548 = vmatprep.subr.bf16.mxu1 %v15355_v26  ;;  %v15434_v51 = vld [vmem:[%s21104_s1 + $0x23e0] ss:$16 sps:$4 sm:$0xff]   ;;  %v15437_v26 = vld [vmem:[%s21104_s1 + $0x23e8] ss:$16 sps:$4 sm:$0xff]  }
 0x445   :  { %10553 = vmatprep.mubr.bf16.mxu0 %v1870_v53  ;;  %11578 = vmatprep.mubr.bf16.mxu1 %v1870_v53  ;;  %v15442_v53 = vld [vmem:[%s21104_s1 + $0x2404] ss:$16 sps:$4 sm:$0xff]  }
 0x447   :  { %10524 = vmatpush1.bf16.msra.mxu0 %v15350_v38  ;;  %11549 = vmatpush1.bf16.msra.mxu1 %v15353_v54  ;;  %v15445_v38 = vld [vmem:[%s21104_s1 + $0x240c] ss:$16 sps:$4 sm:$0xff]   ;;  %v1839_v54 = vcombine.high %v19761_v50, %v19761_v50 }
 0x448   :  { %10525 = vmatprep.subr.bf16.mxu0 %v15358_v43  ;;  %11550 = vmatprep.subr.bf16.mxu1 %v15361_v55  ;;  %v1868_v43 = vcombine.high %v19572_v46, %v19572_v46  ;;  %v15440_v55 = vld [vmem:[%s21104_s1 + $0x2400] ss:$16 sps:$4 sm:$0xff]   ;;  %v15451_v46 = vld [vmem:[%s21104_s1 + $0x242c] ss:$16 sps:$4 sm:$0xff]  }
 0x44b   :  { %10526 = vmatpush1.bf16.msra.mxu0 %v15356_v56  ;;  %11551 = vmatpush1.bf16.msra.mxu1 %v15359_v47  ;;  %v15443_v56 = vld [vmem:[%s21104_s1 + $0x2408] ss:$16 sps:$4 sm:$0xff]   ;;  %v15448_v47 = vld [vmem:[%s21104_s1 + $0x2424] ss:$16 sps:$4 sm:$0xff]  }
 0x44c   :  { %10527 = vmatprep.subr.bf16.mxu0 %v15364_v57  ;;  %11552 = vmatprep.subr.bf16.mxu1 %v15367_v58  ;;  %v19792_v57 = vrot.slane %v1839_v54, %v16239_v49  ;;  %v15446_v58 = vld [vmem:[%s21104_s1 + $0x2420] ss:$16 sps:$4 sm:$0xff]   ;;  %v15532_v54 = vld [vmem:[%s21104_s1 + $0x25e4] ss:$16 sps:$4 sm:$0xff]  }
 0x44f   :  { %10528 = vmatpush1.bf16.msra.mxu0 %v15362_v48  ;;  %11553 = vmatpush1.bf16.msra.mxu1 %v15365_v61  ;;  %v15449_v48 = vld [vmem:[%s21104_s1 + $0x2428] ss:$16 sps:$4 sm:$0xff]   ;;  %v15454_v61 = vld [vmem:[%s21104_s1 + $0x2444] ss:$16 sps:$4 sm:$0xff]  }
 0x450   :  { %10529 = vmatprep.subr.bf16.mxu0 %v15370_v62  ;;  %11554 = vmatprep.subr.bf16.mxu1 %v15373_v44  ;;  %v15457_v62 = vld [vmem:[%s21104_s1 + $0x244c] ss:$16 sps:$4 sm:$0xff]   ;;  %v15452_v44 = vld [vmem:[%s21104_s1 + $0x2440] ss:$16 sps:$4 sm:$0xff]  }
 0x453   :  { %10530 = vmatpush1.bf16.msra.mxu0 %v15368_v0  ;;  %11555 = vmatpush1.bf16.msra.mxu1 %v15371_v1  ;;  %v15455_v0 = vld [vmem:[%s21104_s1 + $0x2448] ss:$16 sps:$4 sm:$0xff]   ;;  %v15460_v1 = vld [vmem:[%s21104_s1 + $0x2464] ss:$16 sps:$4 sm:$0xff]  }
 0x454   :  { %10531 = vmatprep.subr.bf16.mxu0 %v15376_v2  ;;  %11556 = vmatprep.subr.bf16.mxu1 %v15379_v59  ;;  %v15463_v2 = vld [vmem:[%s21104_s1 + $0x246c] ss:$16 sps:$4 sm:$0xff]   ;;  %v15458_v59 = vld [vmem:[%s21104_s1 + $0x2460] ss:$16 sps:$4 sm:$0xff]  }
 0x457   :  { %10532 = vmatpush1.bf16.msra.mxu0 %v15374_v3  ;;  %11557 = vmatpush1.bf16.msra.mxu1 %v15377_v5  ;;  %v15461_v3 = vld [vmem:[%s21104_s1 + $0x2468] ss:$16 sps:$4 sm:$0xff]   ;;  %v15466_v5 = vld [vmem:[%s21104_s1 + $0x2484] ss:$16 sps:$4 sm:$0xff]  }
 0x458   :  { %10533 = vmatprep.subr.bf16.mxu0 %v15382_v6  ;;  %11558 = vmatprep.subr.bf16.mxu1 %v15385_v60  ;;  %v15469_v6 = vld [vmem:[%s21104_s1 + $0x248c] ss:$16 sps:$4 sm:$0xff]   ;;  %v15464_v60 = vld [vmem:[%s21104_s1 + $0x2480] ss:$16 sps:$4 sm:$0xff]  }
 0x45b   :  { %10534 = vmatpush1.bf16.msra.mxu0 %v15380_v9  ;;  %11559 = vmatpush1.bf16.msra.mxu1 %v15383_v11  ;;  %v15467_v9 = vld [vmem:[%s21104_s1 + $0x2488] ss:$16 sps:$4 sm:$0xff]   ;;  %v15472_v11 = vld [vmem:[%s21104_s1 + $0x24a4] ss:$16 sps:$4 sm:$0xff]  }
 0x45c   :  { %10535 = vmatprep.subr.bf16.mxu0 %v15388_v63  ;;  %11560 = vmatprep.subr.bf16.mxu1 %v15391_v12  ;;  %v15475_v63 = vld [vmem:[%s21104_s1 + $0x24ac] ss:$16 sps:$4 sm:$0xff]   ;;  %v15470_v12 = vld [vmem:[%s21104_s1 + $0x24a0] ss:$16 sps:$4 sm:$0xff]  }
 0x45f   :  { %10536 = vmatpush1.bf16.msra.mxu0 %v15386_v52  ;;  %11561 = vmatpush1.bf16.msra.mxu1 %v15389_v15  ;;  %v15473_v52 = vld [vmem:[%s21104_s1 + $0x24a8] ss:$16 sps:$4 sm:$0xff]   ;;  %v15478_v15 = vld [vmem:[%s21104_s1 + $0x24c4] ss:$16 sps:$4 sm:$0xff]  }
 0x460   :  { %10537 = vmatprep.subr.bf16.mxu0 %v15394_v7  ;;  %11562 = vmatprep.subr.bf16.mxu1 %v15397_v16  ;;  %v15481_v7 = vld [vmem:[%s21104_s1 + $0x24cc] ss:$16 sps:$4 sm:$0xff]   ;;  %v15476_v16 = vld [vmem:[%s21104_s1 + $0x24c0] ss:$16 sps:$4 sm:$0xff]  }
 0x463   :  { %10538 = vmatpush1.bf16.msra.mxu0 %v15392_v17  ;;  %11563 = vmatpush1.bf16.msra.mxu1 %v15395_v18  ;;  %v15479_v17 = vld [vmem:[%s21104_s1 + $0x24c8] ss:$16 sps:$4 sm:$0xff]   ;;  %v15484_v18 = vld [vmem:[%s21104_s1 + $0x24e4] ss:$16 sps:$4 sm:$0xff]  }
 0x464   :  { %10539 = vmatprep.subr.bf16.mxu0 %v15400_v8  ;;  %11564 = vmatprep.subr.bf16.mxu1 %v15403_v20  ;;  %v15487_v8 = vld [vmem:[%s21104_s1 + $0x24ec] ss:$16 sps:$4 sm:$0xff]   ;;  %v15482_v20 = vld [vmem:[%s21104_s1 + $0x24e0] ss:$16 sps:$4 sm:$0xff]  }
 0x467   :  { %10540 = vmatpush1.bf16.msra.mxu0 %v15398_v23  ;;  %11565 = vmatpush1.bf16.msra.mxu1 %v15401_v4  ;;  %v15485_v23 = vld [vmem:[%s21104_s1 + $0x24e8] ss:$16 sps:$4 sm:$0xff]   ;;  %v15490_v4 = vld [vmem:[%s21104_s1 + $0x2504] ss:$16 sps:$4 sm:$0xff]  }
 0x468   :  { %10541 = vmatprep.subr.bf16.mxu0 %v15406_v13  ;;  %11566 = vmatprep.subr.bf16.mxu1 %v15409_v10  ;;  %v15493_v13 = vld [vmem:[%s21104_s1 + $0x250c] ss:$16 sps:$4 sm:$0xff]   ;;  %v15488_v10 = vld [vmem:[%s21104_s1 + $0x2500] ss:$16 sps:$4 sm:$0xff]  }
 0x46b   :  { %10542 = vmatpush1.bf16.msra.mxu0 %v15404_v27  ;;  %11567 = vmatpush1.bf16.msra.mxu1 %v15407_v28  ;;  %v15491_v27 = vld [vmem:[%s21104_s1 + $0x2508] ss:$16 sps:$4 sm:$0xff]   ;;  %v15496_v28 = vld [vmem:[%s21104_s1 + $0x2524] ss:$16 sps:$4 sm:$0xff]  }
 0x46c   :  { %10543 = vmatprep.subr.bf16.mxu0 %v15412_v29  ;;  %11568 = vmatprep.subr.bf16.mxu1 %v15415_v19  ;;  %v15499_v29 = vld [vmem:[%s21104_s1 + $0x252c] ss:$16 sps:$4 sm:$0xff]   ;;  %v15494_v19 = vld [vmem:[%s21104_s1 + $0x2520] ss:$16 sps:$4 sm:$0xff]  }
 0x46f   :  { %10544 = vmatpush1.bf16.msra.mxu0 %v15410_v30  ;;  %11569 = vmatpush1.bf16.msra.mxu1 %v15413_v31  ;;  %v15497_v30 = vld [vmem:[%s21104_s1 + $0x2528] ss:$16 sps:$4 sm:$0xff]   ;;  %v15502_v31 = vld [vmem:[%s21104_s1 + $0x2544] ss:$16 sps:$4 sm:$0xff]  }
 0x470   :  { %10545 = vmatprep.subr.bf16.mxu0 %v15418_v22  ;;  %11570 = vmatprep.subr.bf16.mxu1 %v15421_v33  ;;  %v15505_v22 = vld [vmem:[%s21104_s1 + $0x254c] ss:$16 sps:$4 sm:$0xff]   ;;  %v15500_v33 = vld [vmem:[%s21104_s1 + $0x2540] ss:$16 sps:$4 sm:$0xff]  }
 0x473   :  { %10546 = vmatpush1.bf16.msra.mxu0 %v15416_v36  ;;  %11571 = vmatpush1.bf16.msra.mxu1 %v15419_v24  ;;  %v15503_v36 = vld [vmem:[%s21104_s1 + $0x2548] ss:$16 sps:$4 sm:$0xff]   ;;  %v15508_v24 = vld [vmem:[%s21104_s1 + $0x2564] ss:$16 sps:$4 sm:$0xff]  }
 0x474   :  { %10547 = vmatprep.subr.bf16.mxu0 %v15424_v37  ;;  %11572 = vmatprep.subr.bf16.mxu1 %v15427_v21  ;;  %v15511_v37 = vld [vmem:[%s21104_s1 + $0x256c] ss:$16 sps:$4 sm:$0xff]   ;;  %v15506_v21 = vld [vmem:[%s21104_s1 + $0x2560] ss:$16 sps:$4 sm:$0xff]  }
 0x477   :  { %10548 = vmatpush1.bf16.msra.mxu0 %v15422_v39  ;;  %11573 = vmatpush1.bf16.msra.mxu1 %v15425_v25  ;;  %v15509_v39 = vld [vmem:[%s21104_s1 + $0x2568] ss:$16 sps:$4 sm:$0xff]   ;;  %v15514_v25 = vld [vmem:[%s21104_s1 + $0x2584] ss:$16 sps:$4 sm:$0xff]  }
 0x478   :  { %10549 = vmatprep.subr.bf16.mxu0 %v15430_v40  ;;  %11574 = vmatprep.subr.bf16.mxu1 %v15433_v41  ;;  %v15517_v40 = vld [vmem:[%s21104_s1 + $0x258c] ss:$16 sps:$4 sm:$0xff]   ;;  %v15512_v41 = vld [vmem:[%s21104_s1 + $0x2580] ss:$16 sps:$4 sm:$0xff]  }
 0x47b   :  { %10550 = vmatpush1.bf16.msra.mxu0 %v15428_v32  ;;  %11575 = vmatpush1.bf16.msra.mxu1 %v15431_v45  ;;  %v15520_v32 = vld [vmem:[%s21104_s1 + $0x25a4] ss:$16 sps:$4 sm:$0xff]   ;;  %v15523_v45 = vld [vmem:[%s21104_s1 + $0x25ac] ss:$16 sps:$4 sm:$0xff]  }
 0x47c   :  { %10551 = vmatprep.subr.bf16.mxu0 %v15436_v35  ;;  %11576 = vmatprep.subr.bf16.mxu1 %v15439_v14  ;;  %v15518_v35 = vld [vmem:[%s21104_s1 + $0x25a0] ss:$16 sps:$4 sm:$0xff]   ;;  %v15521_v14 = vld [vmem:[%s21104_s1 + $0x25a8] ss:$16 sps:$4 sm:$0xff]  }
 0x47f   :  { %10552 = vmatpush1.bf16.msra.mxu0 %v15434_v51  ;;  %11577 = vmatpush1.bf16.msra.mxu1 %v15437_v26  ;;  %v15526_v51 = vld [vmem:[%s21104_s1 + $0x25c4] ss:$16 sps:$4 sm:$0xff]   ;;  %v15529_v26 = vld [vmem:[%s21104_s1 + $0x25cc] ss:$16 sps:$4 sm:$0xff]  }
 0x480   :  { %10562 = vmatprep.subr.bf16.mxu0 %v15442_v53  ;;  %11587 = vmatprep.subr.bf16.mxu1 %v15445_v38  ;;  %v15524_v53 = vld [vmem:[%s21104_s1 + $0x25c0] ss:$16 sps:$4 sm:$0xff]   ;;  %v15527_v38 = vld [vmem:[%s21104_s1 + $0x25c8] ss:$16 sps:$4 sm:$0xff]  }
 0x482   :  { %10554 = vmatmul.mubr.bf16.vlgmr.msra.gmra.mrb[0].mxu0 %v1868_v43  ;;  %11579 = vmatmul.mubr.bf16.vlgmr.msra.gmra.mrb[0].mxu1 %v1868_v43  ;;  %v15535_v43 = vld [vmem:[%s21104_s1 + $0x25ec] ss:$16 sps:$4 sm:$0xff]  }
 0x483   :  { %10563 = vmatpush1.bf16.msra.mxu0 %v15440_v55  ;;  %11588 = vmatpush1.bf16.msra.mxu1 %v15443_v56  ;;  %v15530_v55 = vld [vmem:[%s21104_s1 + $0x25e0] ss:$16 sps:$4 sm:$0xff]   ;;  %v15533_v56 = vld [vmem:[%s21104_s1 + $0x25e8] ss:$16 sps:$4 sm:$0xff]  }
 0x484   :  { %10564 = vmatprep.subr.bf16.mxu0 %v15448_v47  ;;  %11589 = vmatprep.subr.bf16.mxu1 %v15451_v46  ;;  %v15539_v47 = vld [vmem:[%s21104_s1 + $0x2604] ss:$16 sps:$4 sm:$0xff]   ;;  %v15542_v46 = vld [vmem:[%s21104_s1 + $0x260c] ss:$16 sps:$4 sm:$0xff]  }
 0x485   :  { %10594 = vmatprep.mubr.bf16.mxu0 %v19792_v57  ;;  %11619 = vmatprep.mubr.bf16.mxu1 %v19792_v57 }
 0x487   :  { %10565 = vmatpush1.bf16.msra.mxu0 %v15446_v58  ;;  %11590 = vmatpush1.bf16.msra.mxu1 %v15449_v48  ;;  %v19978_v58 = vrot.slane %v19761_v50, %v16239_v49  ;;  %v15537_v48 = vld [vmem:[%s21104_s1 + $0x2600] ss:$16 sps:$4 sm:$0xff]   ;;  %v15548_v50 = vld [vmem:[%s21104_s1 + $0x262c] ss:$16 sps:$4 sm:$0xff]  }
 0x488   :  { %10566 = vmatprep.subr.bf16.mxu0 %v15454_v61  ;;  %11591 = vmatprep.subr.bf16.mxu1 %v15457_v62  ;;  %v15540_v61 = vld [vmem:[%s21104_s1 + $0x2608] ss:$16 sps:$4 sm:$0xff]   ;;  %v15545_v62 = vld [vmem:[%s21104_s1 + $0x2624] ss:$16 sps:$4 sm:$0xff]  }
 0x48b   :  { %10567 = vmatpush1.bf16.msra.mxu0 %v15452_v44  ;;  %11592 = vmatpush1.bf16.msra.mxu1 %v15455_v0  ;;  %v1871_v44 = vcombine.high %v19792_v57, %v19792_v57  ;;  %v15543_v0 = vld [vmem:[%s21104_s1 + $0x2620] ss:$16 sps:$4 sm:$0xff]   ;;  %v15551_v57 = vld [vmem:[%s21104_s1 + $0x2644] ss:$16 sps:$4 sm:$0xff]  }
 0x48c   :  { %10568 = vmatprep.subr.bf16.mxu0 %v15460_v1  ;;  %11593 = vmatprep.subr.bf16.mxu1 %v15463_v2  ;;  %v15546_v1 = vld [vmem:[%s21104_s1 + $0x2628] ss:$16 sps:$4 sm:$0xff]   ;;  %v15554_v2 = vld [vmem:[%s21104_s1 + $0x264c] ss:$16 sps:$4 sm:$0xff]  }
 0x48f   :  { %10569 = vmatpush1.bf16.msra.mxu0 %v15458_v59  ;;  %11594 = vmatpush1.bf16.msra.mxu1 %v15461_v3  ;;  %v15549_v59 = vld [vmem:[%s21104_s1 + $0x2640] ss:$16 sps:$4 sm:$0xff]   ;;  %v15552_v3 = vld [vmem:[%s21104_s1 + $0x2648] ss:$16 sps:$4 sm:$0xff]  }
 0x490   :  { %10570 = vmatprep.subr.bf16.mxu0 %v15466_v5  ;;  %11595 = vmatprep.subr.bf16.mxu1 %v15469_v6  ;;  %v15557_v5 = vld [vmem:[%s21104_s1 + $0x2664] ss:$16 sps:$4 sm:$0xff]   ;;  %v15560_v6 = vld [vmem:[%s21104_s1 + $0x266c] ss:$16 sps:$4 sm:$0xff]  }
 0x493   :  { %10571 = vmatpush1.bf16.msra.mxu0 %v15464_v60  ;;  %11596 = vmatpush1.bf16.msra.mxu1 %v15467_v9  ;;  %v15555_v60 = vld [vmem:[%s21104_s1 + $0x2660] ss:$16 sps:$4 sm:$0xff]   ;;  %v15558_v9 = vld [vmem:[%s21104_s1 + $0x2668] ss:$16 sps:$4 sm:$0xff]  }
 0x494   :  { %10572 = vmatprep.subr.bf16.mxu0 %v15472_v11  ;;  %11597 = vmatprep.subr.bf16.mxu1 %v15475_v63  ;;  %v15563_v11 = vld [vmem:[%s21104_s1 + $0x2684] ss:$16 sps:$4 sm:$0xff]   ;;  %v15566_v63 = vld [vmem:[%s21104_s1 + $0x268c] ss:$16 sps:$4 sm:$0xff]  }
 0x497   :  { %10573 = vmatpush1.bf16.msra.mxu0 %v15470_v12  ;;  %11598 = vmatpush1.bf16.msra.mxu1 %v15473_v52  ;;  %v15561_v12 = vld [vmem:[%s21104_s1 + $0x2680] ss:$16 sps:$4 sm:$0xff]   ;;  %v15564_v52 = vld [vmem:[%s21104_s1 + $0x2688] ss:$16 sps:$4 sm:$0xff]  }
 0x498   :  { %10574 = vmatprep.subr.bf16.mxu0 %v15478_v15  ;;  %11599 = vmatprep.subr.bf16.mxu1 %v15481_v7  ;;  %v15569_v15 = vld [vmem:[%s21104_s1 + $0x26a4] ss:$16 sps:$4 sm:$0xff]   ;;  %v15572_v7 = vld [vmem:[%s21104_s1 + $0x26ac] ss:$16 sps:$4 sm:$0xff]  }
 0x49b   :  { %10575 = vmatpush1.bf16.msra.mxu0 %v15476_v16  ;;  %11600 = vmatpush1.bf16.msra.mxu1 %v15479_v17  ;;  %v15567_v16 = vld [vmem:[%s21104_s1 + $0x26a0] ss:$16 sps:$4 sm:$0xff]   ;;  %v15570_v17 = vld [vmem:[%s21104_s1 + $0x26a8] ss:$16 sps:$4 sm:$0xff]  }
 0x49c   :  { %10576 = vmatprep.subr.bf16.mxu0 %v15484_v18  ;;  %11601 = vmatprep.subr.bf16.mxu1 %v15487_v8  ;;  %v15575_v18 = vld [vmem:[%s21104_s1 + $0x26c4] ss:$16 sps:$4 sm:$0xff]   ;;  %v15578_v8 = vld [vmem:[%s21104_s1 + $0x26cc] ss:$16 sps:$4 sm:$0xff]  }
 0x49f   :  { %10577 = vmatpush1.bf16.msra.mxu0 %v15482_v20  ;;  %11602 = vmatpush1.bf16.msra.mxu1 %v15485_v23  ;;  %v15573_v20 = vld [vmem:[%s21104_s1 + $0x26c0] ss:$16 sps:$4 sm:$0xff]   ;;  %v15576_v23 = vld [vmem:[%s21104_s1 + $0x26c8] ss:$16 sps:$4 sm:$0xff]  }
 0x4a0   :  { %10578 = vmatprep.subr.bf16.mxu0 %v15490_v4  ;;  %11603 = vmatprep.subr.bf16.mxu1 %v15493_v13  ;;  %v15581_v4 = vld [vmem:[%s21104_s1 + $0x26e4] ss:$16 sps:$4 sm:$0xff]   ;;  %v15584_v13 = vld [vmem:[%s21104_s1 + $0x26ec] ss:$16 sps:$4 sm:$0xff]  }
 0x4a3   :  { %10579 = vmatpush1.bf16.msra.mxu0 %v15488_v10  ;;  %11604 = vmatpush1.bf16.msra.mxu1 %v15491_v27  ;;  %v15579_v10 = vld [vmem:[%s21104_s1 + $0x26e0] ss:$16 sps:$4 sm:$0xff]   ;;  %v15582_v27 = vld [vmem:[%s21104_s1 + $0x26e8] ss:$16 sps:$4 sm:$0xff]  }
 0x4a4   :  { %10580 = vmatprep.subr.bf16.mxu0 %v15496_v28  ;;  %11605 = vmatprep.subr.bf16.mxu1 %v15499_v29  ;;  %v15587_v28 = vld [vmem:[%s21104_s1 + $0x2704] ss:$16 sps:$4 sm:$0xff]   ;;  %v15590_v29 = vld [vmem:[%s21104_s1 + $0x270c] ss:$16 sps:$4 sm:$0xff]  }
 0x4a7   :  { %10581 = vmatpush1.bf16.msra.mxu0 %v15494_v19  ;;  %11606 = vmatpush1.bf16.msra.mxu1 %v15497_v30  ;;  %v15585_v19 = vld [vmem:[%s21104_s1 + $0x2700] ss:$16 sps:$4 sm:$0xff]   ;;  %v15588_v30 = vld [vmem:[%s21104_s1 + $0x2708] ss:$16 sps:$4 sm:$0xff]  }
 0x4a8   :  { %10582 = vmatprep.subr.bf16.mxu0 %v15502_v31  ;;  %11607 = vmatprep.subr.bf16.mxu1 %v15505_v22  ;;  %v15593_v31 = vld [vmem:[%s21104_s1 + $0x2724] ss:$16 sps:$4 sm:$0xff]   ;;  %v15596_v22 = vld [vmem:[%s21104_s1 + $0x272c] ss:$16 sps:$4 sm:$0xff]  }
 0x4ab   :  { %10583 = vmatpush1.bf16.msra.mxu0 %v15500_v33  ;;  %11608 = vmatpush1.bf16.msra.mxu1 %v15503_v36  ;;  %v15591_v33 = vld [vmem:[%s21104_s1 + $0x2720] ss:$16 sps:$4 sm:$0xff]   ;;  %v15594_v36 = vld [vmem:[%s21104_s1 + $0x2728] ss:$16 sps:$4 sm:$0xff]  }
 0x4ac   :  { %10584 = vmatprep.subr.bf16.mxu0 %v15508_v24  ;;  %11609 = vmatprep.subr.bf16.mxu1 %v15511_v37  ;;  %v15599_v24 = vld [vmem:[%s21104_s1 + $0x2744] ss:$16 sps:$4 sm:$0xff]   ;;  %v15602_v37 = vld [vmem:[%s21104_s1 + $0x274c] ss:$16 sps:$4 sm:$0xff]  }
 0x4af   :  { %10585 = vmatpush1.bf16.msra.mxu0 %v15506_v21  ;;  %11610 = vmatpush1.bf16.msra.mxu1 %v15509_v39  ;;  %v15597_v21 = vld [vmem:[%s21104_s1 + $0x2740] ss:$16 sps:$4 sm:$0xff]   ;;  %v15600_v39 = vld [vmem:[%s21104_s1 + $0x2748] ss:$16 sps:$4 sm:$0xff]  }
 0x4b0   :  { %10586 = vmatprep.subr.bf16.mxu0 %v15514_v25  ;;  %11611 = vmatprep.subr.bf16.mxu1 %v15517_v40  ;;  %v15605_v25 = vld [vmem:[%s21104_s1 + $0x2764] ss:$16 sps:$4 sm:$0xff]   ;;  %v15608_v40 = vld [vmem:[%s21104_s1 + $0x276c] ss:$16 sps:$4 sm:$0xff]  }
 0x4b3   :  { %10587 = vmatpush1.bf16.msra.mxu0 %v15512_v41  ;;  %11612 = vmatpush1.bf16.msra.mxu1 %v15515_v34  ;;  %v15603_v41 = vld [vmem:[%s21104_s1 + $0x2760] ss:$16 sps:$4 sm:$0xff]   ;;  %v15606_v34 = vld [vmem:[%s21104_s1 + $0x2768] ss:$16 sps:$4 sm:$0xff]  }
 0x4b4   :  { %10588 = vmatprep.subr.bf16.mxu0 %v15520_v32  ;;  %11613 = vmatprep.subr.bf16.mxu1 %v15523_v45  ;;  %v15611_v32 = vld [vmem:[%s21104_s1 + $0x2784] ss:$16 sps:$4 sm:$0xff]   ;;  %v15614_v45 = vld [vmem:[%s21104_s1 + $0x278c] ss:$16 sps:$4 sm:$0xff]  }
 0x4b7   :  { %10589 = vmatpush1.bf16.msra.mxu0 %v15518_v35  ;;  %11614 = vmatpush1.bf16.msra.mxu1 %v15521_v14  ;;  %v15609_v35 = vld [vmem:[%s21104_s1 + $0x2780] ss:$16 sps:$4 sm:$0xff]   ;;  %v15612_v14 = vld [vmem:[%s21104_s1 + $0x2788] ss:$16 sps:$4 sm:$0xff]  }
 0x4b8   :  { %10590 = vmatprep.subr.bf16.mxu0 %v15526_v51  ;;  %11615 = vmatprep.subr.bf16.mxu1 %v15529_v26  ;;  %v15617_v51 = vld [vmem:[%s21104_s1 + $0x27a4] ss:$16 sps:$4 sm:$0xff]   ;;  %v15620_v26 = vld [vmem:[%s21104_s1 + $0x27ac] ss:$16 sps:$4 sm:$0xff]  }
 0x4bb   :  { %10591 = vmatpush1.bf16.msra.mxu0 %v15524_v53  ;;  %11616 = vmatpush1.bf16.msra.mxu1 %v15527_v38  ;;  %v15615_v53 = vld [vmem:[%s21104_s1 + $0x27a0] ss:$16 sps:$4 sm:$0xff]   ;;  %v15618_v38 = vld [vmem:[%s21104_s1 + $0x27a8] ss:$16 sps:$4 sm:$0xff]  }
 0x4bc   :  { %10592 = vmatprep.subr.bf16.mxu0 %v15532_v54  ;;  %11617 = vmatprep.subr.bf16.mxu1 %v15535_v43  ;;  %v15623_v54 = vld [vmem:[%s21104_s1 + $0x27c4] ss:$16 sps:$4 sm:$0xff]   ;;  %v15626_v43 = vld [vmem:[%s21104_s1 + $0x27cc] ss:$16 sps:$4 sm:$0xff]  }
 0x4bf   :  { %10593 = vmatpush1.bf16.msra.mxu0 %v15530_v55  ;;  %11618 = vmatpush1.bf16.msra.mxu1 %v15533_v56  ;;  %v20155_v55 = vld [vmem:[%s21105_s0 + $0x28] sm:$0xff]  ;;  %v15621_v56 = vld [vmem:[%s21104_s1 + $0x27c0] ss:$16 sps:$4 sm:$0xff]  }
 0x4c0   :  { %10603 = vmatprep.subr.bf16.mxu0 %v15539_v47  ;;  %11628 = vmatprep.subr.bf16.mxu1 %v15542_v46  ;;  %v15624_v47 = vld [vmem:[%s21104_s1 + $0x27c8] ss:$16 sps:$4 sm:$0xff]   ;;  %v15629_v46 = vld [vmem:[%s21104_s1 + $0x27e4] ss:$16 sps:$4 sm:$0xff]  }
 0x4c2   :  { %10595 = vmatmul.mubr.bf16.vlgmr.msra.gmra.mrb[0].mxu0 %v19978_v58  ;;  %11620 = vmatmul.mubr.bf16.vlgmr.msra.gmra.mrb[0].mxu1 %v19978_v58 }
 0x4c3   :  { %10604 = vmatpush1.bf16.msra.mxu0 %v15537_v48  ;;  %11629 = vmatpush1.bf16.msra.mxu1 %v15540_v61  ;;  %v15632_v48 = vld [vmem:[%s21104_s1 + $0x27ec] ss:$16 sps:$4 sm:$0xff]   ;;  %v20171_v61 = vrot.slane %v20155_v55, %v16239_v49 }
 0x4c4   :  { %10605 = vmatprep.subr.bf16.mxu0 %v15545_v62  ;;  %11630 = vmatprep.subr.bf16.mxu1 %v15548_v50  ;;  %v15627_v62 = vld [vmem:[%s21104_s1 + $0x27e0] ss:$16 sps:$4 sm:$0xff]   ;;  %v15630_v50 = vld [vmem:[%s21104_s1 + $0x27e8] ss:$16 sps:$4 sm:$0xff]  }
 0x4c5   :  { %10635 = vmatprep.mubr.bf16.mxu0 %v1871_v44  ;;  %11660 = vmatprep.mubr.bf16.mxu1 %v1871_v44  ;;  %v15635_v44 = vld [vmem:[%s21104_s1 + $0x2804] ss:$16 sps:$4 sm:$0xff]  }
 0x4c7   :  { %10606 = vmatpush1.bf16.msra.mxu0 %v15543_v0  ;;  %11631 = vmatpush1.bf16.msra.mxu1 %v15546_v1  ;;  %v15638_v0 = vld [vmem:[%s21104_s1 + $0x280c] ss:$16 sps:$4 sm:$0xff]   ;;  %v1887_v1 = vcombine.high %v20171_v61, %v20171_v61 }
 0x4c8   :  { %10607 = vmatprep.subr.bf16.mxu0 %v15551_v57  ;;  %11632 = vmatprep.subr.bf16.mxu1 %v15554_v2  ;;  %v1869_v57 = vcombine.high %v19978_v58, %v19978_v58  ;;  %v15633_v2 = vld [vmem:[%s21104_s1 + $0x2800] ss:$16 sps:$4 sm:$0xff]   ;;  %v15644_v58 = vld [vmem:[%s21104_s1 + $0x282c] ss:$16 sps:$4 sm:$0xff]  }
 0x4cb   :  { %10608 = vmatpush1.bf16.msra.mxu0 %v15549_v59  ;;  %11633 = vmatpush1.bf16.msra.mxu1 %v15552_v3  ;;  %v15636_v59 = vld [vmem:[%s21104_s1 + $0x2808] ss:$16 sps:$4 sm:$0xff]   ;;  %v15641_v3 = vld [vmem:[%s21104_s1 + $0x2824] ss:$16 sps:$4 sm:$0xff]  }
 0x4cc   :  { %10609 = vmatprep.subr.bf16.mxu0 %v15557_v5  ;;  %11634 = vmatprep.subr.bf16.mxu1 %v15560_v6  ;;  %v20202_v5 = vrot.slane %v1887_v1, %v16239_v49  ;;  %v15639_v6 = vld [vmem:[%s21104_s1 + $0x2820] ss:$16 sps:$4 sm:$0xff]   ;;  %v15720_v1 = vld [vmem:[%s21104_s1 + $0x29c8] ss:$16 sps:$4 sm:$0xff]  }
 0x4cf   :  { %10610 = vmatpush1.bf16.msra.mxu0 %v15555_v60  ;;  %11635 = vmatpush1.bf16.msra.mxu1 %v15558_v9  ;;  %v15642_v60 = vld [vmem:[%s21104_s1 + $0x2828] ss:$16 sps:$4 sm:$0xff]   ;;  %v15647_v9 = vld [vmem:[%s21104_s1 + $0x2844] ss:$16 sps:$4 sm:$0xff]  }
 0x4d0   :  { %10611 = vmatprep.subr.bf16.mxu0 %v15563_v11  ;;  %11636 = vmatprep.subr.bf16.mxu1 %v15566_v63  ;;  %v15650_v11 = vld [vmem:[%s21104_s1 + $0x284c] ss:$16 sps:$4 sm:$0xff]   ;;  %v15645_v63 = vld [vmem:[%s21104_s1 + $0x2840] ss:$16 sps:$4 sm:$0xff]  }
 0x4d3   :  { %10612 = vmatpush1.bf16.msra.mxu0 %v15561_v12  ;;  %11637 = vmatpush1.bf16.msra.mxu1 %v15564_v52  ;;  %v15648_v12 = vld [vmem:[%s21104_s1 + $0x2848] ss:$16 sps:$4 sm:$0xff]   ;;  %v15653_v52 = vld [vmem:[%s21104_s1 + $0x2864] ss:$16 sps:$4 sm:$0xff]  }
 0x4d4   :  { %10613 = vmatprep.subr.bf16.mxu0 %v15569_v15  ;;  %11638 = vmatprep.subr.bf16.mxu1 %v15572_v7  ;;  %v15656_v15 = vld [vmem:[%s21104_s1 + $0x286c] ss:$16 sps:$4 sm:$0xff]   ;;  %v15651_v7 = vld [vmem:[%s21104_s1 + $0x2860] ss:$16 sps:$4 sm:$0xff]  }
 0x4d7   :  { %10614 = vmatpush1.bf16.msra.mxu0 %v15567_v16  ;;  %11639 = vmatpush1.bf16.msra.mxu1 %v15570_v17  ;;  %v15654_v16 = vld [vmem:[%s21104_s1 + $0x2868] ss:$16 sps:$4 sm:$0xff]   ;;  %v15659_v17 = vld [vmem:[%s21104_s1 + $0x2884] ss:$16 sps:$4 sm:$0xff]  }
 0x4d8   :  { %10615 = vmatprep.subr.bf16.mxu0 %v15575_v18  ;;  %11640 = vmatprep.subr.bf16.mxu1 %v15578_v8  ;;  %v15662_v18 = vld [vmem:[%s21104_s1 + $0x288c] ss:$16 sps:$4 sm:$0xff]   ;;  %v15657_v8 = vld [vmem:[%s21104_s1 + $0x2880] ss:$16 sps:$4 sm:$0xff]  }
 0x4db   :  { %10616 = vmatpush1.bf16.msra.mxu0 %v15573_v20  ;;  %11641 = vmatpush1.bf16.msra.mxu1 %v15576_v23  ;;  %v15660_v20 = vld [vmem:[%s21104_s1 + $0x2888] ss:$16 sps:$4 sm:$0xff]   ;;  %v15665_v23 = vld [vmem:[%s21104_s1 + $0x28a4] ss:$16 sps:$4 sm:$0xff]  }
 0x4dc   :  { %10617 = vmatprep.subr.bf16.mxu0 %v15581_v4  ;;  %11642 = vmatprep.subr.bf16.mxu1 %v15584_v13  ;;  %v15668_v4 = vld [vmem:[%s21104_s1 + $0x28ac] ss:$16 sps:$4 sm:$0xff]   ;;  %v15663_v13 = vld [vmem:[%s21104_s1 + $0x28a0] ss:$16 sps:$4 sm:$0xff]  }
 0x4df   :  { %10618 = vmatpush1.bf16.msra.mxu0 %v15579_v10  ;;  %11643 = vmatpush1.bf16.msra.mxu1 %v15582_v27  ;;  %v15666_v10 = vld [vmem:[%s21104_s1 + $0x28a8] ss:$16 sps:$4 sm:$0xff]   ;;  %v15671_v27 = vld [vmem:[%s21104_s1 + $0x28c4] ss:$16 sps:$4 sm:$0xff]  }
 0x4e0   :  { %10619 = vmatprep.subr.bf16.mxu0 %v15587_v28  ;;  %11644 = vmatprep.subr.bf16.mxu1 %v15590_v29  ;;  %v15674_v28 = vld [vmem:[%s21104_s1 + $0x28cc] ss:$16 sps:$4 sm:$0xff]   ;;  %v15669_v29 = vld [vmem:[%s21104_s1 + $0x28c0] ss:$16 sps:$4 sm:$0xff]  }
 0x4e3   :  { %10620 = vmatpush1.bf16.msra.mxu0 %v15585_v19  ;;  %11645 = vmatpush1.bf16.msra.mxu1 %v15588_v30  ;;  %v15672_v19 = vld [vmem:[%s21104_s1 + $0x28c8] ss:$16 sps:$4 sm:$0xff]   ;;  %v15677_v30 = vld [vmem:[%s21104_s1 + $0x28e4] ss:$16 sps:$4 sm:$0xff]  }
 0x4e4   :  { %10621 = vmatprep.subr.bf16.mxu0 %v15593_v31  ;;  %11646 = vmatprep.subr.bf16.mxu1 %v15596_v22  ;;  %v15680_v31 = vld [vmem:[%s21104_s1 + $0x28ec] ss:$16 sps:$4 sm:$0xff]   ;;  %v15675_v22 = vld [vmem:[%s21104_s1 + $0x28e0] ss:$16 sps:$4 sm:$0xff]  }
 0x4e7   :  { %10622 = vmatpush1.bf16.msra.mxu0 %v15591_v33  ;;  %11647 = vmatpush1.bf16.msra.mxu1 %v15594_v36  ;;  %v15678_v33 = vld [vmem:[%s21104_s1 + $0x28e8] ss:$16 sps:$4 sm:$0xff]   ;;  %v15683_v36 = vld [vmem:[%s21104_s1 + $0x2904] ss:$16 sps:$4 sm:$0xff]  }
 0x4e8   :  { %10623 = vmatprep.subr.bf16.mxu0 %v15599_v24  ;;  %11648 = vmatprep.subr.bf16.mxu1 %v15602_v37  ;;  %v15686_v24 = vld [vmem:[%s21104_s1 + $0x290c] ss:$16 sps:$4 sm:$0xff]   ;;  %v15681_v37 = vld [vmem:[%s21104_s1 + $0x2900] ss:$16 sps:$4 sm:$0xff]  }
 0x4eb   :  { %10624 = vmatpush1.bf16.msra.mxu0 %v15597_v21  ;;  %11649 = vmatpush1.bf16.msra.mxu1 %v15600_v39  ;;  %v15684_v21 = vld [vmem:[%s21104_s1 + $0x2908] ss:$16 sps:$4 sm:$0xff]   ;;  %v15689_v39 = vld [vmem:[%s21104_s1 + $0x2924] ss:$16 sps:$4 sm:$0xff]  }
 0x4ec   :  { %10625 = vmatprep.subr.bf16.mxu0 %v15605_v25  ;;  %11650 = vmatprep.subr.bf16.mxu1 %v15608_v40  ;;  %v15692_v25 = vld [vmem:[%s21104_s1 + $0x292c] ss:$16 sps:$4 sm:$0xff]   ;;  %v15687_v40 = vld [vmem:[%s21104_s1 + $0x2920] ss:$16 sps:$4 sm:$0xff]  }
 0x4ef   :  { %10626 = vmatpush1.bf16.msra.mxu0 %v15603_v41  ;;  %11651 = vmatpush1.bf16.msra.mxu1 %v15606_v34  ;;  %v15690_v41 = vld [vmem:[%s21104_s1 + $0x2928] ss:$16 sps:$4 sm:$0xff]   ;;  %v15695_v34 = vld [vmem:[%s21104_s1 + $0x2944] ss:$16 sps:$4 sm:$0xff]  }
 0x4f0   :  { %10627 = vmatprep.subr.bf16.mxu0 %v15611_v32  ;;  %11652 = vmatprep.subr.bf16.mxu1 %v15614_v45  ;;  %v15698_v32 = vld [vmem:[%s21104_s1 + $0x294c] ss:$16 sps:$4 sm:$0xff]   ;;  %v15693_v45 = vld [vmem:[%s21104_s1 + $0x2940] ss:$16 sps:$4 sm:$0xff]  }
 0x4f3   :  { %10628 = vmatpush1.bf16.msra.mxu0 %v15609_v35  ;;  %11653 = vmatpush1.bf16.msra.mxu1 %v15612_v14  ;;  %v15696_v35 = vld [vmem:[%s21104_s1 + $0x2948] ss:$16 sps:$4 sm:$0xff]   ;;  %v15701_v14 = vld [vmem:[%s21104_s1 + $0x2964] ss:$16 sps:$4 sm:$0xff]  }
 0x4f4   :  { %10629 = vmatprep.subr.bf16.mxu0 %v15617_v51  ;;  %11654 = vmatprep.subr.bf16.mxu1 %v15620_v26  ;;  %v15704_v51 = vld [vmem:[%s21104_s1 + $0x296c] ss:$16 sps:$4 sm:$0xff]   ;;  %v15699_v26 = vld [vmem:[%s21104_s1 + $0x2960] ss:$16 sps:$4 sm:$0xff]  }
 0x4f7   :  { %10630 = vmatpush1.bf16.msra.mxu0 %v15615_v53  ;;  %11655 = vmatpush1.bf16.msra.mxu1 %v15618_v38  ;;  %v15702_v53 = vld [vmem:[%s21104_s1 + $0x2968] ss:$16 sps:$4 sm:$0xff]   ;;  %v15707_v38 = vld [vmem:[%s21104_s1 + $0x2984] ss:$16 sps:$4 sm:$0xff]  }
 0x4f8   :  { %10631 = vmatprep.subr.bf16.mxu0 %v15623_v54  ;;  %11656 = vmatprep.subr.bf16.mxu1 %v15626_v43  ;;  %v15710_v54 = vld [vmem:[%s21104_s1 + $0x298c] ss:$16 sps:$4 sm:$0xff]   ;;  %v15705_v43 = vld [vmem:[%s21104_s1 + $0x2980] ss:$16 sps:$4 sm:$0xff]  }
 0x4fb   :  { %10632 = vmatpush1.bf16.msra.mxu0 %v15621_v56  ;;  %11657 = vmatpush1.bf16.msra.mxu1 %v15624_v47  ;;  %v15708_v56 = vld [vmem:[%s21104_s1 + $0x2988] ss:$16 sps:$4 sm:$0xff]   ;;  %v15713_v47 = vld [vmem:[%s21104_s1 + $0x29a4] ss:$16 sps:$4 sm:$0xff]  }
 0x4fc   :  { %10633 = vmatprep.subr.bf16.mxu0 %v15629_v46  ;;  %11658 = vmatprep.subr.bf16.mxu1 %v15632_v48  ;;  %v15716_v46 = vld [vmem:[%s21104_s1 + $0x29ac] ss:$16 sps:$4 sm:$0xff]   ;;  %v15711_v48 = vld [vmem:[%s21104_s1 + $0x29a0] ss:$16 sps:$4 sm:$0xff]  }
 0x4ff   :  { %10634 = vmatpush1.bf16.msra.mxu0 %v15627_v62  ;;  %11659 = vmatpush1.bf16.msra.mxu1 %v15630_v50  ;;  %v15714_v62 = vld [vmem:[%s21104_s1 + $0x29a8] ss:$16 sps:$4 sm:$0xff]   ;;  %v15719_v50 = vld [vmem:[%s21104_s1 + $0x29c4] ss:$16 sps:$4 sm:$0xff]  }
 0x500   :  { %10644 = vmatprep.subr.bf16.mxu0 %v15635_v44  ;;  %11669 = vmatprep.subr.bf16.mxu1 %v15638_v0  ;;  %v15722_v44 = vld [vmem:[%s21104_s1 + $0x29cc] ss:$16 sps:$4 sm:$0xff]   ;;  %v15717_v0 = vld [vmem:[%s21104_s1 + $0x29c0] ss:$16 sps:$4 sm:$0xff]  }
 0x502   :  { %10636 = vmatmul.mubr.bf16.vlgmr.msra.gmra.mrb[0].mxu0 %v1869_v57  ;;  %11661 = vmatmul.mubr.bf16.vlgmr.msra.gmra.mrb[0].mxu1 %v1869_v57  ;;  %v15725_v57 = vld [vmem:[%s21104_s1 + $0x29e4] ss:$16 sps:$4 sm:$0xff]  }
 0x503   :  { %10645 = vmatpush1.bf16.msra.mxu0 %v15633_v2  ;;  %11670 = vmatpush1.bf16.msra.mxu1 %v15636_v59  ;;  %v15728_v2 = vld [vmem:[%s21104_s1 + $0x29ec] ss:$16 sps:$4 sm:$0xff]   ;;  %v15723_v59 = vld [vmem:[%s21104_s1 + $0x29e0] ss:$16 sps:$4 sm:$0xff]  }
 0x504   :  { %10646 = vmatprep.subr.bf16.mxu0 %v15641_v3  ;;  %11671 = vmatprep.subr.bf16.mxu1 %v15644_v58  ;;  %v15726_v3 = vld [vmem:[%s21104_s1 + $0x29e8] ss:$16 sps:$4 sm:$0xff]   ;;  %v15731_v58 = vld [vmem:[%s21104_s1 + $0x2a04] ss:$16 sps:$4 sm:$0xff]  }
 0x505   :  { %10676 = vmatprep.mubr.bf16.mxu0 %v20202_v5  ;;  %11701 = vmatprep.mubr.bf16.mxu1 %v20202_v5 }
 0x507   :  { %10647 = vmatpush1.bf16.msra.mxu0 %v15639_v6  ;;  %11672 = vmatpush1.bf16.msra.mxu1 %v15642_v60  ;;  %v15734_v6 = vld [vmem:[%s21104_s1 + $0x2a0c] ss:$16 sps:$4 sm:$0xff]   ;;  %v20388_v60 = vrot.slane %v20171_v61, %v16239_v49 }
 0x508   :  { %10648 = vmatprep.subr.bf16.mxu0 %v15647_v9  ;;  %11673 = vmatprep.subr.bf16.mxu1 %v15650_v11  ;;  %v15729_v9 = vld [vmem:[%s21104_s1 + $0x2a00] ss:$16 sps:$4 sm:$0xff]   ;;  %v15732_v11 = vld [vmem:[%s21104_s1 + $0x2a08] ss:$16 sps:$4 sm:$0xff]   ;;  %v15740_v61 = vld [vmem:[%s21104_s1 + $0x2a2c] ss:$16 sps:$4 sm:$0xff]  }
 0x50b   :  { %10649 = vmatpush1.bf16.msra.mxu0 %v15645_v63  ;;  %11674 = vmatpush1.bf16.msra.mxu1 %v15648_v12  ;;  %v15737_v63 = vld [vmem:[%s21104_s1 + $0x2a24] ss:$16 sps:$4 sm:$0xff]   ;;  %v1919_v12 = vcombine.high %v20202_v5, %v20202_v5 }
 0x50c   :  { %10650 = vmatprep.subr.bf16.mxu0 %v15653_v52  ;;  %11675 = vmatprep.subr.bf16.mxu1 %v15656_v15  ;;  %v15735_v52 = vld [vmem:[%s21104_s1 + $0x2a20] ss:$16 sps:$4 sm:$0xff]   ;;  %v15738_v15 = vld [vmem:[%s21104_s1 + $0x2a28] ss:$16 sps:$4 sm:$0xff]   ;;  %v15743_v5 = vld [vmem:[%s21104_s1 + $0x2a44] ss:$16 sps:$4 sm:$0xff]  }
 0x50f   :  { %10651 = vmatpush1.bf16.msra.mxu0 %v15651_v7  ;;  %11676 = vmatpush1.bf16.msra.mxu1 %v15654_v16  ;;  %v15746_v7 = vld [vmem:[%s21104_s1 + $0x2a4c] ss:$16 sps:$4 sm:$0xff]   ;;  %v15741_v16 = vld [vmem:[%s21104_s1 + $0x2a40] ss:$16 sps:$4 sm:$0xff]  }
 0x510   :  { %10652 = vmatprep.subr.bf16.mxu0 %v15659_v17  ;;  %11677 = vmatprep.subr.bf16.mxu1 %v15662_v18  ;;  %v15744_v17 = vld [vmem:[%s21104_s1 + $0x2a48] ss:$16 sps:$4 sm:$0xff]   ;;  %v15749_v18 = vld [vmem:[%s21104_s1 + $0x2a64] ss:$16 sps:$4 sm:$0xff]  }
 0x513   :  { %10653 = vmatpush1.bf16.msra.mxu0 %v15657_v8  ;;  %11678 = vmatpush1.bf16.msra.mxu1 %v15660_v20  ;;  %v15752_v8 = vld [vmem:[%s21104_s1 + $0x2a6c] ss:$16 sps:$4 sm:$0xff]   ;;  %v15747_v20 = vld [vmem:[%s21104_s1 + $0x2a60] ss:$16 sps:$4 sm:$0xff]  }
 0x514   :  { %10654 = vmatprep.subr.bf16.mxu0 %v15665_v23  ;;  %11679 = vmatprep.subr.bf16.mxu1 %v15668_v4  ;;  %v15750_v23 = vld [vmem:[%s21104_s1 + $0x2a68] ss:$16 sps:$4 sm:$0xff]   ;;  %v15755_v4 = vld [vmem:[%s21104_s1 + $0x2a84] ss:$16 sps:$4 sm:$0xff]  }
 0x517   :  { %10655 = vmatpush1.bf16.msra.mxu0 %v15663_v13  ;;  %11680 = vmatpush1.bf16.msra.mxu1 %v15666_v10  ;;  %v15758_v13 = vld [vmem:[%s21104_s1 + $0x2a8c] ss:$16 sps:$4 sm:$0xff]   ;;  %v15753_v10 = vld [vmem:[%s21104_s1 + $0x2a80] ss:$16 sps:$4 sm:$0xff]  }
 0x518   :  { %10656 = vmatprep.subr.bf16.mxu0 %v15671_v27  ;;  %11681 = vmatprep.subr.bf16.mxu1 %v15674_v28  ;;  %v15756_v27 = vld [vmem:[%s21104_s1 + $0x2a88] ss:$16 sps:$4 sm:$0xff]   ;;  %v15761_v28 = vld [vmem:[%s21104_s1 + $0x2aa4] ss:$16 sps:$4 sm:$0xff]  }
 0x51b   :  { %10657 = vmatpush1.bf16.msra.mxu0 %v15669_v29  ;;  %11682 = vmatpush1.bf16.msra.mxu1 %v15672_v19  ;;  %v15764_v29 = vld [vmem:[%s21104_s1 + $0x2aac] ss:$16 sps:$4 sm:$0xff]   ;;  %v15759_v19 = vld [vmem:[%s21104_s1 + $0x2aa0] ss:$16 sps:$4 sm:$0xff]  }
 0x51c   :  { %10658 = vmatprep.subr.bf16.mxu0 %v15677_v30  ;;  %11683 = vmatprep.subr.bf16.mxu1 %v15680_v31  ;;  %v15762_v30 = vld [vmem:[%s21104_s1 + $0x2aa8] ss:$16 sps:$4 sm:$0xff]   ;;  %v15767_v31 = vld [vmem:[%s21104_s1 + $0x2ac4] ss:$16 sps:$4 sm:$0xff]  }
 0x51f   :  { %10659 = vmatpush1.bf16.msra.mxu0 %v15675_v22  ;;  %11684 = vmatpush1.bf16.msra.mxu1 %v15678_v33  ;;  %v15770_v22 = vld [vmem:[%s21104_s1 + $0x2acc] ss:$16 sps:$4 sm:$0xff]   ;;  %v15765_v33 = vld [vmem:[%s21104_s1 + $0x2ac0] ss:$16 sps:$4 sm:$0xff]  }
 0x520   :  { %10660 = vmatprep.subr.bf16.mxu0 %v15683_v36  ;;  %11685 = vmatprep.subr.bf16.mxu1 %v15686_v24  ;;  %v15768_v36 = vld [vmem:[%s21104_s1 + $0x2ac8] ss:$16 sps:$4 sm:$0xff]   ;;  %v15773_v24 = vld [vmem:[%s21104_s1 + $0x2ae4] ss:$16 sps:$4 sm:$0xff]  }
 0x523   :  { %10661 = vmatpush1.bf16.msra.mxu0 %v15681_v37  ;;  %11686 = vmatpush1.bf16.msra.mxu1 %v15684_v21  ;;  %v15776_v37 = vld [vmem:[%s21104_s1 + $0x2aec] ss:$16 sps:$4 sm:$0xff]   ;;  %v15771_v21 = vld [vmem:[%s21104_s1 + $0x2ae0] ss:$16 sps:$4 sm:$0xff]  }
 0x524   :  { %10662 = vmatprep.subr.bf16.mxu0 %v15689_v39  ;;  %11687 = vmatprep.subr.bf16.mxu1 %v15692_v25  ;;  %v15774_v39 = vld [vmem:[%s21104_s1 + $0x2ae8] ss:$16 sps:$4 sm:$0xff]   ;;  %v15779_v25 = vld [vmem:[%s21104_s1 + $0x2b04] ss:$16 sps:$4 sm:$0xff]  }
 0x527   :  { %10663 = vmatpush1.bf16.msra.mxu0 %v15687_v40  ;;  %11688 = vmatpush1.bf16.msra.mxu1 %v15690_v41  ;;  %v15782_v40 = vld [vmem:[%s21104_s1 + $0x2b0c] ss:$16 sps:$4 sm:$0xff]   ;;  %v15777_v41 = vld [vmem:[%s21104_s1 + $0x2b00] ss:$16 sps:$4 sm:$0xff]  }
 0x528   :  { %10664 = vmatprep.subr.bf16.mxu0 %v15695_v34  ;;  %11689 = vmatprep.subr.bf16.mxu1 %v15698_v32  ;;  %v15780_v34 = vld [vmem:[%s21104_s1 + $0x2b08] ss:$16 sps:$4 sm:$0xff]   ;;  %v15785_v32 = vld [vmem:[%s21104_s1 + $0x2b24] ss:$16 sps:$4 sm:$0xff]  }
 0x52b   :  { %10665 = vmatpush1.bf16.msra.mxu0 %v15693_v45  ;;  %11690 = vmatpush1.bf16.msra.mxu1 %v15696_v35  ;;  %v15788_v45 = vld [vmem:[%s21104_s1 + $0x2b2c] ss:$16 sps:$4 sm:$0xff]   ;;  %v15783_v35 = vld [vmem:[%s21104_s1 + $0x2b20] ss:$16 sps:$4 sm:$0xff]  }
 0x52c   :  { %10666 = vmatprep.subr.bf16.mxu0 %v15701_v14  ;;  %11691 = vmatprep.subr.bf16.mxu1 %v15704_v51  ;;  %v15786_v14 = vld [vmem:[%s21104_s1 + $0x2b28] ss:$16 sps:$4 sm:$0xff]   ;;  %v15791_v51 = vld [vmem:[%s21104_s1 + $0x2b44] ss:$16 sps:$4 sm:$0xff]  }
 0x52f   :  { %10667 = vmatpush1.bf16.msra.mxu0 %v15699_v26  ;;  %11692 = vmatpush1.bf16.msra.mxu1 %v15702_v53  ;;  %v15794_v26 = vld [vmem:[%s21104_s1 + $0x2b4c] ss:$16 sps:$4 sm:$0xff]   ;;  %v15789_v53 = vld [vmem:[%s21104_s1 + $0x2b40] ss:$16 sps:$4 sm:$0xff]  }
 0x530   :  { %10668 = vmatprep.subr.bf16.mxu0 %v15707_v38  ;;  %11693 = vmatprep.subr.bf16.mxu1 %v15710_v54  ;;  %v15792_v38 = vld [vmem:[%s21104_s1 + $0x2b48] ss:$16 sps:$4 sm:$0xff]   ;;  %v15797_v54 = vld [vmem:[%s21104_s1 + $0x2b64] ss:$16 sps:$4 sm:$0xff]  }
 0x533   :  { %10669 = vmatpush1.bf16.msra.mxu0 %v15705_v43  ;;  %11694 = vmatpush1.bf16.msra.mxu1 %v15708_v56  ;;  %v15800_v43 = vld [vmem:[%s21104_s1 + $0x2b6c] ss:$16 sps:$4 sm:$0xff]   ;;  %v15795_v56 = vld [vmem:[%s21104_s1 + $0x2b60] ss:$16 sps:$4 sm:$0xff]  }
 0x534   :  { %10670 = vmatprep.subr.bf16.mxu0 %v15713_v47  ;;  %11695 = vmatprep.subr.bf16.mxu1 %v15716_v46  ;;  %v15798_v47 = vld [vmem:[%s21104_s1 + $0x2b68] ss:$16 sps:$4 sm:$0xff]   ;;  %v15803_v46 = vld [vmem:[%s21104_s1 + $0x2b84] ss:$16 sps:$4 sm:$0xff]  }
 0x537   :  { %10671 = vmatpush1.bf16.msra.mxu0 %v15711_v48  ;;  %11696 = vmatpush1.bf16.msra.mxu1 %v15714_v62  ;;  %v15806_v48 = vld [vmem:[%s21104_s1 + $0x2b8c] ss:$16 sps:$4 sm:$0xff]   ;;  %v15801_v62 = vld [vmem:[%s21104_s1 + $0x2b80] ss:$16 sps:$4 sm:$0xff]  }
 0x538   :  { %10672 = vmatprep.subr.bf16.mxu0 %v15719_v50  ;;  %11697 = vmatprep.subr.bf16.mxu1 %v15722_v44  ;;  %v15804_v50 = vld [vmem:[%s21104_s1 + $0x2b88] ss:$16 sps:$4 sm:$0xff]   ;;  %v15809_v44 = vld [vmem:[%s21104_s1 + $0x2ba4] ss:$16 sps:$4 sm:$0xff]  }
 0x53b   :  { %10673 = vmatpush1.bf16.msra.mxu0 %v15717_v0  ;;  %11698 = vmatpush1.bf16.msra.mxu1 %v15720_v1  ;;  %v15812_v0 = vld [vmem:[%s21104_s1 + $0x2bac] ss:$16 sps:$4 sm:$0xff]   ;;  %v15807_v1 = vld [vmem:[%s21104_s1 + $0x2ba0] ss:$16 sps:$4 sm:$0xff]  }
 0x53c   :  { %10674 = vmatprep.subr.bf16.mxu0 %v15725_v57  ;;  %11699 = vmatprep.subr.bf16.mxu1 %v15728_v2  ;;  %v15810_v57 = vld [vmem:[%s21104_s1 + $0x2ba8] ss:$16 sps:$4 sm:$0xff]   ;;  %v15815_v2 = vld [vmem:[%s21104_s1 + $0x2bc4] ss:$16 sps:$4 sm:$0xff]  }
 0x53f   :  { %10675 = vmatpush1.bf16.msra.mxu0 %v15723_v59  ;;  %11700 = vmatpush1.bf16.msra.mxu1 %v15726_v3  ;;  %v15818_v59 = vld [vmem:[%s21104_s1 + $0x2bcc] ss:$16 sps:$4 sm:$0xff]   ;;  %v1872_v3 = vcombine.high %v20155_v55, %v20155_v55 }
 0x540   :  { %10685 = vmatprep.subr.bf16.mxu0 %v15731_v58  ;;  %11710 = vmatprep.subr.bf16.mxu1 %v15734_v6  ;;  %v15813_v58 = vld [vmem:[%s21104_s1 + $0x2bc0] ss:$16 sps:$4 sm:$0xff]   ;;  %v15816_v6 = vld [vmem:[%s21104_s1 + $0x2bc8] ss:$16 sps:$4 sm:$0xff]   ;;  %v15824_v55 = vld [vmem:[%s21104_s1 + $0x2bec] ss:$16 sps:$4 sm:$0xff]  }
 0x542   :  { %10677 = vmatmul.mubr.bf16.vlgmr.msra.gmra.mrb[0].mxu0 %v20388_v60  ;;  %11702 = vmatmul.mubr.bf16.vlgmr.msra.gmra.mrb[0].mxu1 %v20388_v60 }
 0x543   :  { %10686 = vmatpush1.bf16.msra.mxu0 %v15729_v9  ;;  %11711 = vmatpush1.bf16.msra.mxu1 %v15732_v11  ;;  %v15821_v9 = vld [vmem:[%s21104_s1 + $0x2be4] ss:$16 sps:$4 sm:$0xff]   ;;  %v20577_v11 = vrot.slane %v1872_v3, %v16239_v49  ;;  %v15900_v3 = vld [vmem:[%s21104_s1 + $0x2d88] ss:$16 sps:$4 sm:$0xff]  }
 0x544   :  { %10687 = vmatprep.subr.bf16.mxu0 %v15737_v63  ;;  %11712 = vmatprep.subr.bf16.mxu1 %v15740_v61  ;;  %v15819_v63 = vld [vmem:[%s21104_s1 + $0x2be0] ss:$16 sps:$4 sm:$0xff]   ;;  %v15822_v61 = vld [vmem:[%s21104_s1 + $0x2be8] ss:$16 sps:$4 sm:$0xff]  }
 0x545   :  { %10717 = vmatprep.mubr.bf16.mxu0 %v1919_v12  ;;  %11742 = vmatprep.mubr.bf16.mxu1 %v1919_v12  ;;  %v15827_v12 = vld [vmem:[%s21104_s1 + $0x2c04] ss:$16 sps:$4 sm:$0xff]  }
 0x547   :  { %10688 = vmatpush1.bf16.msra.mxu0 %v15735_v52  ;;  %11713 = vmatpush1.bf16.msra.mxu1 %v15738_v15  ;;  %v15830_v52 = vld [vmem:[%s21104_s1 + $0x2c0c] ss:$16 sps:$4 sm:$0xff]   ;;  %v1888_v15 = vcombine.high %v20577_v11, %v20577_v11 }
 0x548   :  { %10689 = vmatprep.subr.bf16.mxu0 %v15743_v5  ;;  %11714 = vmatprep.subr.bf16.mxu1 %v15746_v7  ;;  %v1917_v5 = vcombine.high %v20388_v60, %v20388_v60  ;;  %v15825_v7 = vld [vmem:[%s21104_s1 + $0x2c00] ss:$16 sps:$4 sm:$0xff]   ;;  %v15836_v60 = vld [vmem:[%s21104_s1 + $0x2c2c] ss:$16 sps:$4 sm:$0xff]  }
 0x54b   :  { %10690 = vmatpush1.bf16.msra.mxu0 %v15741_v16  ;;  %11715 = vmatpush1.bf16.msra.mxu1 %v15744_v17  ;;  %v15828_v16 = vld [vmem:[%s21104_s1 + $0x2c08] ss:$16 sps:$4 sm:$0xff]   ;;  %v15833_v17 = vld [vmem:[%s21104_s1 + $0x2c24] ss:$16 sps:$4 sm:$0xff]  }
 0x54c   :  { %10691 = vmatprep.subr.bf16.mxu0 %v15749_v18  ;;  %11716 = vmatprep.subr.bf16.mxu1 %v15752_v8  ;;  %v20608_v18 = vrot.slane %v1888_v15, %v16239_v49  ;;  %v15831_v8 = vld [vmem:[%s21104_s1 + $0x2c20] ss:$16 sps:$4 sm:$0xff]   ;;  %v15917_v15 = vld [vmem:[%s21104_s1 + $0x2de4] ss:$16 sps:$4 sm:$0xff]  }
 0x54f   :  { %10692 = vmatpush1.bf16.msra.mxu0 %v15747_v20  ;;  %11717 = vmatpush1.bf16.msra.mxu1 %v15750_v23  ;;  %v15834_v20 = vld [vmem:[%s21104_s1 + $0x2c28] ss:$16 sps:$4 sm:$0xff]   ;;  %v15839_v23 = vld [vmem:[%s21104_s1 + $0x2c44] ss:$16 sps:$4 sm:$0xff]  }
 0x550   :  { %10693 = vmatprep.subr.bf16.mxu0 %v15755_v4  ;;  %11718 = vmatprep.subr.bf16.mxu1 %v15758_v13  ;;  %v15842_v4 = vld [vmem:[%s21104_s1 + $0x2c4c] ss:$16 sps:$4 sm:$0xff]   ;;  %v15837_v13 = vld [vmem:[%s21104_s1 + $0x2c40] ss:$16 sps:$4 sm:$0xff]  }
 0x553   :  { %10694 = vmatpush1.bf16.msra.mxu0 %v15753_v10  ;;  %11719 = vmatpush1.bf16.msra.mxu1 %v15756_v27  ;;  %v15840_v10 = vld [vmem:[%s21104_s1 + $0x2c48] ss:$16 sps:$4 sm:$0xff]   ;;  %v15845_v27 = vld [vmem:[%s21104_s1 + $0x2c64] ss:$16 sps:$4 sm:$0xff]  }
 0x554   :  { %10695 = vmatprep.subr.bf16.mxu0 %v15761_v28  ;;  %11720 = vmatprep.subr.bf16.mxu1 %v15764_v29  ;;  %v15848_v28 = vld [vmem:[%s21104_s1 + $0x2c6c] ss:$16 sps:$4 sm:$0xff]   ;;  %v15843_v29 = vld [vmem:[%s21104_s1 + $0x2c60] ss:$16 sps:$4 sm:$0xff]  }
 0x557   :  { %10696 = vmatpush1.bf16.msra.mxu0 %v15759_v19  ;;  %11721 = vmatpush1.bf16.msra.mxu1 %v15762_v30  ;;  %v15846_v19 = vld [vmem:[%s21104_s1 + $0x2c68] ss:$16 sps:$4 sm:$0xff]   ;;  %v15851_v30 = vld [vmem:[%s21104_s1 + $0x2c84] ss:$16 sps:$4 sm:$0xff]  }
 0x558   :  { %10697 = vmatprep.subr.bf16.mxu0 %v15767_v31  ;;  %11722 = vmatprep.subr.bf16.mxu1 %v15770_v22  ;;  %v15854_v31 = vld [vmem:[%s21104_s1 + $0x2c8c] ss:$16 sps:$4 sm:$0xff]   ;;  %v15849_v22 = vld [vmem:[%s21104_s1 + $0x2c80] ss:$16 sps:$4 sm:$0xff]  }
 0x55b   :  { %10698 = vmatpush1.bf16.msra.mxu0 %v15765_v33  ;;  %11723 = vmatpush1.bf16.msra.mxu1 %v15768_v36  ;;  %v15852_v33 = vld [vmem:[%s21104_s1 + $0x2c88] ss:$16 sps:$4 sm:$0xff]   ;;  %v15857_v36 = vld [vmem:[%s21104_s1 + $0x2ca4] ss:$16 sps:$4 sm:$0xff]  }
 0x55c   :  { %10699 = vmatprep.subr.bf16.mxu0 %v15773_v24  ;;  %11724 = vmatprep.subr.bf16.mxu1 %v15776_v37  ;;  %v15860_v24 = vld [vmem:[%s21104_s1 + $0x2cac] ss:$16 sps:$4 sm:$0xff]   ;;  %v15855_v37 = vld [vmem:[%s21104_s1 + $0x2ca0] ss:$16 sps:$4 sm:$0xff]  }
 0x55f   :  { %10700 = vmatpush1.bf16.msra.mxu0 %v15771_v21  ;;  %11725 = vmatpush1.bf16.msra.mxu1 %v15774_v39  ;;  %v15858_v21 = vld [vmem:[%s21104_s1 + $0x2ca8] ss:$16 sps:$4 sm:$0xff]   ;;  %v15863_v39 = vld [vmem:[%s21104_s1 + $0x2cc4] ss:$16 sps:$4 sm:$0xff]  }
 0x560   :  { %10701 = vmatprep.subr.bf16.mxu0 %v15779_v25  ;;  %11726 = vmatprep.subr.bf16.mxu1 %v15782_v40  ;;  %v15866_v25 = vld [vmem:[%s21104_s1 + $0x2ccc] ss:$16 sps:$4 sm:$0xff]   ;;  %v15861_v40 = vld [vmem:[%s21104_s1 + $0x2cc0] ss:$16 sps:$4 sm:$0xff]  }
 0x563   :  { %10702 = vmatpush1.bf16.msra.mxu0 %v15777_v41  ;;  %11727 = vmatpush1.bf16.msra.mxu1 %v15780_v34  ;;  %v15864_v41 = vld [vmem:[%s21104_s1 + $0x2cc8] ss:$16 sps:$4 sm:$0xff]   ;;  %v15869_v34 = vld [vmem:[%s21104_s1 + $0x2ce4] ss:$16 sps:$4 sm:$0xff]  }
 0x564   :  { %10703 = vmatprep.subr.bf16.mxu0 %v15785_v32  ;;  %11728 = vmatprep.subr.bf16.mxu1 %v15788_v45  ;;  %v15872_v32 = vld [vmem:[%s21104_s1 + $0x2cec] ss:$16 sps:$4 sm:$0xff]   ;;  %v15867_v45 = vld [vmem:[%s21104_s1 + $0x2ce0] ss:$16 sps:$4 sm:$0xff]  }
 0x567   :  { %10704 = vmatpush1.bf16.msra.mxu0 %v15783_v35  ;;  %11729 = vmatpush1.bf16.msra.mxu1 %v15786_v14  ;;  %v15870_v35 = vld [vmem:[%s21104_s1 + $0x2ce8] ss:$16 sps:$4 sm:$0xff]   ;;  %v15875_v14 = vld [vmem:[%s21104_s1 + $0x2d04] ss:$16 sps:$4 sm:$0xff]  }
 0x568   :  { %10705 = vmatprep.subr.bf16.mxu0 %v15791_v51  ;;  %11730 = vmatprep.subr.bf16.mxu1 %v15794_v26  ;;  %v15878_v51 = vld [vmem:[%s21104_s1 + $0x2d0c] ss:$16 sps:$4 sm:$0xff]   ;;  %v15873_v26 = vld [vmem:[%s21104_s1 + $0x2d00] ss:$16 sps:$4 sm:$0xff]  }
 0x56b   :  { %10706 = vmatpush1.bf16.msra.mxu0 %v15789_v53  ;;  %11731 = vmatpush1.bf16.msra.mxu1 %v15792_v38  ;;  %v15876_v53 = vld [vmem:[%s21104_s1 + $0x2d08] ss:$16 sps:$4 sm:$0xff]   ;;  %v15881_v38 = vld [vmem:[%s21104_s1 + $0x2d24] ss:$16 sps:$4 sm:$0xff]  }
 0x56c   :  { %10707 = vmatprep.subr.bf16.mxu0 %v15797_v54  ;;  %11732 = vmatprep.subr.bf16.mxu1 %v15800_v43  ;;  %v15884_v54 = vld [vmem:[%s21104_s1 + $0x2d2c] ss:$16 sps:$4 sm:$0xff]   ;;  %v15879_v43 = vld [vmem:[%s21104_s1 + $0x2d20] ss:$16 sps:$4 sm:$0xff]  }
 0x56f   :  { %10708 = vmatpush1.bf16.msra.mxu0 %v15795_v56  ;;  %11733 = vmatpush1.bf16.msra.mxu1 %v15798_v47  ;;  %v15882_v56 = vld [vmem:[%s21104_s1 + $0x2d28] ss:$16 sps:$4 sm:$0xff]   ;;  %v15887_v47 = vld [vmem:[%s21104_s1 + $0x2d44] ss:$16 sps:$4 sm:$0xff]  }
 0x570   :  { %10709 = vmatprep.subr.bf16.mxu0 %v15803_v46  ;;  %11734 = vmatprep.subr.bf16.mxu1 %v15806_v48  ;;  %v15890_v46 = vld [vmem:[%s21104_s1 + $0x2d4c] ss:$16 sps:$4 sm:$0xff]   ;;  %v15885_v48 = vld [vmem:[%s21104_s1 + $0x2d40] ss:$16 sps:$4 sm:$0xff]  }
 0x573   :  { %10710 = vmatpush1.bf16.msra.mxu0 %v15801_v62  ;;  %11735 = vmatpush1.bf16.msra.mxu1 %v15804_v50  ;;  %v15888_v62 = vld [vmem:[%s21104_s1 + $0x2d48] ss:$16 sps:$4 sm:$0xff]   ;;  %v15893_v50 = vld [vmem:[%s21104_s1 + $0x2d64] ss:$16 sps:$4 sm:$0xff]  }
 0x574   :  { %10711 = vmatprep.subr.bf16.mxu0 %v15809_v44  ;;  %11736 = vmatprep.subr.bf16.mxu1 %v15812_v0  ;;  %v15896_v44 = vld [vmem:[%s21104_s1 + $0x2d6c] ss:$16 sps:$4 sm:$0xff]   ;;  %v15891_v0 = vld [vmem:[%s21104_s1 + $0x2d60] ss:$16 sps:$4 sm:$0xff]  }
 0x577   :  { %10712 = vmatpush1.bf16.msra.mxu0 %v15807_v1  ;;  %11737 = vmatpush1.bf16.msra.mxu1 %v15810_v57  ;;  %v15894_v1 = vld [vmem:[%s21104_s1 + $0x2d68] ss:$16 sps:$4 sm:$0xff]   ;;  %v15899_v57 = vld [vmem:[%s21104_s1 + $0x2d84] ss:$16 sps:$4 sm:$0xff]  }
 0x578   :  { %10713 = vmatprep.subr.bf16.mxu0 %v15815_v2  ;;  %11738 = vmatprep.subr.bf16.mxu1 %v15818_v59  ;;  %v15902_v2 = vld [vmem:[%s21104_s1 + $0x2d8c] ss:$16 sps:$4 sm:$0xff]   ;;  %v15897_v59 = vld [vmem:[%s21104_s1 + $0x2d80] ss:$16 sps:$4 sm:$0xff]  }
 0x57b   :  { %10714 = vmatpush1.bf16.msra.mxu0 %v15813_v58  ;;  %11739 = vmatpush1.bf16.msra.mxu1 %v15816_v6  ;;  %v15905_v58 = vld [vmem:[%s21104_s1 + $0x2da4] ss:$16 sps:$4 sm:$0xff]   ;;  %v15908_v6 = vld [vmem:[%s21104_s1 + $0x2dac] ss:$16 sps:$4 sm:$0xff]  }
 0x57c   :  { %10715 = vmatprep.subr.bf16.mxu0 %v15821_v9  ;;  %11740 = vmatprep.subr.bf16.mxu1 %v15824_v55  ;;  %v15903_v9 = vld [vmem:[%s21104_s1 + $0x2da0] ss:$16 sps:$4 sm:$0xff]   ;;  %v15906_v55 = vld [vmem:[%s21104_s1 + $0x2da8] ss:$16 sps:$4 sm:$0xff]  }
 0x57f   :  { %10716 = vmatpush1.bf16.msra.mxu0 %v15819_v63  ;;  %11741 = vmatpush1.bf16.msra.mxu1 %v15822_v61  ;;  %v15911_v63 = vld [vmem:[%s21104_s1 + $0x2dc4] ss:$16 sps:$4 sm:$0xff]   ;;  %v15914_v61 = vld [vmem:[%s21104_s1 + $0x2dcc] ss:$16 sps:$4 sm:$0xff]  }
 0x580   :  { %10726 = vmatprep.subr.bf16.mxu0 %v15827_v12  ;;  %11751 = vmatprep.subr.bf16.mxu1 %v15830_v52  ;;  %v15909_v12 = vld [vmem:[%s21104_s1 + $0x2dc0] ss:$16 sps:$4 sm:$0xff]   ;;  %v15912_v52 = vld [vmem:[%s21104_s1 + $0x2dc8] ss:$16 sps:$4 sm:$0xff]  }
 0x582   :  { %10718 = vmatmul.mubr.bf16.vlgmr.msra.gmra.mrb[0].mxu0 %v1917_v5  ;;  %11743 = vmatmul.mubr.bf16.vlgmr.msra.gmra.mrb[0].mxu1 %v1917_v5  ;;  %v15920_v5 = vld [vmem:[%s21104_s1 + $0x2dec] ss:$16 sps:$4 sm:$0xff]  }
 0x583   :  { %10727 = vmatpush1.bf16.msra.mxu0 %v15825_v7  ;;  %11752 = vmatpush1.bf16.msra.mxu1 %v15828_v16  ;;  %v15915_v7 = vld [vmem:[%s21104_s1 + $0x2de0] ss:$16 sps:$4 sm:$0xff]   ;;  %v15918_v16 = vld [vmem:[%s21104_s1 + $0x2de8] ss:$16 sps:$4 sm:$0xff]  }
 0x584   :  { %10728 = vmatprep.subr.bf16.mxu0 %v15833_v17  ;;  %11753 = vmatprep.subr.bf16.mxu1 %v15836_v60  ;;  %v15924_v17 = vld [vmem:[%s21104_s1 + $0x2e04] ss:$16 sps:$4 sm:$0xff]   ;;  %v15927_v60 = vld [vmem:[%s21104_s1 + $0x2e0c] ss:$16 sps:$4 sm:$0xff]  }
 0x585   :  { %10758 = vmatprep.mubr.bf16.mxu0 %v20608_v18  ;;  %11783 = vmatprep.mubr.bf16.mxu1 %v20608_v18 }
 0x587   :  { %10729 = vmatpush1.bf16.msra.mxu0 %v15831_v8  ;;  %11754 = vmatpush1.bf16.msra.mxu1 %v15834_v20  ;;  %v20794_v8 = vrot.slane %v20577_v11, %v16239_v49  ;;  %v15922_v20 = vld [vmem:[%s21104_s1 + $0x2e00] ss:$16 sps:$4 sm:$0xff]   ;;  %v15933_v11 = vld [vmem:[%s21104_s1 + $0x2e2c] ss:$16 sps:$4 sm:$0xff]  }
 0x588   :  { %10730 = vmatprep.subr.bf16.mxu0 %v15839_v23  ;;  %11755 = vmatprep.subr.bf16.mxu1 %v15842_v4  ;;  %v15925_v23 = vld [vmem:[%s21104_s1 + $0x2e08] ss:$16 sps:$4 sm:$0xff]   ;;  %v15930_v4 = vld [vmem:[%s21104_s1 + $0x2e24] ss:$16 sps:$4 sm:$0xff]  }
 0x58b   :  { %10731 = vmatpush1.bf16.msra.mxu0 %v15837_v13  ;;  %11756 = vmatpush1.bf16.msra.mxu1 %v15840_v10  ;;  %v1920_v13 = vcombine.high %v20608_v18, %v20608_v18  ;;  %v15928_v10 = vld [vmem:[%s21104_s1 + $0x2e20] ss:$16 sps:$4 sm:$0xff]   ;;  %v15936_v18 = vld [vmem:[%s21104_s1 + $0x2e44] ss:$16 sps:$4 sm:$0xff]  }
 0x58c   :  { %10732 = vmatprep.subr.bf16.mxu0 %v15845_v27  ;;  %11757 = vmatprep.subr.bf16.mxu1 %v15848_v28  ;;  %v15931_v27 = vld [vmem:[%s21104_s1 + $0x2e28] ss:$16 sps:$4 sm:$0xff]   ;;  %v15939_v28 = vld [vmem:[%s21104_s1 + $0x2e4c] ss:$16 sps:$4 sm:$0xff]  }
 0x58f   :  { %10733 = vmatpush1.bf16.msra.mxu0 %v15843_v29  ;;  %11758 = vmatpush1.bf16.msra.mxu1 %v15846_v19  ;;  %v15934_v29 = vld [vmem:[%s21104_s1 + $0x2e40] ss:$16 sps:$4 sm:$0xff]   ;;  %v15937_v19 = vld [vmem:[%s21104_s1 + $0x2e48] ss:$16 sps:$4 sm:$0xff]  }
 0x590   :  { %10734 = vmatprep.subr.bf16.mxu0 %v15851_v30  ;;  %11759 = vmatprep.subr.bf16.mxu1 %v15854_v31  ;;  %v15942_v30 = vld [vmem:[%s21104_s1 + $0x2e64] ss:$16 sps:$4 sm:$0xff]   ;;  %v15945_v31 = vld [vmem:[%s21104_s1 + $0x2e6c] ss:$16 sps:$4 sm:$0xff]  }
 0x593   :  { %10735 = vmatpush1.bf16.msra.mxu0 %v15849_v22  ;;  %11760 = vmatpush1.bf16.msra.mxu1 %v15852_v33  ;;  %v15940_v22 = vld [vmem:[%s21104_s1 + $0x2e60] ss:$16 sps:$4 sm:$0xff]   ;;  %v15943_v33 = vld [vmem:[%s21104_s1 + $0x2e68] ss:$16 sps:$4 sm:$0xff]  }
 0x594   :  { %10736 = vmatprep.subr.bf16.mxu0 %v15857_v36  ;;  %11761 = vmatprep.subr.bf16.mxu1 %v15860_v24  ;;  %v15948_v36 = vld [vmem:[%s21104_s1 + $0x2e84] ss:$16 sps:$4 sm:$0xff]   ;;  %v15951_v24 = vld [vmem:[%s21104_s1 + $0x2e8c] ss:$16 sps:$4 sm:$0xff]  }
 0x597   :  { %10737 = vmatpush1.bf16.msra.mxu0 %v15855_v37  ;;  %11762 = vmatpush1.bf16.msra.mxu1 %v15858_v21  ;;  %v15946_v37 = vld [vmem:[%s21104_s1 + $0x2e80] ss:$16 sps:$4 sm:$0xff]   ;;  %v15949_v21 = vld [vmem:[%s21104_s1 + $0x2e88] ss:$16 sps:$4 sm:$0xff]  }
 0x598   :  { %10738 = vmatprep.subr.bf16.mxu0 %v15863_v39  ;;  %11763 = vmatprep.subr.bf16.mxu1 %v15866_v25  ;;  %v15954_v39 = vld [vmem:[%s21104_s1 + $0x2ea4] ss:$16 sps:$4 sm:$0xff]   ;;  %v15957_v25 = vld [vmem:[%s21104_s1 + $0x2eac] ss:$16 sps:$4 sm:$0xff]  }
 0x59b   :  { %10739 = vmatpush1.bf16.msra.mxu0 %v15861_v40  ;;  %11764 = vmatpush1.bf16.msra.mxu1 %v15864_v41  ;;  %v15952_v40 = vld [vmem:[%s21104_s1 + $0x2ea0] ss:$16 sps:$4 sm:$0xff]   ;;  %v15955_v41 = vld [vmem:[%s21104_s1 + $0x2ea8] ss:$16 sps:$4 sm:$0xff]  }
 0x59c   :  { %10740 = vmatprep.subr.bf16.mxu0 %v15869_v34  ;;  %11765 = vmatprep.subr.bf16.mxu1 %v15872_v32  ;;  %v15960_v34 = vld [vmem:[%s21104_s1 + $0x2ec4] ss:$16 sps:$4 sm:$0xff]   ;;  %v15963_v32 = vld [vmem:[%s21104_s1 + $0x2ecc] ss:$16 sps:$4 sm:$0xff]  }
 0x59f   :  { %10741 = vmatpush1.bf16.msra.mxu0 %v15867_v45  ;;  %11766 = vmatpush1.bf16.msra.mxu1 %v15870_v35  ;;  %v15958_v45 = vld [vmem:[%s21104_s1 + $0x2ec0] ss:$16 sps:$4 sm:$0xff]   ;;  %v15961_v35 = vld [vmem:[%s21104_s1 + $0x2ec8] ss:$16 sps:$4 sm:$0xff]  }
 0x5a0   :  { %10742 = vmatprep.subr.bf16.mxu0 %v15875_v14  ;;  %11767 = vmatprep.subr.bf16.mxu1 %v15878_v51  ;;  %v15966_v14 = vld [vmem:[%s21104_s1 + $0x2ee4] ss:$16 sps:$4 sm:$0xff]   ;;  %v15969_v51 = vld [vmem:[%s21104_s1 + $0x2eec] ss:$16 sps:$4 sm:$0xff]  }
 0x5a3   :  { %10743 = vmatpush1.bf16.msra.mxu0 %v15873_v26  ;;  %11768 = vmatpush1.bf16.msra.mxu1 %v15876_v53  ;;  %v15964_v26 = vld [vmem:[%s21104_s1 + $0x2ee0] ss:$16 sps:$4 sm:$0xff]   ;;  %v15967_v53 = vld [vmem:[%s21104_s1 + $0x2ee8] ss:$16 sps:$4 sm:$0xff]  }
 0x5a4   :  { %10744 = vmatprep.subr.bf16.mxu0 %v15881_v38  ;;  %11769 = vmatprep.subr.bf16.mxu1 %v15884_v54  ;;  %v15972_v38 = vld [vmem:[%s21104_s1 + $0x2f04] ss:$16 sps:$4 sm:$0xff]   ;;  %v15975_v54 = vld [vmem:[%s21104_s1 + $0x2f0c] ss:$16 sps:$4 sm:$0xff]  }
 0x5a7   :  { %10745 = vmatpush1.bf16.msra.mxu0 %v15879_v43  ;;  %11770 = vmatpush1.bf16.msra.mxu1 %v15882_v56  ;;  %v15970_v43 = vld [vmem:[%s21104_s1 + $0x2f00] ss:$16 sps:$4 sm:$0xff]   ;;  %v15973_v56 = vld [vmem:[%s21104_s1 + $0x2f08] ss:$16 sps:$4 sm:$0xff]  }
 0x5a8   :  { %10746 = vmatprep.subr.bf16.mxu0 %v15887_v47  ;;  %11771 = vmatprep.subr.bf16.mxu1 %v15890_v46  ;;  %v15978_v47 = vld [vmem:[%s21104_s1 + $0x2f24] ss:$16 sps:$4 sm:$0xff]   ;;  %v15981_v46 = vld [vmem:[%s21104_s1 + $0x2f2c] ss:$16 sps:$4 sm:$0xff]  }
 0x5ab   :  { %10747 = vmatpush1.bf16.msra.mxu0 %v15885_v48  ;;  %11772 = vmatpush1.bf16.msra.mxu1 %v15888_v62  ;;  %v15976_v48 = vld [vmem:[%s21104_s1 + $0x2f20] ss:$16 sps:$4 sm:$0xff]   ;;  %v15979_v62 = vld [vmem:[%s21104_s1 + $0x2f28] ss:$16 sps:$4 sm:$0xff]  }
 0x5ac   :  { %10748 = vmatprep.subr.bf16.mxu0 %v15893_v50  ;;  %11773 = vmatprep.subr.bf16.mxu1 %v15896_v44  ;;  %v15984_v50 = vld [vmem:[%s21104_s1 + $0x2f44] ss:$16 sps:$4 sm:$0xff]   ;;  %v15987_v44 = vld [vmem:[%s21104_s1 + $0x2f4c] ss:$16 sps:$4 sm:$0xff]  }
 0x5af   :  { %10749 = vmatpush1.bf16.msra.mxu0 %v15891_v0  ;;  %11774 = vmatpush1.bf16.msra.mxu1 %v15894_v1  ;;  %v15982_v0 = vld [vmem:[%s21104_s1 + $0x2f40] ss:$16 sps:$4 sm:$0xff]   ;;  %v15985_v1 = vld [vmem:[%s21104_s1 + $0x2f48] ss:$16 sps:$4 sm:$0xff]  }
 0x5b0   :  { %10750 = vmatprep.subr.bf16.mxu0 %v15899_v57  ;;  %11775 = vmatprep.subr.bf16.mxu1 %v15902_v2  ;;  %v15990_v57 = vld [vmem:[%s21104_s1 + $0x2f64] ss:$16 sps:$4 sm:$0xff]   ;;  %v15993_v2 = vld [vmem:[%s21104_s1 + $0x2f6c] ss:$16 sps:$4 sm:$0xff]  }
 0x5b3   :  { %10751 = vmatpush1.bf16.msra.mxu0 %v15897_v59  ;;  %11776 = vmatpush1.bf16.msra.mxu1 %v15900_v3  ;;  %v15988_v59 = vld [vmem:[%s21104_s1 + $0x2f60] ss:$16 sps:$4 sm:$0xff]   ;;  %v15991_v3 = vld [vmem:[%s21104_s1 + $0x2f68] ss:$16 sps:$4 sm:$0xff]  }
 0x5b4   :  { %10752 = vmatprep.subr.bf16.mxu0 %v15905_v58  ;;  %11777 = vmatprep.subr.bf16.mxu1 %v15908_v6  ;;  %v15996_v58 = vld [vmem:[%s21104_s1 + $0x2f84] ss:$16 sps:$4 sm:$0xff]   ;;  %v15999_v6 = vld [vmem:[%s21104_s1 + $0x2f8c] ss:$16 sps:$4 sm:$0xff]  }
 0x5b7   :  { %10753 = vmatpush1.bf16.msra.mxu0 %v15903_v9  ;;  %11778 = vmatpush1.bf16.msra.mxu1 %v15906_v55  ;;  %v15994_v9 = vld [vmem:[%s21104_s1 + $0x2f80] ss:$16 sps:$4 sm:$0xff]   ;;  %v15997_v55 = vld [vmem:[%s21104_s1 + $0x2f88] ss:$16 sps:$4 sm:$0xff]  }
 0x5b8   :  { %10754 = vmatprep.subr.bf16.mxu0 %v15911_v63  ;;  %11779 = vmatprep.subr.bf16.mxu1 %v15914_v61  ;;  %v16002_v63 = vld [vmem:[%s21104_s1 + $0x2fa4] ss:$16 sps:$4 sm:$0xff]   ;;  %v16005_v61 = vld [vmem:[%s21104_s1 + $0x2fac] ss:$16 sps:$4 sm:$0xff]  }
 0x5bb   :  { %10755 = vmatpush1.bf16.msra.mxu0 %v15909_v12  ;;  %11780 = vmatpush1.bf16.msra.mxu1 %v15912_v52  ;;  %v16000_v12 = vld [vmem:[%s21104_s1 + $0x2fa0] ss:$16 sps:$4 sm:$0xff]   ;;  %v16003_v52 = vld [vmem:[%s21104_s1 + $0x2fa8] ss:$16 sps:$4 sm:$0xff]  }
 0x5bc   :  { %10756 = vmatprep.subr.bf16.mxu0 %v15917_v15  ;;  %11781 = vmatprep.subr.bf16.mxu1 %v15920_v5  ;;  %v16008_v15 = vld [vmem:[%s21104_s1 + $0x2fc4] ss:$16 sps:$4 sm:$0xff]   ;;  %v16011_v5 = vld [vmem:[%s21104_s1 + $0x2fcc] ss:$16 sps:$4 sm:$0xff]  }
 0x5bf   :  { %10757 = vmatpush1.bf16.msra.mxu0 %v15915_v7  ;;  %11782 = vmatpush1.bf16.msra.mxu1 %v15918_v16  ;;  %v16006_v7 = vld [vmem:[%s21104_s1 + $0x2fc0] ss:$16 sps:$4 sm:$0xff]   ;;  %v16009_v16 = vld [vmem:[%s21104_s1 + $0x2fc8] ss:$16 sps:$4 sm:$0xff]  }
 0x5c0   :  { %10767 = vmatprep.subr.bf16.mxu0 %v15924_v17  ;;  %11792 = vmatprep.subr.bf16.mxu1 %v15927_v60  ;;  %v16014_v17 = vld [vmem:[%s21104_s1 + $0x2fe4] ss:$16 sps:$4 sm:$0xff]   ;;  %v16017_v60 = vld [vmem:[%s21104_s1 + $0x2fec] ss:$16 sps:$4 sm:$0xff]  }
 0x5c2   :  { %10759 = vmatmul.mubr.bf16.vlgmr.msra.gmra.mrb[0].mxu0 %v20794_v8  ;;  %11784 = vmatmul.mubr.bf16.vlgmr.msra.gmra.mrb[0].mxu1 %v20794_v8 }
 0x5c3   :  { %10768 = vmatpush1.bf16.msra.mxu0 %v15922_v20  ;;  %11793 = vmatpush1.bf16.msra.mxu1 %v15925_v23  ;;  %v16012_v20 = vld [vmem:[%s21104_s1 + $0x2fe0] ss:$16 sps:$4 sm:$0xff]   ;;  %v16015_v23 = vld [vmem:[%s21104_s1 + $0x2fe8] ss:$16 sps:$4 sm:$0xff]  }
 0x5c4   :  { %10769 = vmatprep.subr.bf16.mxu0 %v15930_v4  ;;  %11794 = vmatprep.subr.bf16.mxu1 %v15933_v11  ;;  %v16020_v4 = vld [vmem:[%s21104_s1 + $0x3004] ss:$16 sps:$4 sm:$0xff]   ;;  %v16023_v11 = vld [vmem:[%s21104_s1 + $0x300c] ss:$16 sps:$4 sm:$0xff]  }
 0x5c5   :  { %10799 = vmatprep.mubr.bf16.mxu0 %v1920_v13  ;;  %11824 = vmatprep.mubr.bf16.mxu1 %v1920_v13  ;;  %v1918_v13 = vcombine.high %v20794_v8, %v20794_v8  ;;  %v16029_v8 = vld [vmem:[%s21104_s1 + $0x302c] ss:$16 sps:$4 sm:$0xff]  }
 0x5c7   :  { %10770 = vmatpush1.bf16.msra.mxu0 %v15928_v10  ;;  %11795 = vmatpush1.bf16.msra.mxu1 %v15931_v27  ;;  %v16018_v10 = vld [vmem:[%s21104_s1 + $0x3000] ss:$16 sps:$4 sm:$0xff]   ;;  %v16021_v27 = vld [vmem:[%s21104_s1 + $0x3008] ss:$16 sps:$4 sm:$0xff]  }
 0x5c8   :  { %10771 = vmatprep.subr.bf16.mxu0 %v15936_v18  ;;  %11796 = vmatprep.subr.bf16.mxu1 %v15939_v28  ;;  %v16026_v18 = vld [vmem:[%s21104_s1 + $0x3024] ss:$16 sps:$4 sm:$0xff]   ;;  %v16024_v28 = vld [vmem:[%s21104_s1 + $0x3020] ss:$16 sps:$4 sm:$0xff]  }
 0x5cb   :  { %10772 = vmatpush1.bf16.msra.mxu0 %v15934_v29  ;;  %11797 = vmatpush1.bf16.msra.mxu1 %v15937_v19  ;;  %v16027_v29 = vld [vmem:[%s21104_s1 + $0x3028] ss:$16 sps:$4 sm:$0xff]   ;;  %v16032_v19 = vld [vmem:[%s21104_s1 + $0x3044] ss:$16 sps:$4 sm:$0xff]  }
 0x5cc   :  { %10773 = vmatprep.subr.bf16.mxu0 %v15942_v30  ;;  %11798 = vmatprep.subr.bf16.mxu1 %v15945_v31  ;;  %v16035_v30 = vld [vmem:[%s21104_s1 + $0x304c] ss:$16 sps:$4 sm:$0xff]   ;;  %v16073_v31 = vmov 0  }
 0x5cf   :  { %10774 = vmatpush1.bf16.msra.mxu0 %v15940_v22  ;;  %11799 = vmatpush1.bf16.msra.mxu1 %v15943_v33  ;;  %v16030_v22 = vld [vmem:[%s21104_s1 + $0x3040] ss:$16 sps:$4 sm:$0xff]   ;;  %v16033_v33 = vld [vmem:[%s21104_s1 + $0x3048] ss:$16 sps:$4 sm:$0xff]  }
 0x5d0   :  { %10775 = vmatprep.subr.bf16.mxu0 %v15948_v36  ;;  %11800 = vmatprep.subr.bf16.mxu1 %v15951_v24  ;;  %v16038_v36 = vld [vmem:[%s21104_s1 + $0x3064] ss:$16 sps:$4 sm:$0xff]   ;;  %v16041_v24 = vld [vmem:[%s21104_s1 + $0x306c] ss:$16 sps:$4 sm:$0xff]  }
 0x5d3   :  { %10776 = vmatpush1.bf16.msra.mxu0 %v15946_v37  ;;  %11801 = vmatpush1.bf16.msra.mxu1 %v15949_v21  ;;  %v16036_v37 = vld [vmem:[%s21104_s1 + $0x3060] ss:$16 sps:$4 sm:$0xff]   ;;  %v16039_v21 = vld [vmem:[%s21104_s1 + $0x3068] ss:$16 sps:$4 sm:$0xff]  }
 0x5d4   :  { %10777 = vmatprep.subr.bf16.mxu0 %v15954_v39  ;;  %11802 = vmatprep.subr.bf16.mxu1 %v15957_v25  ;;  %v16044_v39 = vld [vmem:[%s21104_s1 + $0x3084] ss:$16 sps:$4 sm:$0xff]   ;;  %v16047_v25 = vld [vmem:[%s21104_s1 + $0x308c] ss:$16 sps:$4 sm:$0xff]  }
 0x5d7   :  { %10778 = vmatpush1.bf16.msra.mxu0 %v15952_v40  ;;  %11803 = vmatpush1.bf16.msra.mxu1 %v15955_v41  ;;  %v16042_v40 = vld [vmem:[%s21104_s1 + $0x3080] ss:$16 sps:$4 sm:$0xff]   ;;  %v16045_v41 = vld [vmem:[%s21104_s1 + $0x3088] ss:$16 sps:$4 sm:$0xff]  }
 0x5d8   :  { %10779 = vmatprep.subr.bf16.mxu0 %v15960_v34  ;;  %11804 = vmatprep.subr.bf16.mxu1 %v15963_v32  ;;  %v16050_v34 = vld [vmem:[%s21104_s1 + $0x30a4] ss:$16 sps:$4 sm:$0xff]   ;;  %v16053_v32 = vld [vmem:[%s21104_s1 + $0x30ac] ss:$16 sps:$4 sm:$0xff]  }
 0x5db   :  { %10780 = vmatpush1.bf16.msra.mxu0 %v15958_v45  ;;  %11805 = vmatpush1.bf16.msra.mxu1 %v15961_v35  ;;  %v16048_v45 = vld [vmem:[%s21104_s1 + $0x30a0] ss:$16 sps:$4 sm:$0xff]   ;;  %v16051_v35 = vld [vmem:[%s21104_s1 + $0x30a8] ss:$16 sps:$4 sm:$0xff]  }
 0x5dc   :  { %10781 = vmatprep.subr.bf16.mxu0 %v15966_v14  ;;  %11806 = vmatprep.subr.bf16.mxu1 %v15969_v51  ;;  %v16056_v14 = vld [vmem:[%s21104_s1 + $0x30c4] ss:$16 sps:$4 sm:$0xff]   ;;  %v16059_v51 = vld [vmem:[%s21104_s1 + $0x30cc] ss:$16 sps:$4 sm:$0xff]  }
 0x5df   :  { %10782 = vmatpush1.bf16.msra.mxu0 %v15964_v26  ;;  %11807 = vmatpush1.bf16.msra.mxu1 %v15967_v53  ;;  %v16054_v26 = vld [vmem:[%s21104_s1 + $0x30c0] ss:$16 sps:$4 sm:$0xff]   ;;  %v16057_v53 = vld [vmem:[%s21104_s1 + $0x30c8] ss:$16 sps:$4 sm:$0xff]  }
 0x5e0   :  { %10783 = vmatprep.subr.bf16.mxu0 %v15972_v38  ;;  %11808 = vmatprep.subr.bf16.mxu1 %v15975_v54  ;;  %v16062_v38 = vld [vmem:[%s21104_s1 + $0x30e4] ss:$16 sps:$4 sm:$0xff]   ;;  %v16065_v54 = vld [vmem:[%s21104_s1 + $0x30ec] ss:$16 sps:$4 sm:$0xff]  }
 0x5e3   :  { %10784 = vmatpush1.bf16.msra.mxu0 %v15970_v43  ;;  %11809 = vmatpush1.bf16.msra.mxu1 %v15973_v56  ;;  %v16060_v43 = vld [vmem:[%s21104_s1 + $0x30e0] ss:$16 sps:$4 sm:$0xff]   ;;  %v16063_v56 = vld [vmem:[%s21104_s1 + $0x30e8] ss:$16 sps:$4 sm:$0xff]  }
 0x5e4   :  { %10785 = vmatprep.subr.bf16.mxu0 %v15978_v47  ;;  %11810 = vmatprep.subr.bf16.mxu1 %v15981_v46  ;;  %v11940_v47 = vld.sshfl [vmem:[%s21105_s0 + $0x30] sm:$0x1 pattern:$0x75316420] }
 0x5e5   :  { %v1934_v46 = vrot.slane %v11940_v47, %v16239_v49  ;;  %v1614_v49 = vsub.s32 3, %v16221_v42 }
 0x5e7   :  { %10786 = vmatpush1.bf16.msra.mxu0 %v15976_v48  ;;  %11811 = vmatpush1.bf16.msra.mxu1 %v15979_v62  ;;  %v10_v48 = vstv %s21106_s4  ;;  %v1602_v62 = vsub.s32 0, %v16221_v42 }
 0x5e8   :  { %10787 = vmatprep.subr.bf16.mxu0 %v15984_v50  ;;  %11812 = vmatprep.subr.bf16.mxu1 %v15987_v44  ;;  %11 = vst [vmem:[#allocation2] sm:$0x1] %v10_v48  ;;  %v1610_v50 = vsub.s32 2, %v16221_v42  ;;  %v1598_v44 = vld [vmem:[%s21107_s2] sm:$0xf] }
 0x5eb   :  { %10788 = vmatpush1.bf16.msra.mxu0 %v15982_v0  ;;  %11813 = vmatpush1.bf16.msra.mxu1 %v15985_v1  ;;  %v1606_v0 = vsub.s32 1, %v16221_v42  ;;  %v1603_v1 = vrot.slane %v1598_v44, %v1602_v62 }
 0x5ec   :  { %10789 = vmatprep.subr.bf16.mxu0 %v15990_v57  ;;  %11814 = vmatprep.subr.bf16.mxu1 %v15993_v2  ;;  %v1611_v57 = vrot.slane %v1598_v44, %v1610_v50  ;;  %v11886_v2 = vld [vmem:[%s21108_s3] sm:$0xf] }
 0x5ef   :  { %10790 = vmatpush1.bf16.msra.mxu0 %v15988_v59  ;;  %11815 = vmatpush1.bf16.msra.mxu1 %v15991_v3  ;;  %v1607_v59 = vrot.slane %v1598_v44, %v1606_v0  ;;  %v1615_v3 = vrot.slane %v1598_v44, %v1614_v49 }
 0x5f0   :  { %10791 = vmatprep.subr.bf16.mxu0 %v15996_v58  ;;  %11816 = vmatprep.subr.bf16.mxu1 %v15999_v6 }
 0x5f3   :  { %10792 = vmatpush1.bf16.msra.mxu0 %v15994_v9  ;;  %11817 = vmatpush1.bf16.msra.mxu1 %v15997_v55  ;;  %v11891_v55 = vrot.slane %v11886_v2, %v1602_v62 }
 0x5f4   :  { %10793 = vmatprep.subr.bf16.mxu0 %v16002_v63  ;;  %11818 = vmatprep.subr.bf16.mxu1 %v16005_v61 }
 0x5f7   :  { %10794 = vmatpush1.bf16.msra.mxu0 %v16000_v12  ;;  %11819 = vmatpush1.bf16.msra.mxu1 %v16003_v52  ;;  %v11899_v52 = vrot.slane %v11886_v2, %v1610_v50 }
 0x5f8   :  { %10795 = vmatprep.subr.bf16.mxu0 %v16008_v15  ;;  %11820 = vmatprep.subr.bf16.mxu1 %v16011_v5  ;;  %v11895_v5 = vrot.slane %v11886_v2, %v1606_v0 }
 0x5fb   :  { %10796 = vmatpush1.bf16.msra.mxu0 %v16006_v7  ;;  %11821 = vmatpush1.bf16.msra.mxu1 %v16009_v16 }
 0x5fc   :  { %10797 = vmatprep.subr.bf16.mxu0 %v16014_v17  ;;  %11822 = vmatprep.subr.bf16.mxu1 %v16017_v60 }
 0x5ff   :  { %10798 = vmatpush1.bf16.msra.mxu0 %v16012_v20  ;;  %11823 = vmatpush1.bf16.msra.mxu1 %v16015_v23 }
 0x600   :  { %10808 = vmatprep.subr.bf16.mxu0 %v16020_v4  ;;  %11833 = vmatprep.subr.bf16.mxu1 %v16023_v11 }
 0x602   :  { %10800 = vmatmul.mubr.bf16.vlgmr.msra.gmra.mrb[0].mxu0 %v1918_v13  ;;  %11825 = vmatmul.mubr.bf16.vlgmr.msra.gmra.mrb[0].mxu1 %v1918_v13 }
 0x603   :  { %10809 = vmatpush1.bf16.msra.mxu0 %v16018_v10  ;;  %11834 = vmatpush1.bf16.msra.mxu1 %v16021_v27  ;;  %v11903_v27 = vrot.slane %v11886_v2, %v1614_v49 }
 0x604   :  { %10810 = vmatprep.subr.bf16.mxu0 %v16026_v18  ;;  %11835 = vmatprep.subr.bf16.mxu1 %v16029_v8 }
 0x605   :  { %10840 = vmatprep.mubr.bf16.mxu0 %v16073_v31  ;;  %11865 = vmatprep.mubr.bf16.mxu1 %v16073_v31 }
 0x607   :  { %10811 = vmatpush1.bf16.msra.mxu0 %v16024_v28  ;;  %11836 = vmatpush1.bf16.msra.mxu1 %v16027_v29 }
 0x608   :  { %10812 = vmatprep.subr.bf16.mxu0 %v16032_v19  ;;  %11837 = vmatprep.subr.bf16.mxu1 %v16035_v30 }
 0x60b   :  { %10813 = vmatpush1.bf16.msra.mxu0 %v16030_v22  ;;  %11838 = vmatpush1.bf16.msra.mxu1 %v16033_v33 }
 0x60c   :  { %10814 = vmatprep.subr.bf16.mxu0 %v16038_v36  ;;  %11839 = vmatprep.subr.bf16.mxu1 %v16041_v24 }
 0x60f   :  { %10815 = vmatpush1.bf16.msra.mxu0 %v16036_v37  ;;  %11840 = vmatpush1.bf16.msra.mxu1 %v16039_v21 }
 0x610   :  { %10816 = vmatprep.subr.bf16.mxu0 %v16044_v39  ;;  %11841 = vmatprep.subr.bf16.mxu1 %v16047_v25  ;;  %v13509_v39 = vld [vmem:[#allocation2] ss:$0 sm:$0xff] }
 0x613   :  { %10817 = vmatpush1.bf16.msra.mxu0 %v16042_v40  ;;  %11842 = vmatpush1.bf16.msra.mxu1 %v16045_v41 }
 0x614   :  { %10818 = vmatprep.subr.bf16.mxu0 %v16050_v34  ;;  %11843 = vmatprep.subr.bf16.mxu1 %v16053_v32 }
 0x617   :  { %10819 = vmatpush1.bf16.msra.mxu0 %v16048_v45  ;;  %11844 = vmatpush1.bf16.msra.mxu1 %v16051_v35 }
 0x618   :  { %10820 = vmatprep.subr.bf16.mxu0 %v16056_v14  ;;  %11845 = vmatprep.subr.bf16.mxu1 %v16059_v51 }
 0x61b   :  { %10821 = vmatpush1.bf16.msra.mxu0 %v16054_v26  ;;  %11846 = vmatpush1.bf16.msra.mxu1 %v16057_v53 }
 0x61c   :  { %10822 = vmatprep.subr.bf16.mxu0 %v16062_v38  ;;  %11847 = vmatprep.subr.bf16.mxu1 %v16065_v54 }
 0x61f   :  { %10823 = vmatpush1.bf16.msra.mxu0 %v16060_v43  ;;  %11848 = vmatpush1.bf16.msra.mxu1 %v16063_v56 }
 0x622   :  { %10841 = vmatmul.mubr.bf16.vlgmr.msra.gmra.mrb[0].mxu0 %v1934_v46  ;;  %11866 = vmatmul.mubr.bf16.vlgmr.msra.gmra.mrb[0].mxu1 %v1934_v46 }
 0x6f5   :  { %v10842_v58 = vpop.f32.mrb[0].mxu0  ;;  %v11867_v6 = vpop.f32.mrb[0].mxu1 }
 0x6f6   :  { %v13510_v9 = vadd.f32 %v10842_v58, %v1603_v1  ;;  %v13512_v63 = vadd.f32 %v11867_v6, %v1611_v57  ;;  %v10844_v61 = vpop.f32.mrb[1].mxu0  ;;  %v11869_v12 = vpop.f32.mrb[1].mxu1 }
 0x6f7   :  { %v13511_v15 = vadd.f32 %v10844_v61, %v1607_v59  ;;  %v13513_v7 = vadd.f32 %v11869_v12, %v1615_v3  ;;  %v10846_v42 = vpop.f32.mrb[2].mxu0  ;;  %v11871_v16 = vpop.f32.mrb[2].mxu1 }
 0x6f8   :  { %vm11874_vm0 = vcmp.gt.f32.partialorder %v13510_v9, 0.0  ;;  %v11878_v17 = vmul.f32 0.2, %v13510_v9  ;;  %vm11876_vm1 = vcmp.gt.f32.partialorder %v13512_v63, 0.0  ;;  %v11880_v60 = vmul.f32 0.2, %v13512_v63 }
 0x6f9   :  { %vm11875_vm2 = vcmp.gt.f32.partialorder %v13511_v15, 0.0  ;;  %v11879_v20 = vmul.f32 0.2, %v13511_v15  ;;  %vm11877_vm3 = vcmp.gt.f32.partialorder %v13513_v7, 0.0  ;;  %v11881_v23 = vmul.f32 0.2, %v13513_v7 }
 0x6fa   :  { %v11882_v4 = vsel %vm11874_vm0, %v13510_v9, %v11878_v17  ;;  %v11884_v11 = vsel %vm11876_vm1, %v13512_v63, %v11880_v60  ;;  %v10847_v13 = vpop.f32.mrb[3].mxu0  ;;  %v11872_v10 = vpop.f32.mrb[3].mxu1 }
 0x6fb   :  { %v11908_v18 = vmul.f32 %v11891_v55, %v11882_v4  ;;  %v11883_v8 = vsel %vm11875_vm2, %v13511_v15, %v11879_v20  ;;  %v11885_v28 = vsel %vm11877_vm3, %v13513_v7, %v11881_v23  ;;  %v11910_v19 = vmul.f32 %v11899_v52, %v11884_v11 }
 0x6fc   :  { %v11909_v29 = vmul.f32 %v11895_v5, %v11883_v8  ;;  %v11911_v31 = vmul.f32 %v11903_v27, %v11885_v28 }
 0x6fd   :  { %v11913_v30 = vsel %vm11912_vm4, %v11908_v18, 0.0  ;;  %v11916_v36 = vsel %vm11912_vm4, %v11910_v19, 0.0 }
 0x6fe   :  { %v11914_v22 = vsel %vm11912_vm4, %v11909_v29, 0.0  ;;  %v11918_v37 = vsel %vm11912_vm4, %v11911_v31, 0.0 }
 0x6ff   :  { %v11915_v33 = vadd.f32 %v11914_v22, %v11913_v30 }
 0x701   :  { %v11917_v24 = vadd.f32 %v11916_v36, %v11915_v33 }
 0x703   :  { %v11919_v21 = vadd.f32 %v11918_v37, %v11917_v24 }
 0x705   :  { %11920 = vadd.xlane.f32.xlu0 %v11919_v21 }
 0x792   :  { %v11921_v25 = vpop.xlane.xlu0 %11920 }
 0x793   :  { %v11929_v40 = vadd.f32 %v13509_v39, %v11921_v25 }
 0x795   :  { %v11930_v41 = vmul.f32 0.5, %v11929_v40 }
 0x797   :  { %16066 = vtanh.f32 %v11930_v41 }
 0x7a1   :  { %v16067_v34 = vpop.eup %16066 }
 0x7a2   :  { %v11932_v32 = vadd.f32 1.0, %v16067_v34 }
 0x7a4   :  { %v11933_v45 = vmul.f32 0.5, %v11932_v32 }
 0x7a6   :  { %11935 = vst.msk [vmem:[%s21109_s5] sm:$0x3] %vm11934_vm5, %v11933_v45 }

</bundles_post_ra>
